<compile_context>
chip_gen: v5e
topology: v5e:2x2
jax: 0.10.0
libtpu: 0.0.40
codegen_flags: <defaults>
</compile_context>

<pallas_src>
import functools
from typing import NamedTuple

import jax
import jax.numpy as jnp
from jax.experimental import pallas as pl
from jax.experimental.pallas import tpu as pltpu


# ----------------------------- scaled config --------------------------------
LAYERS = (1, 2, 1, 1)          # real: (3, 4, 23, 3)
GROUPS = 8                     # real: 64
WIDTH_PER_GROUP = 8            # real: 4 (bumped so widths reach 256 -> 2 slabs)
PLANES = (32, 64, 128, 256)    # real: (64, 128, 256, 512)
STEM = 32                      # real: 64
EXPANSION = 4
BN_EPS = 1e-5

LANE = 128                     # channel dims padded to multiples of this
SUB = 8                        # sublane granularity for row padding


# ------------------------------ small helpers --------------------------------
def _round_up(x, m):
    return (x + m - 1) // m * m


def _cpad(c):
    return _round_up(c, LANE)


def _pick_tile(dim, cap):
    """Largest tile <= cap dividing dim; prefers multiples of 128, then 8."""
    if dim <= cap:
        return dim
    hi = (min(cap, dim) // LANE) * LANE
    for t in range(hi, LANE - 1, -LANE):
        if dim % t == 0:
            return t
    hi = (min(cap, dim) // SUB) * SUB
    for t in range(hi, SUB - 1, -SUB):
        if dim % t == 0:
            return t
    raise AssertionError(f"no tile <= {cap} divides {dim}")


def _row_pad_target(m):
    return _round_up(m, 256) if m > 256 else _round_up(m, SUB)


def _pad_rows(a, m_pad, value=0.0):
    if a.shape[0] < m_pad:
        pad = ((0, m_pad - a.shape[0]),) + ((0, 0),) * (a.ndim - 1)
        a = jnp.pad(a, pad, constant_values=value)
    return a


def _tile_caps():
    """Per-generation matmul tile caps (v5e keeps tk <= 512)."""
    try:
        kind = jax.devices()[0].device_kind.lower()
    except Exception:
        kind = ""
    if "v6" in kind or "v7" in kind:
        return 512, 512, 1024
    return 512, 512, 512


_TM_CAP, _TN_CAP, _TK_CAP = _tile_caps()


def _split_for_parallel(m, n, tm, tn):
    """Ensure >=2 (M,N) tiles where possible so v7x's 2 TensorCores get work."""
    if (m // tm) * (n // tn) >= 2:
        return tm, tn
    if tm % 2 == 0 and (tm // 2) % SUB == 0 and m % (tm // 2) == 0:
        return tm // 2, tn
    if tn % 2 == 0 and (tn // 2) % LANE == 0 and n % (tn // 2) == 0:
        return tm, tn // 2
    return tm, tn


def _mm_compiler_params(tm, tn, tk, has_res):
    # Explicit scoped-VMEM budget: double-buffered bf16 A/B/out (+residual),
    # f32 scale/bias, f32 acc scratch, clamped to [16, 32] MiB (valid on all
    # of v5e / v6e / v7x).
    need = 2 * ((tm * tk + tk * tn + tm * tn) * 2 + 2 * tn * 4)
    if has_res:
        need += 2 * tm * tn * 2
    need += tm * tn * 4
    limit = int(min(max(2 * need, 16 * 1024 * 1024), 32 * 1024 * 1024))
    return pltpu.CompilerParams(
        dimension_semantics=("parallel", "parallel", "arbitrary"),
        vmem_limit_bytes=limit)


# ------------------------- fused conv-as-matmul kernel ------------------------
def _fused_mm_kernel(a_ref, b_ref, s_ref, t_ref, *rest, relu, has_res):
    # a: (tm, tk) bf16, b: (tk, tn) bf16, s/t: (1, tn) f32 folded BN scale/bias,
    # optional residual (tm, tn) bf16, out (tm, tn) bf16, acc scratch f32.
    if has_res:
        r_ref, o_ref, acc_ref = rest
    else:
        o_ref, acc_ref = rest
    k = pl.program_id(2)

    @pl.when(k == 0)
    def _():
        acc_ref[...] = jnp.zeros_like(acc_ref)

    acc_ref[...] += jnp.dot(a_ref[...], b_ref[...],
                            preferred_element_type=jnp.float32)

    @pl.when(k == pl.num_programs(2) - 1)
    def _():
        y = acc_ref[...] * s_ref[...] + t_ref[...]       # folded BN (f32)
        if has_res:
            y = y + r_ref[...].astype(jnp.float32)        # fused residual
        if relu:
            y = jnp.maximum(y, 0.0)
        o_ref[...] = y.astype(o_ref.dtype)                # bf16 writeback


def fused_matmul(a, b, scale, bias, residual=None, relu=True):
    """relu?((a @ b) * scale + bias (+ residual)); bf16 in/out, f32 accumulate."""
    M, K = a.shape
    Kb, N = b.shape
    assert K == Kb, (K, Kb)
    has_res = residual is not None
    if has_res:
        assert residual.shape == (M, N), (residual.shape, M, N)
    tm = _pick_tile(M, _TM_CAP)
    tn = _pick_tile(N, _TN_CAP)
    tk = _pick_tile(K, _TK_CAP)
    tm, tn = _split_for_parallel(M, N, tm, tn)
    grid = (M // tm, N // tn, K // tk)

    in_specs = [
        pl.BlockSpec((tm, tk), lambda i, j, k: (i, k)),
        pl.BlockSpec((tk, tn), lambda i, j, k: (k, j)),
        pl.BlockSpec((1, tn), lambda i, j, k: (0, j)),
        pl.BlockSpec((1, tn), lambda i, j, k: (0, j)),
    ]
    args = [a, b, scale.reshape(1, N), bias.reshape(1, N)]
    if has_res:
        # Block index ignores k -> fetched once per (i, j) tile.
        in_specs.append(pl.BlockSpec((tm, tn), lambda i, j, k: (i, j)))
        args.append(residual)

    return pl.pallas_call(
        functools.partial(_fused_mm_kernel, relu=relu, has_res=has_res),
        out_shape=jax.ShapeDtypeStruct((M, N), jnp.bfloat16),
        grid=grid,
        in_specs=in_specs,
        out_specs=pl.BlockSpec((tm, tn), lambda i, j, k: (i, j)),
        scratch_shapes=[pltpu.VMEM((tm, tn), jnp.float32)],
        compiler_params=_mm_compiler_params(tm, tn, tk, has_res),
    )(*args)


def fused_matmul_grouped(a, b, scale, bias, *, n_slabs, kslab_pad, relu=True):
    """Grouped-conv matmul: the slab grid axis selects a 128-lane output slab
    AND its own K slice of the patch matrix / stacked weight, so cross-slab
    zero blocks are never DMA'd or multiplied."""
    M, Ka = a.shape
    N = scale.shape[0]
    assert Ka == n_slabs * kslab_pad, (Ka, n_slabs, kslab_pad)
    tn = N // n_slabs
    assert b.shape == (n_slabs * kslab_pad, tn), b.shape
    tm = _pick_tile(M, _TM_CAP)
    tk = _pick_tile(kslab_pad, _TK_CAP)
    ks = kslab_pad // tk
    if (M // tm) * n_slabs < 2 and tm % 2 == 0 and (tm // 2) % SUB == 0:
        tm //= 2
    grid = (M // tm, n_slabs, ks)

    in_specs = [
        pl.BlockSpec((tm, tk), lambda i, j, k: (i, j * ks + k)),
        pl.BlockSpec((tk, tn), lambda i, j, k: (j * ks + k, 0)),
        pl.BlockSpec((1, tn), lambda i, j, k: (0, j)),
        pl.BlockSpec((1, tn), lambda i, j, k: (0, j)),
    ]
    return pl.pallas_call(
        functools.partial(_fused_mm_kernel, relu=relu, has_res=False),
        out_shape=jax.ShapeDtypeStruct((M, N), jnp.bfloat16),
        grid=grid,
        in_specs=in_specs,
        out_specs=pl.BlockSpec((tm, tn), lambda i, j, k: (i, j)),
        scratch_shapes=[pltpu.VMEM((tm, tn), jnp.float32)],
        compiler_params=_mm_compiler_params(tm, tn, tk, False),
    )(a, b, scale.reshape(1, N), bias.reshape(1, N))


# --------------------------- activation container -----------------------------
class Act(NamedTuple):
    """Activation kept as a lane-dense (M_pad, C) bf16 matrix between 1x1
    convs (skips NHWC reshape/re-pad/re-cast round trips).  Rows beyond
    n*h*w may hold relu(bias) garbage from an epilogue; consumers either stay
    row-aligned (1x1 chains / residual adds) or slice [:n*h*w] first."""
    mat: jax.Array
    n: int
    h: int
    w: int


def act_from_nhwc(x):
    n, h, w, c = x.shape
    m = n * h * w
    mat = _pad_rows(x.reshape(m, c).astype(jnp.bfloat16), _row_pad_target(m))
    return Act(mat, n, h, w)


def act_nhwc(a):
    m = a.n * a.h * a.w
    return a.mat[:m].reshape(a.n, a.h, a.w, a.mat.shape[1])


# ------------------------------ im2col glue ----------------------------------
# TODO(synk): patch extraction still materialized by XLA glue; in-kernel
#   gathering via shifted index_maps is the remaining step for real 224^2 input.
def _im2col(x, kh, kw, stride, padding, k_pad):
    """Dense (M_pad, k_pad) bf16 patch matrix; K ordered (kh, kw, C)."""
    n, h, w, c = x.shape
    xp = jnp.pad(x, ((0, 0), (padding, padding), (padding, padding), (0, 0)))
    ho = (h + 2 * padding - kh) // stride + 1
    wo = (w + 2 * padding - kw) // stride + 1
    patches = [xp[:, i:i + stride * ho:stride, j:j + stride * wo:stride, :]
               for i in range(kh) for j in range(kw)]
    a = jnp.stack(patches, axis=3).reshape(n * ho * wo, kh * kw * c)
    m = a.shape[0]
    if a.shape[1] < k_pad:
        a = jnp.pad(a, ((0, 0), (0, k_pad - a.shape[1])))
    a = _pad_rows(a, _row_pad_target(m))
    return a.astype(jnp.bfloat16), m, ho, wo


def _im2col_grouped(x, p):
    """Slab-major patch matrix for the grouped 3x3 conv.  Only the `width`
    logical channels enter K (lane padding never does)."""
    n, h, w, _ = x.shape
    kh, kw, stride, pad = p["kh"], p["kw"], p["stride"], p["pad"]
    width, n_slabs, kslab_pad = p["width"], p["n_slabs"], p["kslab_pad"]
    cslab = width // n_slabs
    xp = jnp.pad(x[..., :width], ((0, 0), (pad, pad), (pad, pad), (0, 0)))
    ho = (h + 2 * pad - kh) // stride + 1
    wo = (w + 2 * pad - kw) // stride + 1
    patches = [xp[:, i:i + stride * ho:stride, j:j + stride * wo:stride, :]
               for i in range(kh) for j in range(kw)]
    m = n * ho * wo
    kk = kh * kw
    a = jnp.stack(patches, axis=3).reshape(m, kk, n_slabs, cslab)
    a = jnp.moveaxis(a, 2, 1).reshape(m, n_slabs, kk * cslab)
    if kk * cslab < kslab_pad:
        a = jnp.pad(a, ((0, 0), (0, 0), (0, kslab_pad - kk * cslab)))
    a = a.reshape(m, n_slabs * kslab_pad)
    a = _pad_rows(a, _row_pad_target(m))
    return a.astype(jnp.bfloat16), m, ho, wo


# ------------------------------ conv wrappers ---------------------------------
def conv_stem(x_nhwc, p):
    n = x_nhwc.shape[0]
    a, m, ho, wo = _im2col(x_nhwc, p["kh"], p["kw"], p["stride"], p["pad"],
                           p["w"].shape[0])
    out = fused_matmul(a, p["w"], p["scale"], p["bias"], relu=True)
    return out[:m].reshape(n, ho, wo, p["w"].shape[1])     # NHWC bf16


def conv1x1_bn(act, p, residual=None, relu=True):
    """Fused 1x1 conv + BN (+residual) (+ReLU) directly on the Act matrix."""
    if p["stride"] == 1:
        a, n, h, w = act.mat, act.n, act.h, act.w
    else:                      # strided downsample: slice NHWC, re-pad rows
        s = p["stride"]
        x = act_nhwc(act)[:, ::s, ::s, :]
        n, h, w = x.shape[0], x.shape[1], x.shape[2]
        a = _pad_rows(x.reshape(n * h * w, x.shape[3]),
                      _row_pad_target(n * h * w))
    res = residual.mat if residual is not None else None
    out = fused_matmul(a, p["w"], p["scale"], p["bias"],
                       residual=res, relu=relu)
    return Act(out, n, h, w)


def conv_grouped_bn(act, p, relu=True):
    a, m, ho, wo = _im2col_grouped(act_nhwc(act), p)
    out = fused_matmul_grouped(a, p["w"], p["scale"], p["bias"],
                               n_slabs=p["n_slabs"], kslab_pad=p["kslab_pad"],
                               relu=relu)
    return Act(out, act.n, ho, wo)


# ------------------------------ pooling kernels -------------------------------
def _max3_kernel(x_ref, o_ref):
    o_ref[...] = jnp.maximum(jnp.maximum(x_ref[0], x_ref[1]), x_ref[2])


def _max3_pass(slabs, c, dtype, neg):
    xs = jnp.stack(slabs, axis=0)                 # (3, M, C)
    m = xs.shape[1]
    m_pad = _round_up(m, SUB)
    if m_pad > m:
        xs = jnp.pad(xs, ((0, 0), (0, m_pad - m), (0, 0)), constant_values=neg)
    tm = _pick_tile(m_pad, 512)
    out = pl.pallas_call(
        _max3_kernel,
        out_shape=jax.ShapeDtypeStruct((m_pad, c), dtype),
        grid=(m_pad // tm,),
        in_specs=[pl.BlockSpec((3, tm, c), lambda i: (0, i, 0))],
        out_specs=pl.BlockSpec((tm, c), lambda i: (i, 0)),
        compiler_params=pltpu.CompilerParams(dimension_semantics=("parallel",)),
    )(xs)
    return out[:m]


def maxpool2d(x, k=3, stride=2, padding=1):
    """3x3/s2 max pool as two separable lane-dense 3-tap passes (W then H);
    ~3x less HBM traffic than stacking all 9 window slabs.
    TODO(synk): in-kernel windowing over a (rows, Wp, C) block would remove the
    remaining slab stacking entirely."""
    assert k == 3
    n, h, w, c = x.shape
    neg = jnp.finfo(x.dtype).min
    xp = jnp.pad(x, ((0, 0), (padding, padding), (padding, padding), (0, 0)),
                 constant_values=neg)
    hp, wp = h + 2 * padding, w + 2 * padding
    ho = (hp - k) // stride + 1
    wo = (wp - k) // stride + 1
    slabs_w = [xp[:, :, j:j + stride * wo:stride, :].reshape(n * hp * wo, c)
               for j in range(k)]
    yw = _max3_pass(slabs_w, c, x.dtype, neg).reshape(n, hp, wo, c)
    slabs_h = [yw[:, i:i + stride * ho:stride, :, :].reshape(n * ho * wo, c)
               for i in range(k)]
    return _max3_pass(slabs_h, c, x.dtype, neg).reshape(n, ho, wo, c)


def _gap_kernel(x_ref, o_ref):
    o_ref[...] = jnp.mean(x_ref[...].astype(jnp.float32), axis=1)


def global_avg_pool(x):
    n, h, w, c = x.shape
    xr = x.reshape(n, h * w, c)
    tc = _pick_tile(c, 512)
    return pl.pallas_call(
        _gap_kernel,
        out_shape=jax.ShapeDtypeStruct((n, c), jnp.float32),
        grid=(c // tc,),
        in_specs=[pl.BlockSpec((n, h * w, tc), lambda j: (0, 0, j))],
        out_specs=pl.BlockSpec((n, tc), lambda j: (0, j)),
        compiler_params=pltpu.CompilerParams(dimension_semantics=("parallel",)),
    )(xr)


# ------------------------------ raw parameters --------------------------------
class _ParamGen:
    def __init__(self, key):
        self._key = key
        self._i = 0

    def next(self):
        self._i += 1
        return jax.random.fold_in(self._key, self._i)


def _conv_params(pg, cout, cin_g, kh, kw):
    return 0.05 * jax.random.normal(pg.next(), (cout, cin_g, kh, kw), jnp.float32)


def _bn_params(pg, c):
    gamma = 1.0 + 0.01 * jax.random.normal(pg.next(), (c,), jnp.float32)
    beta = 0.01 * jax.random.normal(pg.next(), (c,), jnp.float32)
    mean = 0.01 * jax.random.normal(pg.next(), (c,), jnp.float32)
    var = jnp.abs(1.0 + 0.01 * jax.random.normal(pg.next(), (c,), jnp.float32))
    return (gamma, beta, mean, var)


def _make_bottleneck(pg, inplanes, planes, stride, downsample):
    width = int(planes * (WIDTH_PER_GROUP / 64.0)) * GROUPS
    p = {
        "conv1": _conv_params(pg, width, inplanes, 1, 1),
        "bn1": _bn_params(pg, width),
        "conv2": _conv_params(pg, width, width // GROUPS, 3, 3),
        "bn2": _bn_params(pg, width),
        "conv3": _conv_params(pg, planes * EXPANSION, width, 1, 1),
        "bn3": _bn_params(pg, planes * EXPANSION),
        "stride": stride,
    }
    if downsample:
        p["down_conv"] = _conv_params(pg, planes * EXPANSION, inplanes, 1, 1)
        p["down_bn"] = _bn_params(pg, planes * EXPANSION)
    return p


def build_feature_extractor_params(key):
    pg = _ParamGen(key)
    params = {
        "conv1": _conv_params(pg, STEM, 3, 7, 7),
        "bn1": _bn_params(pg, STEM),
        "layers": [],
    }
    inplanes = STEM
    for li, (planes, nblocks) in enumerate(zip(PLANES, LAYERS)):
        layer_stride = 1 if li == 0 else 2
        blocks = []
        for b in range(nblocks):
            s = layer_stride if b == 0 else 1
            downsample = (b == 0) and (s != 1 or inplanes != planes * EXPANSION)
            blocks.append(_make_bottleneck(pg, inplanes, planes, s, downsample))
            inplanes = planes * EXPANSION
        params["layers"].append(blocks)
    return params


# ------------------------- matmul-ready parameter prep -------------------------
def _fold_bn(bn, cout_phys):
    gamma, beta, mean, var = bn
    scale = gamma / jnp.sqrt(var + BN_EPS)
    bias = beta - mean * scale
    pad = cout_phys - scale.shape[0]          # padded channels get scale=bias=0
    return jnp.pad(scale, (0, pad)), jnp.pad(bias, (0, pad))


def _prep_1x1_bn(w, bn, cin_phys, stride):
    cout = w.shape[0]
    cout_phys = _cpad(cout)
    wd = jnp.transpose(w[:, :, 0, 0], (1, 0))                # (cin, cout)
    wd = jnp.pad(wd, ((0, cin_phys - w.shape[1]), (0, cout_phys - cout)))
    scale, bias = _fold_bn(bn, cout_phys)
    return {"w": wd.astype(jnp.bfloat16), "scale": scale, "bias": bias,
            "kh": 1, "kw": 1, "stride": stride, "pad": 0, "cout": cout_phys}


def _prep_stem(w, bn, stride, padding):
    cout, cin, kh, kw = w.shape
    cout_phys = _cpad(cout)
    wd = jnp.transpose(w, (2, 3, 1, 0)).reshape(kh * kw * cin, cout)
    K = kh * kw * cin
    k_pad = _round_up(K, 256) if K > 128 else _round_up(K, 128)
    wd = jnp.pad(wd, ((0, k_pad - K), (0, cout_phys - cout)))
    scale, bias = _fold_bn(bn, cout_phys)
    return {"w": wd.astype(jnp.bfloat16), "scale": scale, "bias": bias,
            "kh": kh, "kw": kw, "stride": stride, "pad": padding,
            "cout": cout_phys}


def _prep_grouped_bn(w, bn, stride, padding, groups):
    """Grouped 3x3 conv packed into 128-lane output slabs with per-slab K."""
    cout, cin_g, kh, kw = w.shape
    cout_g = cout // groups
    width = cout
    n_pad = _cpad(width)
    n_slabs = n_pad // LANE
    if n_slabs > 1 and (width % LANE != 0 or groups % n_slabs != 0):
        n_slabs = 1                      # fallback: single block-diagonal slab
    gps = groups // n_slabs              # groups per slab
    slab_lanes = n_pad // n_slabs
    cslab_in = gps * cin_g
    kslab = kh * kw * cslab_in
    kslab_pad = _round_up(kslab, LANE)
    wt = jnp.zeros((n_slabs, kh, kw, cslab_in, slab_lanes), jnp.float32)
    for g in range(groups):
        s, gl = divmod(g, gps)
        wg = jnp.transpose(w[g * cout_g:(g + 1) * cout_g], (2, 3, 1, 0))
        wt = wt.at[s, :, :, gl * cin_g:(gl + 1) * cin_g,
                   gl * cout_g:(gl + 1) * cout_g].set(wg)
    wt = wt.reshape(n_slabs, kslab, slab_lanes)
    wt = jnp.pad(wt, ((0, 0), (0, kslab_pad - kslab), (0, 0)))
    wmat = wt.reshape(n_slabs * kslab_pad, slab_lanes)
    scale, bias = _fold_bn(bn, n_pad)
    return {"w": wmat.astype(jnp.bfloat16), "scale": scale, "bias": bias,
            "kh": kh, "kw": kw, "stride": stride, "pad": padding,
            "width": width, "n_slabs": n_slabs, "kslab_pad": kslab_pad,
            "cout": n_pad}


def prepare_params(raw):
    prep = {"stem": _prep_stem(raw["conv1"], raw["bn1"], stride=2, padding=3)}
    cin = prep["stem"]["cout"]
    layers = []
    for blocks in raw["layers"]:
        pblocks = []
        for bp in blocks:
            q = {"conv1": _prep_1x1_bn(bp["conv1"], bp["bn1"], cin, stride=1)}
            q["conv2"] = _prep_grouped_bn(bp["conv2"], bp["bn2"],
                                          stride=bp["stride"], padding=1,
                                          groups=GROUPS)
            q["conv3"] = _prep_1x1_bn(bp["conv3"], bp["bn3"],
                                      q["conv2"]["cout"], stride=1)
            if "down_conv" in bp:
                q["down"] = _prep_1x1_bn(bp["down_conv"], bp["down_bn"], cin,
                                         stride=bp["stride"])
            pblocks.append(q)
            cin = q["conv3"]["cout"]
        layers.append(pblocks)
    prep["layers"] = layers
    prep["feat_dim"] = PLANES[-1] * EXPANSION
    return prep


# ------------------------------ forward pass ----------------------------------
def _bottleneck_forward(x_act, q):
    out = conv1x1_bn(x_act, q["conv1"], relu=True)        # 1x1 + bn + relu
    out = conv_grouped_bn(out, q["conv2"], relu=True)     # grouped 3x3 + bn + relu
    identity = (conv1x1_bn(x_act, q["down"], relu=False)
                if "down" in q else x_act)
    # bn3 + residual add + ReLU fused into conv3's matmul epilogue.
    return conv1x1_bn(out, q["conv3"], residual=identity, relu=True)


def feature_extractor_forward(prep, x_nchw):
    """Equivalent of FeatureExtractor.forward: backbone (minus fc) + flatten."""
    x = jnp.transpose(x_nchw, (0, 2, 3, 1)).astype(jnp.float32)   # NCHW -> NHWC
    x = conv_stem(x, prep["stem"])               # conv1 + bn1 + relu (fused)
    x = maxpool2d(x, k=3, stride=2, padding=1)
    act = act_from_nhwc(x)
    for blocks in prep["layers"]:
        for q in blocks:
            act = _bottleneck_forward(act, q)
    feats = global_avg_pool(act_nhwc(act))       # (N, C) f32 == features.view(N,-1)
    return feats[:, :prep["feat_dim"]]


# ---------------------------------- main --------------------------------------
if __name__ == "__main__":
    key = jax.random.PRNGKey(0)
    pkey, xkey = jax.random.split(key)
    raw_params = build_feature_extractor_params(pkey)
    params = prepare_params(raw_params)

    # NCHW input, like the PyTorch module (RGB image batch).
    x = jax.random.normal(xkey, (2, 3, 32, 32), jnp.float32)

    fwd = jax.jit(lambda inp: feature_extractor_forward(params, inp))
    feats = jax.block_until_ready(fwd(x))

    expected_dim = PLANES[-1] * EXPANSION
    assert feats.shape == (2, expected_dim), feats.shape
    assert feats.dtype == jnp.float32
    assert bool(jnp.all(jnp.isfinite(feats)))
    print("KERNEL_OK")
</pallas_src>

<mosaic_0001>
module attributes {stable_mosaic.version = 11 : i64} {
  func.func @_fused_mm_kernel(%arg0: i32, %arg1: i32, %arg2: i32, %arg3: memref<256x256xbf16, #tpu.memory_space<vmem>>, %arg4: memref<256x128xbf16, #tpu.memory_space<vmem>>, %arg5: memref<1x128xf32, #tpu.memory_space<vmem>>, %arg6: memref<1x128xf32, #tpu.memory_space<vmem>>, %arg7: memref<256x128xbf16, #tpu.memory_space<vmem>>, %arg8: memref<256x128xf32, #tpu.memory_space<vmem>>) attributes {dimension_semantics = [#tpu.dimension_semantics<parallel>, #tpu.dimension_semantics<parallel>, #tpu.dimension_semantics<arbitrary>], iteration_bounds = array<i64: 2, 1, 1>, scalar_prefetch = 0 : i64, scratch_operands = 1 : i64, tpu.core_type = #tpu.core_type<tc>, window_params = [{transform_indices = @transform_0, window_bounds = array<i64: 256, 256>}, {transform_indices = @transform_1, window_bounds = array<i64: 256, 128>}, {transform_indices = @transform_2, window_bounds = array<i64: 1, 128>}, {transform_indices = @transform_3, window_bounds = array<i64: 1, 128>}, {transform_indices = @transform_4, window_bounds = array<i64: 256, 128>}]} {
    %c0_i32 = arith.constant 0 : i32
    %0 = arith.cmpi eq, %arg2, %c0_i32 : i32
    %1 = arith.extui %0 : i1 to i32
    %c0_i32_0 = arith.constant 0 : i32
    %2 = arith.cmpi ne, %1, %c0_i32_0 : i32
    scf.if %2 {
      %cst_10 = arith.constant 0.000000e+00 : f32
      %12 = vector.broadcast %cst_10 : f32 to vector<256x128xf32>
      %c0_11 = arith.constant 0 : index
      %c0_12 = arith.constant 0 : index
      %13 = vector.load %arg8[%c0_11, %c0_12] : memref<256x128xf32, #tpu.memory_space<vmem>>, vector<256x128xf32>
      tpu.vector_store %arg8[%c0_11, %c0_12], %12 {strides = array<i32>} : memref<256x128xf32, #tpu.memory_space<vmem>>, vector<256x128xf32>,
    } else {
    }
    %c0 = arith.constant 0 : index
    %c0_1 = arith.constant 0 : index
    %3 = vector.load %arg8[%c0, %c0_1] : memref<256x128xf32, #tpu.memory_space<vmem>>, vector<256x128xf32>
    %c0_2 = arith.constant 0 : index
    %c0_3 = arith.constant 0 : index
    %4 = vector.load %arg3[%c0_2, %c0_3] : memref<256x256xbf16, #tpu.memory_space<vmem>>, vector<256x256xbf16>
    %c0_4 = arith.constant 0 : index
    %c0_5 = arith.constant 0 : index
    %5 = vector.load %arg4[%c0_4, %c0_5] : memref<256x128xbf16, #tpu.memory_space<vmem>>, vector<256x128xbf16>
    %cst = arith.constant dense<0.000000e+00> : vector<256x128xf32>
    %6 = tpu.matmul %4, %5, %cst {dimension_numbers = #tpu.dot_dimension_numbers<[1], [0], [0], [1], [0, 0, 1, 1], [], []>} : vector<256x256xbf16>, vector<256x128xbf16>, vector<256x128xf32> -> vector<256x128xf32>
    %7 = arith.addf %3, %6 : vector<256x128xf32>
    %c0_6 = arith.constant 0 : index
    %c0_7 = arith.constant 0 : index
    %8 = vector.load %arg8[%c0_6, %c0_7] : memref<256x128xf32, #tpu.memory_space<vmem>>, vector<256x128xf32>
    tpu.vector_store %arg8[%c0_6, %c0_7], %7 {strides = array<i32>} : memref<256x128xf32, #tpu.memory_space<vmem>>, vector<256x128xf32>,
    %c0_i32_8 = arith.constant 0 : i32
    %9 = arith.cmpi eq, %arg2, %c0_i32_8 : i32
    %10 = arith.extui %9 : i1 to i32
    %c0_i32_9 = arith.constant 0 : i32
    %11 = arith.cmpi ne, %10, %c0_i32_9 : i32
    scf.if %11 {
      %c0_10 = arith.constant 0 : index
      %c0_11 = arith.constant 0 : index
      %12 = vector.load %arg8[%c0_10, %c0_11] : memref<256x128xf32, #tpu.memory_space<vmem>>, vector<256x128xf32>
      %c0_12 = arith.constant 0 : index
      %c0_13 = arith.constant 0 : index
      %13 = vector.load %arg5[%c0_12, %c0_13] : memref<1x128xf32, #tpu.memory_space<vmem>>, vector<1x128xf32>
      %14 = vector.broadcast %13 : vector<1x128xf32> to vector<256x128xf32>
      %15 = arith.mulf %12, %14 : vector<256x128xf32>
      %c0_14 = arith.constant 0 : index
      %c0_15 = arith.constant 0 : index
      %16 = vector.load %arg6[%c0_14, %c0_15] : memref<1x128xf32, #tpu.memory_space<vmem>>, vector<1x128xf32>
      %17 = vector.broadcast %16 : vector<1x128xf32> to vector<256x128xf32>
      %18 = arith.addf %15, %17 : vector<256x128xf32>
      %cst_16 = arith.constant 0.000000e+00 : f32
      %19 = vector.broadcast %cst_16 : f32 to vector<256x128xf32>
      %20 = arith.maximumf %18, %19 : vector<256x128xf32>
      %21 = arith.truncf %20 : vector<256x128xf32> to vector<256x128xbf16>
      %c0_17 = arith.constant 0 : index
      %c0_18 = arith.constant 0 : index
      %22 = vector.load %arg7[%c0_17, %c0_18] : memref<256x128xbf16, #tpu.memory_space<vmem>>, vector<256x128xbf16>
      tpu.vector_store %arg7[%c0_17, %c0_18], %21 {strides = array<i32>} : memref<256x128xbf16, #tpu.memory_space<vmem>>, vector<256x128xbf16>,
    } else {
    }
    return
  }
  func.func @transform_0(%arg0: i32, %arg1: i32, %arg2: i32) -> (i32, i32) {
    %c0_i32 = arith.constant 0 : i32
    return %arg0, %arg2 : i32, i32
  }
  func.func @transform_1(%arg0: i32, %arg1: i32, %arg2: i32) -> (i32, i32) {
    %c0_i32 = arith.constant 0 : i32
    return %arg2, %arg1 : i32, i32
  }
  func.func @transform_2(%arg0: i32, %arg1: i32, %arg2: i32) -> (i32, i32) {
    %c0_i32 = arith.constant 0 : i32
    %c0_i32_0 = arith.constant 0 : i32
    return %c0_i32, %arg1 : i32, i32
  }
  func.func @transform_3(%arg0: i32, %arg1: i32, %arg2: i32) -> (i32, i32) {
    %c0_i32 = arith.constant 0 : i32
    %c0_i32_0 = arith.constant 0 : i32
    return %c0_i32, %arg1 : i32, i32
  }
  func.func @transform_4(%arg0: i32, %arg1: i32, %arg2: i32) -> (i32, i32) {
    %c0_i32 = arith.constant 0 : i32
    return %arg0, %arg1 : i32, i32
  }
}

module attributes {stable_mosaic.version = 11 : i64} {
  func.func @_max3_kernel(%arg0: i32, %arg1: memref<3x288x128xbf16, #tpu.memory_space<vmem>>, %arg2: memref<288x128xbf16, #tpu.memory_space<vmem>>) attributes {dimension_semantics = [#tpu.dimension_semantics<parallel>], iteration_bounds = array<i64: 1>, scalar_prefetch = 0 : i64, scratch_operands = 0 : i64, tpu.core_type = #tpu.core_type<tc>, window_params = [{transform_indices = @transform_0, window_bounds = array<i64: 3, 288, 128>}, {transform_indices = @transform_1, window_bounds = array<i64: 288, 128>}]} {
    %c0 = arith.constant 0 : index
    %c0_0 = arith.constant 0 : index
    %c0_1 = arith.constant 0 : index
    %0 = vector.load %arg1[%c0, %c0_0, %c0_1] : memref<3x288x128xbf16, #tpu.memory_space<vmem>>, vector<1x288x128xbf16>
    %1 = vector.shape_cast %0 : vector<1x288x128xbf16> to vector<288x128xbf16>
    %c1 = arith.constant 1 : index
    %c0_2 = arith.constant 0 : index
    %c0_3 = arith.constant 0 : index
    %2 = vector.load %arg1[%c1, %c0_2, %c0_3] : memref<3x288x128xbf16, #tpu.memory_space<vmem>>, vector<1x288x128xbf16>
    %3 = vector.shape_cast %2 : vector<1x288x128xbf16> to vector<288x128xbf16>
    %4 = arith.maximumf %1, %3 : vector<288x128xbf16>
    %c2 = arith.constant 2 : index
    %c0_4 = arith.constant 0 : index
    %c0_5 = arith.constant 0 : index
    %5 = vector.load %arg1[%c2, %c0_4, %c0_5] : memref<3x288x128xbf16, #tpu.memory_space<vmem>>, vector<1x288x128xbf16>
    %6 = vector.shape_cast %5 : vector<1x288x128xbf16> to vector<288x128xbf16>
    %7 = arith.maximumf %4, %6 : vector<288x128xbf16>
    %c0_6 = arith.constant 0 : index
    %c0_7 = arith.constant 0 : index
    %8 = vector.load %arg2[%c0_6, %c0_7] : memref<288x128xbf16, #tpu.memory_space<vmem>>, vector<288x128xbf16>
    tpu.vector_store %arg2[%c0_6, %c0_7], %7 {strides = array<i32>} : memref<288x128xbf16, #tpu.memory_space<vmem>>, vector<288x128xbf16>,
    return
  }
  func.func @transform_0(%arg0: i32) -> (i32, i32, i32) {
    %c0_i32 = arith.constant 0 : i32
    %c0_i32_0 = arith.constant 0 : i32
    %c0_i32_1 = arith.constant 0 : i32
    return %c0_i32, %arg0, %c0_i32_0 : i32, i32, i32
  }
  func.func @transform_1(%arg0: i32) -> (i32, i32) {
    %c0_i32 = arith.constant 0 : i32
    %c0_i32_0 = arith.constant 0 : i32
    return %arg0, %c0_i32 : i32, i32
  }
}

module attributes {stable_mosaic.version = 11 : i64} {
  func.func @_max3_kernel(%arg0: i32, %arg1: memref<3x128x128xbf16, #tpu.memory_space<vmem>>, %arg2: memref<128x128xbf16, #tpu.memory_space<vmem>>) attributes {dimension_semantics = [#tpu.dimension_semantics<parallel>], iteration_bounds = array<i64: 1>, scalar_prefetch = 0 : i64, scratch_operands = 0 : i64, tpu.core_type = #tpu.core_type<tc>, window_params = [{transform_indices = @transform_0, window_bounds = array<i64: 3, 128, 128>}, {transform_indices = @transform_1, window_bounds = array<i64: 128, 128>}]} {
    %c0 = arith.constant 0 : index
    %c0_0 = arith.constant 0 : index
    %c0_1 = arith.constant 0 : index
    %0 = vector.load %arg1[%c0, %c0_0, %c0_1] : memref<3x128x128xbf16, #tpu.memory_space<vmem>>, vector<1x128x128xbf16>
    %1 = vector.shape_cast %0 : vector<1x128x128xbf16> to vector<128x128xbf16>
    %c1 = arith.constant 1 : index
    %c0_2 = arith.constant 0 : index
    %c0_3 = arith.constant 0 : index
    %2 = vector.load %arg1[%c1, %c0_2, %c0_3] : memref<3x128x128xbf16, #tpu.memory_space<vmem>>, vector<1x128x128xbf16>
    %3 = vector.shape_cast %2 : vector<1x128x128xbf16> to vector<128x128xbf16>
    %4 = arith.maximumf %1, %3 : vector<128x128xbf16>
    %c2 = arith.constant 2 : index
    %c0_4 = arith.constant 0 : index
    %c0_5 = arith.constant 0 : index
    %5 = vector.load %arg1[%c2, %c0_4, %c0_5] : memref<3x128x128xbf16, #tpu.memory_space<vmem>>, vector<1x128x128xbf16>
    %6 = vector.shape_cast %5 : vector<1x128x128xbf16> to vector<128x128xbf16>
    %7 = arith.maximumf %4, %6 : vector<128x128xbf16>
    %c0_6 = arith.constant 0 : index
    %c0_7 = arith.constant 0 : index
    %8 = vector.load %arg2[%c0_6, %c0_7] : memref<128x128xbf16, #tpu.memory_space<vmem>>, vector<128x128xbf16>
    tpu.vector_store %arg2[%c0_6, %c0_7], %7 {strides = array<i32>} : memref<128x128xbf16, #tpu.memory_space<vmem>>, vector<128x128xbf16>,
    return
  }
  func.func @transform_0(%arg0: i32) -> (i32, i32, i32) {
    %c0_i32 = arith.constant 0 : i32
    %c0_i32_0 = arith.constant 0 : i32
    %c0_i32_1 = arith.constant 0 : i32
    return %c0_i32, %arg0, %c0_i32_0 : i32, i32, i32
  }
  func.func @transform_1(%arg0: i32) -> (i32, i32) {
    %c0_i32 = arith.constant 0 : i32
    %c0_i32_0 = arith.constant 0 : i32
    return %arg0, %c0_i32 : i32, i32
  }
}

module attributes {stable_mosaic.version = 11 : i64} {
  func.func @_fused_mm_kernel(%arg0: i32, %arg1: i32, %arg2: i32, %arg3: memref<64x128xbf16, #tpu.memory_space<vmem>>, %arg4: memref<128x128xbf16, #tpu.memory_space<vmem>>, %arg5: memref<1x128xf32, #tpu.memory_space<vmem>>, %arg6: memref<1x128xf32, #tpu.memory_space<vmem>>, %arg7: memref<64x128xbf16, #tpu.memory_space<vmem>>, %arg8: memref<64x128xf32, #tpu.memory_space<vmem>>) attributes {dimension_semantics = [#tpu.dimension_semantics<parallel>, #tpu.dimension_semantics<parallel>, #tpu.dimension_semantics<arbitrary>], iteration_bounds = array<i64: 2, 1, 1>, scalar_prefetch = 0 : i64, scratch_operands = 1 : i64, tpu.core_type = #tpu.core_type<tc>, window_params = [{transform_indices = @transform_0, window_bounds = array<i64: 64, 128>}, {transform_indices = @transform_1, window_bounds = array<i64: 128, 128>}, {transform_indices = @transform_2, window_bounds = array<i64: 1, 128>}, {transform_indices = @transform_3, window_bounds = array<i64: 1, 128>}, {transform_indices = @transform_4, window_bounds = array<i64: 64, 128>}]} {
    %c0_i32 = arith.constant 0 : i32
    %0 = arith.cmpi eq, %arg2, %c0_i32 : i32
    %1 = arith.extui %0 : i1 to i32
    %c0_i32_0 = arith.constant 0 : i32
    %2 = arith.cmpi ne, %1, %c0_i32_0 : i32
    scf.if %2 {
      %cst_10 = arith.constant 0.000000e+00 : f32
      %12 = vector.broadcast %cst_10 : f32 to vector<64x128xf32>
      %c0_11 = arith.constant 0 : index
      %c0_12 = arith.constant 0 : index
      %13 = vector.load %arg8[%c0_11, %c0_12] : memref<64x128xf32, #tpu.memory_space<vmem>>, vector<64x128xf32>
      tpu.vector_store %arg8[%c0_11, %c0_12], %12 {strides = array<i32>} : memref<64x128xf32, #tpu.memory_space<vmem>>, vector<64x128xf32>,
    } else {
    }
    %c0 = arith.constant 0 : index
    %c0_1 = arith.constant 0 : index
    %3 = vector.load %arg8[%c0, %c0_1] : memref<64x128xf32, #tpu.memory_space<vmem>>, vector<64x128xf32>
    %c0_2 = arith.constant 0 : index
    %c0_3 = arith.constant 0 : index
    %4 = vector.load %arg3[%c0_2, %c0_3] : memref<64x128xbf16, #tpu.memory_space<vmem>>, vector<64x128xbf16>
    %c0_4 = arith.constant 0 : index
    %c0_5 = arith.constant 0 : index
    %5 = vector.load %arg4[%c0_4, %c0_5] : memref<128x128xbf16, #tpu.memory_space<vmem>>, vector<128x128xbf16>
    %cst = arith.constant dense<0.000000e+00> : vector<64x128xf32>
    %6 = tpu.matmul %4, %5, %cst {dimension_numbers = #tpu.dot_dimension_numbers<[1], [0], [0], [1], [0, 0, 1, 1], [], []>} : vector<64x128xbf16>, vector<128x128xbf16>, vector<64x128xf32> -> vector<64x128xf32>
    %7 = arith.addf %3, %6 : vector<64x128xf32>
    %c0_6 = arith.constant 0 : index
    %c0_7 = arith.constant 0 : index
    %8 = vector.load %arg8[%c0_6, %c0_7] : memref<64x128xf32, #tpu.memory_space<vmem>>, vector<64x128xf32>
    tpu.vector_store %arg8[%c0_6, %c0_7], %7 {strides = array<i32>} : memref<64x128xf32, #tpu.memory_space<vmem>>, vector<64x128xf32>,
    %c0_i32_8 = arith.constant 0 : i32
    %9 = arith.cmpi eq, %arg2, %c0_i32_8 : i32
    %10 = arith.extui %9 : i1 to i32
    %c0_i32_9 = arith.constant 0 : i32
    %11 = arith.cmpi ne, %10, %c0_i32_9 : i32
    scf.if %11 {
      %c0_10 = arith.constant 0 : index
      %c0_11 = arith.constant 0 : index
      %12 = vector.load %arg8[%c0_10, %c0_11] : memref<64x128xf32, #tpu.memory_space<vmem>>, vector<64x128xf32>
      %c0_12 = arith.constant 0 : index
      %c0_13 = arith.constant 0 : index
      %13 = vector.load %arg5[%c0_12, %c0_13] : memref<1x128xf32, #tpu.memory_space<vmem>>, vector<1x128xf32>
      %14 = vector.broadcast %13 : vector<1x128xf32> to vector<64x128xf32>
      %15 = arith.mulf %12, %14 : vector<64x128xf32>
      %c0_14 = arith.constant 0 : index
      %c0_15 = arith.constant 0 : index
      %16 = vector.load %arg6[%c0_14, %c0_15] : memref<1x128xf32, #tpu.memory_space<vmem>>, vector<1x128xf32>
      %17 = vector.broadcast %16 : vector<1x128xf32> to vector<64x128xf32>
      %18 = arith.addf %15, %17 : vector<64x128xf32>
      %cst_16 = arith.constant 0.000000e+00 : f32
      %19 = vector.broadcast %cst_16 : f32 to vector<64x128xf32>
      %20 = arith.maximumf %18, %19 : vector<64x128xf32>
      %21 = arith.truncf %20 : vector<64x128xf32> to vector<64x128xbf16>
      %c0_17 = arith.constant 0 : index
      %c0_18 = arith.constant 0 : index
      %22 = vector.load %arg7[%c0_17, %c0_18] : memref<64x128xbf16, #tpu.memory_space<vmem>>, vector<64x128xbf16>
      tpu.vector_store %arg7[%c0_17, %c0_18], %21 {strides = array<i32>} : memref<64x128xbf16, #tpu.memory_space<vmem>>, vector<64x128xbf16>,
    } else {
    }
    return
  }
  func.func @transform_0(%arg0: i32, %arg1: i32, %arg2: i32) -> (i32, i32) {
    %c0_i32 = arith.constant 0 : i32
    return %arg0, %arg2 : i32, i32
  }
  func.func @transform_1(%arg0: i32, %arg1: i32, %arg2: i32) -> (i32, i32) {
    %c0_i32 = arith.constant 0 : i32
    return %arg2, %arg1 : i32, i32
  }
  func.func @transform_2(%arg0: i32, %arg1: i32, %arg2: i32) -> (i32, i32) {
    %c0_i32 = arith.constant 0 : i32
    %c0_i32_0 = arith.constant 0 : i32
    return %c0_i32, %arg1 : i32, i32
  }
  func.func @transform_3(%arg0: i32, %arg1: i32, %arg2: i32) -> (i32, i32) {
    %c0_i32 = arith.constant 0 : i32
    %c0_i32_0 = arith.constant 0 : i32
    return %c0_i32, %arg1 : i32, i32
  }
  func.func @transform_4(%arg0: i32, %arg1: i32, %arg2: i32) -> (i32, i32) {
    %c0_i32 = arith.constant 0 : i32
    return %arg0, %arg1 : i32, i32
  }
}

module attributes {stable_mosaic.version = 11 : i64} {
  func.func @_fused_mm_kernel(%arg0: i32, %arg1: i32, %arg2: i32, %arg3: memref<64x384xbf16, #tpu.memory_space<vmem>>, %arg4: memref<384x128xbf16, #tpu.memory_space<vmem>>, %arg5: memref<1x128xf32, #tpu.memory_space<vmem>>, %arg6: memref<1x128xf32, #tpu.memory_space<vmem>>, %arg7: memref<64x128xbf16, #tpu.memory_space<vmem>>, %arg8: memref<64x128xf32, #tpu.memory_space<vmem>>) attributes {dimension_semantics = [#tpu.dimension_semantics<parallel>, #tpu.dimension_semantics<parallel>, #tpu.dimension_semantics<arbitrary>], iteration_bounds = array<i64: 2, 1, 1>, scalar_prefetch = 0 : i64, scratch_operands = 1 : i64, tpu.core_type = #tpu.core_type<tc>, window_params = [{transform_indices = @transform_0, window_bounds = array<i64: 64, 384>}, {transform_indices = @transform_1, window_bounds = array<i64: 384, 128>}, {transform_indices = @transform_2, window_bounds = array<i64: 1, 128>}, {transform_indices = @transform_3, window_bounds = array<i64: 1, 128>}, {transform_indices = @transform_4, window_bounds = array<i64: 64, 128>}]} {
    %c0_i32 = arith.constant 0 : i32
    %0 = arith.cmpi eq, %arg2, %c0_i32 : i32
    %1 = arith.extui %0 : i1 to i32
    %c0_i32_0 = arith.constant 0 : i32
    %2 = arith.cmpi ne, %1, %c0_i32_0 : i32
    scf.if %2 {
      %cst_10 = arith.constant 0.000000e+00 : f32
      %12 = vector.broadcast %cst_10 : f32 to vector<64x128xf32>
      %c0_11 = arith.constant 0 : index
      %c0_12 = arith.constant 0 : index
      %13 = vector.load %arg8[%c0_11, %c0_12] : memref<64x128xf32, #tpu.memory_space<vmem>>, vector<64x128xf32>
      tpu.vector_store %arg8[%c0_11, %c0_12], %12 {strides = array<i32>} : memref<64x128xf32, #tpu.memory_space<vmem>>, vector<64x128xf32>,
    } else {
    }
    %c0 = arith.constant 0 : index
    %c0_1 = arith.constant 0 : index
    %3 = vector.load %arg8[%c0, %c0_1] : memref<64x128xf32, #tpu.memory_space<vmem>>, vector<64x128xf32>
    %c0_2 = arith.constant 0 : index
    %c0_3 = arith.constant 0 : index
    %4 = vector.load %arg3[%c0_2, %c0_3] : memref<64x384xbf16, #tpu.memory_space<vmem>>, vector<64x384xbf16>
    %c0_4 = arith.constant 0 : index
    %c0_5 = arith.constant 0 : index
    %5 = vector.load %arg4[%c0_4, %c0_5] : memref<384x128xbf16, #tpu.memory_space<vmem>>, vector<384x128xbf16>
    %cst = arith.constant dense<0.000000e+00> : vector<64x128xf32>
    %6 = tpu.matmul %4, %5, %cst {dimension_numbers = #tpu.dot_dimension_numbers<[1], [0], [0], [1], [0, 0, 1, 1], [], []>} : vector<64x384xbf16>, vector<384x128xbf16>, vector<64x128xf32> -> vector<64x128xf32>
    %7 = arith.addf %3, %6 : vector<64x128xf32>
    %c0_6 = arith.constant 0 : index
    %c0_7 = arith.constant 0 : index
    %8 = vector.load %arg8[%c0_6, %c0_7] : memref<64x128xf32, #tpu.memory_space<vmem>>, vector<64x128xf32>
    tpu.vector_store %arg8[%c0_6, %c0_7], %7 {strides = array<i32>} : memref<64x128xf32, #tpu.memory_space<vmem>>, vector<64x128xf32>,
    %c0_i32_8 = arith.constant 0 : i32
    %9 = arith.cmpi eq, %arg2, %c0_i32_8 : i32
    %10 = arith.extui %9 : i1 to i32
    %c0_i32_9 = arith.constant 0 : i32
    %11 = arith.cmpi ne, %10, %c0_i32_9 : i32
    scf.if %11 {
      %c0_10 = arith.constant 0 : index
      %c0_11 = arith.constant 0 : index
      %12 = vector.load %arg8[%c0_10, %c0_11] : memref<64x128xf32, #tpu.memory_space<vmem>>, vector<64x128xf32>
      %c0_12 = arith.constant 0 : index
      %c0_13 = arith.constant 0 : index
      %13 = vector.load %arg5[%c0_12, %c0_13] : memref<1x128xf32, #tpu.memory_space<vmem>>, vector<1x128xf32>
      %14 = vector.broadcast %13 : vector<1x128xf32> to vector<64x128xf32>
      %15 = arith.mulf %12, %14 : vector<64x128xf32>
      %c0_14 = arith.constant 0 : index
      %c0_15 = arith.constant 0 : index
      %16 = vector.load %arg6[%c0_14, %c0_15] : memref<1x128xf32, #tpu.memory_space<vmem>>, vector<1x128xf32>
      %17 = vector.broadcast %16 : vector<1x128xf32> to vector<64x128xf32>
      %18 = arith.addf %15, %17 : vector<64x128xf32>
      %cst_16 = arith.constant 0.000000e+00 : f32
      %19 = vector.broadcast %cst_16 : f32 to vector<64x128xf32>
      %20 = arith.maximumf %18, %19 : vector<64x128xf32>
      %21 = arith.truncf %20 : vector<64x128xf32> to vector<64x128xbf16>
      %c0_17 = arith.constant 0 : index
      %c0_18 = arith.constant 0 : index
      %22 = vector.load %arg7[%c0_17, %c0_18] : memref<64x128xbf16, #tpu.memory_space<vmem>>, vector<64x128xbf16>
      tpu.vector_store %arg7[%c0_17, %c0_18], %21 {strides = array<i32>} : memref<64x128xbf16, #tpu.memory_space<vmem>>, vector<64x128xbf16>,
    } else {
    }
    return
  }
  func.func @transform_0(%arg0: i32, %arg1: i32, %arg2: i32) -> (i32, i32) {
    %c1_i32 = arith.constant 1 : i32
    %0 = arith.muli %arg1, %c1_i32 : i32
    %1 = arith.addi %0, %arg2 : i32
    %c0_i32 = arith.constant 0 : i32
    return %arg0, %1 : i32, i32
  }
  func.func @transform_1(%arg0: i32, %arg1: i32, %arg2: i32) -> (i32, i32) {
    %c1_i32 = arith.constant 1 : i32
    %0 = arith.muli %arg1, %c1_i32 : i32
    %1 = arith.addi %0, %arg2 : i32
    %c0_i32 = arith.constant 0 : i32
    %c0_i32_0 = arith.constant 0 : i32
    return %1, %c0_i32 : i32, i32
  }
  func.func @transform_2(%arg0: i32, %arg1: i32, %arg2: i32) -> (i32, i32) {
    %c0_i32 = arith.constant 0 : i32
    %c0_i32_0 = arith.constant 0 : i32
    return %c0_i32, %arg1 : i32, i32
  }
  func.func @transform_3(%arg0: i32, %arg1: i32, %arg2: i32) -> (i32, i32) {
    %c0_i32 = arith.constant 0 : i32
    %c0_i32_0 = arith.constant 0 : i32
    return %c0_i32, %arg1 : i32, i32
  }
  func.func @transform_4(%arg0: i32, %arg1: i32, %arg2: i32) -> (i32, i32) {
    %c0_i32 = arith.constant 0 : i32
    return %arg0, %arg1 : i32, i32
  }
}

module attributes {stable_mosaic.version = 11 : i64} {
  func.func @_fused_mm_kernel(%arg0: i32, %arg1: i32, %arg2: i32, %arg3: memref<64x128xbf16, #tpu.memory_space<vmem>>, %arg4: memref<128x128xbf16, #tpu.memory_space<vmem>>, %arg5: memref<1x128xf32, #tpu.memory_space<vmem>>, %arg6: memref<1x128xf32, #tpu.memory_space<vmem>>, %arg7: memref<64x128xbf16, #tpu.memory_space<vmem>>, %arg8: memref<64x128xf32, #tpu.memory_space<vmem>>) attributes {dimension_semantics = [#tpu.dimension_semantics<parallel>, #tpu.dimension_semantics<parallel>, #tpu.dimension_semantics<arbitrary>], iteration_bounds = array<i64: 2, 1, 1>, scalar_prefetch = 0 : i64, scratch_operands = 1 : i64, tpu.core_type = #tpu.core_type<tc>, window_params = [{transform_indices = @transform_0, window_bounds = array<i64: 64, 128>}, {transform_indices = @transform_1, window_bounds = array<i64: 128, 128>}, {transform_indices = @transform_2, window_bounds = array<i64: 1, 128>}, {transform_indices = @transform_3, window_bounds = array<i64: 1, 128>}, {transform_indices = @transform_4, window_bounds = array<i64: 64, 128>}]} {
    %c0_i32 = arith.constant 0 : i32
    %0 = arith.cmpi eq, %arg2, %c0_i32 : i32
    %1 = arith.extui %0 : i1 to i32
    %c0_i32_0 = arith.constant 0 : i32
    %2 = arith.cmpi ne, %1, %c0_i32_0 : i32
    scf.if %2 {
      %cst_10 = arith.constant 0.000000e+00 : f32
      %12 = vector.broadcast %cst_10 : f32 to vector<64x128xf32>
      %c0_11 = arith.constant 0 : index
      %c0_12 = arith.constant 0 : index
      %13 = vector.load %arg8[%c0_11, %c0_12] : memref<64x128xf32, #tpu.memory_space<vmem>>, vector<64x128xf32>
      tpu.vector_store %arg8[%c0_11, %c0_12], %12 {strides = array<i32>} : memref<64x128xf32, #tpu.memory_space<vmem>>, vector<64x128xf32>,
    } else {
    }
    %c0 = arith.constant 0 : index
    %c0_1 = arith.constant 0 : index
    %3 = vector.load %arg8[%c0, %c0_1] : memref<64x128xf32, #tpu.memory_space<vmem>>, vector<64x128xf32>
    %c0_2 = arith.constant 0 : index
    %c0_3 = arith.constant 0 : index
    %4 = vector.load %arg3[%c0_2, %c0_3] : memref<64x128xbf16, #tpu.memory_space<vmem>>, vector<64x128xbf16>
    %c0_4 = arith.constant 0 : index
    %c0_5 = arith.constant 0 : index
    %5 = vector.load %arg4[%c0_4, %c0_5] : memref<128x128xbf16, #tpu.memory_space<vmem>>, vector<128x128xbf16>
    %cst = arith.constant dense<0.000000e+00> : vector<64x128xf32>
    %6 = tpu.matmul %4, %5, %cst {dimension_numbers = #tpu.dot_dimension_numbers<[1], [0], [0], [1], [0, 0, 1, 1], [], []>} : vector<64x128xbf16>, vector<128x128xbf16>, vector<64x128xf32> -> vector<64x128xf32>
    %7 = arith.addf %3, %6 : vector<64x128xf32>
    %c0_6 = arith.constant 0 : index
    %c0_7 = arith.constant 0 : index
    %8 = vector.load %arg8[%c0_6, %c0_7] : memref<64x128xf32, #tpu.memory_space<vmem>>, vector<64x128xf32>
    tpu.vector_store %arg8[%c0_6, %c0_7], %7 {strides = array<i32>} : memref<64x128xf32, #tpu.memory_space<vmem>>, vector<64x128xf32>,
    %c0_i32_8 = arith.constant 0 : i32
    %9 = arith.cmpi eq, %arg2, %c0_i32_8 : i32
    %10 = arith.extui %9 : i1 to i32
    %c0_i32_9 = arith.constant 0 : i32
    %11 = arith.cmpi ne, %10, %c0_i32_9 : i32
    scf.if %11 {
      %c0_10 = arith.constant 0 : index
      %c0_11 = arith.constant 0 : index
      %12 = vector.load %arg8[%c0_10, %c0_11] : memref<64x128xf32, #tpu.memory_space<vmem>>, vector<64x128xf32>
      %c0_12 = arith.constant 0 : index
      %c0_13 = arith.constant 0 : index
      %13 = vector.load %arg5[%c0_12, %c0_13] : memref<1x128xf32, #tpu.memory_space<vmem>>, vector<1x128xf32>
      %14 = vector.broadcast %13 : vector<1x128xf32> to vector<64x128xf32>
      %15 = arith.mulf %12, %14 : vector<64x128xf32>
      %c0_14 = arith.constant 0 : index
      %c0_15 = arith.constant 0 : index
      %16 = vector.load %arg6[%c0_14, %c0_15] : memref<1x128xf32, #tpu.memory_space<vmem>>, vector<1x128xf32>
      %17 = vector.broadcast %16 : vector<1x128xf32> to vector<64x128xf32>
      %18 = arith.addf %15, %17 : vector<64x128xf32>
      %19 = arith.truncf %18 : vector<64x128xf32> to vector<64x128xbf16>
      %c0_16 = arith.constant 0 : index
      %c0_17 = arith.constant 0 : index
      %20 = vector.load %arg7[%c0_16, %c0_17] : memref<64x128xbf16, #tpu.memory_space<vmem>>, vector<64x128xbf16>
      tpu.vector_store %arg7[%c0_16, %c0_17], %19 {strides = array<i32>} : memref<64x128xbf16, #tpu.memory_space<vmem>>, vector<64x128xbf16>,
    } else {
    }
    return
  }
  func.func @transform_0(%arg0: i32, %arg1: i32, %arg2: i32) -> (i32, i32) {
    %c0_i32 = arith.constant 0 : i32
    return %arg0, %arg2 : i32, i32
  }
  func.func @transform_1(%arg0: i32, %arg1: i32, %arg2: i32) -> (i32, i32) {
    %c0_i32 = arith.constant 0 : i32
    return %arg2, %arg1 : i32, i32
  }
  func.func @transform_2(%arg0: i32, %arg1: i32, %arg2: i32) -> (i32, i32) {
    %c0_i32 = arith.constant 0 : i32
    %c0_i32_0 = arith.constant 0 : i32
    return %c0_i32, %arg1 : i32, i32
  }
  func.func @transform_3(%arg0: i32, %arg1: i32, %arg2: i32) -> (i32, i32) {
    %c0_i32 = arith.constant 0 : i32
    %c0_i32_0 = arith.constant 0 : i32
    return %c0_i32, %arg1 : i32, i32
  }
  func.func @transform_4(%arg0: i32, %arg1: i32, %arg2: i32) -> (i32, i32) {
    %c0_i32 = arith.constant 0 : i32
    return %arg0, %arg1 : i32, i32
  }
}

module attributes {stable_mosaic.version = 11 : i64} {
  func.func @_fused_mm_kernel(%arg0: i32, %arg1: i32, %arg2: i32, %arg3: memref<64x128xbf16, #tpu.memory_space<vmem>>, %arg4: memref<128x128xbf16, #tpu.memory_space<vmem>>, %arg5: memref<1x128xf32, #tpu.memory_space<vmem>>, %arg6: memref<1x128xf32, #tpu.memory_space<vmem>>, %arg7: memref<64x128xbf16, #tpu.memory_space<vmem>>, %arg8: memref<64x128xbf16, #tpu.memory_space<vmem>>, %arg9: memref<64x128xf32, #tpu.memory_space<vmem>>) attributes {dimension_semantics = [#tpu.dimension_semantics<parallel>, #tpu.dimension_semantics<parallel>, #tpu.dimension_semantics<arbitrary>], iteration_bounds = array<i64: 2, 1, 1>, scalar_prefetch = 0 : i64, scratch_operands = 1 : i64, tpu.core_type = #tpu.core_type<tc>, window_params = [{transform_indices = @transform_0, window_bounds = array<i64: 64, 128>}, {transform_indices = @transform_1, window_bounds = array<i64: 128, 128>}, {transform_indices = @transform_2, window_bounds = array<i64: 1, 128>}, {transform_indices = @transform_3, window_bounds = array<i64: 1, 128>}, {transform_indices = @transform_4, window_bounds = array<i64: 64, 128>}, {transform_indices = @transform_5, window_bounds = array<i64: 64, 128>}]} {
    %c0_i32 = arith.constant 0 : i32
    %0 = arith.cmpi eq, %arg2, %c0_i32 : i32
    %1 = arith.extui %0 : i1 to i32
    %c0_i32_0 = arith.constant 0 : i32
    %2 = arith.cmpi ne, %1, %c0_i32_0 : i32
    scf.if %2 {
      %cst_10 = arith.constant 0.000000e+00 : f32
      %12 = vector.broadcast %cst_10 : f32 to vector<64x128xf32>
      %c0_11 = arith.constant 0 : index
      %c0_12 = arith.constant 0 : index
      %13 = vector.load %arg9[%c0_11, %c0_12] : memref<64x128xf32, #tpu.memory_space<vmem>>, vector<64x128xf32>
      tpu.vector_store %arg9[%c0_11, %c0_12], %12 {strides = array<i32>} : memref<64x128xf32, #tpu.memory_space<vmem>>, vector<64x128xf32>,
    } else {
    }
    %c0 = arith.constant 0 : index
    %c0_1 = arith.constant 0 : index
    %3 = vector.load %arg9[%c0, %c0_1] : memref<64x128xf32, #tpu.memory_space<vmem>>, vector<64x128xf32>
    %c0_2 = arith.constant 0 : index
    %c0_3 = arith.constant 0 : index
    %4 = vector.load %arg3[%c0_2, %c0_3] : memref<64x128xbf16, #tpu.memory_space<vmem>>, vector<64x128xbf16>
    %c0_4 = arith.constant 0 : index
    %c0_5 = arith.constant 0 : index
    %5 = vector.load %arg4[%c0_4, %c0_5] : memref<128x128xbf16, #tpu.memory_space<vmem>>, vector<128x128xbf16>
    %cst = arith.constant dense<0.000000e+00> : vector<64x128xf32>
    %6 = tpu.matmul %4, %5, %cst {dimension_numbers = #tpu.dot_dimension_numbers<[1], [0], [0], [1], [0, 0, 1, 1], [], []>} : vector<64x128xbf16>, vector<128x128xbf16>, vector<64x128xf32> -> vector<64x128xf32>
    %7 = arith.addf %3, %6 : vector<64x128xf32>
    %c0_6 = arith.constant 0 : index
    %c0_7 = arith.constant 0 : index
    %8 = vector.load %arg9[%c0_6, %c0_7] : memref<64x128xf32, #tpu.memory_space<vmem>>, vector<64x128xf32>
    tpu.vector_store %arg9[%c0_6, %c0_7], %7 {strides = array<i32>} : memref<64x128xf32, #tpu.memory_space<vmem>>, vector<64x128xf32>,
    %c0_i32_8 = arith.constant 0 : i32
    %9 = arith.cmpi eq, %arg2, %c0_i32_8 : i32
    %10 = arith.extui %9 : i1 to i32
    %c0_i32_9 = arith.constant 0 : i32
    %11 = arith.cmpi ne, %10, %c0_i32_9 : i32
    scf.if %11 {
      %c0_10 = arith.constant 0 : index
      %c0_11 = arith.constant 0 : index
      %12 = vector.load %arg9[%c0_10, %c0_11] : memref<64x128xf32, #tpu.memory_space<vmem>>, vector<64x128xf32>
      %c0_12 = arith.constant 0 : index
      %c0_13 = arith.constant 0 : index
      %13 = vector.load %arg5[%c0_12, %c0_13] : memref<1x128xf32, #tpu.memory_space<vmem>>, vector<1x128xf32>
      %14 = vector.broadcast %13 : vector<1x128xf32> to vector<64x128xf32>
      %15 = arith.mulf %12, %14 : vector<64x128xf32>
      %c0_14 = arith.constant 0 : index
      %c0_15 = arith.constant 0 : index
      %16 = vector.load %arg6[%c0_14, %c0_15] : memref<1x128xf32, #tpu.memory_space<vmem>>, vector<1x128xf32>
      %17 = vector.broadcast %16 : vector<1x128xf32> to vector<64x128xf32>
      %18 = arith.addf %15, %17 : vector<64x128xf32>
      %c0_16 = arith.constant 0 : index
      %c0_17 = arith.constant 0 : index
      %19 = vector.load %arg7[%c0_16, %c0_17] : memref<64x128xbf16, #tpu.memory_space<vmem>>, vector<64x128xbf16>
      %20 = arith.extf %19 : vector<64x128xbf16> to vector<64x128xf32>
      %21 = arith.addf %18, %20 : vector<64x128xf32>
      %cst_18 = arith.constant 0.000000e+00 : f32
      %22 = vector.broadcast %cst_18 : f32 to vector<64x128xf32>
      %23 = arith.maximumf %21, %22 : vector<64x128xf32>
      %24 = arith.truncf %23 : vector<64x128xf32> to vector<64x128xbf16>
      %c0_19 = arith.constant 0 : index
      %c0_20 = arith.constant 0 : index
      %25 = vector.load %arg8[%c0_19, %c0_20] : memref<64x128xbf16, #tpu.memory_space<vmem>>, vector<64x128xbf16>
      tpu.vector_store %arg8[%c0_19, %c0_20], %24 {strides = array<i32>} : memref<64x128xbf16, #tpu.memory_space<vmem>>, vector<64x128xbf16>,
    } else {
    }
    return
  }
  func.func @transform_0(%arg0: i32, %arg1: i32, %arg2: i32) -> (i32, i32) {
    %c0_i32 = arith.constant 0 : i32
    return %arg0, %arg2 : i32, i32
  }
  func.func @transform_1(%arg0: i32, %arg1: i32, %arg2: i32) -> (i32, i32) {
    %c0_i32 = arith.constant 0 : i32
    return %arg2, %arg1 : i32, i32
  }
  func.func @transform_2(%arg0: i32, %arg1: i32, %arg2: i32) -> (i32, i32) {
    %c0_i32 = arith.constant 0 : i32
    %c0_i32_0 = arith.constant 0 : i32
    return %c0_i32, %arg1 : i32, i32
  }
  func.func @transform_3(%arg0: i32, %arg1: i32, %arg2: i32) -> (i32, i32) {
    %c0_i32 = arith.constant 0 : i32
    %c0_i32_0 = arith.constant 0 : i32
    return %c0_i32, %arg1 : i32, i32
  }
  func.func @transform_4(%arg0: i32, %arg1: i32, %arg2: i32) -> (i32, i32) {
    %c0_i32 = arith.constant 0 : i32
    return %arg0, %arg1 : i32, i32
  }
  func.func @transform_5(%arg0: i32, %arg1: i32, %arg2: i32) -> (i32, i32) {
    %c0_i32 = arith.constant 0 : i32
    return %arg0, %arg1 : i32, i32
  }
}

module attributes {stable_mosaic.version = 11 : i64} {
  func.func @_fused_mm_kernel(%arg0: i32, %arg1: i32, %arg2: i32, %arg3: memref<64x128xbf16, #tpu.memory_space<vmem>>, %arg4: memref<128x128xbf16, #tpu.memory_space<vmem>>, %arg5: memref<1x128xf32, #tpu.memory_space<vmem>>, %arg6: memref<1x128xf32, #tpu.memory_space<vmem>>, %arg7: memref<64x128xbf16, #tpu.memory_space<vmem>>, %arg8: memref<64x128xf32, #tpu.memory_space<vmem>>) attributes {dimension_semantics = [#tpu.dimension_semantics<parallel>, #tpu.dimension_semantics<parallel>, #tpu.dimension_semantics<arbitrary>], iteration_bounds = array<i64: 2, 1, 1>, scalar_prefetch = 0 : i64, scratch_operands = 1 : i64, tpu.core_type = #tpu.core_type<tc>, window_params = [{transform_indices = @transform_0, window_bounds = array<i64: 64, 128>}, {transform_indices = @transform_1, window_bounds = array<i64: 128, 128>}, {transform_indices = @transform_2, window_bounds = array<i64: 1, 128>}, {transform_indices = @transform_3, window_bounds = array<i64: 1, 128>}, {transform_indices = @transform_4, window_bounds = array<i64: 64, 128>}]} {
    %c0_i32 = arith.constant 0 : i32
    %0 = arith.cmpi eq, %arg2, %c0_i32 : i32
    %1 = arith.extui %0 : i1 to i32
    %c0_i32_0 = arith.constant 0 : i32
    %2 = arith.cmpi ne, %1, %c0_i32_0 : i32
    scf.if %2 {
      %cst_10 = arith.constant 0.000000e+00 : f32
      %12 = vector.broadcast %cst_10 : f32 to vector<64x128xf32>
      %c0_11 = arith.constant 0 : index
      %c0_12 = arith.constant 0 : index
      %13 = vector.load %arg8[%c0_11, %c0_12] : memref<64x128xf32, #tpu.memory_space<vmem>>, vector<64x128xf32>
      tpu.vector_store %arg8[%c0_11, %c0_12], %12 {strides = array<i32>} : memref<64x128xf32, #tpu.memory_space<vmem>>, vector<64x128xf32>,
    } else {
    }
    %c0 = arith.constant 0 : index
    %c0_1 = arith.constant 0 : index
    %3 = vector.load %arg8[%c0, %c0_1] : memref<64x128xf32, #tpu.memory_space<vmem>>, vector<64x128xf32>
    %c0_2 = arith.constant 0 : index
    %c0_3 = arith.constant 0 : index
    %4 = vector.load %arg3[%c0_2, %c0_3] : memref<64x128xbf16, #tpu.memory_space<vmem>>, vector<64x128xbf16>
    %c0_4 = arith.constant 0 : index
    %c0_5 = arith.constant 0 : index
    %5 = vector.load %arg4[%c0_4, %c0_5] : memref<128x128xbf16, #tpu.memory_space<vmem>>, vector<128x128xbf16>
    %cst = arith.constant dense<0.000000e+00> : vector<64x128xf32>
    %6 = tpu.matmul %4, %5, %cst {dimension_numbers = #tpu.dot_dimension_numbers<[1], [0], [0], [1], [0, 0, 1, 1], [], []>} : vector<64x128xbf16>, vector<128x128xbf16>, vector<64x128xf32> -> vector<64x128xf32>
    %7 = arith.addf %3, %6 : vector<64x128xf32>
    %c0_6 = arith.constant 0 : index
    %c0_7 = arith.constant 0 : index
    %8 = vector.load %arg8[%c0_6, %c0_7] : memref<64x128xf32, #tpu.memory_space<vmem>>, vector<64x128xf32>
    tpu.vector_store %arg8[%c0_6, %c0_7], %7 {strides = array<i32>} : memref<64x128xf32, #tpu.memory_space<vmem>>, vector<64x128xf32>,
    %c0_i32_8 = arith.constant 0 : i32
    %9 = arith.cmpi eq, %arg2, %c0_i32_8 : i32
    %10 = arith.extui %9 : i1 to i32
    %c0_i32_9 = arith.constant 0 : i32
    %11 = arith.cmpi ne, %10, %c0_i32_9 : i32
    scf.if %11 {
      %c0_10 = arith.constant 0 : index
      %c0_11 = arith.constant 0 : index
      %12 = vector.load %arg8[%c0_10, %c0_11] : memref<64x128xf32, #tpu.memory_space<vmem>>, vector<64x128xf32>
      %c0_12 = arith.constant 0 : index
      %c0_13 = arith.constant 0 : index
      %13 = vector.load %arg5[%c0_12, %c0_13] : memref<1x128xf32, #tpu.memory_space<vmem>>, vector<1x128xf32>
      %14 = vector.broadcast %13 : vector<1x128xf32> to vector<64x128xf32>
      %15 = arith.mulf %12, %14 : vector<64x128xf32>
      %c0_14 = arith.constant 0 : index
      %c0_15 = arith.constant 0 : index
      %16 = vector.load %arg6[%c0_14, %c0_15] : memref<1x128xf32, #tpu.memory_space<vmem>>, vector<1x128xf32>
      %17 = vector.broadcast %16 : vector<1x128xf32> to vector<64x128xf32>
      %18 = arith.addf %15, %17 : vector<64x128xf32>
      %cst_16 = arith.constant 0.000000e+00 : f32
      %19 = vector.broadcast %cst_16 : f32 to vector<64x128xf32>
      %20 = arith.maximumf %18, %19 : vector<64x128xf32>
      %21 = arith.truncf %20 : vector<64x128xf32> to vector<64x128xbf16>
      %c0_17 = arith.constant 0 : index
      %c0_18 = arith.constant 0 : index
      %22 = vector.load %arg7[%c0_17, %c0_18] : memref<64x128xbf16, #tpu.memory_space<vmem>>, vector<64x128xbf16>
      tpu.vector_store %arg7[%c0_17, %c0_18], %21 {strides = array<i32>} : memref<64x128xbf16, #tpu.memory_space<vmem>>, vector<64x128xbf16>,
    } else {
    }
    return
  }
  func.func @transform_0(%arg0: i32, %arg1: i32, %arg2: i32) -> (i32, i32) {
    %c0_i32 = arith.constant 0 : i32
    return %arg0, %arg2 : i32, i32
  }
  func.func @transform_1(%arg0: i32, %arg1: i32, %arg2: i32) -> (i32, i32) {
    %c0_i32 = arith.constant 0 : i32
    return %arg2, %arg1 : i32, i32
  }
  func.func @transform_2(%arg0: i32, %arg1: i32, %arg2: i32) -> (i32, i32) {
    %c0_i32 = arith.constant 0 : i32
    %c0_i32_0 = arith.constant 0 : i32
    return %c0_i32, %arg1 : i32, i32
  }
  func.func @transform_3(%arg0: i32, %arg1: i32, %arg2: i32) -> (i32, i32) {
    %c0_i32 = arith.constant 0 : i32
    %c0_i32_0 = arith.constant 0 : i32
    return %c0_i32, %arg1 : i32, i32
  }
  func.func @transform_4(%arg0: i32, %arg1: i32, %arg2: i32) -> (i32, i32) {
    %c0_i32 = arith.constant 0 : i32
    return %arg0, %arg1 : i32, i32
  }
}

module attributes {stable_mosaic.version = 11 : i64} {
  func.func @_fused_mm_kernel(%arg0: i32, %arg1: i32, %arg2: i32, %arg3: memref<16x128xbf16, #tpu.memory_space<vmem>>, %arg4: memref<128x128xbf16, #tpu.memory_space<vmem>>, %arg5: memref<1x128xf32, #tpu.memory_space<vmem>>, %arg6: memref<1x128xf32, #tpu.memory_space<vmem>>, %arg7: memref<16x128xbf16, #tpu.memory_space<vmem>>, %arg8: memref<16x128xf32, #tpu.memory_space<vmem>>) attributes {dimension_semantics = [#tpu.dimension_semantics<parallel>, #tpu.dimension_semantics<parallel>, #tpu.dimension_semantics<arbitrary>], iteration_bounds = array<i64: 2, 1, 5>, scalar_prefetch = 0 : i64, scratch_operands = 1 : i64, tpu.core_type = #tpu.core_type<tc>, window_params = [{transform_indices = @transform_0, window_bounds = array<i64: 16, 128>}, {transform_indices = @transform_1, window_bounds = array<i64: 128, 128>}, {transform_indices = @transform_2, window_bounds = array<i64: 1, 128>}, {transform_indices = @transform_3, window_bounds = array<i64: 1, 128>}, {transform_indices = @transform_4, window_bounds = array<i64: 16, 128>}]} {
    %c0_i32 = arith.constant 0 : i32
    %0 = arith.cmpi eq, %arg2, %c0_i32 : i32
    %1 = arith.extui %0 : i1 to i32
    %c0_i32_0 = arith.constant 0 : i32
    %2 = arith.cmpi ne, %1, %c0_i32_0 : i32
    scf.if %2 {
      %cst_9 = arith.constant 0.000000e+00 : f32
      %12 = vector.broadcast %cst_9 : f32 to vector<16x128xf32>
      %c0_10 = arith.constant 0 : index
      %c0_11 = arith.constant 0 : index
      %13 = vector.load %arg8[%c0_10, %c0_11] : memref<16x128xf32, #tpu.memory_space<vmem>>, vector<16x128xf32>
      tpu.vector_store %arg8[%c0_10, %c0_11], %12 {strides = array<i32>} : memref<16x128xf32, #tpu.memory_space<vmem>>, vector<16x128xf32>,
    } else {
    }
    %c0 = arith.constant 0 : index
    %c0_1 = arith.constant 0 : index
    %3 = vector.load %arg8[%c0, %c0_1] : memref<16x128xf32, #tpu.memory_space<vmem>>, vector<16x128xf32>
    %c0_2 = arith.constant 0 : index
    %c0_3 = arith.constant 0 : index
    %4 = vector.load %arg3[%c0_2, %c0_3] : memref<16x128xbf16, #tpu.memory_space<vmem>>, vector<16x128xbf16>
    %c0_4 = arith.constant 0 : index
    %c0_5 = arith.constant 0 : index
    %5 = vector.load %arg4[%c0_4, %c0_5] : memref<128x128xbf16, #tpu.memory_space<vmem>>, vector<128x128xbf16>
    %cst = arith.constant dense<0.000000e+00> : vector<16x128xf32>
    %6 = tpu.matmul %4, %5, %cst {dimension_numbers = #tpu.dot_dimension_numbers<[1], [0], [0], [1], [0, 0, 1, 1], [], []>} : vector<16x128xbf16>, vector<128x128xbf16>, vector<16x128xf32> -> vector<16x128xf32>
    %7 = arith.addf %3, %6 : vector<16x128xf32>
    %c0_6 = arith.constant 0 : index
    %c0_7 = arith.constant 0 : index
    %8 = vector.load %arg8[%c0_6, %c0_7] : memref<16x128xf32, #tpu.memory_space<vmem>>, vector<16x128xf32>
    tpu.vector_store %arg8[%c0_6, %c0_7], %7 {strides = array<i32>} : memref<16x128xf32, #tpu.memory_space<vmem>>, vector<16x128xf32>,
    %c4_i32 = arith.constant 4 : i32
    %9 = arith.cmpi eq, %arg2, %c4_i32 : i32
    %10 = arith.extui %9 : i1 to i32
    %c0_i32_8 = arith.constant 0 : i32
    %11 = arith.cmpi ne, %10, %c0_i32_8 : i32
    scf.if %11 {
      %c0_9 = arith.constant 0 : index
      %c0_10 = arith.constant 0 : index
      %12 = vector.load %arg8[%c0_9, %c0_10] : memref<16x128xf32, #tpu.memory_space<vmem>>, vector<16x128xf32>
      %c0_11 = arith.constant 0 : index
      %c0_12 = arith.constant 0 : index
      %13 = vector.load %arg5[%c0_11, %c0_12] : memref<1x128xf32, #tpu.memory_space<vmem>>, vector<1x128xf32>
      %14 = vector.broadcast %13 : vector<1x128xf32> to vector<16x128xf32>
      %15 = arith.mulf %12, %14 : vector<16x128xf32>
      %c0_13 = arith.constant 0 : index
      %c0_14 = arith.constant 0 : index
      %16 = vector.load %arg6[%c0_13, %c0_14] : memref<1x128xf32, #tpu.memory_space<vmem>>, vector<1x128xf32>
      %17 = vector.broadcast %16 : vector<1x128xf32> to vector<16x128xf32>
      %18 = arith.addf %15, %17 : vector<16x128xf32>
      %cst_15 = arith.constant 0.000000e+00 : f32
      %19 = vector.broadcast %cst_15 : f32 to vector<16x128xf32>
      %20 = arith.maximumf %18, %19 : vector<16x128xf32>
      %21 = arith.truncf %20 : vector<16x128xf32> to vector<16x128xbf16>
      %c0_16 = arith.constant 0 : index
      %c0_17 = arith.constant 0 : index
      %22 = vector.load %arg7[%c0_16, %c0_17] : memref<16x128xbf16, #tpu.memory_space<vmem>>, vector<16x128xbf16>
      tpu.vector_store %arg7[%c0_16, %c0_17], %21 {strides = array<i32>} : memref<16x128xbf16, #tpu.memory_space<vmem>>, vector<16x128xbf16>,
    } else {
    }
    return
  }
  func.func @transform_0(%arg0: i32, %arg1: i32, %arg2: i32) -> (i32, i32) {
    %c5_i32 = arith.constant 5 : i32
    %0 = arith.muli %arg1, %c5_i32 : i32
    %1 = arith.addi %0, %arg2 : i32
    %c0_i32 = arith.constant 0 : i32
    return %arg0, %1 : i32, i32
  }
  func.func @transform_1(%arg0: i32, %arg1: i32, %arg2: i32) -> (i32, i32) {
    %c5_i32 = arith.constant 5 : i32
    %0 = arith.muli %arg1, %c5_i32 : i32
    %1 = arith.addi %0, %arg2 : i32
    %c0_i32 = arith.constant 0 : i32
    %c0_i32_0 = arith.constant 0 : i32
    return %1, %c0_i32 : i32, i32
  }
  func.func @transform_2(%arg0: i32, %arg1: i32, %arg2: i32) -> (i32, i32) {
    %c0_i32 = arith.constant 0 : i32
    %c0_i32_0 = arith.constant 0 : i32
    return %c0_i32, %arg1 : i32, i32
  }
  func.func @transform_3(%arg0: i32, %arg1: i32, %arg2: i32) -> (i32, i32) {
    %c0_i32 = arith.constant 0 : i32
    %c0_i32_0 = arith.constant 0 : i32
    return %c0_i32, %arg1 : i32, i32
  }
  func.func @transform_4(%arg0: i32, %arg1: i32, %arg2: i32) -> (i32, i32) {
    %c0_i32 = arith.constant 0 : i32
    return %arg0, %arg1 : i32, i32
  }
}

module attributes {stable_mosaic.version = 11 : i64} {
  func.func @_fused_mm_kernel(%arg0: i32, %arg1: i32, %arg2: i32, %arg3: memref<16x128xbf16, #tpu.memory_space<vmem>>, %arg4: memref<128x256xbf16, #tpu.memory_space<vmem>>, %arg5: memref<1x256xf32, #tpu.memory_space<vmem>>, %arg6: memref<1x256xf32, #tpu.memory_space<vmem>>, %arg7: memref<16x256xbf16, #tpu.memory_space<vmem>>, %arg8: memref<16x256xf32, #tpu.memory_space<vmem>>) attributes {dimension_semantics = [#tpu.dimension_semantics<parallel>, #tpu.dimension_semantics<parallel>, #tpu.dimension_semantics<arbitrary>], iteration_bounds = array<i64: 2, 1, 1>, scalar_prefetch = 0 : i64, scratch_operands = 1 : i64, tpu.core_type = #tpu.core_type<tc>, window_params = [{transform_indices = @transform_0, window_bounds = array<i64: 16, 128>}, {transform_indices = @transform_1, window_bounds = array<i64: 128, 256>}, {transform_indices = @transform_2, window_bounds = array<i64: 1, 256>}, {transform_indices = @transform_3, window_bounds = array<i64: 1, 256>}, {transform_indices = @transform_4, window_bounds = array<i64: 16, 256>}]} {
    %c0_i32 = arith.constant 0 : i32
    %0 = arith.cmpi eq, %arg2, %c0_i32 : i32
    %1 = arith.extui %0 : i1 to i32
    %c0_i32_0 = arith.constant 0 : i32
    %2 = arith.cmpi ne, %1, %c0_i32_0 : i32
    scf.if %2 {
      %cst_10 = arith.constant 0.000000e+00 : f32
      %12 = vector.broadcast %cst_10 : f32 to vector<16x256xf32>
      %c0_11 = arith.constant 0 : index
      %c0_12 = arith.constant 0 : index
      %13 = vector.load %arg8[%c0_11, %c0_12] : memref<16x256xf32, #tpu.memory_space<vmem>>, vector<16x256xf32>
      tpu.vector_store %arg8[%c0_11, %c0_12], %12 {strides = array<i32>} : memref<16x256xf32, #tpu.memory_space<vmem>>, vector<16x256xf32>,
    } else {
    }
    %c0 = arith.constant 0 : index
    %c0_1 = arith.constant 0 : index
    %3 = vector.load %arg8[%c0, %c0_1] : memref<16x256xf32, #tpu.memory_space<vmem>>, vector<16x256xf32>
    %c0_2 = arith.constant 0 : index
    %c0_3 = arith.constant 0 : index
    %4 = vector.load %arg3[%c0_2, %c0_3] : memref<16x128xbf16, #tpu.memory_space<vmem>>, vector<16x128xbf16>
    %c0_4 = arith.constant 0 : index
    %c0_5 = arith.constant 0 : index
    %5 = vector.load %arg4[%c0_4, %c0_5] : memref<128x256xbf16, #tpu.memory_space<vmem>>, vector<128x256xbf16>
    %cst = arith.constant dense<0.000000e+00> : vector<16x256xf32>
    %6 = tpu.matmul %4, %5, %cst {dimension_numbers = #tpu.dot_dimension_numbers<[1], [0], [0], [1], [0, 0, 1, 1], [], []>} : vector<16x128xbf16>, vector<128x256xbf16>, vector<16x256xf32> -> vector<16x256xf32>
    %7 = arith.addf %3, %6 : vector<16x256xf32>
    %c0_6 = arith.constant 0 : index
    %c0_7 = arith.constant 0 : index
    %8 = vector.load %arg8[%c0_6, %c0_7] : memref<16x256xf32, #tpu.memory_space<vmem>>, vector<16x256xf32>
    tpu.vector_store %arg8[%c0_6, %c0_7], %7 {strides = array<i32>} : memref<16x256xf32, #tpu.memory_space<vmem>>, vector<16x256xf32>,
    %c0_i32_8 = arith.constant 0 : i32
    %9 = arith.cmpi eq, %arg2, %c0_i32_8 : i32
    %10 = arith.extui %9 : i1 to i32
    %c0_i32_9 = arith.constant 0 : i32
    %11 = arith.cmpi ne, %10, %c0_i32_9 : i32
    scf.if %11 {
      %c0_10 = arith.constant 0 : index
      %c0_11 = arith.constant 0 : index
      %12 = vector.load %arg8[%c0_10, %c0_11] : memref<16x256xf32, #tpu.memory_space<vmem>>, vector<16x256xf32>
      %c0_12 = arith.constant 0 : index
      %c0_13 = arith.constant 0 : index
      %13 = vector.load %arg5[%c0_12, %c0_13] : memref<1x256xf32, #tpu.memory_space<vmem>>, vector<1x256xf32>
      %14 = vector.broadcast %13 : vector<1x256xf32> to vector<16x256xf32>
      %15 = arith.mulf %12, %14 : vector<16x256xf32>
      %c0_14 = arith.constant 0 : index
      %c0_15 = arith.constant 0 : index
      %16 = vector.load %arg6[%c0_14, %c0_15] : memref<1x256xf32, #tpu.memory_space<vmem>>, vector<1x256xf32>
      %17 = vector.broadcast %16 : vector<1x256xf32> to vector<16x256xf32>
      %18 = arith.addf %15, %17 : vector<16x256xf32>
      %19 = arith.truncf %18 : vector<16x256xf32> to vector<16x256xbf16>
      %c0_16 = arith.constant 0 : index
      %c0_17 = arith.constant 0 : index
      %20 = vector.load %arg7[%c0_16, %c0_17] : memref<16x256xbf16, #tpu.memory_space<vmem>>, vector<16x256xbf16>
      tpu.vector_store %arg7[%c0_16, %c0_17], %19 {strides = array<i32>} : memref<16x256xbf16, #tpu.memory_space<vmem>>, vector<16x256xbf16>,
    } else {
    }
    return
  }
  func.func @transform_0(%arg0: i32, %arg1: i32, %arg2: i32) -> (i32, i32) {
    %c0_i32 = arith.constant 0 : i32
    return %arg0, %arg2 : i32, i32
  }
  func.func @transform_1(%arg0: i32, %arg1: i32, %arg2: i32) -> (i32, i32) {
    %c0_i32 = arith.constant 0 : i32
    return %arg2, %arg1 : i32, i32
  }
  func.func @transform_2(%arg0: i32, %arg1: i32, %arg2: i32) -> (i32, i32) {
    %c0_i32 = arith.constant 0 : i32
    %c0_i32_0 = arith.constant 0 : i32
    return %c0_i32, %arg1 : i32, i32
  }
  func.func @transform_3(%arg0: i32, %arg1: i32, %arg2: i32) -> (i32, i32) {
    %c0_i32 = arith.constant 0 : i32
    %c0_i32_0 = arith.constant 0 : i32
    return %c0_i32, %arg1 : i32, i32
  }
  func.func @transform_4(%arg0: i32, %arg1: i32, %arg2: i32) -> (i32, i32) {
    %c0_i32 = arith.constant 0 : i32
    return %arg0, %arg1 : i32, i32
  }
}

module attributes {stable_mosaic.version = 11 : i64} {
  func.func @_fused_mm_kernel(%arg0: i32, %arg1: i32, %arg2: i32, %arg3: memref<16x128xbf16, #tpu.memory_space<vmem>>, %arg4: memref<128x256xbf16, #tpu.memory_space<vmem>>, %arg5: memref<1x256xf32, #tpu.memory_space<vmem>>, %arg6: memref<1x256xf32, #tpu.memory_space<vmem>>, %arg7: memref<16x256xbf16, #tpu.memory_space<vmem>>, %arg8: memref<16x256xbf16, #tpu.memory_space<vmem>>, %arg9: memref<16x256xf32, #tpu.memory_space<vmem>>) attributes {dimension_semantics = [#tpu.dimension_semantics<parallel>, #tpu.dimension_semantics<parallel>, #tpu.dimension_semantics<arbitrary>], iteration_bounds = array<i64: 2, 1, 1>, scalar_prefetch = 0 : i64, scratch_operands = 1 : i64, tpu.core_type = #tpu.core_type<tc>, window_params = [{transform_indices = @transform_0, window_bounds = array<i64: 16, 128>}, {transform_indices = @transform_1, window_bounds = array<i64: 128, 256>}, {transform_indices = @transform_2, window_bounds = array<i64: 1, 256>}, {transform_indices = @transform_3, window_bounds = array<i64: 1, 256>}, {transform_indices = @transform_4, window_bounds = array<i64: 16, 256>}, {transform_indices = @transform_5, window_bounds = array<i64: 16, 256>}]} {
    %c0_i32 = arith.constant 0 : i32
    %0 = arith.cmpi eq, %arg2, %c0_i32 : i32
    %1 = arith.extui %0 : i1 to i32
    %c0_i32_0 = arith.constant 0 : i32
    %2 = arith.cmpi ne, %1, %c0_i32_0 : i32
    scf.if %2 {
      %cst_10 = arith.constant 0.000000e+00 : f32
      %12 = vector.broadcast %cst_10 : f32 to vector<16x256xf32>
      %c0_11 = arith.constant 0 : index
      %c0_12 = arith.constant 0 : index
      %13 = vector.load %arg9[%c0_11, %c0_12] : memref<16x256xf32, #tpu.memory_space<vmem>>, vector<16x256xf32>
      tpu.vector_store %arg9[%c0_11, %c0_12], %12 {strides = array<i32>} : memref<16x256xf32, #tpu.memory_space<vmem>>, vector<16x256xf32>,
    } else {
    }
    %c0 = arith.constant 0 : index
    %c0_1 = arith.constant 0 : index
    %3 = vector.load %arg9[%c0, %c0_1] : memref<16x256xf32, #tpu.memory_space<vmem>>, vector<16x256xf32>
    %c0_2 = arith.constant 0 : index
    %c0_3 = arith.constant 0 : index
    %4 = vector.load %arg3[%c0_2, %c0_3] : memref<16x128xbf16, #tpu.memory_space<vmem>>, vector<16x128xbf16>
    %c0_4 = arith.constant 0 : index
    %c0_5 = arith.constant 0 : index
    %5 = vector.load %arg4[%c0_4, %c0_5] : memref<128x256xbf16, #tpu.memory_space<vmem>>, vector<128x256xbf16>
    %cst = arith.constant dense<0.000000e+00> : vector<16x256xf32>
    %6 = tpu.matmul %4, %5, %cst {dimension_numbers = #tpu.dot_dimension_numbers<[1], [0], [0], [1], [0, 0, 1, 1], [], []>} : vector<16x128xbf16>, vector<128x256xbf16>, vector<16x256xf32> -> vector<16x256xf32>
    %7 = arith.addf %3, %6 : vector<16x256xf32>
    %c0_6 = arith.constant 0 : index
    %c0_7 = arith.constant 0 : index
    %8 = vector.load %arg9[%c0_6, %c0_7] : memref<16x256xf32, #tpu.memory_space<vmem>>, vector<16x256xf32>
    tpu.vector_store %arg9[%c0_6, %c0_7], %7 {strides = array<i32>} : memref<16x256xf32, #tpu.memory_space<vmem>>, vector<16x256xf32>,
    %c0_i32_8 = arith.constant 0 : i32
    %9 = arith.cmpi eq, %arg2, %c0_i32_8 : i32
    %10 = arith.extui %9 : i1 to i32
    %c0_i32_9 = arith.constant 0 : i32
    %11 = arith.cmpi ne, %10, %c0_i32_9 : i32
    scf.if %11 {
      %c0_10 = arith.constant 0 : index
      %c0_11 = arith.constant 0 : index
      %12 = vector.load %arg9[%c0_10, %c0_11] : memref<16x256xf32, #tpu.memory_space<vmem>>, vector<16x256xf32>
      %c0_12 = arith.constant 0 : index
      %c0_13 = arith.constant 0 : index
      %13 = vector.load %arg5[%c0_12, %c0_13] : memref<1x256xf32, #tpu.memory_space<vmem>>, vector<1x256xf32>
      %14 = vector.broadcast %13 : vector<1x256xf32> to vector<16x256xf32>
      %15 = arith.mulf %12, %14 : vector<16x256xf32>
      %c0_14 = arith.constant 0 : index
      %c0_15 = arith.constant 0 : index
      %16 = vector.load %arg6[%c0_14, %c0_15] : memref<1x256xf32, #tpu.memory_space<vmem>>, vector<1x256xf32>
      %17 = vector.broadcast %16 : vector<1x256xf32> to vector<16x256xf32>
      %18 = arith.addf %15, %17 : vector<16x256xf32>
      %c0_16 = arith.constant 0 : index
      %c0_17 = arith.constant 0 : index
      %19 = vector.load %arg7[%c0_16, %c0_17] : memref<16x256xbf16, #tpu.memory_space<vmem>>, vector<16x256xbf16>
      %20 = arith.extf %19 : vector<16x256xbf16> to vector<16x256xf32>
      %21 = arith.addf %18, %20 : vector<16x256xf32>
      %cst_18 = arith.constant 0.000000e+00 : f32
      %22 = vector.broadcast %cst_18 : f32 to vector<16x256xf32>
      %23 = arith.maximumf %21, %22 : vector<16x256xf32>
      %24 = arith.truncf %23 : vector<16x256xf32> to vector<16x256xbf16>
      %c0_19 = arith.constant 0 : index
      %c0_20 = arith.constant 0 : index
      %25 = vector.load %arg8[%c0_19, %c0_20] : memref<16x256xbf16, #tpu.memory_space<vmem>>, vector<16x256xbf16>
      tpu.vector_store %arg8[%c0_19, %c0_20], %24 {strides = array<i32>} : memref<16x256xbf16, #tpu.memory_space<vmem>>, vector<16x256xbf16>,
    } else {
    }
    return
  }
  func.func @transform_0(%arg0: i32, %arg1: i32, %arg2: i32) -> (i32, i32) {
    %c0_i32 = arith.constant 0 : i32
    return %arg0, %arg2 : i32, i32
  }
  func.func @transform_1(%arg0: i32, %arg1: i32, %arg2: i32) -> (i32, i32) {
    %c0_i32 = arith.constant 0 : i32
    return %arg2, %arg1 : i32, i32
  }
  func.func @transform_2(%arg0: i32, %arg1: i32, %arg2: i32) -> (i32, i32) {
    %c0_i32 = arith.constant 0 : i32
    %c0_i32_0 = arith.constant 0 : i32
    return %c0_i32, %arg1 : i32, i32
  }
  func.func @transform_3(%arg0: i32, %arg1: i32, %arg2: i32) -> (i32, i32) {
    %c0_i32 = arith.constant 0 : i32
    %c0_i32_0 = arith.constant 0 : i32
    return %c0_i32, %arg1 : i32, i32
  }
  func.func @transform_4(%arg0: i32, %arg1: i32, %arg2: i32) -> (i32, i32) {
    %c0_i32 = arith.constant 0 : i32
    return %arg0, %arg1 : i32, i32
  }
  func.func @transform_5(%arg0: i32, %arg1: i32, %arg2: i32) -> (i32, i32) {
    %c0_i32 = arith.constant 0 : i32
    return %arg0, %arg1 : i32, i32
  }
}

module attributes {stable_mosaic.version = 11 : i64} {
  func.func @_fused_mm_kernel(%arg0: i32, %arg1: i32, %arg2: i32, %arg3: memref<16x256xbf16, #tpu.memory_space<vmem>>, %arg4: memref<256x128xbf16, #tpu.memory_space<vmem>>, %arg5: memref<1x128xf32, #tpu.memory_space<vmem>>, %arg6: memref<1x128xf32, #tpu.memory_space<vmem>>, %arg7: memref<16x128xbf16, #tpu.memory_space<vmem>>, %arg8: memref<16x128xf32, #tpu.memory_space<vmem>>) attributes {dimension_semantics = [#tpu.dimension_semantics<parallel>, #tpu.dimension_semantics<parallel>, #tpu.dimension_semantics<arbitrary>], iteration_bounds = array<i64: 2, 1, 1>, scalar_prefetch = 0 : i64, scratch_operands = 1 : i64, tpu.core_type = #tpu.core_type<tc>, window_params = [{transform_indices = @transform_0, window_bounds = array<i64: 16, 256>}, {transform_indices = @transform_1, window_bounds = array<i64: 256, 128>}, {transform_indices = @transform_2, window_bounds = array<i64: 1, 128>}, {transform_indices = @transform_3, window_bounds = array<i64: 1, 128>}, {transform_indices = @transform_4, window_bounds = array<i64: 16, 128>}]} {
    %c0_i32 = arith.constant 0 : i32
    %0 = arith.cmpi eq, %arg2, %c0_i32 : i32
    %1 = arith.extui %0 : i1 to i32
    %c0_i32_0 = arith.constant 0 : i32
    %2 = arith.cmpi ne, %1, %c0_i32_0 : i32
    scf.if %2 {
      %cst_10 = arith.constant 0.000000e+00 : f32
      %12 = vector.broadcast %cst_10 : f32 to vector<16x128xf32>
      %c0_11 = arith.constant 0 : index
      %c0_12 = arith.constant 0 : index
      %13 = vector.load %arg8[%c0_11, %c0_12] : memref<16x128xf32, #tpu.memory_space<vmem>>, vector<16x128xf32>
      tpu.vector_store %arg8[%c0_11, %c0_12], %12 {strides = array<i32>} : memref<16x128xf32, #tpu.memory_space<vmem>>, vector<16x128xf32>,
    } else {
    }
    %c0 = arith.constant 0 : index
    %c0_1 = arith.constant 0 : index
    %3 = vector.load %arg8[%c0, %c0_1] : memref<16x128xf32, #tpu.memory_space<vmem>>, vector<16x128xf32>
    %c0_2 = arith.constant 0 : index
    %c0_3 = arith.constant 0 : index
    %4 = vector.load %arg3[%c0_2, %c0_3] : memref<16x256xbf16, #tpu.memory_space<vmem>>, vector<16x256xbf16>
    %c0_4 = arith.constant 0 : index
    %c0_5 = arith.constant 0 : index
    %5 = vector.load %arg4[%c0_4, %c0_5] : memref<256x128xbf16, #tpu.memory_space<vmem>>, vector<256x128xbf16>
    %cst = arith.constant dense<0.000000e+00> : vector<16x128xf32>
    %6 = tpu.matmul %4, %5, %cst {dimension_numbers = #tpu.dot_dimension_numbers<[1], [0], [0], [1], [0, 0, 1, 1], [], []>} : vector<16x256xbf16>, vector<256x128xbf16>, vector<16x128xf32> -> vector<16x128xf32>
    %7 = arith.addf %3, %6 : vector<16x128xf32>
    %c0_6 = arith.constant 0 : index
    %c0_7 = arith.constant 0 : index
    %8 = vector.load %arg8[%c0_6, %c0_7] : memref<16x128xf32, #tpu.memory_space<vmem>>, vector<16x128xf32>
    tpu.vector_store %arg8[%c0_6, %c0_7], %7 {strides = array<i32>} : memref<16x128xf32, #tpu.memory_space<vmem>>, vector<16x128xf32>,
    %c0_i32_8 = arith.constant 0 : i32
    %9 = arith.cmpi eq, %arg2, %c0_i32_8 : i32
    %10 = arith.extui %9 : i1 to i32
    %c0_i32_9 = arith.constant 0 : i32
    %11 = arith.cmpi ne, %10, %c0_i32_9 : i32
    scf.if %11 {
      %c0_10 = arith.constant 0 : index
      %c0_11 = arith.constant 0 : index
      %12 = vector.load %arg8[%c0_10, %c0_11] : memref<16x128xf32, #tpu.memory_space<vmem>>, vector<16x128xf32>
      %c0_12 = arith.constant 0 : index
      %c0_13 = arith.constant 0 : index
      %13 = vector.load %arg5[%c0_12, %c0_13] : memref<1x128xf32, #tpu.memory_space<vmem>>, vector<1x128xf32>
      %14 = vector.broadcast %13 : vector<1x128xf32> to vector<16x128xf32>
      %15 = arith.mulf %12, %14 : vector<16x128xf32>
      %c0_14 = arith.constant 0 : index
      %c0_15 = arith.constant 0 : index
      %16 = vector.load %arg6[%c0_14, %c0_15] : memref<1x128xf32, #tpu.memory_space<vmem>>, vector<1x128xf32>
      %17 = vector.broadcast %16 : vector<1x128xf32> to vector<16x128xf32>
      %18 = arith.addf %15, %17 : vector<16x128xf32>
      %cst_16 = arith.constant 0.000000e+00 : f32
      %19 = vector.broadcast %cst_16 : f32 to vector<16x128xf32>
      %20 = arith.maximumf %18, %19 : vector<16x128xf32>
      %21 = arith.truncf %20 : vector<16x128xf32> to vector<16x128xbf16>
      %c0_17 = arith.constant 0 : index
      %c0_18 = arith.constant 0 : index
      %22 = vector.load %arg7[%c0_17, %c0_18] : memref<16x128xbf16, #tpu.memory_space<vmem>>, vector<16x128xbf16>
      tpu.vector_store %arg7[%c0_17, %c0_18], %21 {strides = array<i32>} : memref<16x128xbf16, #tpu.memory_space<vmem>>, vector<16x128xbf16>,
    } else {
    }
    return
  }
  func.func @transform_0(%arg0: i32, %arg1: i32, %arg2: i32) -> (i32, i32) {
    %c0_i32 = arith.constant 0 : i32
    return %arg0, %arg2 : i32, i32
  }
  func.func @transform_1(%arg0: i32, %arg1: i32, %arg2: i32) -> (i32, i32) {
    %c0_i32 = arith.constant 0 : i32
    return %arg2, %arg1 : i32, i32
  }
  func.func @transform_2(%arg0: i32, %arg1: i32, %arg2: i32) -> (i32, i32) {
    %c0_i32 = arith.constant 0 : i32
    %c0_i32_0 = arith.constant 0 : i32
    return %c0_i32, %arg1 : i32, i32
  }
  func.func @transform_3(%arg0: i32, %arg1: i32, %arg2: i32) -> (i32, i32) {
    %c0_i32 = arith.constant 0 : i32
    %c0_i32_0 = arith.constant 0 : i32
    return %c0_i32, %arg1 : i32, i32
  }
  func.func @transform_4(%arg0: i32, %arg1: i32, %arg2: i32) -> (i32, i32) {
    %c0_i32 = arith.constant 0 : i32
    return %arg0, %arg1 : i32, i32
  }
}

module attributes {stable_mosaic.version = 11 : i64} {
  func.func @_fused_mm_kernel(%arg0: i32, %arg1: i32, %arg2: i32, %arg3: memref<16x256xbf16, #tpu.memory_space<vmem>>, %arg4: memref<256x128xbf16, #tpu.memory_space<vmem>>, %arg5: memref<1x128xf32, #tpu.memory_space<vmem>>, %arg6: memref<1x128xf32, #tpu.memory_space<vmem>>, %arg7: memref<16x128xbf16, #tpu.memory_space<vmem>>, %arg8: memref<16x128xf32, #tpu.memory_space<vmem>>) attributes {dimension_semantics = [#tpu.dimension_semantics<parallel>, #tpu.dimension_semantics<parallel>, #tpu.dimension_semantics<arbitrary>], iteration_bounds = array<i64: 2, 1, 1>, scalar_prefetch = 0 : i64, scratch_operands = 1 : i64, tpu.core_type = #tpu.core_type<tc>, window_params = [{transform_indices = @transform_0, window_bounds = array<i64: 16, 256>}, {transform_indices = @transform_1, window_bounds = array<i64: 256, 128>}, {transform_indices = @transform_2, window_bounds = array<i64: 1, 128>}, {transform_indices = @transform_3, window_bounds = array<i64: 1, 128>}, {transform_indices = @transform_4, window_bounds = array<i64: 16, 128>}]} {
    %c0_i32 = arith.constant 0 : i32
    %0 = arith.cmpi eq, %arg2, %c0_i32 : i32
    %1 = arith.extui %0 : i1 to i32
    %c0_i32_0 = arith.constant 0 : i32
    %2 = arith.cmpi ne, %1, %c0_i32_0 : i32
    scf.if %2 {
      %cst_10 = arith.constant 0.000000e+00 : f32
      %12 = vector.broadcast %cst_10 : f32 to vector<16x128xf32>
      %c0_11 = arith.constant 0 : index
      %c0_12 = arith.constant 0 : index
      %13 = vector.load %arg8[%c0_11, %c0_12] : memref<16x128xf32, #tpu.memory_space<vmem>>, vector<16x128xf32>
      tpu.vector_store %arg8[%c0_11, %c0_12], %12 {strides = array<i32>} : memref<16x128xf32, #tpu.memory_space<vmem>>, vector<16x128xf32>,
    } else {
    }
    %c0 = arith.constant 0 : index
    %c0_1 = arith.constant 0 : index
    %3 = vector.load %arg8[%c0, %c0_1] : memref<16x128xf32, #tpu.memory_space<vmem>>, vector<16x128xf32>
    %c0_2 = arith.constant 0 : index
    %c0_3 = arith.constant 0 : index
    %4 = vector.load %arg3[%c0_2, %c0_3] : memref<16x256xbf16, #tpu.memory_space<vmem>>, vector<16x256xbf16>
    %c0_4 = arith.constant 0 : index
    %c0_5 = arith.constant 0 : index
    %5 = vector.load %arg4[%c0_4, %c0_5] : memref<256x128xbf16, #tpu.memory_space<vmem>>, vector<256x128xbf16>
    %cst = arith.constant dense<0.000000e+00> : vector<16x128xf32>
    %6 = tpu.matmul %4, %5, %cst {dimension_numbers = #tpu.dot_dimension_numbers<[1], [0], [0], [1], [0, 0, 1, 1], [], []>} : vector<16x256xbf16>, vector<256x128xbf16>, vector<16x128xf32> -> vector<16x128xf32>
    %7 = arith.addf %3, %6 : vector<16x128xf32>
    %c0_6 = arith.constant 0 : index
    %c0_7 = arith.constant 0 : index
    %8 = vector.load %arg8[%c0_6, %c0_7] : memref<16x128xf32, #tpu.memory_space<vmem>>, vector<16x128xf32>
    tpu.vector_store %arg8[%c0_6, %c0_7], %7 {strides = array<i32>} : memref<16x128xf32, #tpu.memory_space<vmem>>, vector<16x128xf32>,
    %c0_i32_8 = arith.constant 0 : i32
    %9 = arith.cmpi eq, %arg2, %c0_i32_8 : i32
    %10 = arith.extui %9 : i1 to i32
    %c0_i32_9 = arith.constant 0 : i32
    %11 = arith.cmpi ne, %10, %c0_i32_9 : i32
    scf.if %11 {
      %c0_10 = arith.constant 0 : index
      %c0_11 = arith.constant 0 : index
      %12 = vector.load %arg8[%c0_10, %c0_11] : memref<16x128xf32, #tpu.memory_space<vmem>>, vector<16x128xf32>
      %c0_12 = arith.constant 0 : index
      %c0_13 = arith.constant 0 : index
      %13 = vector.load %arg5[%c0_12, %c0_13] : memref<1x128xf32, #tpu.memory_space<vmem>>, vector<1x128xf32>
      %14 = vector.broadcast %13 : vector<1x128xf32> to vector<16x128xf32>
      %15 = arith.mulf %12, %14 : vector<16x128xf32>
      %c0_14 = arith.constant 0 : index
      %c0_15 = arith.constant 0 : index
      %16 = vector.load %arg6[%c0_14, %c0_15] : memref<1x128xf32, #tpu.memory_space<vmem>>, vector<1x128xf32>
      %17 = vector.broadcast %16 : vector<1x128xf32> to vector<16x128xf32>
      %18 = arith.addf %15, %17 : vector<16x128xf32>
      %cst_16 = arith.constant 0.000000e+00 : f32
      %19 = vector.broadcast %cst_16 : f32 to vector<16x128xf32>
      %20 = arith.maximumf %18, %19 : vector<16x128xf32>
      %21 = arith.truncf %20 : vector<16x128xf32> to vector<16x128xbf16>
      %c0_17 = arith.constant 0 : index
      %c0_18 = arith.constant 0 : index
      %22 = vector.load %arg7[%c0_17, %c0_18] : memref<16x128xbf16, #tpu.memory_space<vmem>>, vector<16x128xbf16>
      tpu.vector_store %arg7[%c0_17, %c0_18], %21 {strides = array<i32>} : memref<16x128xbf16, #tpu.memory_space<vmem>>, vector<16x128xbf16>,
    } else {
    }
    return
  }
  func.func @transform_0(%arg0: i32, %arg1: i32, %arg2: i32) -> (i32, i32) {
    %c0_i32 = arith.constant 0 : i32
    return %arg0, %arg2 : i32, i32
  }
  func.func @transform_1(%arg0: i32, %arg1: i32, %arg2: i32) -> (i32, i32) {
    %c0_i32 = arith.constant 0 : i32
    return %arg2, %arg1 : i32, i32
  }
  func.func @transform_2(%arg0: i32, %arg1: i32, %arg2: i32) -> (i32, i32) {
    %c0_i32 = arith.constant 0 : i32
    %c0_i32_0 = arith.constant 0 : i32
    return %c0_i32, %arg1 : i32, i32
  }
  func.func @transform_3(%arg0: i32, %arg1: i32, %arg2: i32) -> (i32, i32) {
    %c0_i32 = arith.constant 0 : i32
    %c0_i32_0 = arith.constant 0 : i32
    return %c0_i32, %arg1 : i32, i32
  }
  func.func @transform_4(%arg0: i32, %arg1: i32, %arg2: i32) -> (i32, i32) {
    %c0_i32 = arith.constant 0 : i32
    return %arg0, %arg1 : i32, i32
  }
}

module attributes {stable_mosaic.version = 11 : i64} {
  func.func @_fused_mm_kernel(%arg0: i32, %arg1: i32, %arg2: i32, %arg3: memref<8x384xbf16, #tpu.memory_space<vmem>>, %arg4: memref<384x128xbf16, #tpu.memory_space<vmem>>, %arg5: memref<1x128xf32, #tpu.memory_space<vmem>>, %arg6: memref<1x128xf32, #tpu.memory_space<vmem>>, %arg7: memref<8x128xbf16, #tpu.memory_space<vmem>>, %arg8: memref<8x128xf32, #tpu.memory_space<vmem>>) attributes {dimension_semantics = [#tpu.dimension_semantics<parallel>, #tpu.dimension_semantics<parallel>, #tpu.dimension_semantics<arbitrary>], iteration_bounds = array<i64: 1, 1, 3>, scalar_prefetch = 0 : i64, scratch_operands = 1 : i64, tpu.core_type = #tpu.core_type<tc>, window_params = [{transform_indices = @transform_0, window_bounds = array<i64: 8, 384>}, {transform_indices = @transform_1, window_bounds = array<i64: 384, 128>}, {transform_indices = @transform_2, window_bounds = array<i64: 1, 128>}, {transform_indices = @transform_3, window_bounds = array<i64: 1, 128>}, {transform_indices = @transform_4, window_bounds = array<i64: 8, 128>}]} {
    %c0_i32 = arith.constant 0 : i32
    %0 = arith.cmpi eq, %arg2, %c0_i32 : i32
    %1 = arith.extui %0 : i1 to i32
    %c0_i32_0 = arith.constant 0 : i32
    %2 = arith.cmpi ne, %1, %c0_i32_0 : i32
    scf.if %2 {
      %cst_9 = arith.constant 0.000000e+00 : f32
      %12 = vector.broadcast %cst_9 : f32 to vector<8x128xf32>
      %c0_10 = arith.constant 0 : index
      %c0_11 = arith.constant 0 : index
      %13 = vector.load %arg8[%c0_10, %c0_11] : memref<8x128xf32, #tpu.memory_space<vmem>>, vector<8x128xf32>
      tpu.vector_store %arg8[%c0_10, %c0_11], %12 {strides = array<i32>} : memref<8x128xf32, #tpu.memory_space<vmem>>, vector<8x128xf32>,
    } else {
    }
    %c0 = arith.constant 0 : index
    %c0_1 = arith.constant 0 : index
    %3 = vector.load %arg8[%c0, %c0_1] : memref<8x128xf32, #tpu.memory_space<vmem>>, vector<8x128xf32>
    %c0_2 = arith.constant 0 : index
    %c0_3 = arith.constant 0 : index
    %4 = vector.load %arg3[%c0_2, %c0_3] : memref<8x384xbf16, #tpu.memory_space<vmem>>, vector<8x384xbf16>
    %c0_4 = arith.constant 0 : index
    %c0_5 = arith.constant 0 : index
    %5 = vector.load %arg4[%c0_4, %c0_5] : memref<384x128xbf16, #tpu.memory_space<vmem>>, vector<384x128xbf16>
    %cst = arith.constant dense<0.000000e+00> : vector<8x128xf32>
    %6 = tpu.matmul %4, %5, %cst {dimension_numbers = #tpu.dot_dimension_numbers<[1], [0], [0], [1], [0, 0, 1, 1], [], []>} : vector<8x384xbf16>, vector<384x128xbf16>, vector<8x128xf32> -> vector<8x128xf32>
    %7 = arith.addf %3, %6 : vector<8x128xf32>
    %c0_6 = arith.constant 0 : index
    %c0_7 = arith.constant 0 : index
    %8 = vector.load %arg8[%c0_6, %c0_7] : memref<8x128xf32, #tpu.memory_space<vmem>>, vector<8x128xf32>
    tpu.vector_store %arg8[%c0_6, %c0_7], %7 {strides = array<i32>} : memref<8x128xf32, #tpu.memory_space<vmem>>, vector<8x128xf32>,
    %c2_i32 = arith.constant 2 : i32
    %9 = arith.cmpi eq, %arg2, %c2_i32 : i32
    %10 = arith.extui %9 : i1 to i32
    %c0_i32_8 = arith.constant 0 : i32
    %11 = arith.cmpi ne, %10, %c0_i32_8 : i32
    scf.if %11 {
      %c0_9 = arith.constant 0 : index
      %c0_10 = arith.constant 0 : index
      %12 = vector.load %arg8[%c0_9, %c0_10] : memref<8x128xf32, #tpu.memory_space<vmem>>, vector<8x128xf32>
      %c0_11 = arith.constant 0 : index
      %c0_12 = arith.constant 0 : index
      %13 = vector.load %arg5[%c0_11, %c0_12] : memref<1x128xf32, #tpu.memory_space<vmem>>, vector<1x128xf32>
      %14 = vector.broadcast %13 : vector<1x128xf32> to vector<8x128xf32>
      %15 = arith.mulf %12, %14 : vector<8x128xf32>
      %c0_13 = arith.constant 0 : index
      %c0_14 = arith.constant 0 : index
      %16 = vector.load %arg6[%c0_13, %c0_14] : memref<1x128xf32, #tpu.memory_space<vmem>>, vector<1x128xf32>
      %17 = vector.broadcast %16 : vector<1x128xf32> to vector<8x128xf32>
      %18 = arith.addf %15, %17 : vector<8x128xf32>
      %cst_15 = arith.constant 0.000000e+00 : f32
      %19 = vector.broadcast %cst_15 : f32 to vector<8x128xf32>
      %20 = arith.maximumf %18, %19 : vector<8x128xf32>
      %21 = arith.truncf %20 : vector<8x128xf32> to vector<8x128xbf16>
      %c0_16 = arith.constant 0 : index
      %c0_17 = arith.constant 0 : index
      %22 = vector.load %arg7[%c0_16, %c0_17] : memref<8x128xbf16, #tpu.memory_space<vmem>>, vector<8x128xbf16>
      tpu.vector_store %arg7[%c0_16, %c0_17], %21 {strides = array<i32>} : memref<8x128xbf16, #tpu.memory_space<vmem>>, vector<8x128xbf16>,
    } else {
    }
    return
  }
  func.func @transform_0(%arg0: i32, %arg1: i32, %arg2: i32) -> (i32, i32) {
    %c3_i32 = arith.constant 3 : i32
    %0 = arith.muli %arg1, %c3_i32 : i32
    %1 = arith.addi %0, %arg2 : i32
    %c0_i32 = arith.constant 0 : i32
    return %arg0, %1 : i32, i32
  }
  func.func @transform_1(%arg0: i32, %arg1: i32, %arg2: i32) -> (i32, i32) {
    %c3_i32 = arith.constant 3 : i32
    %0 = arith.muli %arg1, %c3_i32 : i32
    %1 = arith.addi %0, %arg2 : i32
    %c0_i32 = arith.constant 0 : i32
    %c0_i32_0 = arith.constant 0 : i32
    return %1, %c0_i32 : i32, i32
  }
  func.func @transform_2(%arg0: i32, %arg1: i32, %arg2: i32) -> (i32, i32) {
    %c0_i32 = arith.constant 0 : i32
    %c0_i32_0 = arith.constant 0 : i32
    return %c0_i32, %arg1 : i32, i32
  }
  func.func @transform_3(%arg0: i32, %arg1: i32, %arg2: i32) -> (i32, i32) {
    %c0_i32 = arith.constant 0 : i32
    %c0_i32_0 = arith.constant 0 : i32
    return %c0_i32, %arg1 : i32, i32
  }
  func.func @transform_4(%arg0: i32, %arg1: i32, %arg2: i32) -> (i32, i32) {
    %c0_i32 = arith.constant 0 : i32
    return %arg0, %arg1 : i32, i32
  }
}

module attributes {stable_mosaic.version = 11 : i64} {
  func.func @_fused_mm_kernel(%arg0: i32, %arg1: i32, %arg2: i32, %arg3: memref<8x128xbf16, #tpu.memory_space<vmem>>, %arg4: memref<128x256xbf16, #tpu.memory_space<vmem>>, %arg5: memref<1x256xf32, #tpu.memory_space<vmem>>, %arg6: memref<1x256xf32, #tpu.memory_space<vmem>>, %arg7: memref<8x256xbf16, #tpu.memory_space<vmem>>, %arg8: memref<8x256xbf16, #tpu.memory_space<vmem>>, %arg9: memref<8x256xf32, #tpu.memory_space<vmem>>) attributes {dimension_semantics = [#tpu.dimension_semantics<parallel>, #tpu.dimension_semantics<parallel>, #tpu.dimension_semantics<arbitrary>], iteration_bounds = array<i64: 1, 2, 1>, scalar_prefetch = 0 : i64, scratch_operands = 1 : i64, tpu.core_type = #tpu.core_type<tc>, window_params = [{transform_indices = @transform_0, window_bounds = array<i64: 8, 128>}, {transform_indices = @transform_1, window_bounds = array<i64: 128, 256>}, {transform_indices = @transform_2, window_bounds = array<i64: 1, 256>}, {transform_indices = @transform_3, window_bounds = array<i64: 1, 256>}, {transform_indices = @transform_4, window_bounds = array<i64: 8, 256>}, {transform_indices = @transform_5, window_bounds = array<i64: 8, 256>}]} {
    %c0_i32 = arith.constant 0 : i32
    %0 = arith.cmpi eq, %arg2, %c0_i32 : i32
    %1 = arith.extui %0 : i1 to i32
    %c0_i32_0 = arith.constant 0 : i32
    %2 = arith.cmpi ne, %1, %c0_i32_0 : i32
    scf.if %2 {
      %cst_10 = arith.constant 0.000000e+00 : f32
      %12 = vector.broadcast %cst_10 : f32 to vector<8x256xf32>
      %c0_11 = arith.constant 0 : index
      %c0_12 = arith.constant 0 : index
      %13 = vector.load %arg9[%c0_11, %c0_12] : memref<8x256xf32, #tpu.memory_space<vmem>>, vector<8x256xf32>
      tpu.vector_store %arg9[%c0_11, %c0_12], %12 {strides = array<i32>} : memref<8x256xf32, #tpu.memory_space<vmem>>, vector<8x256xf32>,
    } else {
    }
    %c0 = arith.constant 0 : index
    %c0_1 = arith.constant 0 : index
    %3 = vector.load %arg9[%c0, %c0_1] : memref<8x256xf32, #tpu.memory_space<vmem>>, vector<8x256xf32>
    %c0_2 = arith.constant 0 : index
    %c0_3 = arith.constant 0 : index
    %4 = vector.load %arg3[%c0_2, %c0_3] : memref<8x128xbf16, #tpu.memory_space<vmem>>, vector<8x128xbf16>
    %c0_4 = arith.constant 0 : index
    %c0_5 = arith.constant 0 : index
    %5 = vector.load %arg4[%c0_4, %c0_5] : memref<128x256xbf16, #tpu.memory_space<vmem>>, vector<128x256xbf16>
    %cst = arith.constant dense<0.000000e+00> : vector<8x256xf32>
    %6 = tpu.matmul %4, %5, %cst {dimension_numbers = #tpu.dot_dimension_numbers<[1], [0], [0], [1], [0, 0, 1, 1], [], []>} : vector<8x128xbf16>, vector<128x256xbf16>, vector<8x256xf32> -> vector<8x256xf32>
    %7 = arith.addf %3, %6 : vector<8x256xf32>
    %c0_6 = arith.constant 0 : index
    %c0_7 = arith.constant 0 : index
    %8 = vector.load %arg9[%c0_6, %c0_7] : memref<8x256xf32, #tpu.memory_space<vmem>>, vector<8x256xf32>
    tpu.vector_store %arg9[%c0_6, %c0_7], %7 {strides = array<i32>} : memref<8x256xf32, #tpu.memory_space<vmem>>, vector<8x256xf32>,
    %c0_i32_8 = arith.constant 0 : i32
    %9 = arith.cmpi eq, %arg2, %c0_i32_8 : i32
    %10 = arith.extui %9 : i1 to i32
    %c0_i32_9 = arith.constant 0 : i32
    %11 = arith.cmpi ne, %10, %c0_i32_9 : i32
    scf.if %11 {
      %c0_10 = arith.constant 0 : index
      %c0_11 = arith.constant 0 : index
      %12 = vector.load %arg9[%c0_10, %c0_11] : memref<8x256xf32, #tpu.memory_space<vmem>>, vector<8x256xf32>
      %c0_12 = arith.constant 0 : index
      %c0_13 = arith.constant 0 : index
      %13 = vector.load %arg5[%c0_12, %c0_13] : memref<1x256xf32, #tpu.memory_space<vmem>>, vector<1x256xf32>
      %14 = vector.broadcast %13 : vector<1x256xf32> to vector<8x256xf32>
      %15 = arith.mulf %12, %14 : vector<8x256xf32>
      %c0_14 = arith.constant 0 : index
      %c0_15 = arith.constant 0 : index
      %16 = vector.load %arg6[%c0_14, %c0_15] : memref<1x256xf32, #tpu.memory_space<vmem>>, vector<1x256xf32>
      %17 = vector.broadcast %16 : vector<1x256xf32> to vector<8x256xf32>
      %18 = arith.addf %15, %17 : vector<8x256xf32>
      %c0_16 = arith.constant 0 : index
      %c0_17 = arith.constant 0 : index
      %19 = vector.load %arg7[%c0_16, %c0_17] : memref<8x256xbf16, #tpu.memory_space<vmem>>, vector<8x256xbf16>
      %20 = arith.extf %19 : vector<8x256xbf16> to vector<8x256xf32>
      %21 = arith.addf %18, %20 : vector<8x256xf32>
      %cst_18 = arith.constant 0.000000e+00 : f32
      %22 = vector.broadcast %cst_18 : f32 to vector<8x256xf32>
      %23 = arith.maximumf %21, %22 : vector<8x256xf32>
      %24 = arith.truncf %23 : vector<8x256xf32> to vector<8x256xbf16>
      %c0_19 = arith.constant 0 : index
      %c0_20 = arith.constant 0 : index
      %25 = vector.load %arg8[%c0_19, %c0_20] : memref<8x256xbf16, #tpu.memory_space<vmem>>, vector<8x256xbf16>
      tpu.vector_store %arg8[%c0_19, %c0_20], %24 {strides = array<i32>} : memref<8x256xbf16, #tpu.memory_space<vmem>>, vector<8x256xbf16>,
    } else {
    }
    return
  }
  func.func @transform_0(%arg0: i32, %arg1: i32, %arg2: i32) -> (i32, i32) {
    %c0_i32 = arith.constant 0 : i32
    return %arg0, %arg2 : i32, i32
  }
  func.func @transform_1(%arg0: i32, %arg1: i32, %arg2: i32) -> (i32, i32) {
    %c0_i32 = arith.constant 0 : i32
    return %arg2, %arg1 : i32, i32
  }
  func.func @transform_2(%arg0: i32, %arg1: i32, %arg2: i32) -> (i32, i32) {
    %c0_i32 = arith.constant 0 : i32
    %c0_i32_0 = arith.constant 0 : i32
    return %c0_i32, %arg1 : i32, i32
  }
  func.func @transform_3(%arg0: i32, %arg1: i32, %arg2: i32) -> (i32, i32) {
    %c0_i32 = arith.constant 0 : i32
    %c0_i32_0 = arith.constant 0 : i32
    return %c0_i32, %arg1 : i32, i32
  }
  func.func @transform_4(%arg0: i32, %arg1: i32, %arg2: i32) -> (i32, i32) {
    %c0_i32 = arith.constant 0 : i32
    return %arg0, %arg1 : i32, i32
  }
  func.func @transform_5(%arg0: i32, %arg1: i32, %arg2: i32) -> (i32, i32) {
    %c0_i32 = arith.constant 0 : i32
    return %arg0, %arg1 : i32, i32
  }
}

module attributes {stable_mosaic.version = 11 : i64} {
  func.func @_fused_mm_kernel(%arg0: i32, %arg1: i32, %arg2: i32, %arg3: memref<8x256xbf16, #tpu.memory_space<vmem>>, %arg4: memref<256x256xbf16, #tpu.memory_space<vmem>>, %arg5: memref<1x256xf32, #tpu.memory_space<vmem>>, %arg6: memref<1x256xf32, #tpu.memory_space<vmem>>, %arg7: memref<8x256xbf16, #tpu.memory_space<vmem>>, %arg8: memref<8x256xf32, #tpu.memory_space<vmem>>) attributes {dimension_semantics = [#tpu.dimension_semantics<parallel>, #tpu.dimension_semantics<parallel>, #tpu.dimension_semantics<arbitrary>], iteration_bounds = array<i64: 1, 2, 1>, scalar_prefetch = 0 : i64, scratch_operands = 1 : i64, tpu.core_type = #tpu.core_type<tc>, window_params = [{transform_indices = @transform_0, window_bounds = array<i64: 8, 256>}, {transform_indices = @transform_1, window_bounds = array<i64: 256, 256>}, {transform_indices = @transform_2, window_bounds = array<i64: 1, 256>}, {transform_indices = @transform_3, window_bounds = array<i64: 1, 256>}, {transform_indices = @transform_4, window_bounds = array<i64: 8, 256>}]} {
    %c0_i32 = arith.constant 0 : i32
    %0 = arith.cmpi eq, %arg2, %c0_i32 : i32
    %1 = arith.extui %0 : i1 to i32
    %c0_i32_0 = arith.constant 0 : i32
    %2 = arith.cmpi ne, %1, %c0_i32_0 : i32
    scf.if %2 {
      %cst_10 = arith.constant 0.000000e+00 : f32
      %12 = vector.broadcast %cst_10 : f32 to vector<8x256xf32>
      %c0_11 = arith.constant 0 : index
      %c0_12 = arith.constant 0 : index
      %13 = vector.load %arg8[%c0_11, %c0_12] : memref<8x256xf32, #tpu.memory_space<vmem>>, vector<8x256xf32>
      tpu.vector_store %arg8[%c0_11, %c0_12], %12 {strides = array<i32>} : memref<8x256xf32, #tpu.memory_space<vmem>>, vector<8x256xf32>,
    } else {
    }
    %c0 = arith.constant 0 : index
    %c0_1 = arith.constant 0 : index
    %3 = vector.load %arg8[%c0, %c0_1] : memref<8x256xf32, #tpu.memory_space<vmem>>, vector<8x256xf32>
    %c0_2 = arith.constant 0 : index
    %c0_3 = arith.constant 0 : index
    %4 = vector.load %arg3[%c0_2, %c0_3] : memref<8x256xbf16, #tpu.memory_space<vmem>>, vector<8x256xbf16>
    %c0_4 = arith.constant 0 : index
    %c0_5 = arith.constant 0 : index
    %5 = vector.load %arg4[%c0_4, %c0_5] : memref<256x256xbf16, #tpu.memory_space<vmem>>, vector<256x256xbf16>
    %cst = arith.constant dense<0.000000e+00> : vector<8x256xf32>
    %6 = tpu.matmul %4, %5, %cst {dimension_numbers = #tpu.dot_dimension_numbers<[1], [0], [0], [1], [0, 0, 1, 1], [], []>} : vector<8x256xbf16>, vector<256x256xbf16>, vector<8x256xf32> -> vector<8x256xf32>
    %7 = arith.addf %3, %6 : vector<8x256xf32>
    %c0_6 = arith.constant 0 : index
    %c0_7 = arith.constant 0 : index
    %8 = vector.load %arg8[%c0_6, %c0_7] : memref<8x256xf32, #tpu.memory_space<vmem>>, vector<8x256xf32>
    tpu.vector_store %arg8[%c0_6, %c0_7], %7 {strides = array<i32>} : memref<8x256xf32, #tpu.memory_space<vmem>>, vector<8x256xf32>,
    %c0_i32_8 = arith.constant 0 : i32
    %9 = arith.cmpi eq, %arg2, %c0_i32_8 : i32
    %10 = arith.extui %9 : i1 to i32
    %c0_i32_9 = arith.constant 0 : i32
    %11 = arith.cmpi ne, %10, %c0_i32_9 : i32
    scf.if %11 {
      %c0_10 = arith.constant 0 : index
      %c0_11 = arith.constant 0 : index
      %12 = vector.load %arg8[%c0_10, %c0_11] : memref<8x256xf32, #tpu.memory_space<vmem>>, vector<8x256xf32>
      %c0_12 = arith.constant 0 : index
      %c0_13 = arith.constant 0 : index
      %13 = vector.load %arg5[%c0_12, %c0_13] : memref<1x256xf32, #tpu.memory_space<vmem>>, vector<1x256xf32>
      %14 = vector.broadcast %13 : vector<1x256xf32> to vector<8x256xf32>
      %15 = arith.mulf %12, %14 : vector<8x256xf32>
      %c0_14 = arith.constant 0 : index
      %c0_15 = arith.constant 0 : index
      %16 = vector.load %arg6[%c0_14, %c0_15] : memref<1x256xf32, #tpu.memory_space<vmem>>, vector<1x256xf32>
      %17 = vector.broadcast %16 : vector<1x256xf32> to vector<8x256xf32>
      %18 = arith.addf %15, %17 : vector<8x256xf32>
      %19 = arith.truncf %18 : vector<8x256xf32> to vector<8x256xbf16>
      %c0_16 = arith.constant 0 : index
      %c0_17 = arith.constant 0 : index
      %20 = vector.load %arg7[%c0_16, %c0_17] : memref<8x256xbf16, #tpu.memory_space<vmem>>, vector<8x256xbf16>
      tpu.vector_store %arg7[%c0_16, %c0_17], %19 {strides = array<i32>} : memref<8x256xbf16, #tpu.memory_space<vmem>>, vector<8x256xbf16>,
    } else {
    }
    return
  }
  func.func @transform_0(%arg0: i32, %arg1: i32, %arg2: i32) -> (i32, i32) {
    %c0_i32 = arith.constant 0 : i32
    return %arg0, %arg2 : i32, i32
  }
  func.func @transform_1(%arg0: i32, %arg1: i32, %arg2: i32) -> (i32, i32) {
    %c0_i32 = arith.constant 0 : i32
    return %arg2, %arg1 : i32, i32
  }
  func.func @transform_2(%arg0: i32, %arg1: i32, %arg2: i32) -> (i32, i32) {
    %c0_i32 = arith.constant 0 : i32
    %c0_i32_0 = arith.constant 0 : i32
    return %c0_i32, %arg1 : i32, i32
  }
  func.func @transform_3(%arg0: i32, %arg1: i32, %arg2: i32) -> (i32, i32) {
    %c0_i32 = arith.constant 0 : i32
    %c0_i32_0 = arith.constant 0 : i32
    return %c0_i32, %arg1 : i32, i32
  }
  func.func @transform_4(%arg0: i32, %arg1: i32, %arg2: i32) -> (i32, i32) {
    %c0_i32 = arith.constant 0 : i32
    return %arg0, %arg1 : i32, i32
  }
}

module attributes {stable_mosaic.version = 11 : i64} {
  func.func @_fused_mm_kernel(%arg0: i32, %arg1: i32, %arg2: i32, %arg3: memref<8x512xbf16, #tpu.memory_space<vmem>>, %arg4: memref<512x128xbf16, #tpu.memory_space<vmem>>, %arg5: memref<1x128xf32, #tpu.memory_space<vmem>>, %arg6: memref<1x128xf32, #tpu.memory_space<vmem>>, %arg7: memref<8x128xbf16, #tpu.memory_space<vmem>>, %arg8: memref<8x128xf32, #tpu.memory_space<vmem>>) attributes {dimension_semantics = [#tpu.dimension_semantics<parallel>, #tpu.dimension_semantics<parallel>, #tpu.dimension_semantics<arbitrary>], iteration_bounds = array<i64: 1, 2, 1>, scalar_prefetch = 0 : i64, scratch_operands = 1 : i64, tpu.core_type = #tpu.core_type<tc>, window_params = [{transform_indices = @transform_0, window_bounds = array<i64: 8, 512>}, {transform_indices = @transform_1, window_bounds = array<i64: 512, 128>}, {transform_indices = @transform_2, window_bounds = array<i64: 1, 128>}, {transform_indices = @transform_3, window_bounds = array<i64: 1, 128>}, {transform_indices = @transform_4, window_bounds = array<i64: 8, 128>}]} {
    %c0_i32 = arith.constant 0 : i32
    %0 = arith.cmpi eq, %arg2, %c0_i32 : i32
    %1 = arith.extui %0 : i1 to i32
    %c0_i32_0 = arith.constant 0 : i32
    %2 = arith.cmpi ne, %1, %c0_i32_0 : i32
    scf.if %2 {
      %cst_10 = arith.constant 0.000000e+00 : f32
      %12 = vector.broadcast %cst_10 : f32 to vector<8x128xf32>
      %c0_11 = arith.constant 0 : index
      %c0_12 = arith.constant 0 : index
      %13 = vector.load %arg8[%c0_11, %c0_12] : memref<8x128xf32, #tpu.memory_space<vmem>>, vector<8x128xf32>
      tpu.vector_store %arg8[%c0_11, %c0_12], %12 {strides = array<i32>} : memref<8x128xf32, #tpu.memory_space<vmem>>, vector<8x128xf32>,
    } else {
    }
    %c0 = arith.constant 0 : index
    %c0_1 = arith.constant 0 : index
    %3 = vector.load %arg8[%c0, %c0_1] : memref<8x128xf32, #tpu.memory_space<vmem>>, vector<8x128xf32>
    %c0_2 = arith.constant 0 : index
    %c0_3 = arith.constant 0 : index
    %4 = vector.load %arg3[%c0_2, %c0_3] : memref<8x512xbf16, #tpu.memory_space<vmem>>, vector<8x512xbf16>
    %c0_4 = arith.constant 0 : index
    %c0_5 = arith.constant 0 : index
    %5 = vector.load %arg4[%c0_4, %c0_5] : memref<512x128xbf16, #tpu.memory_space<vmem>>, vector<512x128xbf16>
    %cst = arith.constant dense<0.000000e+00> : vector<8x128xf32>
    %6 = tpu.matmul %4, %5, %cst {dimension_numbers = #tpu.dot_dimension_numbers<[1], [0], [0], [1], [0, 0, 1, 1], [], []>} : vector<8x512xbf16>, vector<512x128xbf16>, vector<8x128xf32> -> vector<8x128xf32>
    %7 = arith.addf %3, %6 : vector<8x128xf32>
    %c0_6 = arith.constant 0 : index
    %c0_7 = arith.constant 0 : index
    %8 = vector.load %arg8[%c0_6, %c0_7] : memref<8x128xf32, #tpu.memory_space<vmem>>, vector<8x128xf32>
    tpu.vector_store %arg8[%c0_6, %c0_7], %7 {strides = array<i32>} : memref<8x128xf32, #tpu.memory_space<vmem>>, vector<8x128xf32>,
    %c0_i32_8 = arith.constant 0 : i32
    %9 = arith.cmpi eq, %arg2, %c0_i32_8 : i32
    %10 = arith.extui %9 : i1 to i32
    %c0_i32_9 = arith.constant 0 : i32
    %11 = arith.cmpi ne, %10, %c0_i32_9 : i32
    scf.if %11 {
      %c0_10 = arith.constant 0 : index
      %c0_11 = arith.constant 0 : index
      %12 = vector.load %arg8[%c0_10, %c0_11] : memref<8x128xf32, #tpu.memory_space<vmem>>, vector<8x128xf32>
      %c0_12 = arith.constant 0 : index
      %c0_13 = arith.constant 0 : index
      %13 = vector.load %arg5[%c0_12, %c0_13] : memref<1x128xf32, #tpu.memory_space<vmem>>, vector<1x128xf32>
      %14 = vector.broadcast %13 : vector<1x128xf32> to vector<8x128xf32>
      %15 = arith.mulf %12, %14 : vector<8x128xf32>
      %c0_14 = arith.constant 0 : index
      %c0_15 = arith.constant 0 : index
      %16 = vector.load %arg6[%c0_14, %c0_15] : memref<1x128xf32, #tpu.memory_space<vmem>>, vector<1x128xf32>
      %17 = vector.broadcast %16 : vector<1x128xf32> to vector<8x128xf32>
      %18 = arith.addf %15, %17 : vector<8x128xf32>
      %cst_16 = arith.constant 0.000000e+00 : f32
      %19 = vector.broadcast %cst_16 : f32 to vector<8x128xf32>
      %20 = arith.maximumf %18, %19 : vector<8x128xf32>
      %21 = arith.truncf %20 : vector<8x128xf32> to vector<8x128xbf16>
      %c0_17 = arith.constant 0 : index
      %c0_18 = arith.constant 0 : index
      %22 = vector.load %arg7[%c0_17, %c0_18] : memref<8x128xbf16, #tpu.memory_space<vmem>>, vector<8x128xbf16>
      tpu.vector_store %arg7[%c0_17, %c0_18], %21 {strides = array<i32>} : memref<8x128xbf16, #tpu.memory_space<vmem>>, vector<8x128xbf16>,
    } else {
    }
    return
  }
  func.func @transform_0(%arg0: i32, %arg1: i32, %arg2: i32) -> (i32, i32) {
    %c0_i32 = arith.constant 0 : i32
    return %arg0, %arg2 : i32, i32
  }
  func.func @transform_1(%arg0: i32, %arg1: i32, %arg2: i32) -> (i32, i32) {
    %c0_i32 = arith.constant 0 : i32
    return %arg2, %arg1 : i32, i32
  }
  func.func @transform_2(%arg0: i32, %arg1: i32, %arg2: i32) -> (i32, i32) {
    %c0_i32 = arith.constant 0 : i32
    %c0_i32_0 = arith.constant 0 : i32
    return %c0_i32, %arg1 : i32, i32
  }
  func.func @transform_3(%arg0: i32, %arg1: i32, %arg2: i32) -> (i32, i32) {
    %c0_i32 = arith.constant 0 : i32
    %c0_i32_0 = arith.constant 0 : i32
    return %c0_i32, %arg1 : i32, i32
  }
  func.func @transform_4(%arg0: i32, %arg1: i32, %arg2: i32) -> (i32, i32) {
    %c0_i32 = arith.constant 0 : i32
    return %arg0, %arg1 : i32, i32
  }
}

module attributes {stable_mosaic.version = 11 : i64} {
  func.func @_fused_mm_kernel(%arg0: i32, %arg1: i32, %arg2: i32, %arg3: memref<8x384xbf16, #tpu.memory_space<vmem>>, %arg4: memref<384x128xbf16, #tpu.memory_space<vmem>>, %arg5: memref<1x128xf32, #tpu.memory_space<vmem>>, %arg6: memref<1x128xf32, #tpu.memory_space<vmem>>, %arg7: memref<8x128xbf16, #tpu.memory_space<vmem>>, %arg8: memref<8x128xf32, #tpu.memory_space<vmem>>) attributes {dimension_semantics = [#tpu.dimension_semantics<parallel>, #tpu.dimension_semantics<parallel>, #tpu.dimension_semantics<arbitrary>], iteration_bounds = array<i64: 1, 2, 3>, scalar_prefetch = 0 : i64, scratch_operands = 1 : i64, tpu.core_type = #tpu.core_type<tc>, window_params = [{transform_indices = @transform_0, window_bounds = array<i64: 8, 384>}, {transform_indices = @transform_1, window_bounds = array<i64: 384, 128>}, {transform_indices = @transform_2, window_bounds = array<i64: 1, 128>}, {transform_indices = @transform_3, window_bounds = array<i64: 1, 128>}, {transform_indices = @transform_4, window_bounds = array<i64: 8, 128>}]} {
    %c0_i32 = arith.constant 0 : i32
    %0 = arith.cmpi eq, %arg2, %c0_i32 : i32
    %1 = arith.extui %0 : i1 to i32
    %c0_i32_0 = arith.constant 0 : i32
    %2 = arith.cmpi ne, %1, %c0_i32_0 : i32
    scf.if %2 {
      %cst_9 = arith.constant 0.000000e+00 : f32
      %12 = vector.broadcast %cst_9 : f32 to vector<8x128xf32>
      %c0_10 = arith.constant 0 : index
      %c0_11 = arith.constant 0 : index
      %13 = vector.load %arg8[%c0_10, %c0_11] : memref<8x128xf32, #tpu.memory_space<vmem>>, vector<8x128xf32>
      tpu.vector_store %arg8[%c0_10, %c0_11], %12 {strides = array<i32>} : memref<8x128xf32, #tpu.memory_space<vmem>>, vector<8x128xf32>,
    } else {
    }
    %c0 = arith.constant 0 : index
    %c0_1 = arith.constant 0 : index
    %3 = vector.load %arg8[%c0, %c0_1] : memref<8x128xf32, #tpu.memory_space<vmem>>, vector<8x128xf32>
    %c0_2 = arith.constant 0 : index
    %c0_3 = arith.constant 0 : index
    %4 = vector.load %arg3[%c0_2, %c0_3] : memref<8x384xbf16, #tpu.memory_space<vmem>>, vector<8x384xbf16>
    %c0_4 = arith.constant 0 : index
    %c0_5 = arith.constant 0 : index
    %5 = vector.load %arg4[%c0_4, %c0_5] : memref<384x128xbf16, #tpu.memory_space<vmem>>, vector<384x128xbf16>
    %cst = arith.constant dense<0.000000e+00> : vector<8x128xf32>
    %6 = tpu.matmul %4, %5, %cst {dimension_numbers = #tpu.dot_dimension_numbers<[1], [0], [0], [1], [0, 0, 1, 1], [], []>} : vector<8x384xbf16>, vector<384x128xbf16>, vector<8x128xf32> -> vector<8x128xf32>
    %7 = arith.addf %3, %6 : vector<8x128xf32>
    %c0_6 = arith.constant 0 : index
    %c0_7 = arith.constant 0 : index
    %8 = vector.load %arg8[%c0_6, %c0_7] : memref<8x128xf32, #tpu.memory_space<vmem>>, vector<8x128xf32>
    tpu.vector_store %arg8[%c0_6, %c0_7], %7 {strides = array<i32>} : memref<8x128xf32, #tpu.memory_space<vmem>>, vector<8x128xf32>,
    %c2_i32 = arith.constant 2 : i32
    %9 = arith.cmpi eq, %arg2, %c2_i32 : i32
    %10 = arith.extui %9 : i1 to i32
    %c0_i32_8 = arith.constant 0 : i32
    %11 = arith.cmpi ne, %10, %c0_i32_8 : i32
    scf.if %11 {
      %c0_9 = arith.constant 0 : index
      %c0_10 = arith.constant 0 : index
      %12 = vector.load %arg8[%c0_9, %c0_10] : memref<8x128xf32, #tpu.memory_space<vmem>>, vector<8x128xf32>
      %c0_11 = arith.constant 0 : index
      %c0_12 = arith.constant 0 : index
      %13 = vector.load %arg5[%c0_11, %c0_12] : memref<1x128xf32, #tpu.memory_space<vmem>>, vector<1x128xf32>
      %14 = vector.broadcast %13 : vector<1x128xf32> to vector<8x128xf32>
      %15 = arith.mulf %12, %14 : vector<8x128xf32>
      %c0_13 = arith.constant 0 : index
      %c0_14 = arith.constant 0 : index
      %16 = vector.load %arg6[%c0_13, %c0_14] : memref<1x128xf32, #tpu.memory_space<vmem>>, vector<1x128xf32>
      %17 = vector.broadcast %16 : vector<1x128xf32> to vector<8x128xf32>
      %18 = arith.addf %15, %17 : vector<8x128xf32>
      %cst_15 = arith.constant 0.000000e+00 : f32
      %19 = vector.broadcast %cst_15 : f32 to vector<8x128xf32>
      %20 = arith.maximumf %18, %19 : vector<8x128xf32>
      %21 = arith.truncf %20 : vector<8x128xf32> to vector<8x128xbf16>
      %c0_16 = arith.constant 0 : index
      %c0_17 = arith.constant 0 : index
      %22 = vector.load %arg7[%c0_16, %c0_17] : memref<8x128xbf16, #tpu.memory_space<vmem>>, vector<8x128xbf16>
      tpu.vector_store %arg7[%c0_16, %c0_17], %21 {strides = array<i32>} : memref<8x128xbf16, #tpu.memory_space<vmem>>, vector<8x128xbf16>,
    } else {
    }
    return
  }
  func.func @transform_0(%arg0: i32, %arg1: i32, %arg2: i32) -> (i32, i32) {
    %c3_i32 = arith.constant 3 : i32
    %0 = arith.muli %arg1, %c3_i32 : i32
    %1 = arith.addi %0, %arg2 : i32
    %c0_i32 = arith.constant 0 : i32
    return %arg0, %1 : i32, i32
  }
  func.func @transform_1(%arg0: i32, %arg1: i32, %arg2: i32) -> (i32, i32) {
    %c3_i32 = arith.constant 3 : i32
    %0 = arith.muli %arg1, %c3_i32 : i32
    %1 = arith.addi %0, %arg2 : i32
    %c0_i32 = arith.constant 0 : i32
    %c0_i32_0 = arith.constant 0 : i32
    return %1, %c0_i32 : i32, i32
  }
  func.func @transform_2(%arg0: i32, %arg1: i32, %arg2: i32) -> (i32, i32) {
    %c0_i32 = arith.constant 0 : i32
    %c0_i32_0 = arith.constant 0 : i32
    return %c0_i32, %arg1 : i32, i32
  }
  func.func @transform_3(%arg0: i32, %arg1: i32, %arg2: i32) -> (i32, i32) {
    %c0_i32 = arith.constant 0 : i32
    %c0_i32_0 = arith.constant 0 : i32
    return %c0_i32, %arg1 : i32, i32
  }
  func.func @transform_4(%arg0: i32, %arg1: i32, %arg2: i32) -> (i32, i32) {
    %c0_i32 = arith.constant 0 : i32
    return %arg0, %arg1 : i32, i32
  }
}

module attributes {stable_mosaic.version = 11 : i64} {
  func.func @_fused_mm_kernel(%arg0: i32, %arg1: i32, %arg2: i32, %arg3: memref<8x512xbf16, #tpu.memory_space<vmem>>, %arg4: memref<512x512xbf16, #tpu.memory_space<vmem>>, %arg5: memref<1x512xf32, #tpu.memory_space<vmem>>, %arg6: memref<1x512xf32, #tpu.memory_space<vmem>>, %arg7: memref<8x512xbf16, #tpu.memory_space<vmem>>, %arg8: memref<8x512xf32, #tpu.memory_space<vmem>>) attributes {dimension_semantics = [#tpu.dimension_semantics<parallel>, #tpu.dimension_semantics<parallel>, #tpu.dimension_semantics<arbitrary>], iteration_bounds = array<i64: 1, 2, 1>, scalar_prefetch = 0 : i64, scratch_operands = 1 : i64, tpu.core_type = #tpu.core_type<tc>, window_params = [{transform_indices = @transform_0, window_bounds = array<i64: 8, 512>}, {transform_indices = @transform_1, window_bounds = array<i64: 512, 512>}, {transform_indices = @transform_2, window_bounds = array<i64: 1, 512>}, {transform_indices = @transform_3, window_bounds = array<i64: 1, 512>}, {transform_indices = @transform_4, window_bounds = array<i64: 8, 512>}]} {
    %c0_i32 = arith.constant 0 : i32
    %0 = arith.cmpi eq, %arg2, %c0_i32 : i32
    %1 = arith.extui %0 : i1 to i32
    %c0_i32_0 = arith.constant 0 : i32
    %2 = arith.cmpi ne, %1, %c0_i32_0 : i32
    scf.if %2 {
      %cst_10 = arith.constant 0.000000e+00 : f32
      %12 = vector.broadcast %cst_10 : f32 to vector<8x512xf32>
      %c0_11 = arith.constant 0 : index
      %c0_12 = arith.constant 0 : index
      %13 = vector.load %arg8[%c0_11, %c0_12] : memref<8x512xf32, #tpu.memory_space<vmem>>, vector<8x512xf32>
      tpu.vector_store %arg8[%c0_11, %c0_12], %12 {strides = array<i32>} : memref<8x512xf32, #tpu.memory_space<vmem>>, vector<8x512xf32>,
    } else {
    }
    %c0 = arith.constant 0 : index
    %c0_1 = arith.constant 0 : index
    %3 = vector.load %arg8[%c0, %c0_1] : memref<8x512xf32, #tpu.memory_space<vmem>>, vector<8x512xf32>
    %c0_2 = arith.constant 0 : index
    %c0_3 = arith.constant 0 : index
    %4 = vector.load %arg3[%c0_2, %c0_3] : memref<8x512xbf16, #tpu.memory_space<vmem>>, vector<8x512xbf16>
    %c0_4 = arith.constant 0 : index
    %c0_5 = arith.constant 0 : index
    %5 = vector.load %arg4[%c0_4, %c0_5] : memref<512x512xbf16, #tpu.memory_space<vmem>>, vector<512x512xbf16>
    %cst = arith.constant dense<0.000000e+00> : vector<8x512xf32>
    %6 = tpu.matmul %4, %5, %cst {dimension_numbers = #tpu.dot_dimension_numbers<[1], [0], [0], [1], [0, 0, 1, 1], [], []>} : vector<8x512xbf16>, vector<512x512xbf16>, vector<8x512xf32> -> vector<8x512xf32>
    %7 = arith.addf %3, %6 : vector<8x512xf32>
    %c0_6 = arith.constant 0 : index
    %c0_7 = arith.constant 0 : index
    %8 = vector.load %arg8[%c0_6, %c0_7] : memref<8x512xf32, #tpu.memory_space<vmem>>, vector<8x512xf32>
    tpu.vector_store %arg8[%c0_6, %c0_7], %7 {strides = array<i32>} : memref<8x512xf32, #tpu.memory_space<vmem>>, vector<8x512xf32>,
    %c0_i32_8 = arith.constant 0 : i32
    %9 = arith.cmpi eq, %arg2, %c0_i32_8 : i32
    %10 = arith.extui %9 : i1 to i32
    %c0_i32_9 = arith.constant 0 : i32
    %11 = arith.cmpi ne, %10, %c0_i32_9 : i32
    scf.if %11 {
      %c0_10 = arith.constant 0 : index
      %c0_11 = arith.constant 0 : index
      %12 = vector.load %arg8[%c0_10, %c0_11] : memref<8x512xf32, #tpu.memory_space<vmem>>, vector<8x512xf32>
      %c0_12 = arith.constant 0 : index
      %c0_13 = arith.constant 0 : index
      %13 = vector.load %arg5[%c0_12, %c0_13] : memref<1x512xf32, #tpu.memory_space<vmem>>, vector<1x512xf32>
      %14 = vector.broadcast %13 : vector<1x512xf32> to vector<8x512xf32>
      %15 = arith.mulf %12, %14 : vector<8x512xf32>
      %c0_14 = arith.constant 0 : index
      %c0_15 = arith.constant 0 : index
      %16 = vector.load %arg6[%c0_14, %c0_15] : memref<1x512xf32, #tpu.memory_space<vmem>>, vector<1x512xf32>
      %17 = vector.broadcast %16 : vector<1x512xf32> to vector<8x512xf32>
      %18 = arith.addf %15, %17 : vector<8x512xf32>
      %19 = arith.truncf %18 : vector<8x512xf32> to vector<8x512xbf16>
      %c0_16 = arith.constant 0 : index
      %c0_17 = arith.constant 0 : index
      %20 = vector.load %arg7[%c0_16, %c0_17] : memref<8x512xbf16, #tpu.memory_space<vmem>>, vector<8x512xbf16>
      tpu.vector_store %arg7[%c0_16, %c0_17], %19 {strides = array<i32>} : memref<8x512xbf16, #tpu.memory_space<vmem>>, vector<8x512xbf16>,
    } else {
    }
    return
  }
  func.func @transform_0(%arg0: i32, %arg1: i32, %arg2: i32) -> (i32, i32) {
    %c0_i32 = arith.constant 0 : i32
    return %arg0, %arg2 : i32, i32
  }
  func.func @transform_1(%arg0: i32, %arg1: i32, %arg2: i32) -> (i32, i32) {
    %c0_i32 = arith.constant 0 : i32
    return %arg2, %arg1 : i32, i32
  }
  func.func @transform_2(%arg0: i32, %arg1: i32, %arg2: i32) -> (i32, i32) {
    %c0_i32 = arith.constant 0 : i32
    %c0_i32_0 = arith.constant 0 : i32
    return %c0_i32, %arg1 : i32, i32
  }
  func.func @transform_3(%arg0: i32, %arg1: i32, %arg2: i32) -> (i32, i32) {
    %c0_i32 = arith.constant 0 : i32
    %c0_i32_0 = arith.constant 0 : i32
    return %c0_i32, %arg1 : i32, i32
  }
  func.func @transform_4(%arg0: i32, %arg1: i32, %arg2: i32) -> (i32, i32) {
    %c0_i32 = arith.constant 0 : i32
    return %arg0, %arg1 : i32, i32
  }
}

module attributes {stable_mosaic.version = 11 : i64} {
  func.func @_fused_mm_kernel(%arg0: i32, %arg1: i32, %arg2: i32, %arg3: memref<8x256xbf16, #tpu.memory_space<vmem>>, %arg4: memref<256x512xbf16, #tpu.memory_space<vmem>>, %arg5: memref<1x512xf32, #tpu.memory_space<vmem>>, %arg6: memref<1x512xf32, #tpu.memory_space<vmem>>, %arg7: memref<8x512xbf16, #tpu.memory_space<vmem>>, %arg8: memref<8x512xbf16, #tpu.memory_space<vmem>>, %arg9: memref<8x512xf32, #tpu.memory_space<vmem>>) attributes {dimension_semantics = [#tpu.dimension_semantics<parallel>, #tpu.dimension_semantics<parallel>, #tpu.dimension_semantics<arbitrary>], iteration_bounds = array<i64: 1, 2, 1>, scalar_prefetch = 0 : i64, scratch_operands = 1 : i64, tpu.core_type = #tpu.core_type<tc>, window_params = [{transform_indices = @transform_0, window_bounds = array<i64: 8, 256>}, {transform_indices = @transform_1, window_bounds = array<i64: 256, 512>}, {transform_indices = @transform_2, window_bounds = array<i64: 1, 512>}, {transform_indices = @transform_3, window_bounds = array<i64: 1, 512>}, {transform_indices = @transform_4, window_bounds = array<i64: 8, 512>}, {transform_indices = @transform_5, window_bounds = array<i64: 8, 512>}]} {
    %c0_i32 = arith.constant 0 : i32
    %0 = arith.cmpi eq, %arg2, %c0_i32 : i32
    %1 = arith.extui %0 : i1 to i32
    %c0_i32_0 = arith.constant 0 : i32
    %2 = arith.cmpi ne, %1, %c0_i32_0 : i32
    scf.if %2 {
      %cst_10 = arith.constant 0.000000e+00 : f32
      %12 = vector.broadcast %cst_10 : f32 to vector<8x512xf32>
      %c0_11 = arith.constant 0 : index
      %c0_12 = arith.constant 0 : index
      %13 = vector.load %arg9[%c0_11, %c0_12] : memref<8x512xf32, #tpu.memory_space<vmem>>, vector<8x512xf32>
      tpu.vector_store %arg9[%c0_11, %c0_12], %12 {strides = array<i32>} : memref<8x512xf32, #tpu.memory_space<vmem>>, vector<8x512xf32>,
    } else {
    }
    %c0 = arith.constant 0 : index
    %c0_1 = arith.constant 0 : index
    %3 = vector.load %arg9[%c0, %c0_1] : memref<8x512xf32, #tpu.memory_space<vmem>>, vector<8x512xf32>
    %c0_2 = arith.constant 0 : index
    %c0_3 = arith.constant 0 : index
    %4 = vector.load %arg3[%c0_2, %c0_3] : memref<8x256xbf16, #tpu.memory_space<vmem>>, vector<8x256xbf16>
    %c0_4 = arith.constant 0 : index
    %c0_5 = arith.constant 0 : index
    %5 = vector.load %arg4[%c0_4, %c0_5] : memref<256x512xbf16, #tpu.memory_space<vmem>>, vector<256x512xbf16>
    %cst = arith.constant dense<0.000000e+00> : vector<8x512xf32>
    %6 = tpu.matmul %4, %5, %cst {dimension_numbers = #tpu.dot_dimension_numbers<[1], [0], [0], [1], [0, 0, 1, 1], [], []>} : vector<8x256xbf16>, vector<256x512xbf16>, vector<8x512xf32> -> vector<8x512xf32>
    %7 = arith.addf %3, %6 : vector<8x512xf32>
    %c0_6 = arith.constant 0 : index
    %c0_7 = arith.constant 0 : index
    %8 = vector.load %arg9[%c0_6, %c0_7] : memref<8x512xf32, #tpu.memory_space<vmem>>, vector<8x512xf32>
    tpu.vector_store %arg9[%c0_6, %c0_7], %7 {strides = array<i32>} : memref<8x512xf32, #tpu.memory_space<vmem>>, vector<8x512xf32>,
    %c0_i32_8 = arith.constant 0 : i32
    %9 = arith.cmpi eq, %arg2, %c0_i32_8 : i32
    %10 = arith.extui %9 : i1 to i32
    %c0_i32_9 = arith.constant 0 : i32
    %11 = arith.cmpi ne, %10, %c0_i32_9 : i32
    scf.if %11 {
      %c0_10 = arith.constant 0 : index
      %c0_11 = arith.constant 0 : index
      %12 = vector.load %arg9[%c0_10, %c0_11] : memref<8x512xf32, #tpu.memory_space<vmem>>, vector<8x512xf32>
      %c0_12 = arith.constant 0 : index
      %c0_13 = arith.constant 0 : index
      %13 = vector.load %arg5[%c0_12, %c0_13] : memref<1x512xf32, #tpu.memory_space<vmem>>, vector<1x512xf32>
      %14 = vector.broadcast %13 : vector<1x512xf32> to vector<8x512xf32>
      %15 = arith.mulf %12, %14 : vector<8x512xf32>
      %c0_14 = arith.constant 0 : index
      %c0_15 = arith.constant 0 : index
      %16 = vector.load %arg6[%c0_14, %c0_15] : memref<1x512xf32, #tpu.memory_space<vmem>>, vector<1x512xf32>
      %17 = vector.broadcast %16 : vector<1x512xf32> to vector<8x512xf32>
      %18 = arith.addf %15, %17 : vector<8x512xf32>
      %c0_16 = arith.constant 0 : index
      %c0_17 = arith.constant 0 : index
      %19 = vector.load %arg7[%c0_16, %c0_17] : memref<8x512xbf16, #tpu.memory_space<vmem>>, vector<8x512xbf16>
      %20 = arith.extf %19 : vector<8x512xbf16> to vector<8x512xf32>
      %21 = arith.addf %18, %20 : vector<8x512xf32>
      %cst_18 = arith.constant 0.000000e+00 : f32
      %22 = vector.broadcast %cst_18 : f32 to vector<8x512xf32>
      %23 = arith.maximumf %21, %22 : vector<8x512xf32>
      %24 = arith.truncf %23 : vector<8x512xf32> to vector<8x512xbf16>
      %c0_19 = arith.constant 0 : index
      %c0_20 = arith.constant 0 : index
      %25 = vector.load %arg8[%c0_19, %c0_20] : memref<8x512xbf16, #tpu.memory_space<vmem>>, vector<8x512xbf16>
      tpu.vector_store %arg8[%c0_19, %c0_20], %24 {strides = array<i32>} : memref<8x512xbf16, #tpu.memory_space<vmem>>, vector<8x512xbf16>,
    } else {
    }
    return
  }
  func.func @transform_0(%arg0: i32, %arg1: i32, %arg2: i32) -> (i32, i32) {
    %c0_i32 = arith.constant 0 : i32
    return %arg0, %arg2 : i32, i32
  }
  func.func @transform_1(%arg0: i32, %arg1: i32, %arg2: i32) -> (i32, i32) {
    %c0_i32 = arith.constant 0 : i32
    return %arg2, %arg1 : i32, i32
  }
  func.func @transform_2(%arg0: i32, %arg1: i32, %arg2: i32) -> (i32, i32) {
    %c0_i32 = arith.constant 0 : i32
    %c0_i32_0 = arith.constant 0 : i32
    return %c0_i32, %arg1 : i32, i32
  }
  func.func @transform_3(%arg0: i32, %arg1: i32, %arg2: i32) -> (i32, i32) {
    %c0_i32 = arith.constant 0 : i32
    %c0_i32_0 = arith.constant 0 : i32
    return %c0_i32, %arg1 : i32, i32
  }
  func.func @transform_4(%arg0: i32, %arg1: i32, %arg2: i32) -> (i32, i32) {
    %c0_i32 = arith.constant 0 : i32
    return %arg0, %arg1 : i32, i32
  }
  func.func @transform_5(%arg0: i32, %arg1: i32, %arg2: i32) -> (i32, i32) {
    %c0_i32 = arith.constant 0 : i32
    return %arg0, %arg1 : i32, i32
  }
}

module attributes {stable_mosaic.version = 11 : i64} {
  func.func @_gap_kernel(%arg0: i32, %arg1: memref<2x1x512xbf16, #tpu.memory_space<vmem>>, %arg2: memref<2x512xf32, #tpu.memory_space<vmem>>) attributes {dimension_semantics = [#tpu.dimension_semantics<parallel>], iteration_bounds = array<i64: 2>, scalar_prefetch = 0 : i64, scratch_operands = 0 : i64, tpu.core_type = #tpu.core_type<tc>, window_params = [{transform_indices = @transform_0, window_bounds = array<i64: 2, 1, 512>}, {transform_indices = @transform_1, window_bounds = array<i64: 2, 512>}]} {
    %c0 = arith.constant 0 : index
    %c0_0 = arith.constant 0 : index
    %c0_1 = arith.constant 0 : index
    %0 = vector.load %arg1[%c0, %c0_0, %c0_1] : memref<2x1x512xbf16, #tpu.memory_space<vmem>>, vector<2x1x512xbf16>
    %1 = arith.extf %0 : vector<2x1x512xbf16> to vector<2x1x512xf32>
    %cst = arith.constant dense<0.000000e+00> : vector<2x512xf32>
    %2 = vector.multi_reduction <add>, %1, %cst [1] : vector<2x1x512xf32> to vector<2x512xf32>
    %cst_2 = arith.constant 1.000000e+00 : f32
    %3 = vector.broadcast %cst_2 : f32 to vector<2x512xf32>
    %4 = arith.divf %2, %3 : vector<2x512xf32>
    %c0_3 = arith.constant 0 : index
    %c0_4 = arith.constant 0 : index
    %5 = vector.load %arg2[%c0_3, %c0_4] : memref<2x512xf32, #tpu.memory_space<vmem>>, vector<2x512xf32>
    tpu.vector_store %arg2[%c0_3, %c0_4], %4 {strides = array<i32>} : memref<2x512xf32, #tpu.memory_space<vmem>>, vector<2x512xf32>,
    return
  }
  func.func @transform_0(%arg0: i32) -> (i32, i32, i32) {
    %c0_i32 = arith.constant 0 : i32
    %c0_i32_0 = arith.constant 0 : i32
    %c0_i32_1 = arith.constant 0 : i32
    return %c0_i32, %c0_i32_0, %arg0 : i32, i32, i32
  }
  func.func @transform_1(%arg0: i32) -> (i32, i32) {
    %c0_i32 = arith.constant 0 : i32
    %c0_i32_0 = arith.constant 0 : i32
    return %c0_i32, %arg0 : i32, i32
  }
}

</mosaic_0001>

<bundles_post_ra>
// kernel: _lambda_.23
= control target key start
LH: loop header
LB: loop body
LE: loop exit
PB: predicated region body
PF: predicated region fallthrough
CT: control target
= control target key end

     0   :  { %s1709_s15 = smov 0   ;;  %s1711_s16 = smov 0   ;;  %s1955_s0 = inlined_call_operand.vmem [shape: bf16[512,256], index: 0, kind: input, shape index: {}]   ;;  %s1956_s1 = inlined_call_operand.vmem [shape: bf16[256,128], index: 1, kind: input, shape index: {}]   ;;  %s1957_s2 = inlined_call_operand.vmem [shape: f32[1,128], index: 2, kind: input, shape index: {}]   ;;  %s1958_s3 = inlined_call_operand.vmem [shape: f32[1,128], index: 3, kind: input, shape index: {}]   ;;  %s1959_s4 = inlined_call_operand.vmem [shape: bf16[512,128], index: 4, kind: output, shape index: {}]  }
   0x1   :  { %s1713_s17 = smov 0  }
   0x2 LB: > { %s33_s18 = sadd.s32 1, %s1678_s16  ;;  %p1274_p0 = scmp.ge.s32.totalorder %s1682_s17, 1  ;;  %s1682_s17 = sphi %s1713_s17, %s14_s17   ;;  %s1678_s16 = sphi %s1711_s16, %s1961_s16   ;;  %s1674_s15 = sphi %s1709_s15, %s1960_s15  }
   0x3   : > { %p35_p1 = scmp.ge.s32.totalorder %s33_s18, 2  ;;  %p224_p2 = scmp.lt.s32.totalorder %s1682_s17, 3 }
   0x5   : > { %s1963_s18 = smov (%p35_p1, %s33_s18), 0  ;;  %p225_p3 = pnand %p1274_p0, %p224_p2 }
   0x6   : > { %s1275_s5 = sshll.u32 (!%p225_p3), %s1674_s15, 5 }
   0x7   : > { %228 = sbr.rel (%p225_p3) target bundleno = 308 (0x134), region = 36  ;;  %p274_p4 = scmp.lt.s32.totalorder (!%p225_p3), %s1275_s5, 63 }
   0xc   : > { %v1514_v0 = vld [vmem:[%s1956_s1 + $0x38] sm:$0xff]  ;;  %v1513_v2 = vld [vmem:[%s1956_s1 + $0x30] sm:$0xff]  ;;  %v1512_v4 = vld [vmem:[%s1956_s1 + $0x28] sm:$0xff]  ;;  %s1965_s5 = smov (!%p274_p4, %s1275_s5), 63 }
   0xd   : > { %v1522_v1 = vld [vmem:[%s1956_s1 + $0x78] sm:$0xff]  ;;  %696 = vmatpush.bf16.msra.mxu0 %v1514_v0  ;;  %1618 = vmatpush.bf16.msra.mxu2 %v1514_v0  ;;  %v1521_v3 = vld [vmem:[%s1956_s1 + $0x70] sm:$0xff]  ;;  %v1520_v5 = vld [vmem:[%s1956_s1 + $0x68] sm:$0xff]  ;;  %s1474_s21 = sshll.u32 %s1965_s5, 3  ;;  %s1279_s12 = sshll.u32 %s1965_s5, 2 }
   0xe   : > { %785 = vmatpush.bf16.msra.mxu1 %v1522_v1  ;;  %1626 = vmatpush.bf16.msra.mxu3 %v1522_v1  ;;  %v1511_v6 = vld [vmem:[%s1956_s1 + $0x20] sm:$0xff]  ;;  %v1510_v8 = vld [vmem:[%s1956_s1 + $0x18] sm:$0xff]  ;;  %v1509_v10 = vld [vmem:[%s1956_s1 + $0x10] sm:$0xff]  ;;  %s1775_s26 = scalar_lea.vmem %s1955_s0, %s1474_s21  ;;  %s1869_s15 = scalar_lea.vmem %s1959_s4, %s1279_s12 }
   0xf   : > { %v1519_v7 = vld [vmem:[%s1956_s1 + $0x60] sm:$0xff]  ;;  %v1518_v9 = vld [vmem:[%s1956_s1 + $0x58] sm:$0xff]  ;;  %v1517_v11 = vld [vmem:[%s1956_s1 + $0x50] sm:$0xff] }
  0x10   : > { %v1508_v12 = vld [vmem:[%s1956_s1 + $0x8] sm:$0xff]  ;;  %v1507_v14 = vld [vmem:[%s1956_s1] sm:$0xff]  ;;  %v1290_v28 = vld [vmem:[%s1775_s26 + $0x10] sm:$0xf] }
  0x11   : > { %697 = vmatpush.bf16.msra.mxu0 %v1513_v2  ;;  %1619 = vmatpush.bf16.msra.mxu2 %v1513_v2  ;;  %v1516_v13 = vld [vmem:[%s1956_s1 + $0x48] sm:$0xff]  ;;  %v1515_v15 = vld [vmem:[%s1956_s1 + $0x40] sm:$0xff]  ;;  %v1478_v29 = vld [vmem:[%s1775_s26 + $0x14] sm:$0xf0] }
  0x12   : > { %786 = vmatpush.bf16.msra.mxu1 %v1521_v3  ;;  %1627 = vmatpush.bf16.msra.mxu3 %v1521_v3  ;;  %v1282_v16 = vld [vmem:[%s1775_s26] sm:$0xf]  ;;  %v1476_v17 = vld [vmem:[%s1775_s26 + $0x4] sm:$0xf0]  ;;  %v1475_v20 = vld [vmem:[%s1775_s26 + $0x4] sm:$0xf]  ;;  %v1291_v36 = vor.u32 %v1478_v29, %v1290_v28 }
  0x13   : > { %v1346_v18 = vld [vmem:[%s1775_s26 + $0x80] sm:$0xf]  ;;  %v1492_v19 = vld [vmem:[%s1775_s26 + $0x84] sm:$0xf0]  ;;  %v1284_v21 = vld [vmem:[%s1775_s26 + $0x8] sm:$0xf0]  ;;  %v1283_v24 = vor.u32 %v1476_v17, %v1282_v16 }
  0x14   : > { %v1491_v22 = vld [vmem:[%s1775_s26 + $0x84] sm:$0xf]  ;;  %v1348_v23 = vld [vmem:[%s1775_s26 + $0x88] sm:$0xf0]  ;;  %v1347_v25 = vor.u32 %v1492_v19, %v1346_v18  ;;  %v1287_v26 = vor.u32 %v1475_v20, %v1284_v21  ;;  %v1354_v30 = vld [vmem:[%s1775_s26 + $0x90] sm:$0xf] }
  0x15   : > { %698 = vmatpush.bf16.msra.mxu0 %v1512_v4  ;;  %1620 = vmatpush.bf16.msra.mxu2 %v1512_v4  ;;  %v1351_v27 = vor.u32 %v1491_v22, %v1348_v23  ;;  %v1494_v31 = vld [vmem:[%s1775_s26 + $0x94] sm:$0xf0]  ;;  %v1477_v32 = vld [vmem:[%s1775_s26 + $0x14] sm:$0xf]  ;;  %v1292_v33 = vld [vmem:[%s1775_s26 + $0x18] sm:$0xf0] }
  0x16   : > { %787 = vmatpush.bf16.msra.mxu1 %v1520_v5  ;;  %1628 = vmatpush.bf16.msra.mxu3 %v1520_v5  ;;  %v1493_v34 = vld [vmem:[%s1775_s26 + $0x94] sm:$0xf]  ;;  %v1356_v35 = vld [vmem:[%s1775_s26 + $0x98] sm:$0xf0]  ;;  %v1355_v37 = vor.u32 %v1494_v31, %v1354_v30  ;;  %v1295_v38 = vor.u32 %v1477_v32, %v1292_v33  ;;  %v1298_v40 = vld [vmem:[%s1775_s26 + $0x20] sm:$0xf] }
  0x17   : > { %v1359_v39 = vor.u32 %v1493_v34, %v1356_v35  ;;  %v1480_v41 = vld [vmem:[%s1775_s26 + $0x24] sm:$0xf0]  ;;  %v1362_v42 = vld [vmem:[%s1775_s26 + $0xa0] sm:$0xf]  ;;  %v1479_v44 = vld [vmem:[%s1775_s26 + $0x24] sm:$0xf] }
  0x18   : > { %v1496_v43 = vld [vmem:[%s1775_s26 + $0xa4] sm:$0xf0]  ;;  %v1300_v45 = vld [vmem:[%s1775_s26 + $0x28] sm:$0xf0]  ;;  %v1495_v46 = vld [vmem:[%s1775_s26 + $0xa4] sm:$0xf]  ;;  %v1299_v48 = vor.u32 %v1480_v41, %v1298_v40 }
  0x19   : > { %699 = vmatpush.bf16.msra.mxu0 %v1511_v6  ;;  %1621 = vmatpush.bf16.msra.mxu2 %v1511_v6  ;;  %v1364_v47 = vld [vmem:[%s1775_s26 + $0xa8] sm:$0xf0]  ;;  %v1363_v49 = vor.u32 %v1496_v43, %v1362_v42  ;;  %v1303_v50 = vor.u32 %v1479_v44, %v1300_v45  ;;  %v1306_v52 = vld [vmem:[%s1775_s26 + $0x30] sm:$0xf]  ;;  %v1482_v53 = vld [vmem:[%s1775_s26 + $0x34] sm:$0xf0] }
  0x1a   : > { %788 = vmatpush.bf16.msra.mxu1 %v1519_v7  ;;  %1629 = vmatpush.bf16.msra.mxu3 %v1519_v7  ;;  %v1367_v51 = vor.u32 %v1495_v46, %v1364_v47  ;;  %v1370_v54 = vld [vmem:[%s1775_s26 + $0xb0] sm:$0xf]  ;;  %v1498_v55 = vld [vmem:[%s1775_s26 + $0xb4] sm:$0xf0]  ;;  %v1481_v56 = vld [vmem:[%s1775_s26 + $0x34] sm:$0xf]  ;;  %v1307_v60 = vor.u32 %v1482_v53, %v1306_v52 }
  0x1b   : > { %v1308_v57 = vld [vmem:[%s1775_s26 + $0x38] sm:$0xf0]  ;;  %v1497_v58 = vld [vmem:[%s1775_s26 + $0xb4] sm:$0xf]  ;;  %v1371_v61 = vor.u32 %v1498_v55, %v1370_v54  ;;  %v1314_v0 = vld [vmem:[%s1775_s26 + $0x40] sm:$0xf] }
  0x1c   : > { %v1372_v59 = vld [vmem:[%s1775_s26 + $0xb8] sm:$0xf0]  ;;  %v1311_v62 = vor.u32 %v1481_v56, %v1308_v57  ;;  %v1484_v1 = vld [vmem:[%s1775_s26 + $0x44] sm:$0xf0]  ;;  %v1378_v2 = vld [vmem:[%s1775_s26 + $0xc0] sm:$0xf] }
  0x1d   : > { %700 = vmatpush.bf16.msra.mxu0 %v1510_v8  ;;  %1622 = vmatpush.bf16.msra.mxu2 %v1510_v8  ;;  %v1375_v63 = vor.u32 %v1497_v58, %v1372_v59  ;;  %v1500_v3 = vld [vmem:[%s1775_s26 + $0xc4] sm:$0xf0]  ;;  %v1483_v4 = vld [vmem:[%s1775_s26 + $0x44] sm:$0xf]  ;;  %v1316_v5 = vld [vmem:[%s1775_s26 + $0x48] sm:$0xf0]  ;;  %v1315_v8 = vor.u32 %v1484_v1, %v1314_v0 }
  0x1e   : > { %789 = vmatpush.bf16.msra.mxu1 %v1518_v9  ;;  %1630 = vmatpush.bf16.msra.mxu3 %v1518_v9  ;;  %v1499_v6 = vld [vmem:[%s1775_s26 + $0xc4] sm:$0xf]  ;;  %v1380_v7 = vld [vmem:[%s1775_s26 + $0xc8] sm:$0xf0]  ;;  %v1379_v9 = vor.u32 %v1500_v3, %v1378_v2  ;;  %v1485_v16 = vld [vmem:[%s1775_s26 + $0x54] sm:$0xf] }
  0x1f   : > { %v1324_v17 = vld [vmem:[%s1775_s26 + $0x58] sm:$0xf0]  ;;  %v1501_v18 = vld [vmem:[%s1775_s26 + $0xd4] sm:$0xf]  ;;  %v1487_v28 = vld [vmem:[%s1775_s26 + $0x64] sm:$0xf] }
  0x20   : > { %v1388_v19 = vld [vmem:[%s1775_s26 + $0xd8] sm:$0xf0]  ;;  %v1327_v22 = vor.u32 %v1485_v16, %v1324_v17  ;;  %v1332_v29 = vld [vmem:[%s1775_s26 + $0x68] sm:$0xf0]  ;;  %v1503_v30 = vld [vmem:[%s1775_s26 + $0xe4] sm:$0xf] }
  0x21   : > { %701 = vmatpush.bf16.msra.mxu0 %v1509_v10  ;;  %1623 = vmatpush.bf16.msra.mxu2 %v1509_v10  ;;  %v1319_v10 = vor.u32 %v1483_v4, %v1316_v5  ;;  %v1391_v23 = vor.u32 %v1501_v18, %v1388_v19  ;;  %v1396_v31 = vld [vmem:[%s1775_s26 + $0xe8] sm:$0xf0]  ;;  %v1335_v34 = vor.u32 %v1487_v28, %v1332_v29  ;;  %v1489_v40 = vld [vmem:[%s1775_s26 + $0x74] sm:$0xf]  ;;  %v1340_v41 = vld [vmem:[%s1775_s26 + $0x78] sm:$0xf0] }
  0x22   : > { %790 = vmatpush.bf16.msra.mxu1 %v1517_v11  ;;  %1631 = vmatpush.bf16.msra.mxu3 %v1517_v11  ;;  %v1383_v11 = vor.u32 %v1499_v6, %v1380_v7  ;;  %v1399_v35 = vor.u32 %v1503_v30, %v1396_v31  ;;  %v1505_v42 = vld [vmem:[%s1775_s26 + $0xf4] sm:$0xf]  ;;  %v1404_v43 = vld [vmem:[%s1775_s26 + $0xf8] sm:$0xf0]  ;;  %v1343_v46 = vor.u32 %v1489_v40, %v1340_v41  ;;  %v1859_v55 = vld [vmem:[%s1958_s3] ss:$0 sm:$0xff] }
  0x23   : > { %v1407_v47 = vor.u32 %v1505_v42, %v1404_v43 }
  0x25   : > { %702 = vmatpush.bf16.msra.mxu0 %v1508_v12  ;;  %1624 = vmatpush.bf16.msra.mxu2 %v1508_v12  ;;  %v1322_v12 = vld [vmem:[%s1775_s26 + $0x50] sm:$0xf] }
  0x26   : > { %791 = vmatpush.bf16.msra.mxu1 %v1516_v13  ;;  %1632 = vmatpush.bf16.msra.mxu3 %v1516_v13  ;;  %v1486_v13 = vld [vmem:[%s1775_s26 + $0x54] sm:$0xf0] }
  0x27   : > { %v1323_v20 = vor.u32 %v1486_v13, %v1322_v12 }
  0x29   : > { %703 = vmatpush.bf16.msra.mxu0 %v1507_v14  ;;  %1625 = vmatpush.bf16.msra.mxu2 %v1507_v14  ;;  %v1386_v14 = vld [vmem:[%s1775_s26 + $0xd0] sm:$0xf] }
  0x2a   : > { %792 = vmatpush.bf16.msra.mxu1 %v1515_v15  ;;  %1633 = vmatpush.bf16.msra.mxu3 %v1515_v15  ;;  %v1502_v15 = vld [vmem:[%s1775_s26 + $0xd4] sm:$0xf0] }
  0x2b   : > { %v1387_v21 = vor.u32 %v1502_v15, %v1386_v14 }
  0x2c   : > { %704 = vmatmul.bf16.vlgmr.msra.gmra.mxu0 %v1283_v24  ;;  %744 = vmatmul.bf16.vlgmr.msra.gmra.mxu2 %v1347_v25  ;;  %v1330_v24 = vld [vmem:[%s1775_s26 + $0x60] sm:$0xf]  ;;  %v1488_v25 = vld [vmem:[%s1775_s26 + $0x64] sm:$0xf0] }
  0x2d   : > { %793 = vmatmul.bf16.vlgmr.msra.gmra.mxu1 %v1287_v26  ;;  %833 = vmatmul.bf16.vlgmr.msra.gmra.mxu3 %v1351_v27  ;;  %v1394_v26 = vld [vmem:[%s1775_s26 + $0xe0] sm:$0xf]  ;;  %v1504_v27 = vld [vmem:[%s1775_s26 + $0xe4] sm:$0xf0]  ;;  %v1331_v32 = vor.u32 %v1488_v25, %v1330_v24 }
  0x2e   : > { %v1395_v33 = vor.u32 %v1504_v27, %v1394_v26 }
  0x3c   : > { %709 = vmatmul.bf16.gmra.mxu0 %v1291_v36  ;;  %749 = vmatmul.bf16.gmra.mxu2 %v1355_v37  ;;  %v1338_v36 = vld [vmem:[%s1775_s26 + $0x70] sm:$0xf]  ;;  %v1490_v37 = vld [vmem:[%s1775_s26 + $0x74] sm:$0xf0] }
  0x3d   : > { %798 = vmatmul.bf16.gmra.mxu1 %v1295_v38  ;;  %838 = vmatmul.bf16.gmra.mxu3 %v1359_v39  ;;  %v1402_v38 = vld [vmem:[%s1775_s26 + $0xf0] sm:$0xf]  ;;  %v1506_v39 = vld [vmem:[%s1775_s26 + $0xf4] sm:$0xf0]  ;;  %v1339_v44 = vor.u32 %v1490_v37, %v1338_v36 }
  0x3e   : > { %v1403_v45 = vor.u32 %v1506_v39, %v1402_v38 }
  0x4c   : > { %714 = vmatmul.bf16.gmra.mxu0 %v1299_v48  ;;  %754 = vmatmul.bf16.gmra.mxu2 %v1363_v49 }
  0x4d   : > { %803 = vmatmul.bf16.gmra.mxu1 %v1303_v50  ;;  %843 = vmatmul.bf16.gmra.mxu3 %v1367_v51  ;;  %v1853_v51 = vld [vmem:[%s1957_s2] ss:$0 sm:$0xff] }
  0x5c   : > { %719 = vmatmul.bf16.gmra.mxu0 %v1307_v60  ;;  %759 = vmatmul.bf16.gmra.mxu2 %v1371_v61 }
  0x5d   : > { %808 = vmatmul.bf16.gmra.mxu1 %v1311_v62  ;;  %848 = vmatmul.bf16.gmra.mxu3 %v1375_v63 }
  0x6c   : > { %724 = vmatmul.bf16.gmra.mxu0 %v1315_v8  ;;  %764 = vmatmul.bf16.gmra.mxu2 %v1379_v9 }
  0x6d   : > { %813 = vmatmul.bf16.gmra.mxu1 %v1319_v10  ;;  %853 = vmatmul.bf16.gmra.mxu3 %v1383_v11 }
  0x7c   : > { %729 = vmatmul.bf16.gmra.mxu0 %v1323_v20  ;;  %769 = vmatmul.bf16.gmra.mxu2 %v1387_v21 }
  0x7d   : > { %818 = vmatmul.bf16.gmra.mxu1 %v1327_v22  ;;  %858 = vmatmul.bf16.gmra.mxu3 %v1391_v23 }
  0x8c   : > { %734 = vmatmul.bf16.gmra.mxu0 %v1331_v32  ;;  %774 = vmatmul.bf16.gmra.mxu2 %v1395_v33 }
  0x8d   : > { %823 = vmatmul.bf16.gmra.mxu1 %v1335_v34  ;;  %863 = vmatmul.bf16.gmra.mxu3 %v1399_v35 }
  0x9c   : > { %739 = vmatmul.bf16.gmra.mxu0 %v1339_v44  ;;  %779 = vmatmul.bf16.gmra.mxu2 %v1403_v45 }
  0x9d   : > { %828 = vmatmul.bf16.gmra.mxu1 %v1343_v46  ;;  %868 = vmatmul.bf16.gmra.mxu3 %v1407_v47 }
  0xa9   : > { %v705_v48 = vpop.f32.mrf.mxu0 }
  0xaa   : > { %v794_v49 = vpop.f32.mrf.mxu1 }
  0xab   : > { %v795_v50 = vadd.f32 %v794_v49, %v705_v48 }
  0xad   : > { %v977_v54 = vmul.f32 %v1853_v51, %v795_v50 }
  0xaf   : > { %v745_v52 = vpop.f32.mrf.mxu2  ;;  %v1013_v60 = vadd.f32 %v1859_v55, %v977_v54 }
  0xb0   : > { %v834_v53 = vpop.f32.mrf.mxu3 }
  0xb1   : > { %v707_v56 = vpop.f32.mrf.mxu0  ;;  %v835_v58 = vadd.f32 %v834_v53, %v745_v52  ;;  %v1045_v2 = vmax.f32 %v1013_v60, 0.0 }
  0xb2   : > { %v796_v57 = vpop.f32.mrf.mxu1 }
  0xb3   : > { %v797_v59 = vadd.f32 %v796_v57, %v707_v56  ;;  %v993_v62 = vmul.f32 %v1853_v51, %v835_v58 }
  0xb5   : > { %v978_v61 = vmul.f32 %v1853_v51, %v797_v59  ;;  %v1029_v7 = vadd.f32 %v1859_v55, %v993_v62 }
  0xb7   : > { %v1014_v63 = vadd.f32 %v1859_v55, %v978_v61  ;;  %v747_v0 = vpop.f32.mrf.mxu2  ;;  %v1061_v12 = vmax.f32 %v1029_v7, 0.0 }
  0xb8   : > { %v836_v1 = vpop.f32.mrf.mxu3 }
  0xb9   : > { %v1046_v3 = vmax.f32 %v1014_v63, 0.0  ;;  %v837_v4 = vadd.f32 %v836_v1, %v747_v0  ;;  %v710_v5 = vpop.f32.mrf.mxu0 }
  0xba   : > { %v799_v6 = vpop.f32.mrf.mxu1 }
  0xbb   : > { %v1526_v8 = vpack.c.bf16 %v1046_v3, %v1045_v2  ;;  %v994_v9 = vmul.f32 %v1853_v51, %v837_v4  ;;  %v800_v11 = vadd.f32 %v799_v6, %v710_v5 }
  0xbd   : > { %1527 = vst [vmem:[%s1869_s15] sm:$0xff] %v1526_v8   ;;  %v1030_v10 = vadd.f32 %v1859_v55, %v994_v9  ;;  %v979_v17 = vmul.f32 %v1853_v51, %v800_v11 }
  0xbf   : > { %v1062_v13 = vmax.f32 %v1030_v10, 0.0  ;;  %v750_v14 = vpop.f32.mrf.mxu2  ;;  %v1015_v22 = vadd.f32 %v1859_v55, %v979_v17 }
  0xc0   : > { %v839_v15 = vpop.f32.mrf.mxu3 }
  0xc1   : > { %v1566_v16 = vpack.c.bf16 %v1062_v13, %v1061_v12  ;;  %v712_v18 = vpop.f32.mrf.mxu0  ;;  %v840_v20 = vadd.f32 %v839_v15, %v750_v14  ;;  %v1047_v28 = vmax.f32 %v1015_v22, 0.0 }
  0xc2   : > { %v801_v19 = vpop.f32.mrf.mxu1 }
  0xc3   : > { %1610 = vst [vmem:[%s1869_s15 + $0x40] sm:$0xff] %v1566_v16   ;;  %v802_v21 = vadd.f32 %v801_v19, %v712_v18  ;;  %v995_v24 = vmul.f32 %v1853_v51, %v840_v20 }
  0xc5   : > { %v980_v23 = vmul.f32 %v1853_v51, %v802_v21  ;;  %v1031_v33 = vadd.f32 %v1859_v55, %v995_v24 }
  0xc7   : > { %v1016_v25 = vadd.f32 %v1859_v55, %v980_v23  ;;  %v752_v26 = vpop.f32.mrf.mxu2  ;;  %v1063_v38 = vmax.f32 %v1031_v33, 0.0 }
  0xc8   : > { %v841_v27 = vpop.f32.mrf.mxu3 }
  0xc9   : > { %v1048_v29 = vmax.f32 %v1016_v25, 0.0  ;;  %v842_v30 = vadd.f32 %v841_v27, %v752_v26  ;;  %v715_v31 = vpop.f32.mrf.mxu0 }
  0xca   : > { %v804_v32 = vpop.f32.mrf.mxu1 }
  0xcb   : > { %v1531_v34 = vpack.c.bf16 %v1048_v29, %v1047_v28  ;;  %v996_v35 = vmul.f32 %v1853_v51, %v842_v30  ;;  %v805_v37 = vadd.f32 %v804_v32, %v715_v31 }
  0xcd   : > { %1603 = vst [vmem:[%s1869_s15 + $0x8] sm:$0xff] %v1531_v34   ;;  %v1032_v36 = vadd.f32 %v1859_v55, %v996_v35  ;;  %v981_v43 = vmul.f32 %v1853_v51, %v805_v37 }
  0xcf   : > { %v1064_v39 = vmax.f32 %v1032_v36, 0.0  ;;  %v755_v40 = vpop.f32.mrf.mxu2  ;;  %v1017_v48 = vadd.f32 %v1859_v55, %v981_v43 }
  0xd0   : > { %v844_v41 = vpop.f32.mrf.mxu3 }
  0xd1   : > { %v1571_v42 = vpack.c.bf16 %v1064_v39, %v1063_v38  ;;  %v717_v44 = vpop.f32.mrf.mxu0  ;;  %v845_v46 = vadd.f32 %v844_v41, %v755_v40  ;;  %v1049_v56 = vmax.f32 %v1017_v48, 0.0 }
  0xd2   : > { %v806_v45 = vpop.f32.mrf.mxu1 }
  0xd3   : > { %1611 = vst [vmem:[%s1869_s15 + $0x48] sm:$0xff] %v1571_v42   ;;  %v807_v47 = vadd.f32 %v806_v45, %v717_v44  ;;  %v997_v50 = vmul.f32 %v1853_v51, %v845_v46 }
  0xd5   : > { %v982_v49 = vmul.f32 %v1853_v51, %v807_v47  ;;  %v1033_v61 = vadd.f32 %v1859_v55, %v997_v50 }
  0xd7   : > { %v1018_v52 = vadd.f32 %v1859_v55, %v982_v49  ;;  %v757_v53 = vpop.f32.mrf.mxu2  ;;  %v1065_v2 = vmax.f32 %v1033_v61, 0.0 }
  0xd8   : > { %v846_v54 = vpop.f32.mrf.mxu3 }
  0xd9   : > { %v1050_v57 = vmax.f32 %v1018_v52, 0.0  ;;  %v847_v58 = vadd.f32 %v846_v54, %v757_v53  ;;  %v720_v59 = vpop.f32.mrf.mxu0 }
  0xda   : > { %v809_v60 = vpop.f32.mrf.mxu1 }
  0xdb   : > { %v1536_v62 = vpack.c.bf16 %v1050_v57, %v1049_v56  ;;  %v998_v63 = vmul.f32 %v1853_v51, %v847_v58  ;;  %v810_v1 = vadd.f32 %v809_v60, %v720_v59 }
  0xdd   : > { %1604 = vst [vmem:[%s1869_s15 + $0x10] sm:$0xff] %v1536_v62   ;;  %v1034_v0 = vadd.f32 %v1859_v55, %v998_v63  ;;  %v983_v7 = vmul.f32 %v1853_v51, %v810_v1 }
  0xdf   : > { %v1066_v3 = vmax.f32 %v1034_v0, 0.0  ;;  %v760_v4 = vpop.f32.mrf.mxu2  ;;  %v1019_v12 = vadd.f32 %v1859_v55, %v983_v7 }
  0xe0   : > { %v849_v5 = vpop.f32.mrf.mxu3 }
  0xe1   : > { %v1576_v6 = vpack.c.bf16 %v1066_v3, %v1065_v2  ;;  %v722_v8 = vpop.f32.mrf.mxu0  ;;  %v850_v10 = vadd.f32 %v849_v5, %v760_v4  ;;  %v1051_v18 = vmax.f32 %v1019_v12, 0.0 }
  0xe2   : > { %v811_v9 = vpop.f32.mrf.mxu1 }
  0xe3   : > { %1612 = vst [vmem:[%s1869_s15 + $0x50] sm:$0xff] %v1576_v6   ;;  %v812_v11 = vadd.f32 %v811_v9, %v722_v8  ;;  %v999_v14 = vmul.f32 %v1853_v51, %v850_v10 }
  0xe5   : > { %v984_v13 = vmul.f32 %v1853_v51, %v812_v11  ;;  %v1035_v23 = vadd.f32 %v1859_v55, %v999_v14 }
  0xe7   : > { %v1020_v15 = vadd.f32 %v1859_v55, %v984_v13  ;;  %v762_v16 = vpop.f32.mrf.mxu2  ;;  %v1067_v28 = vmax.f32 %v1035_v23, 0.0 }
  0xe8   : > { %v851_v17 = vpop.f32.mrf.mxu3 }
  0xe9   : > { %v1052_v19 = vmax.f32 %v1020_v15, 0.0  ;;  %v852_v20 = vadd.f32 %v851_v17, %v762_v16  ;;  %v725_v21 = vpop.f32.mrf.mxu0 }
  0xea   : > { %v814_v22 = vpop.f32.mrf.mxu1 }
  0xeb   : > { %v1541_v24 = vpack.c.bf16 %v1052_v19, %v1051_v18  ;;  %v1000_v25 = vmul.f32 %v1853_v51, %v852_v20  ;;  %v815_v27 = vadd.f32 %v814_v22, %v725_v21 }
  0xed   : > { %1605 = vst [vmem:[%s1869_s15 + $0x18] sm:$0xff] %v1541_v24   ;;  %v1036_v26 = vadd.f32 %v1859_v55, %v1000_v25  ;;  %v985_v33 = vmul.f32 %v1853_v51, %v815_v27 }
  0xef   : > { %v1068_v29 = vmax.f32 %v1036_v26, 0.0  ;;  %v765_v30 = vpop.f32.mrf.mxu2  ;;  %v1021_v38 = vadd.f32 %v1859_v55, %v985_v33 }
  0xf0   : > { %v854_v31 = vpop.f32.mrf.mxu3 }
  0xf1   : > { %v1581_v32 = vpack.c.bf16 %v1068_v29, %v1067_v28  ;;  %v727_v34 = vpop.f32.mrf.mxu0  ;;  %v855_v36 = vadd.f32 %v854_v31, %v765_v30  ;;  %v1053_v44 = vmax.f32 %v1021_v38, 0.0 }
  0xf2   : > { %v816_v35 = vpop.f32.mrf.mxu1 }
  0xf3   : > { %1613 = vst [vmem:[%s1869_s15 + $0x58] sm:$0xff] %v1581_v32   ;;  %v817_v37 = vadd.f32 %v816_v35, %v727_v34  ;;  %v1001_v40 = vmul.f32 %v1853_v51, %v855_v36 }
  0xf5   : > { %v986_v39 = vmul.f32 %v1853_v51, %v817_v37  ;;  %v1037_v49 = vadd.f32 %v1859_v55, %v1001_v40 }
  0xf7   : > { %v1022_v41 = vadd.f32 %v1859_v55, %v986_v39  ;;  %v767_v42 = vpop.f32.mrf.mxu2  ;;  %v1069_v56 = vmax.f32 %v1037_v49, 0.0 }
  0xf8   : > { %v856_v43 = vpop.f32.mrf.mxu3 }
  0xf9   : > { %v1054_v45 = vmax.f32 %v1022_v41, 0.0  ;;  %v857_v46 = vadd.f32 %v856_v43, %v767_v42  ;;  %v730_v47 = vpop.f32.mrf.mxu0 }
  0xfa   : > { %v819_v48 = vpop.f32.mrf.mxu1 }
  0xfb   : > { %v1546_v50 = vpack.c.bf16 %v1054_v45, %v1053_v44  ;;  %v1002_v52 = vmul.f32 %v1853_v51, %v857_v46  ;;  %v820_v54 = vadd.f32 %v819_v48, %v730_v47 }
  0xfd   : > { %1606 = vst [vmem:[%s1869_s15 + $0x20] sm:$0xff] %v1546_v50   ;;  %v1038_v53 = vadd.f32 %v1859_v55, %v1002_v52  ;;  %v987_v61 = vmul.f32 %v1853_v51, %v820_v54 }
  0xff   : > { %v1070_v57 = vmax.f32 %v1038_v53, 0.0  ;;  %v770_v58 = vpop.f32.mrf.mxu2  ;;  %v1023_v2 = vadd.f32 %v1859_v55, %v987_v61 }
 0x100   : > { %v859_v59 = vpop.f32.mrf.mxu3 }
 0x101   : > { %v1586_v60 = vpack.c.bf16 %v1070_v57, %v1069_v56  ;;  %v732_v62 = vpop.f32.mrf.mxu0  ;;  %v860_v0 = vadd.f32 %v859_v59, %v770_v58  ;;  %v1055_v8 = vmax.f32 %v1023_v2, 0.0 }
 0x102   : > { %v821_v63 = vpop.f32.mrf.mxu1 }
 0x103   : > { %1614 = vst [vmem:[%s1869_s15 + $0x60] sm:$0xff] %v1586_v60   ;;  %v822_v1 = vadd.f32 %v821_v63, %v732_v62  ;;  %v1003_v4 = vmul.f32 %v1853_v51, %v860_v0 }
 0x105   : > { %v988_v3 = vmul.f32 %v1853_v51, %v822_v1  ;;  %v1039_v13 = vadd.f32 %v1859_v55, %v1003_v4 }
 0x107   : > { %v1024_v5 = vadd.f32 %v1859_v55, %v988_v3  ;;  %v772_v6 = vpop.f32.mrf.mxu2  ;;  %v1071_v18 = vmax.f32 %v1039_v13, 0.0 }
 0x108   : > { %v861_v7 = vpop.f32.mrf.mxu3 }
 0x109   : > { %v1056_v9 = vmax.f32 %v1024_v5, 0.0  ;;  %v862_v10 = vadd.f32 %v861_v7, %v772_v6  ;;  %v735_v11 = vpop.f32.mrf.mxu0 }
 0x10a   : > { %v824_v12 = vpop.f32.mrf.mxu1 }
 0x10b   : > { %v1551_v14 = vpack.c.bf16 %v1056_v9, %v1055_v8  ;;  %v1004_v15 = vmul.f32 %v1853_v51, %v862_v10  ;;  %v825_v17 = vadd.f32 %v824_v12, %v735_v11 }
 0x10d   : > { %1607 = vst [vmem:[%s1869_s15 + $0x28] sm:$0xff] %v1551_v14   ;;  %v1040_v16 = vadd.f32 %v1859_v55, %v1004_v15  ;;  %v989_v23 = vmul.f32 %v1853_v51, %v825_v17 }
 0x10f   : > { %v1072_v19 = vmax.f32 %v1040_v16, 0.0  ;;  %v775_v20 = vpop.f32.mrf.mxu2  ;;  %v1025_v28 = vadd.f32 %v1859_v55, %v989_v23 }
 0x110   : > { %v864_v21 = vpop.f32.mrf.mxu3 }
 0x111   : > { %v1591_v22 = vpack.c.bf16 %v1072_v19, %v1071_v18  ;;  %v737_v24 = vpop.f32.mrf.mxu0  ;;  %v865_v26 = vadd.f32 %v864_v21, %v775_v20  ;;  %v1057_v34 = vmax.f32 %v1025_v28, 0.0 }
 0x112   : > { %v826_v25 = vpop.f32.mrf.mxu1 }
 0x113   : > { %1615 = vst [vmem:[%s1869_s15 + $0x68] sm:$0xff] %v1591_v22   ;;  %v827_v27 = vadd.f32 %v826_v25, %v737_v24  ;;  %v1005_v30 = vmul.f32 %v1853_v51, %v865_v26 }
 0x115   : > { %v990_v29 = vmul.f32 %v1853_v51, %v827_v27  ;;  %v1041_v39 = vadd.f32 %v1859_v55, %v1005_v30 }
 0x117   : > { %v1026_v31 = vadd.f32 %v1859_v55, %v990_v29  ;;  %v777_v32 = vpop.f32.mrf.mxu2  ;;  %v1073_v44 = vmax.f32 %v1041_v39, 0.0 }
 0x118   : > { %v866_v33 = vpop.f32.mrf.mxu3 }
 0x119   : > { %v1058_v35 = vmax.f32 %v1026_v31, 0.0  ;;  %v867_v36 = vadd.f32 %v866_v33, %v777_v32  ;;  %v740_v37 = vpop.f32.mrf.mxu0 }
 0x11a   : > { %v829_v38 = vpop.f32.mrf.mxu1 }
 0x11b   : > { %v1556_v40 = vpack.c.bf16 %v1058_v35, %v1057_v34  ;;  %v1006_v41 = vmul.f32 %v1853_v51, %v867_v36  ;;  %v830_v43 = vadd.f32 %v829_v38, %v740_v37 }
 0x11d   : > { %1608 = vst [vmem:[%s1869_s15 + $0x30] sm:$0xff] %v1556_v40   ;;  %v1042_v42 = vadd.f32 %v1859_v55, %v1006_v41  ;;  %v991_v49 = vmul.f32 %v1853_v51, %v830_v43 }
 0x11f   : > { %v1074_v45 = vmax.f32 %v1042_v42, 0.0  ;;  %v780_v46 = vpop.f32.mrf.mxu2  ;;  %v1027_v56 = vadd.f32 %v1859_v55, %v991_v49 }
 0x120   : > { %v869_v47 = vpop.f32.mrf.mxu3 }
 0x121   : > { %v1596_v48 = vpack.c.bf16 %v1074_v45, %v1073_v44  ;;  %v742_v50 = vpop.f32.mrf.mxu0  ;;  %v870_v53 = vadd.f32 %v869_v47, %v780_v46  ;;  %v1059_v62 = vmax.f32 %v1027_v56, 0.0 }
 0x122   : > { %v831_v52 = vpop.f32.mrf.mxu1 }
 0x123   : > { %1616 = vst [vmem:[%s1869_s15 + $0x70] sm:$0xff] %v1596_v48   ;;  %v832_v54 = vadd.f32 %v831_v52, %v742_v50  ;;  %v1007_v58 = vmul.f32 %v1853_v51, %v870_v53 }
 0x125   : > { %v992_v57 = vmul.f32 %v1853_v51, %v832_v54  ;;  %v1043_v1 = vadd.f32 %v1859_v55, %v1007_v58 }
 0x127   : > { %v1028_v59 = vadd.f32 %v1859_v55, %v992_v57  ;;  %v782_v60 = vpop.f32.mrf.mxu2  ;;  %v1075_v5 = vmax.f32 %v1043_v1, 0.0 }
 0x128   : > { %v871_v61 = vpop.f32.mrf.mxu3 }
 0x129   : > { %v1060_v63 = vmax.f32 %v1028_v59, 0.0  ;;  %v872_v0 = vadd.f32 %v871_v61, %v782_v60 }
 0x12b   : > { %v1561_v2 = vpack.c.bf16 %v1060_v63, %v1059_v62  ;;  %v1008_v3 = vmul.f32 %v1853_v51, %v872_v0 }
 0x12d   : > { %1609 = vst [vmem:[%s1869_s15 + $0x38] sm:$0xff] %v1561_v2   ;;  %v1044_v4 = vadd.f32 %v1859_v55, %v1008_v3 }
 0x12f   : > { %v1076_v6 = vmax.f32 %v1044_v4, 0.0 }
 0x131   : > { %v1601_v7 = vpack.c.bf16 %v1076_v6, %v1075_v5 }
 0x133   : > { %1617 = vst [vmem:[%s1869_s15 + $0x78] sm:$0xff] %v1601_v7  }
 0x134 PF: > { %s14_s17 = sadd.s32 1, %s1682_s17   ;;  %s1960_s15 = smov %s1678_s16 }
 0x135   : > { %p11_p5 = scmp.ge.s32.totalorder %s14_s17, 4   ;;  %s1961_s16 = smov %s1963_s18 }
 0x137   :  { %13 = sbr.rel (!%p11_p5) target bundleno = 2 (0x2), region = 83 }

// kernel: _lambda_.24
= control target key start
LH: loop header
LB: loop body
LE: loop exit
PB: predicated region body
PF: predicated region fallthrough
CT: control target
= control target key end

     0   :  { %s1120_s0 = inlined_call_operand.vmem [shape: bf16[3,288,128], index: 0, kind: input, shape index: {}]   ;;  %s1121_s1 = inlined_call_operand.vmem [shape: bf16[288,128], index: 1, kind: output, shape index: {}]  }
   0x1   :  { %v519_v0 = vld [vmem:[%s1120_s0] sm:$0xff]   ;;  %v841_v1 = vld [vmem:[%s1120_s0 + $0x90] sm:$0xff]   ;;  %v824_v7 = vld [vmem:[%s1120_s0 + $0x8] sm:$0xff]  }
   0x2   :  { %v859_v2 = vld [vmem:[%s1120_s0 + $0x120] sm:$0xff]   ;;  %v520_v3 = vunpack.c.l.bf16 %v519_v0  ;;  %v521_v4 = vunpack.c.h.bf16 %v519_v0  ;;  %v592_v5 = vunpack.c.l.bf16 %v841_v1  ;;  %v593_v6 = vunpack.c.h.bf16 %v841_v1  ;;  %v842_v8 = vld [vmem:[%s1120_s0 + $0x98] sm:$0xff]   ;;  %v860_v9 = vld [vmem:[%s1120_s0 + $0x128] sm:$0xff]  }
   0x3   :  { %v664_v10 = vunpack.c.l.bf16 %v859_v2  ;;  %v665_v11 = vunpack.c.h.bf16 %v859_v2  ;;  %v524_v12 = vunpack.c.l.bf16 %v824_v7  ;;  %v525_v13 = vunpack.c.h.bf16 %v824_v7  ;;  %v825_v14 = vld [vmem:[%s1120_s0 + $0x10] sm:$0xff]   ;;  %v843_v19 = vld [vmem:[%s1120_s0 + $0xa0] sm:$0xff]   ;;  %v826_v25 = vld [vmem:[%s1120_s0 + $0x18] sm:$0xff]  }
   0x4   :  { %v153_v15 = vmax.f32 %v520_v3, %v592_v5  ;;  %v154_v16 = vmax.f32 %v521_v4, %v593_v6  ;;  %v596_v17 = vunpack.c.l.bf16 %v842_v8  ;;  %v597_v18 = vunpack.c.h.bf16 %v842_v8  ;;  %v861_v20 = vld [vmem:[%s1120_s0 + $0x130] sm:$0xff]   ;;  %v844_v30 = vld [vmem:[%s1120_s0 + $0xa8] sm:$0xff]   ;;  %v862_v35 = vld [vmem:[%s1120_s0 + $0x138] sm:$0xff]  }
   0x5   :  { %v668_v21 = vunpack.c.l.bf16 %v860_v9  ;;  %v669_v22 = vunpack.c.h.bf16 %v860_v9  ;;  %v528_v23 = vunpack.c.l.bf16 %v825_v14  ;;  %v529_v24 = vunpack.c.h.bf16 %v825_v14  ;;  %v827_v40 = vld [vmem:[%s1120_s0 + $0x20] sm:$0xff]   ;;  %v845_v45 = vld [vmem:[%s1120_s0 + $0xb0] sm:$0xff]   ;;  %v828_v55 = vld [vmem:[%s1120_s0 + $0x28] sm:$0xff]  }
   0x6   :  { %v334_v26 = vmax.f32 %v153_v15, %v664_v10  ;;  %v335_v27 = vmax.f32 %v154_v16, %v665_v11  ;;  %v155_v28 = vmax.f32 %v524_v12, %v596_v17  ;;  %v156_v29 = vmax.f32 %v525_v13, %v597_v18  ;;  %v863_v50 = vld [vmem:[%s1120_s0 + $0x140] sm:$0xff]   ;;  %v846_v60 = vld [vmem:[%s1120_s0 + $0xb8] sm:$0xff]   ;;  %v864_v61 = vld [vmem:[%s1120_s0 + $0x148] sm:$0xff]  }
   0x7   :  { %v600_v31 = vunpack.c.l.bf16 %v843_v19  ;;  %v601_v32 = vunpack.c.h.bf16 %v843_v19  ;;  %v672_v33 = vunpack.c.l.bf16 %v861_v20  ;;  %v673_v34 = vunpack.c.h.bf16 %v861_v20  ;;  %v829_v6 = vld [vmem:[%s1120_s0 + $0x30] sm:$0xff]   ;;  %v847_v11 = vld [vmem:[%s1120_s0 + $0xc0] sm:$0xff]   ;;  %v830_v17 = vld [vmem:[%s1120_s0 + $0x38] sm:$0xff]  }
   0x8   :  { %v737_v36 = vpack.c.bf16 %v335_v27, %v334_v26  ;;  %v336_v37 = vmax.f32 %v155_v28, %v668_v21  ;;  %v337_v38 = vmax.f32 %v156_v29, %v669_v22  ;;  %v532_v39 = vunpack.c.l.bf16 %v826_v25  ;;  %v865_v12 = vld [vmem:[%s1120_s0 + $0x150] sm:$0xff]   ;;  %v848_v22 = vld [vmem:[%s1120_s0 + $0xc8] sm:$0xff]   ;;  %v866_v27 = vld [vmem:[%s1120_s0 + $0x158] sm:$0xff]  }
   0x9   :  { %v157_v41 = vmax.f32 %v528_v23, %v600_v31  ;;  %v158_v42 = vmax.f32 %v529_v24, %v601_v32  ;;  %v533_v43 = vunpack.c.h.bf16 %v826_v25  ;;  %v604_v44 = vunpack.c.l.bf16 %v844_v30  ;;  %v831_v32 = vld [vmem:[%s1120_s0 + $0x40] sm:$0xff]  }
   0xa   :  { %738 = vst [vmem:[%s1121_s1] sm:$0xff] %v737_v36   ;;  %v742_v46 = vpack.c.bf16 %v337_v38, %v336_v37  ;;  %v605_v47 = vunpack.c.h.bf16 %v844_v30  ;;  %v676_v48 = vunpack.c.l.bf16 %v862_v35  ;;  %v677_v49 = vunpack.c.h.bf16 %v862_v35  ;;  %v849_v37 = vld [vmem:[%s1120_s0 + $0xd0] sm:$0xff]  }
   0xb   :  { %v338_v51 = vmax.f32 %v157_v41, %v672_v33  ;;  %v339_v52 = vmax.f32 %v158_v42, %v673_v34  ;;  %v159_v53 = vmax.f32 %v532_v39, %v604_v44  ;;  %v536_v54 = vunpack.c.l.bf16 %v827_v40  ;;  %v867_v42 = vld [vmem:[%s1120_s0 + $0x160] sm:$0xff]  }
   0xc   :  { %877 = vst [vmem:[%s1121_s1 + $0x8] sm:$0xff] %v742_v46   ;;  %v160_v56 = vmax.f32 %v533_v43, %v605_v47  ;;  %v537_v57 = vunpack.c.h.bf16 %v827_v40  ;;  %v608_v58 = vunpack.c.l.bf16 %v845_v45  ;;  %v609_v59 = vunpack.c.h.bf16 %v845_v45  ;;  %v832_v47 = vld [vmem:[%s1120_s0 + $0x48] sm:$0xff]  }
   0xd   :  { %v747_v62 = vpack.c.bf16 %v339_v52, %v338_v51  ;;  %v340_v63 = vmax.f32 %v159_v53, %v676_v48  ;;  %v680_v0 = vunpack.c.l.bf16 %v863_v50  ;;  %v681_v1 = vunpack.c.h.bf16 %v863_v50  ;;  %v850_v52 = vld [vmem:[%s1120_s0 + $0xd8] sm:$0xff]   ;;  %v868_v53 = vld [vmem:[%s1120_s0 + $0x168] sm:$0xff]  }
   0xe   :  { %v341_v2 = vmax.f32 %v160_v56, %v677_v49  ;;  %v161_v3 = vmax.f32 %v536_v54, %v608_v58  ;;  %v162_v4 = vmax.f32 %v537_v57, %v609_v59  ;;  %v540_v5 = vunpack.c.l.bf16 %v828_v55 }
   0xf   :  { %878 = vst [vmem:[%s1121_s1 + $0x10] sm:$0xff] %v747_v62   ;;  %v541_v7 = vunpack.c.h.bf16 %v828_v55  ;;  %v612_v8 = vunpack.c.l.bf16 %v846_v60  ;;  %v613_v9 = vunpack.c.h.bf16 %v846_v60  ;;  %v684_v10 = vunpack.c.l.bf16 %v864_v61  ;;  %v833_v62 = vld [vmem:[%s1120_s0 + $0x50] sm:$0xff]  }
  0x10   :  { %v752_v13 = vpack.c.bf16 %v341_v2, %v340_v63  ;;  %v342_v14 = vmax.f32 %v161_v3, %v680_v0  ;;  %v343_v15 = vmax.f32 %v162_v4, %v681_v1  ;;  %v685_v16 = vunpack.c.h.bf16 %v864_v61  ;;  %v851_v3 = vld [vmem:[%s1120_s0 + $0xe0] sm:$0xff]   ;;  %v869_v4 = vld [vmem:[%s1120_s0 + $0x170] sm:$0xff]  }
  0x11   :  { %v163_v18 = vmax.f32 %v540_v5, %v612_v8  ;;  %v164_v19 = vmax.f32 %v541_v7, %v613_v9  ;;  %v544_v20 = vunpack.c.l.bf16 %v829_v6  ;;  %v545_v21 = vunpack.c.h.bf16 %v829_v6  ;;  %v834_v9 = vld [vmem:[%s1120_s0 + $0x58] sm:$0xff]  }
  0x12   :  { %879 = vst [vmem:[%s1121_s1 + $0x18] sm:$0xff] %v752_v13   ;;  %v757_v23 = vpack.c.bf16 %v343_v15, %v342_v14  ;;  %v616_v24 = vunpack.c.l.bf16 %v847_v11  ;;  %v617_v25 = vunpack.c.h.bf16 %v847_v11  ;;  %v688_v26 = vunpack.c.l.bf16 %v865_v12  ;;  %v852_v14 = vld [vmem:[%s1120_s0 + $0xe8] sm:$0xff]  }
  0x13   :  { %v344_v28 = vmax.f32 %v163_v18, %v684_v10  ;;  %v345_v29 = vmax.f32 %v164_v19, %v685_v16  ;;  %v689_v30 = vunpack.c.h.bf16 %v865_v12  ;;  %v548_v31 = vunpack.c.l.bf16 %v830_v17  ;;  %v870_v19 = vld [vmem:[%s1120_s0 + $0x178] sm:$0xff]  }
  0x14   :  { %880 = vst [vmem:[%s1121_s1 + $0x20] sm:$0xff] %v757_v23   ;;  %v165_v33 = vmax.f32 %v544_v20, %v616_v24  ;;  %v166_v34 = vmax.f32 %v545_v21, %v617_v25  ;;  %v549_v35 = vunpack.c.h.bf16 %v830_v17  ;;  %v620_v36 = vunpack.c.l.bf16 %v848_v22  ;;  %v835_v24 = vld [vmem:[%s1120_s0 + $0x60] sm:$0xff]  }
  0x15   :  { %v762_v38 = vpack.c.bf16 %v345_v29, %v344_v28  ;;  %v621_v39 = vunpack.c.h.bf16 %v848_v22  ;;  %v692_v40 = vunpack.c.l.bf16 %v866_v27  ;;  %v693_v41 = vunpack.c.h.bf16 %v866_v27  ;;  %v853_v29 = vld [vmem:[%s1120_s0 + $0xf0] sm:$0xff]  }
  0x16   :  { %v346_v43 = vmax.f32 %v165_v33, %v688_v26  ;;  %v347_v44 = vmax.f32 %v166_v34, %v689_v30  ;;  %v167_v45 = vmax.f32 %v548_v31, %v620_v36  ;;  %v552_v46 = vunpack.c.l.bf16 %v831_v32  ;;  %v871_v34 = vld [vmem:[%s1120_s0 + $0x180] sm:$0xff]  }
  0x17   :  { %881 = vst [vmem:[%s1121_s1 + $0x28] sm:$0xff] %v762_v38   ;;  %v168_v48 = vmax.f32 %v549_v35, %v621_v39  ;;  %v553_v49 = vunpack.c.h.bf16 %v831_v32  ;;  %v624_v50 = vunpack.c.l.bf16 %v849_v37  ;;  %v625_v51 = vunpack.c.h.bf16 %v849_v37  ;;  %v836_v39 = vld [vmem:[%s1120_s0 + $0x68] sm:$0xff]  }
  0x18   :  { %v767_v54 = vpack.c.bf16 %v347_v44, %v346_v43  ;;  %v348_v55 = vmax.f32 %v167_v45, %v692_v40  ;;  %v696_v56 = vunpack.c.l.bf16 %v867_v42  ;;  %v697_v57 = vunpack.c.h.bf16 %v867_v42  ;;  %v854_v44 = vld [vmem:[%s1120_s0 + $0xf8] sm:$0xff]   ;;  %v872_v45 = vld [vmem:[%s1120_s0 + $0x188] sm:$0xff]  }
  0x19   :  { %v349_v58 = vmax.f32 %v168_v48, %v693_v41  ;;  %v169_v59 = vmax.f32 %v552_v46, %v624_v50  ;;  %v170_v60 = vmax.f32 %v553_v49, %v625_v51  ;;  %v556_v61 = vunpack.c.l.bf16 %v832_v47 }
  0x1a   :  { %882 = vst [vmem:[%s1121_s1 + $0x30] sm:$0xff] %v767_v54   ;;  %v557_v63 = vunpack.c.h.bf16 %v832_v47  ;;  %v628_v0 = vunpack.c.l.bf16 %v850_v52  ;;  %v629_v1 = vunpack.c.h.bf16 %v850_v52  ;;  %v700_v2 = vunpack.c.l.bf16 %v868_v53  ;;  %v837_v54 = vld [vmem:[%s1120_s0 + $0x70] sm:$0xff]  }
  0x1b   :  { %v772_v5 = vpack.c.bf16 %v349_v58, %v348_v55  ;;  %v350_v6 = vmax.f32 %v169_v59, %v696_v56  ;;  %v351_v7 = vmax.f32 %v170_v60, %v697_v57  ;;  %v701_v8 = vunpack.c.h.bf16 %v868_v53  ;;  %v855_v59 = vld [vmem:[%s1120_s0 + $0x100] sm:$0xff]   ;;  %v873_v60 = vld [vmem:[%s1120_s0 + $0x190] sm:$0xff]  }
  0x1c   :  { %v171_v10 = vmax.f32 %v556_v61, %v628_v0  ;;  %v172_v11 = vmax.f32 %v557_v63, %v629_v1  ;;  %v560_v12 = vunpack.c.l.bf16 %v833_v62  ;;  %v561_v13 = vunpack.c.h.bf16 %v833_v62  ;;  %v838_v1 = vld [vmem:[%s1120_s0 + $0x78] sm:$0xff]  }
  0x1d   :  { %883 = vst [vmem:[%s1121_s1 + $0x38] sm:$0xff] %v772_v5   ;;  %v777_v15 = vpack.c.bf16 %v351_v7, %v350_v6  ;;  %v632_v16 = vunpack.c.l.bf16 %v851_v3  ;;  %v633_v17 = vunpack.c.h.bf16 %v851_v3  ;;  %v704_v18 = vunpack.c.l.bf16 %v869_v4  ;;  %v856_v6 = vld [vmem:[%s1120_s0 + $0x108] sm:$0xff]  }
  0x1e   :  { %v352_v20 = vmax.f32 %v171_v10, %v700_v2  ;;  %v353_v21 = vmax.f32 %v172_v11, %v701_v8  ;;  %v705_v22 = vunpack.c.h.bf16 %v869_v4  ;;  %v564_v23 = vunpack.c.l.bf16 %v834_v9  ;;  %v874_v11 = vld [vmem:[%s1120_s0 + $0x198] sm:$0xff]  }
  0x1f   :  { %884 = vst [vmem:[%s1121_s1 + $0x40] sm:$0xff] %v777_v15   ;;  %v173_v25 = vmax.f32 %v560_v12, %v632_v16  ;;  %v174_v26 = vmax.f32 %v561_v13, %v633_v17  ;;  %v565_v27 = vunpack.c.h.bf16 %v834_v9  ;;  %v636_v28 = vunpack.c.l.bf16 %v852_v14  ;;  %v839_v16 = vld [vmem:[%s1120_s0 + $0x80] sm:$0xff]  }
  0x20   :  { %v782_v30 = vpack.c.bf16 %v353_v21, %v352_v20  ;;  %v637_v31 = vunpack.c.h.bf16 %v852_v14  ;;  %v708_v32 = vunpack.c.l.bf16 %v870_v19  ;;  %v709_v33 = vunpack.c.h.bf16 %v870_v19  ;;  %v857_v21 = vld [vmem:[%s1120_s0 + $0x110] sm:$0xff]  }
  0x21   :  { %v354_v35 = vmax.f32 %v173_v25, %v704_v18  ;;  %v355_v36 = vmax.f32 %v174_v26, %v705_v22  ;;  %v175_v37 = vmax.f32 %v564_v23, %v636_v28  ;;  %v568_v38 = vunpack.c.l.bf16 %v835_v24  ;;  %v875_v26 = vld [vmem:[%s1120_s0 + $0x1a0] sm:$0xff]  }
  0x22   :  { %885 = vst [vmem:[%s1121_s1 + $0x48] sm:$0xff] %v782_v30   ;;  %v176_v40 = vmax.f32 %v565_v27, %v637_v31  ;;  %v569_v41 = vunpack.c.h.bf16 %v835_v24  ;;  %v640_v42 = vunpack.c.l.bf16 %v853_v29  ;;  %v641_v43 = vunpack.c.h.bf16 %v853_v29  ;;  %v840_v31 = vld [vmem:[%s1120_s0 + $0x88] sm:$0xff]  }
  0x23   :  { %v787_v46 = vpack.c.bf16 %v355_v36, %v354_v35  ;;  %v356_v47 = vmax.f32 %v175_v37, %v708_v32  ;;  %v712_v48 = vunpack.c.l.bf16 %v871_v34  ;;  %v713_v49 = vunpack.c.h.bf16 %v871_v34  ;;  %v858_v36 = vld [vmem:[%s1120_s0 + $0x118] sm:$0xff]   ;;  %v876_v37 = vld [vmem:[%s1120_s0 + $0x1a8] sm:$0xff]  }
  0x24   :  { %v357_v50 = vmax.f32 %v176_v40, %v709_v33  ;;  %v177_v51 = vmax.f32 %v568_v38, %v640_v42  ;;  %v178_v52 = vmax.f32 %v569_v41, %v641_v43  ;;  %v572_v53 = vunpack.c.l.bf16 %v836_v39 }
  0x25   :  { %886 = vst [vmem:[%s1121_s1 + $0x50] sm:$0xff] %v787_v46   ;;  %v573_v55 = vunpack.c.h.bf16 %v836_v39  ;;  %v644_v56 = vunpack.c.l.bf16 %v854_v44  ;;  %v645_v57 = vunpack.c.h.bf16 %v854_v44  ;;  %v716_v58 = vunpack.c.l.bf16 %v872_v45 }
  0x26   :  { %v792_v61 = vpack.c.bf16 %v357_v50, %v356_v47  ;;  %v358_v62 = vmax.f32 %v177_v51, %v712_v48  ;;  %v359_v63 = vmax.f32 %v178_v52, %v713_v49  ;;  %v717_v0 = vunpack.c.h.bf16 %v872_v45 }
  0x27   :  { %v179_v2 = vmax.f32 %v572_v53, %v644_v56  ;;  %v180_v3 = vmax.f32 %v573_v55, %v645_v57  ;;  %v576_v4 = vunpack.c.l.bf16 %v837_v54  ;;  %v577_v5 = vunpack.c.h.bf16 %v837_v54 }
  0x28   :  { %887 = vst [vmem:[%s1121_s1 + $0x58] sm:$0xff] %v792_v61   ;;  %v797_v7 = vpack.c.bf16 %v359_v63, %v358_v62  ;;  %v648_v8 = vunpack.c.l.bf16 %v855_v59  ;;  %v649_v9 = vunpack.c.h.bf16 %v855_v59  ;;  %v720_v10 = vunpack.c.l.bf16 %v873_v60 }
  0x29   :  { %v360_v12 = vmax.f32 %v179_v2, %v716_v58  ;;  %v361_v13 = vmax.f32 %v180_v3, %v717_v0  ;;  %v721_v14 = vunpack.c.h.bf16 %v873_v60  ;;  %v580_v15 = vunpack.c.l.bf16 %v838_v1 }
  0x2a   :  { %888 = vst [vmem:[%s1121_s1 + $0x60] sm:$0xff] %v797_v7   ;;  %v181_v17 = vmax.f32 %v576_v4, %v648_v8  ;;  %v182_v18 = vmax.f32 %v577_v5, %v649_v9  ;;  %v581_v19 = vunpack.c.h.bf16 %v838_v1  ;;  %v652_v20 = vunpack.c.l.bf16 %v856_v6 }
  0x2b   :  { %v802_v22 = vpack.c.bf16 %v361_v13, %v360_v12  ;;  %v653_v23 = vunpack.c.h.bf16 %v856_v6  ;;  %v724_v24 = vunpack.c.l.bf16 %v874_v11  ;;  %v725_v25 = vunpack.c.h.bf16 %v874_v11 }
  0x2c   :  { %v362_v27 = vmax.f32 %v181_v17, %v720_v10  ;;  %v363_v28 = vmax.f32 %v182_v18, %v721_v14  ;;  %v183_v29 = vmax.f32 %v580_v15, %v652_v20  ;;  %v584_v30 = vunpack.c.l.bf16 %v839_v16 }
  0x2d   :  { %889 = vst [vmem:[%s1121_s1 + $0x68] sm:$0xff] %v802_v22   ;;  %v184_v32 = vmax.f32 %v581_v19, %v653_v23  ;;  %v585_v33 = vunpack.c.h.bf16 %v839_v16  ;;  %v656_v34 = vunpack.c.l.bf16 %v857_v21  ;;  %v657_v35 = vunpack.c.h.bf16 %v857_v21 }
  0x2e   :  { %v807_v38 = vpack.c.bf16 %v363_v28, %v362_v27  ;;  %v364_v39 = vmax.f32 %v183_v29, %v724_v24  ;;  %v728_v40 = vunpack.c.l.bf16 %v875_v26  ;;  %v729_v41 = vunpack.c.h.bf16 %v875_v26 }
  0x2f   :  { %v365_v42 = vmax.f32 %v184_v32, %v725_v25  ;;  %v185_v43 = vmax.f32 %v584_v30, %v656_v34  ;;  %v186_v44 = vmax.f32 %v585_v33, %v657_v35  ;;  %v588_v45 = vunpack.c.l.bf16 %v840_v31 }
  0x30   :  { %890 = vst [vmem:[%s1121_s1 + $0x70] sm:$0xff] %v807_v38   ;;  %v589_v46 = vunpack.c.h.bf16 %v840_v31  ;;  %v660_v47 = vunpack.c.l.bf16 %v858_v36  ;;  %v661_v48 = vunpack.c.h.bf16 %v858_v36  ;;  %v732_v49 = vunpack.c.l.bf16 %v876_v37 }
  0x31   :  { %v812_v50 = vpack.c.bf16 %v365_v42, %v364_v39  ;;  %v366_v51 = vmax.f32 %v185_v43, %v728_v40  ;;  %v367_v52 = vmax.f32 %v186_v44, %v729_v41  ;;  %v733_v53 = vunpack.c.h.bf16 %v876_v37 }
  0x32   :  { %v187_v54 = vmax.f32 %v588_v45, %v660_v47  ;;  %v188_v55 = vmax.f32 %v589_v46, %v661_v48 }
  0x33   :  { %891 = vst [vmem:[%s1121_s1 + $0x78] sm:$0xff] %v812_v50   ;;  %v817_v56 = vpack.c.bf16 %v367_v52, %v366_v51 }
  0x34   :  { %v368_v57 = vmax.f32 %v187_v54, %v732_v49  ;;  %v369_v58 = vmax.f32 %v188_v55, %v733_v53 }
  0x35   :  { %892 = vst [vmem:[%s1121_s1 + $0x80] sm:$0xff] %v817_v56  }
  0x36   :  { %v822_v59 = vpack.c.bf16 %v369_v58, %v368_v57 }
  0x38   :  { %893 = vst [vmem:[%s1121_s1 + $0x88] sm:$0xff] %v822_v59  }

// kernel: _lambda_.25
= control target key start
LH: loop header
LB: loop body
LE: loop exit
PB: predicated region body
PF: predicated region fallthrough
CT: control target
= control target key end

     0   :  { %s510_s0 = inlined_call_operand.vmem [shape: bf16[3,128,128], index: 0, kind: input, shape index: {}]   ;;  %s511_s1 = inlined_call_operand.vmem [shape: bf16[128,128], index: 1, kind: output, shape index: {}]  }
   0x1   :  { %v239_v0 = vld [vmem:[%s510_s0] sm:$0xff]   ;;  %v374_v7 = vld [vmem:[%s510_s0 + $0x8] sm:$0xff]   ;;  %v375_v14 = vld [vmem:[%s510_s0 + $0x10] sm:$0xff]  }
   0x2   :  { %v381_v1 = vld [vmem:[%s510_s0 + $0x40] sm:$0xff]   ;;  %v240_v3 = vunpack.c.l.bf16 %v239_v0  ;;  %v241_v4 = vunpack.c.h.bf16 %v239_v0  ;;  %v382_v8 = vld [vmem:[%s510_s0 + $0x48] sm:$0xff]   ;;  %v244_v12 = vunpack.c.l.bf16 %v374_v7  ;;  %v245_v13 = vunpack.c.h.bf16 %v374_v7  ;;  %v383_v19 = vld [vmem:[%s510_s0 + $0x50] sm:$0xff]  }
   0x3   :  { %v389_v2 = vld [vmem:[%s510_s0 + $0x80] sm:$0xff]   ;;  %v272_v5 = vunpack.c.l.bf16 %v381_v1  ;;  %v273_v6 = vunpack.c.h.bf16 %v381_v1  ;;  %v390_v9 = vld [vmem:[%s510_s0 + $0x88] sm:$0xff]   ;;  %v276_v17 = vunpack.c.l.bf16 %v382_v8  ;;  %v277_v18 = vunpack.c.h.bf16 %v382_v8  ;;  %v391_v20 = vld [vmem:[%s510_s0 + $0x90] sm:$0xff]  }
   0x4   :  { %v304_v10 = vunpack.c.l.bf16 %v389_v2  ;;  %v305_v11 = vunpack.c.h.bf16 %v389_v2  ;;  %v308_v21 = vunpack.c.l.bf16 %v390_v9  ;;  %v309_v22 = vunpack.c.h.bf16 %v390_v9  ;;  %v376_v25 = vld [vmem:[%s510_s0 + $0x18] sm:$0xff]   ;;  %v377_v40 = vld [vmem:[%s510_s0 + $0x20] sm:$0xff]   ;;  %v378_v55 = vld [vmem:[%s510_s0 + $0x28] sm:$0xff]  }
   0x5   :  { %v73_v15 = vmax.f32 %v240_v3, %v272_v5  ;;  %v74_v16 = vmax.f32 %v241_v4, %v273_v6  ;;  %v248_v23 = vunpack.c.l.bf16 %v375_v14  ;;  %v249_v24 = vunpack.c.h.bf16 %v375_v14  ;;  %v384_v30 = vld [vmem:[%s510_s0 + $0x58] sm:$0xff]   ;;  %v385_v45 = vld [vmem:[%s510_s0 + $0x60] sm:$0xff]   ;;  %v386_v60 = vld [vmem:[%s510_s0 + $0x68] sm:$0xff]  }
   0x6   :  { %v75_v28 = vmax.f32 %v244_v12, %v276_v17  ;;  %v76_v29 = vmax.f32 %v245_v13, %v277_v18  ;;  %v280_v31 = vunpack.c.l.bf16 %v383_v19  ;;  %v281_v32 = vunpack.c.h.bf16 %v383_v19  ;;  %v392_v35 = vld [vmem:[%s510_s0 + $0x98] sm:$0xff]   ;;  %v393_v50 = vld [vmem:[%s510_s0 + $0xa0] sm:$0xff]   ;;  %v394_v61 = vld [vmem:[%s510_s0 + $0xa8] sm:$0xff]  }
   0x7   :  { %v154_v26 = vmax.f32 %v73_v15, %v304_v10  ;;  %v155_v27 = vmax.f32 %v74_v16, %v305_v11  ;;  %v312_v33 = vunpack.c.l.bf16 %v391_v20  ;;  %v313_v34 = vunpack.c.h.bf16 %v391_v20  ;;  %v379_v6 = vld [vmem:[%s510_s0 + $0x30] sm:$0xff]   ;;  %v380_v17 = vld [vmem:[%s510_s0 + $0x38] sm:$0xff]  }
   0x8   :  { %v156_v37 = vmax.f32 %v75_v28, %v308_v21  ;;  %v157_v38 = vmax.f32 %v76_v29, %v309_v22  ;;  %v252_v39 = vunpack.c.l.bf16 %v376_v25  ;;  %v77_v41 = vmax.f32 %v248_v23, %v280_v31  ;;  %v387_v11 = vld [vmem:[%s510_s0 + $0x70] sm:$0xff]   ;;  %v388_v22 = vld [vmem:[%s510_s0 + $0x78] sm:$0xff]  }
   0x9   :  { %v337_v36 = vpack.c.bf16 %v155_v27, %v154_v26  ;;  %v78_v42 = vmax.f32 %v249_v24, %v281_v32  ;;  %v253_v43 = vunpack.c.h.bf16 %v376_v25  ;;  %v284_v44 = vunpack.c.l.bf16 %v384_v30  ;;  %v395_v12 = vld [vmem:[%s510_s0 + $0xb0] sm:$0xff]   ;;  %v396_v27 = vld [vmem:[%s510_s0 + $0xb8] sm:$0xff]  }
   0xa   :  { %v342_v46 = vpack.c.bf16 %v157_v38, %v156_v37  ;;  %v285_v47 = vunpack.c.h.bf16 %v384_v30  ;;  %v316_v48 = vunpack.c.l.bf16 %v392_v35  ;;  %v317_v49 = vunpack.c.h.bf16 %v392_v35 }
   0xb   :  { %338 = vst [vmem:[%s511_s1] sm:$0xff] %v337_v36   ;;  %v158_v51 = vmax.f32 %v77_v41, %v312_v33  ;;  %v159_v52 = vmax.f32 %v78_v42, %v313_v34  ;;  %v79_v53 = vmax.f32 %v252_v39, %v284_v44  ;;  %v256_v54 = vunpack.c.l.bf16 %v377_v40 }
   0xc   :  { %397 = vst [vmem:[%s511_s1 + $0x8] sm:$0xff] %v342_v46   ;;  %v80_v56 = vmax.f32 %v253_v43, %v285_v47  ;;  %v257_v57 = vunpack.c.h.bf16 %v377_v40  ;;  %v288_v58 = vunpack.c.l.bf16 %v385_v45  ;;  %v289_v59 = vunpack.c.h.bf16 %v385_v45 }
   0xd   :  { %v347_v62 = vpack.c.bf16 %v159_v52, %v158_v51  ;;  %v160_v63 = vmax.f32 %v79_v53, %v316_v48  ;;  %v320_v0 = vunpack.c.l.bf16 %v393_v50  ;;  %v321_v1 = vunpack.c.h.bf16 %v393_v50 }
   0xe   :  { %v161_v2 = vmax.f32 %v80_v56, %v317_v49  ;;  %v81_v3 = vmax.f32 %v256_v54, %v288_v58  ;;  %v82_v4 = vmax.f32 %v257_v57, %v289_v59  ;;  %v260_v5 = vunpack.c.l.bf16 %v378_v55 }
   0xf   :  { %398 = vst [vmem:[%s511_s1 + $0x10] sm:$0xff] %v347_v62   ;;  %v261_v7 = vunpack.c.h.bf16 %v378_v55  ;;  %v292_v8 = vunpack.c.l.bf16 %v386_v60  ;;  %v293_v9 = vunpack.c.h.bf16 %v386_v60  ;;  %v324_v10 = vunpack.c.l.bf16 %v394_v61 }
  0x10   :  { %v352_v13 = vpack.c.bf16 %v161_v2, %v160_v63  ;;  %v162_v14 = vmax.f32 %v81_v3, %v320_v0  ;;  %v163_v15 = vmax.f32 %v82_v4, %v321_v1  ;;  %v325_v16 = vunpack.c.h.bf16 %v394_v61 }
  0x11   :  { %v83_v18 = vmax.f32 %v260_v5, %v292_v8  ;;  %v84_v19 = vmax.f32 %v261_v7, %v293_v9  ;;  %v264_v20 = vunpack.c.l.bf16 %v379_v6  ;;  %v265_v21 = vunpack.c.h.bf16 %v379_v6 }
  0x12   :  { %399 = vst [vmem:[%s511_s1 + $0x18] sm:$0xff] %v352_v13   ;;  %v357_v23 = vpack.c.bf16 %v163_v15, %v162_v14  ;;  %v296_v24 = vunpack.c.l.bf16 %v387_v11  ;;  %v297_v25 = vunpack.c.h.bf16 %v387_v11  ;;  %v328_v26 = vunpack.c.l.bf16 %v395_v12 }
  0x13   :  { %v164_v28 = vmax.f32 %v83_v18, %v324_v10  ;;  %v165_v29 = vmax.f32 %v84_v19, %v325_v16  ;;  %v329_v30 = vunpack.c.h.bf16 %v395_v12  ;;  %v268_v31 = vunpack.c.l.bf16 %v380_v17 }
  0x14   :  { %400 = vst [vmem:[%s511_s1 + $0x20] sm:$0xff] %v357_v23   ;;  %v85_v32 = vmax.f32 %v264_v20, %v296_v24  ;;  %v86_v33 = vmax.f32 %v265_v21, %v297_v25  ;;  %v269_v34 = vunpack.c.h.bf16 %v380_v17  ;;  %v300_v35 = vunpack.c.l.bf16 %v388_v22 }
  0x15   :  { %v362_v36 = vpack.c.bf16 %v165_v29, %v164_v28  ;;  %v301_v37 = vunpack.c.h.bf16 %v388_v22  ;;  %v332_v38 = vunpack.c.l.bf16 %v396_v27  ;;  %v333_v39 = vunpack.c.h.bf16 %v396_v27 }
  0x16   :  { %v166_v40 = vmax.f32 %v85_v32, %v328_v26  ;;  %v167_v41 = vmax.f32 %v86_v33, %v329_v30  ;;  %v87_v42 = vmax.f32 %v268_v31, %v300_v35 }
  0x17   :  { %401 = vst [vmem:[%s511_s1 + $0x28] sm:$0xff] %v362_v36   ;;  %v88_v43 = vmax.f32 %v269_v34, %v301_v37 }
  0x18   :  { %v367_v44 = vpack.c.bf16 %v167_v41, %v166_v40  ;;  %v168_v45 = vmax.f32 %v87_v42, %v332_v38 }
  0x19   :  { %v169_v46 = vmax.f32 %v88_v43, %v333_v39 }
  0x1a   :  { %402 = vst [vmem:[%s511_s1 + $0x30] sm:$0xff] %v367_v44  }
  0x1b   :  { %v372_v47 = vpack.c.bf16 %v169_v46, %v168_v45 }
  0x1d   :  { %403 = vst [vmem:[%s511_s1 + $0x38] sm:$0xff] %v372_v47  }

// kernel: _lambda_.26
= control target key start
LH: loop header
LB: loop body
LE: loop exit
PB: predicated region body
PF: predicated region fallthrough
CT: control target
= control target key end

     0   :  { %s839_s15 = smov 0   ;;  %s841_s16 = smov 0   ;;  %s912_s0 = inlined_call_operand.vmem [shape: bf16[128,128], index: 0, kind: input, shape index: {}]   ;;  %s913_s1 = inlined_call_operand.vmem [shape: bf16[128,128], index: 1, kind: input, shape index: {}]   ;;  %s914_s2 = inlined_call_operand.vmem [shape: f32[1,128], index: 2, kind: input, shape index: {}]   ;;  %s915_s3 = inlined_call_operand.vmem [shape: f32[1,128], index: 3, kind: input, shape index: {}]   ;;  %s916_s4 = inlined_call_operand.vmem [shape: bf16[128,128], index: 4, kind: output, shape index: {}]  }
   0x1   :  { %s843_s17 = smov 0  }
   0x2 LB: > { %s33_s18 = sadd.s32 1, %s808_s16  ;;  %p650_p0 = scmp.ge.s32.totalorder %s812_s17, 1  ;;  %s812_s17 = sphi %s843_s17, %s14_s17   ;;  %s808_s16 = sphi %s841_s16, %s918_s16   ;;  %s804_s15 = sphi %s839_s15, %s917_s15  }
   0x3   : > { %p35_p1 = scmp.ge.s32.totalorder %s33_s18, 2  ;;  %p221_p2 = scmp.lt.s32.totalorder %s812_s17, 3 }
   0x5   : > { %s920_s18 = smov (%p35_p1, %s33_s18), 0  ;;  %p222_p3 = pnand %p650_p0, %p221_p2 }
   0x6   : > { %s651_s27 = sshll.u32 (!%p222_p3), %s804_s15, 3 }
   0x7   : > { %225 = sbr.rel (%p222_p3) target bundleno = 195 (0xc3), region = 36  ;;  %p268_p4 = scmp.lt.s32.totalorder (!%p222_p3), %s651_s27, 15 }
   0xc   : > { %v716_v0 = vld [vmem:[%s913_s1 + $0x38] sm:$0xff]  ;;  %v715_v1 = vld [vmem:[%s913_s1 + $0x30] sm:$0xff]  ;;  %v714_v2 = vld [vmem:[%s913_s1 + $0x28] sm:$0xff]  ;;  %s922_s27 = smov (!%p268_p4, %s651_s27), 15 }
   0xd   : > { %416 = vmatpush.bf16.msra.mxu0 %v716_v0  ;;  %740 = vmatpush.bf16.msra.mxu1 %v716_v0  ;;  %v713_v3 = vld [vmem:[%s913_s1 + $0x20] sm:$0xff]  ;;  %v712_v4 = vld [vmem:[%s913_s1 + $0x18] sm:$0xff]  ;;  %v711_v5 = vld [vmem:[%s913_s1 + $0x10] sm:$0xff]  ;;  %s652_s8 = sshll.u32 %s922_s27, 2 }
   0xe   : > { %741 = vmatpush.bf16.msra.mxu2 %v716_v0  ;;  %742 = vmatpush.bf16.msra.mxu3 %v716_v0  ;;  %v710_v6 = vld [vmem:[%s913_s1 + $0x8] sm:$0xff]  ;;  %v709_v7 = vld [vmem:[%s913_s1] sm:$0xff]  ;;  %s274_s13 = scalar_lea.vmem %s912_s0, %s652_s8  ;;  %s298_s23 = scalar_lea.vmem %s916_s4, %s652_s8 }
   0xf   : > { %v705_v8 = vld [vmem:[%s274_s13] sm:$0xff]  ;;  %v706_v9 = vld [vmem:[%s274_s13 + $0x8] sm:$0xff]  ;;  %v707_v10 = vld [vmem:[%s274_s13 + $0x10] sm:$0xff] }
  0x10   : > { %v708_v11 = vld [vmem:[%s274_s13 + $0x18] sm:$0xff]  ;;  %v788_v14 = vld [vmem:[%s914_s2] ss:$0 sm:$0xff] }
  0x11   : > { %417 = vmatpush.bf16.msra.mxu0 %v715_v1  ;;  %743 = vmatpush.bf16.msra.mxu1 %v715_v1  ;;  %v789_v16 = vld [vmem:[%s915_s3] ss:$0 sm:$0xff] }
  0x12   : > { %744 = vmatpush.bf16.msra.mxu2 %v715_v1  ;;  %745 = vmatpush.bf16.msra.mxu3 %v715_v1 }
  0x15   : > { %418 = vmatpush.bf16.msra.mxu0 %v714_v2  ;;  %746 = vmatpush.bf16.msra.mxu1 %v714_v2 }
  0x16   : > { %747 = vmatpush.bf16.msra.mxu2 %v714_v2  ;;  %748 = vmatpush.bf16.msra.mxu3 %v714_v2 }
  0x19   : > { %419 = vmatpush.bf16.msra.mxu0 %v713_v3  ;;  %749 = vmatpush.bf16.msra.mxu1 %v713_v3 }
  0x1a   : > { %750 = vmatpush.bf16.msra.mxu2 %v713_v3  ;;  %751 = vmatpush.bf16.msra.mxu3 %v713_v3 }
  0x1d   : > { %420 = vmatpush.bf16.msra.mxu0 %v712_v4  ;;  %752 = vmatpush.bf16.msra.mxu1 %v712_v4 }
  0x1e   : > { %753 = vmatpush.bf16.msra.mxu2 %v712_v4  ;;  %754 = vmatpush.bf16.msra.mxu3 %v712_v4 }
  0x21   : > { %421 = vmatpush.bf16.msra.mxu0 %v711_v5  ;;  %755 = vmatpush.bf16.msra.mxu1 %v711_v5 }
  0x22   : > { %756 = vmatpush.bf16.msra.mxu2 %v711_v5  ;;  %757 = vmatpush.bf16.msra.mxu3 %v711_v5 }
  0x25   : > { %422 = vmatpush.bf16.msra.mxu0 %v710_v6  ;;  %758 = vmatpush.bf16.msra.mxu1 %v710_v6 }
  0x26   : > { %759 = vmatpush.bf16.msra.mxu2 %v710_v6  ;;  %760 = vmatpush.bf16.msra.mxu3 %v710_v6 }
  0x29   : > { %423 = vmatpush.bf16.msra.mxu0 %v709_v7  ;;  %761 = vmatpush.bf16.msra.mxu1 %v709_v7 }
  0x2a   : > { %762 = vmatpush.bf16.msra.mxu2 %v709_v7  ;;  %763 = vmatpush.bf16.msra.mxu3 %v709_v7 }
  0x2c   : > { %424 = vmatmul.bf16.vlgmr.msra.gmra.mxu0 %v705_v8  ;;  %429 = vmatmul.bf16.vlgmr.msra.gmra.mxu1 %v706_v9 }
  0x2d   : > { %434 = vmatmul.bf16.vlgmr.msra.gmra.mxu2 %v707_v10  ;;  %439 = vmatmul.bf16.vlgmr.msra.gmra.mxu3 %v708_v11 }
  0xa9   : > { %v425_v12 = vpop.f32.mrf.mxu0  ;;  %v430_v13 = vpop.f32.mrf.mxu1 }
  0xaa   : > { %v476_v15 = vmul.f32 %v788_v14, %v425_v12  ;;  %v478_v17 = vmul.f32 %v788_v14, %v430_v13 }
  0xac   : > { %v488_v22 = vadd.f32 %v789_v16, %v476_v15  ;;  %v490_v23 = vadd.f32 %v789_v16, %v478_v17 }
  0xae   : > { %v496_v30 = vmax.f32 %v488_v22, 0.0  ;;  %v498_v31 = vmax.f32 %v490_v23, 0.0 }
  0xb0   : > { %v435_v18 = vpop.f32.mrf.mxu2  ;;  %v440_v19 = vpop.f32.mrf.mxu3 }
  0xb1   : > { %v427_v20 = vpop.f32.mrf.mxu0  ;;  %v432_v21 = vpop.f32.mrf.mxu1  ;;  %v480_v28 = vmul.f32 %v788_v14, %v435_v18  ;;  %v482_v29 = vmul.f32 %v788_v14, %v440_v19 }
  0xb2   : > { %v477_v24 = vmul.f32 %v788_v14, %v427_v20  ;;  %v479_v25 = vmul.f32 %v788_v14, %v432_v21 }
  0xb3   : > { %v492_v38 = vadd.f32 %v789_v16, %v480_v28  ;;  %v494_v39 = vadd.f32 %v789_v16, %v482_v29 }
  0xb4   : > { %v489_v26 = vadd.f32 %v789_v16, %v477_v24  ;;  %v491_v27 = vadd.f32 %v789_v16, %v479_v25 }
  0xb5   : > { %v500_v44 = vmax.f32 %v492_v38, 0.0  ;;  %v502_v45 = vmax.f32 %v494_v39, 0.0 }
  0xb6   : > { %v497_v32 = vmax.f32 %v489_v26, 0.0  ;;  %v499_v33 = vmax.f32 %v491_v27, 0.0 }
  0xb8   : > { %v720_v34 = vpack.c.bf16 %v497_v32, %v496_v30  ;;  %v725_v35 = vpack.c.bf16 %v499_v33, %v498_v31  ;;  %v437_v36 = vpop.f32.mrf.mxu2  ;;  %v442_v37 = vpop.f32.mrf.mxu3 }
  0xb9   : > { %v481_v40 = vmul.f32 %v788_v14, %v437_v36  ;;  %v483_v41 = vmul.f32 %v788_v14, %v442_v37 }
  0xba   : > { %721 = vst [vmem:[%s298_s23] sm:$0xff] %v720_v34  }
  0xbb   : > { %737 = vst [vmem:[%s298_s23 + $0x8] sm:$0xff] %v725_v35   ;;  %v493_v42 = vadd.f32 %v789_v16, %v481_v40  ;;  %v495_v43 = vadd.f32 %v789_v16, %v483_v41 }
  0xbd   : > { %v501_v46 = vmax.f32 %v493_v42, 0.0  ;;  %v503_v47 = vmax.f32 %v495_v43, 0.0 }
  0xbf   : > { %v730_v48 = vpack.c.bf16 %v501_v46, %v500_v44  ;;  %v735_v49 = vpack.c.bf16 %v503_v47, %v502_v45 }
  0xc1   : > { %738 = vst [vmem:[%s298_s23 + $0x10] sm:$0xff] %v730_v48  }
  0xc2   : > { %739 = vst [vmem:[%s298_s23 + $0x18] sm:$0xff] %v735_v49  }
  0xc3 PF: > { %s14_s17 = sadd.s32 1, %s812_s17   ;;  %s917_s15 = smov %s808_s16 }
  0xc4   : > { %p11_p5 = scmp.ge.s32.totalorder %s14_s17, 4   ;;  %s918_s16 = smov %s920_s18 }
  0xc6   :  { %13 = sbr.rel (!%p11_p5) target bundleno = 2 (0x2), region = 83 }

// kernel: _lambda_.27
= control target key start
LH: loop header
LB: loop body
LE: loop exit
PB: predicated region body
PF: predicated region fallthrough
CT: control target
= control target key end

     0   :  { %9 = vsyncpa [#allocation4], 0  ;;  %s1479_s0 = inlined_call_operand.vmem [shape: bf16[128,384], index: 0, kind: input, shape index: {}]   ;;  %s1480_s1 = inlined_call_operand.vmem [shape: bf16[384,128], index: 1, kind: input, shape index: {}]   ;;  %s1481_s2 = inlined_call_operand.hbm [shape: f32[1,128], index: 2, kind: input, shape index: {}]   ;;  %s1482_s3 = inlined_call_operand.hbm [shape: f32[1,128], index: 3, kind: input, shape index: {}]   ;;  %s1483_s4 = inlined_call_operand.vmem [shape: bf16[128,128], index: 4, kind: output, shape index: {}]  }
   0x1   :  { %10 = vsyncpa [#allocation6], 0  ;;  %s1296_s15 = smov 0   ;;  %s1298_s16 = smov 0  }
   0x2   :  { %s1300_s17 = smov 0  }
   0x3 LB: > { %s902_s18 = sadd.s32 4294967295, %s1267_s17   ;;  %s35_s19 = sadd.s32 1, %s1263_s16  ;;  %s1267_s17 = sphi %s1300_s17, %s16_s17   ;;  %s1263_s16 = sphi %s1298_s16, %s1487_s16   ;;  %s1259_s15 = sphi %s1296_s15, %s1486_s15  }
   0x4   : > { %p37_p0 = scmp.ge.s32.totalorder %s35_s19, 2  ;;  %p904_p1 = scmp.ge.s32.totalorder %s1267_s17, 1 }
   0x5   : > { %p178_p2 = scmp.lt.s32.totalorder %s1267_s17, 3  ;;  %p1321_p4 = scmp.eq.s32.totalorder %s902_s18, 0 }
   0x6   : > { %s1489_s19 = smov (%p37_p0, %s35_s19), 0  ;;  %s202_s24 = sshll.u32 %s1481_s2, 4  ;;  %s203_s24 = int_to_ptr.hbm [resolvable:$true] %s202_s24 }
   0x7   : > { %p1317_p3 = pnand %p904_p1, %p178_p2  ;;  %s1269_s25 = smov [#allocation3]  }
   0x8   : > { %s204_s26 = sshll.u32 %s1269_s25, 4  ;;  %s215_s29 = sshll.u32 %s1482_s3, 4  ;;  %s205_s26 = int_to_ptr.vmem [resolvable:$true] %s204_s26  ;;  %s216_s29 = int_to_ptr.hbm [resolvable:$true] %s215_s29 }
   0x9   : > { %p1138_p5 = pneg %p1317_p3  ;;  %s1270_s30 = smov [#allocation5]  }
   0xa   : > { %s217_s5 = sshll.u32 %s1270_s30, 4  ;;  %247 = sbr.rel (%p1317_p3) target bundleno = 251 (0xfb), region = 36  ;;  %s218_s5 = int_to_ptr.vmem [resolvable:$true] %s217_s5 }
   0xb   : > { %p1139_p6 = pnand %p1321_p4, %p1138_p5 }
   0xd   : > { %1141 = dma.hbm_to_vmem [thread:$0]  (!%p1139_p6), %s203_s24, 16, %s205_s26, [#allocation4]  }
   0xe   : > { %1144 = dma.hbm_to_vmem [thread:$0]  (!%p1139_p6), %s216_s29, 16, %s218_s5, [#allocation6]  }
   0xf   : > { %1250 = dma.done.wait (%p1321_p4), [#allocation4], 16  }
  0x10   : > { %1252 = vsyncadd (%p1321_p4), [#allocation4], 4294967280 }
  0x11   : > { %1254 = dma.done.wait (%p1321_p4), [#allocation6], 16  }
  0x12   : > { %1256 = vsyncadd (%p1321_p4), [#allocation6], 4294967280  ;;  %v1081_v0 = vld [vmem:[%s1480_s1 + $0x38] sm:$0xff]  ;;  %v1080_v3 = vld [vmem:[%s1480_s1 + $0x30] sm:$0xff]  ;;  %s912_s28 = sshll.u32 %s1259_s15, 3 }
  0x13   : > { %v1089_v1 = vld [vmem:[%s1480_s1 + $0x78] sm:$0xff]  ;;  %617 = vmatpush.bf16.msra.mxu0 %v1081_v0  ;;  %v1088_v4 = vld [vmem:[%s1480_s1 + $0x70] sm:$0xff]  ;;  %1121 = vmatpush.bf16.msra.mxu3 %v1081_v0  ;;  %v1079_v6 = vld [vmem:[%s1480_s1 + $0x28] sm:$0xff]  ;;  %p297_p7 = scmp.lt.s32.totalorder %s912_s28, 15 }
  0x14   : > { %v1097_v2 = vld [vmem:[%s1480_s1 + $0xb8] sm:$0xff]  ;;  %646 = vmatpush.bf16.msra.mxu1 %v1089_v1  ;;  %v1096_v5 = vld [vmem:[%s1480_s1 + $0xb0] sm:$0xff]  ;;  %v1087_v7 = vld [vmem:[%s1480_s1 + $0x68] sm:$0xff] }
  0x15   : > { %675 = vmatpush.bf16.msra.mxu2 %v1097_v2  ;;  %v1095_v8 = vld [vmem:[%s1480_s1 + $0xa8] sm:$0xff]  ;;  %v1078_v9 = vld [vmem:[%s1480_s1 + $0x20] sm:$0xff]  ;;  %v1077_v12 = vld [vmem:[%s1480_s1 + $0x18] sm:$0xff]  ;;  %s1491_s28 = smov (!%p297_p7, %s912_s28), 15 }
  0x16   : > { %v1086_v10 = vld [vmem:[%s1480_s1 + $0x60] sm:$0xff]  ;;  %v1085_v13 = vld [vmem:[%s1480_s1 + $0x58] sm:$0xff]  ;;  %v1076_v15 = vld [vmem:[%s1480_s1 + $0x10] sm:$0xff]  ;;  %s1129_s22 = smul.u32 12, %s1491_s28  ;;  %s915_s14 = sshll.u32 %s1491_s28, 2 }
  0x17   : > { %618 = vmatpush.bf16.msra.mxu0 %v1080_v3  ;;  %1122 = vmatpush.bf16.msra.mxu3 %v1080_v3  ;;  %v1094_v11 = vld [vmem:[%s1480_s1 + $0xa0] sm:$0xff]  ;;  %v1093_v14 = vld [vmem:[%s1480_s1 + $0x98] sm:$0xff]  ;;  %v1084_v16 = vld [vmem:[%s1480_s1 + $0x50] sm:$0xff]  ;;  %s1458_s21 = scalar_lea.vmem %s1483_s4, %s915_s14 }
  0x18   : > { %647 = vmatpush.bf16.msra.mxu1 %v1088_v4  ;;  %v1092_v17 = vld [vmem:[%s1480_s1 + $0x90] sm:$0xff]  ;;  %v1075_v18 = vld [vmem:[%s1480_s1 + $0x8] sm:$0xff]  ;;  %s1412_s6 = scalar_lea.vmem %s1479_s0, %s1129_s22  ;;  %v1074_v21 = vld [vmem:[%s1480_s1] sm:$0xff] }
  0x19   : > { %676 = vmatpush.bf16.msra.mxu2 %v1096_v5  ;;  %v1083_v19 = vld [vmem:[%s1480_s1 + $0x48] sm:$0xff]  ;;  %v1082_v22 = vld [vmem:[%s1480_s1 + $0x40] sm:$0xff]  ;;  %v920_v27 = vld [vmem:[%s1412_s6 + $0xc] sm:$0xf0] }
  0x1a   : > { %v1091_v20 = vld [vmem:[%s1480_s1 + $0x88] sm:$0xff]  ;;  %v1090_v23 = vld [vmem:[%s1480_s1 + $0x80] sm:$0xff]  ;;  %v1064_v29 = vld [vmem:[%s1412_s6 + $0x10] sm:$0xf0] }
  0x1b   : > { %619 = vmatpush.bf16.msra.mxu0 %v1079_v6  ;;  %1123 = vmatpush.bf16.msra.mxu3 %v1079_v6  ;;  %v918_v24 = vld [vmem:[%s1412_s6] sm:$0xf]  ;;  %v1063_v25 = vld [vmem:[%s1412_s6 + $0x8] sm:$0xf0]  ;;  %v1062_v26 = vld [vmem:[%s1412_s6 + $0x4] sm:$0xf] }
  0x1c   : > { %648 = vmatpush.bf16.msra.mxu1 %v1087_v7  ;;  %v926_v28 = vld [vmem:[%s1412_s6 + $0x8] sm:$0xf]  ;;  %v930_v30 = vld [vmem:[%s1412_s6 + $0x18] sm:$0xf]  ;;  %v1066_v31 = vld [vmem:[%s1412_s6 + $0x20] sm:$0xf0]  ;;  %v919_v32 = vor.u32 %v1063_v25, %v918_v24  ;;  %v923_v33 = vor.u32 %v1062_v26, %v920_v27 }
  0x1d   : > { %677 = vmatpush.bf16.msra.mxu2 %v1095_v8  ;;  %v927_v34 = vor.u32 %v1064_v29, %v926_v28  ;;  %v931_v35 = vor.u32 %v1066_v31, %v930_v30  ;;  %v1065_v36 = vld [vmem:[%s1412_s6 + $0x1c] sm:$0xf]  ;;  %v932_v37 = vld [vmem:[%s1412_s6 + $0x24] sm:$0xf0]  ;;  %v938_v38 = vld [vmem:[%s1412_s6 + $0x20] sm:$0xf] }
  0x1e   : > { %v1067_v39 = vld [vmem:[%s1412_s6 + $0x28] sm:$0xf0]  ;;  %v942_v40 = vld [vmem:[%s1412_s6 + $0x30] sm:$0xf]  ;;  %v1069_v41 = vld [vmem:[%s1412_s6 + $0x38] sm:$0xf0]  ;;  %v935_v42 = vor.u32 %v1065_v36, %v932_v37 }
  0x1f   : > { %620 = vmatpush.bf16.msra.mxu0 %v1078_v9  ;;  %1124 = vmatpush.bf16.msra.mxu3 %v1078_v9  ;;  %v939_v43 = vor.u32 %v1067_v39, %v938_v38  ;;  %v943_v44 = vor.u32 %v1069_v41, %v942_v40  ;;  %v1068_v45 = vld [vmem:[%s1412_s6 + $0x34] sm:$0xf]  ;;  %v944_v46 = vld [vmem:[%s1412_s6 + $0x3c] sm:$0xf0]  ;;  %v950_v47 = vld [vmem:[%s1412_s6 + $0x38] sm:$0xf] }
  0x20   : > { %649 = vmatpush.bf16.msra.mxu1 %v1086_v10  ;;  %v1070_v48 = vld [vmem:[%s1412_s6 + $0x40] sm:$0xf0]  ;;  %v954_v49 = vld [vmem:[%s1412_s6 + $0x48] sm:$0xf]  ;;  %v1072_v50 = vld [vmem:[%s1412_s6 + $0x50] sm:$0xf0]  ;;  %v947_v51 = vor.u32 %v1068_v45, %v944_v46 }
  0x21   : > { %678 = vmatpush.bf16.msra.mxu2 %v1094_v11  ;;  %v951_v52 = vor.u32 %v1070_v48, %v950_v47  ;;  %v955_v53 = vor.u32 %v1072_v50, %v954_v49  ;;  %v1071_v54 = vld [vmem:[%s1412_s6 + $0x4c] sm:$0xf]  ;;  %v956_v55 = vld [vmem:[%s1412_s6 + $0x54] sm:$0xf0]  ;;  %v962_v56 = vld [vmem:[%s1412_s6 + $0x50] sm:$0xf] }
  0x22   : > { %v1073_v57 = vld [vmem:[%s1412_s6 + $0x58] sm:$0xf0]  ;;  %v959_v58 = vor.u32 %v1071_v54, %v956_v55  ;;  %v1450_v2 = vld [vmem:[#allocation3] ss:$0 sm:$0xff]  ;;  %v1176_v6 = vld [vmem:[#allocation5] ss:$0 sm:$0xff] }
  0x23   : > { %621 = vmatpush.bf16.msra.mxu0 %v1077_v12  ;;  %1125 = vmatpush.bf16.msra.mxu3 %v1077_v12  ;;  %v963_v59 = vor.u32 %v1073_v57, %v962_v56 }
  0x24   : > { %650 = vmatpush.bf16.msra.mxu1 %v1085_v13 }
  0x25   : > { %679 = vmatpush.bf16.msra.mxu2 %v1093_v14 }
  0x27   : > { %622 = vmatpush.bf16.msra.mxu0 %v1076_v15  ;;  %1126 = vmatpush.bf16.msra.mxu3 %v1076_v15 }
  0x28   : > { %651 = vmatpush.bf16.msra.mxu1 %v1084_v16 }
  0x29   : > { %680 = vmatpush.bf16.msra.mxu2 %v1092_v17 }
  0x2b   : > { %623 = vmatpush.bf16.msra.mxu0 %v1075_v18  ;;  %1127 = vmatpush.bf16.msra.mxu3 %v1075_v18 }
  0x2c   : > { %652 = vmatpush.bf16.msra.mxu1 %v1083_v19 }
  0x2d   : > { %681 = vmatpush.bf16.msra.mxu2 %v1091_v20 }
  0x2f   : > { %624 = vmatpush.bf16.msra.mxu0 %v1074_v21  ;;  %1128 = vmatpush.bf16.msra.mxu3 %v1074_v21 }
  0x30   : > { %653 = vmatpush.bf16.msra.mxu1 %v1082_v22 }
  0x31   : > { %682 = vmatpush.bf16.msra.mxu2 %v1090_v23 }
  0x32   : > { %625 = vmatmul.bf16.vlgmr.msra.gmra.mxu0 %v919_v32  ;;  %630 = vmatmul.bf16.vlgmr.msra.gmra.mxu3 %v931_v35 }
  0x33   : > { %654 = vmatmul.bf16.vlgmr.msra.gmra.mxu1 %v923_v33 }
  0x34   : > { %683 = vmatmul.bf16.vlgmr.msra.gmra.mxu2 %v927_v34 }
  0x42   : > { %635 = vmatmul.bf16.gmra.mxu3 %v943_v44 }
  0x43   : > { %659 = vmatmul.bf16.gmra.mxu1 %v935_v42 }
  0x44   : > { %688 = vmatmul.bf16.gmra.mxu2 %v939_v43 }
  0x52   : > { %640 = vmatmul.bf16.gmra.mxu3 %v955_v53 }
  0x53   : > { %664 = vmatmul.bf16.gmra.mxu1 %v947_v51 }
  0x54   : > { %693 = vmatmul.bf16.gmra.mxu2 %v951_v52 }
  0x63   : > { %669 = vmatmul.bf16.gmra.mxu1 %v959_v58 }
  0x64   : > { %698 = vmatmul.bf16.gmra.mxu2 %v963_v59 }
  0xaf   : > { %v626_v61 = vpop.f32.mrf.mxu0 }
  0xb0   : > { %v655_v60 = vpop.f32.mrf.mxu1 }
  0xb1   : > { %v656_v62 = vadd.f32 %v655_v60, %v626_v61 }
  0xb5   : > { %v631_v4 = vpop.f32.mrf.mxu3 }
  0xb7   : > { %v684_v63 = vpop.f32.mrf.mxu2  ;;  %v628_v3 = vpop.f32.mrf.mxu0 }
  0xb8   : > { %v657_v0 = vpop.f32.mrf.mxu1  ;;  %v685_v1 = vadd.f32 %v684_v63, %v656_v62 }
  0xb9   : > { %v658_v7 = vadd.f32 %v657_v0, %v628_v3 }
  0xba   : > { %v735_v5 = vmul.f32 %v1450_v2, %v685_v1 }
  0xbc   : > { %v747_v11 = vadd.f32 %v1176_v6, %v735_v5 }
  0xbd   : > { %v633_v14 = vpop.f32.mrf.mxu3 }
  0xbe   : > { %v755_v15 = vmax.f32 %v747_v11, 0.0 }
  0xbf   : > { %v686_v8 = vpop.f32.mrf.mxu2 }
  0xc0   : > { %v687_v9 = vadd.f32 %v686_v8, %v658_v7  ;;  %v660_v10 = vpop.f32.mrf.mxu1 }
  0xc1   : > { %v661_v17 = vadd.f32 %v660_v10, %v631_v4 }
  0xc2   : > { %v736_v12 = vmul.f32 %v1450_v2, %v687_v9 }
  0xc4   : > { %v748_v13 = vadd.f32 %v1176_v6, %v736_v12 }
  0xc5   : > { %v636_v24 = vpop.f32.mrf.mxu3 }
  0xc6   : > { %v756_v16 = vmax.f32 %v748_v13, 0.0 }
  0xc7   : > { %v689_v18 = vpop.f32.mrf.mxu2 }
  0xc8   : > { %v1101_v19 = vpack.c.bf16 %v756_v16, %v755_v15  ;;  %v662_v20 = vpop.f32.mrf.mxu1  ;;  %v690_v21 = vadd.f32 %v689_v18, %v661_v17 }
  0xc9   : > { %v663_v23 = vadd.f32 %v662_v20, %v633_v14 }
  0xca   : > { %1102 = vst [vmem:[%s1458_s21] sm:$0xff] %v1101_v19   ;;  %v737_v22 = vmul.f32 %v1450_v2, %v690_v21 }
  0xcc   : > { %v749_v28 = vadd.f32 %v1176_v6, %v737_v22 }
  0xcd   : > { %v638_v37 = vpop.f32.mrf.mxu3 }
  0xce   : > { %v757_v31 = vmax.f32 %v749_v28, 0.0 }
  0xcf   : > { %v691_v25 = vpop.f32.mrf.mxu2 }
  0xd0   : > { %v692_v26 = vadd.f32 %v691_v25, %v663_v23  ;;  %v665_v27 = vpop.f32.mrf.mxu1 }
  0xd1   : > { %v666_v33 = vadd.f32 %v665_v27, %v636_v24 }
  0xd2   : > { %v738_v29 = vmul.f32 %v1450_v2, %v692_v26 }
  0xd4   : > { %v750_v30 = vadd.f32 %v1176_v6, %v738_v29 }
  0xd5   : > { %v641_v46 = vpop.f32.mrf.mxu3 }
  0xd6   : > { %v758_v32 = vmax.f32 %v750_v30, 0.0 }
  0xd7   : > { %v694_v34 = vpop.f32.mrf.mxu2 }
  0xd8   : > { %v1106_v35 = vpack.c.bf16 %v758_v32, %v757_v31  ;;  %v667_v36 = vpop.f32.mrf.mxu1  ;;  %v695_v38 = vadd.f32 %v694_v34, %v666_v33 }
  0xd9   : > { %v668_v40 = vadd.f32 %v667_v36, %v638_v37 }
  0xda   : > { %1118 = vst [vmem:[%s1458_s21 + $0x8] sm:$0xff] %v1106_v35   ;;  %v739_v39 = vmul.f32 %v1450_v2, %v695_v38 }
  0xdc   : > { %v751_v44 = vadd.f32 %v1176_v6, %v739_v39 }
  0xdd   : > { %v643_v55 = vpop.f32.mrf.mxu3 }
  0xde   : > { %v759_v48 = vmax.f32 %v751_v44, 0.0 }
  0xdf   : > { %v696_v41 = vpop.f32.mrf.mxu2 }
  0xe0   : > { %v697_v42 = vadd.f32 %v696_v41, %v668_v40  ;;  %v670_v43 = vpop.f32.mrf.mxu1 }
  0xe1   : > { %v671_v50 = vadd.f32 %v670_v43, %v641_v46 }
  0xe2   : > { %v740_v45 = vmul.f32 %v1450_v2, %v697_v42 }
  0xe4   : > { %v752_v47 = vadd.f32 %v1176_v6, %v740_v45 }
  0xe6   : > { %v760_v49 = vmax.f32 %v752_v47, 0.0 }
  0xe7   : > { %v699_v51 = vpop.f32.mrf.mxu2 }
  0xe8   : > { %v1111_v52 = vpack.c.bf16 %v760_v49, %v759_v48  ;;  %v700_v53 = vadd.f32 %v699_v51, %v671_v50  ;;  %v672_v54 = vpop.f32.mrf.mxu1 }
  0xe9   : > { %v673_v57 = vadd.f32 %v672_v54, %v643_v55 }
  0xea   : > { %1119 = vst [vmem:[%s1458_s21 + $0x10] sm:$0xff] %v1111_v52   ;;  %v741_v56 = vmul.f32 %v1450_v2, %v700_v53 }
  0xec   : > { %v753_v60 = vadd.f32 %v1176_v6, %v741_v56 }
  0xee   : > { %v761_v63 = vmax.f32 %v753_v60, 0.0 }
  0xef   : > { %v701_v58 = vpop.f32.mrf.mxu2 }
  0xf0   : > { %v702_v59 = vadd.f32 %v701_v58, %v673_v57 }
  0xf2   : > { %v742_v61 = vmul.f32 %v1450_v2, %v702_v59 }
  0xf4   : > { %v754_v62 = vadd.f32 %v1176_v6, %v742_v61 }
  0xf6   : > { %v762_v0 = vmax.f32 %v754_v62, 0.0 }
  0xf8   : > { %v1116_v1 = vpack.c.bf16 %v762_v0, %v761_v63 }
  0xfa   : > { %1120 = vst [vmem:[%s1458_s21 + $0x18] sm:$0xff] %v1116_v1  }
  0xfb PF: > { %s16_s17 = sadd.s32 1, %s1267_s17   ;;  %s1486_s15 = smov %s1263_s16 }
  0xfc   : > { %p13_p8 = scmp.ge.s32.totalorder %s16_s17, 4   ;;  %s1487_s16 = smov %s1489_s19 }
  0xfe   :  { %15 = sbr.rel (!%p13_p8) target bundleno = 3 (0x3), region = 88 }
 0x103   :  { %807 = vsyncpa [#allocation4], 1 }
 0x104   :  { %809 = vsyncpa [#allocation4 + $0x1], 1 }
 0x105   :  { %810 = vsyncpa [#allocation6], 1 }

// kernel: _lambda_.28
= control target key start
LH: loop header
LB: loop body
LE: loop exit
PB: predicated region body
PF: predicated region fallthrough
CT: control target
= control target key end

     0   :  { %9 = vsyncpa [#allocation4], 0  ;;  %s1034_s0 = inlined_call_operand.vmem [shape: bf16[128,128], index: 0, kind: input, shape index: {}]   ;;  %s1035_s1 = inlined_call_operand.vmem [shape: bf16[128,128], index: 1, kind: input, shape index: {}]   ;;  %s1036_s2 = inlined_call_operand.hbm [shape: f32[1,128], index: 2, kind: input, shape index: {}]   ;;  %s1037_s3 = inlined_call_operand.hbm [shape: f32[1,128], index: 3, kind: input, shape index: {}]   ;;  %s1038_s4 = inlined_call_operand.vmem [shape: bf16[128,128], index: 4, kind: output, shape index: {}]  }
   0x1   :  { %10 = vsyncpa [#allocation6], 0  ;;  %s938_s15 = smov 0   ;;  %s940_s16 = smov 0  }
   0x2   :  { %s942_s17 = smov 0  }
   0x3 LB: > { %s649_s18 = sadd.s32 4294967295, %s909_s17   ;;  %s35_s19 = sadd.s32 1, %s905_s16  ;;  %s909_s17 = sphi %s942_s17, %s16_s17   ;;  %s905_s16 = sphi %s940_s16, %s1042_s16   ;;  %s901_s15 = sphi %s938_s15, %s1041_s15  }
   0x4   : > { %p37_p0 = scmp.ge.s32.totalorder %s35_s19, 2  ;;  %p651_p1 = scmp.ge.s32.totalorder %s909_s17, 1 }
   0x5   : > { %p176_p2 = scmp.lt.s32.totalorder %s909_s17, 3  ;;  %p963_p4 = scmp.eq.s32.totalorder %s649_s18, 0 }
   0x6   : > { %s1044_s19 = smov (%p37_p0, %s35_s19), 0  ;;  %s201_s24 = sshll.u32 %s1036_s2, 4  ;;  %s202_s24 = int_to_ptr.hbm [resolvable:$true] %s201_s24 }
   0x7   : > { %p959_p3 = pnand %p651_p1, %p176_p2  ;;  %s911_s25 = smov [#allocation3]  }
   0x8   : > { %s203_s26 = sshll.u32 %s911_s25, 4  ;;  %s214_s29 = sshll.u32 %s1037_s3, 4  ;;  %s204_s26 = int_to_ptr.vmem [resolvable:$true] %s203_s26  ;;  %s215_s29 = int_to_ptr.hbm [resolvable:$true] %s214_s29 }
   0x9   : > { %p780_p5 = pneg %p959_p3  ;;  %s912_s30 = smov [#allocation5]  }
   0xa   : > { %s216_s5 = sshll.u32 %s912_s30, 4  ;;  %241 = sbr.rel (%p959_p3) target bundleno = 199 (0xc7), region = 36  ;;  %s217_s5 = int_to_ptr.vmem [resolvable:$true] %s216_s5 }
   0xb   : > { %p781_p6 = pnand %p963_p4, %p780_p5 }
   0xd   : > { %783 = dma.hbm_to_vmem [thread:$0]  (!%p781_p6), %s202_s24, 16, %s204_s26, [#allocation4]  }
   0xe   : > { %786 = dma.hbm_to_vmem [thread:$0]  (!%p781_p6), %s215_s29, 16, %s217_s5, [#allocation6]  }
   0xf   : > { %892 = dma.done.wait (%p963_p4), [#allocation4], 16  }
  0x10   : > { %894 = vsyncadd (%p963_p4), [#allocation4], 4294967280 }
  0x11   : > { %896 = dma.done.wait (%p963_p4), [#allocation6], 16  }
  0x12   : > { %898 = vsyncadd (%p963_p4), [#allocation6], 4294967280  ;;  %v724_v0 = vld [vmem:[%s1035_s1 + $0x38] sm:$0xff]  ;;  %v723_v1 = vld [vmem:[%s1035_s1 + $0x30] sm:$0xff]  ;;  %s659_s14 = sshll.u32 %s901_s15, 3 }
  0x13   : > { %430 = vmatpush.bf16.msra.mxu0 %v724_v0  ;;  %748 = vmatpush.bf16.msra.mxu1 %v724_v0  ;;  %v722_v2 = vld [vmem:[%s1035_s1 + $0x28] sm:$0xff]  ;;  %v721_v3 = vld [vmem:[%s1035_s1 + $0x20] sm:$0xff]  ;;  %v720_v4 = vld [vmem:[%s1035_s1 + $0x18] sm:$0xff]  ;;  %p288_p7 = scmp.lt.s32.totalorder %s659_s14, 15 }
  0x14   : > { %749 = vmatpush.bf16.msra.mxu2 %v724_v0  ;;  %750 = vmatpush.bf16.msra.mxu3 %v724_v0  ;;  %v719_v5 = vld [vmem:[%s1035_s1 + $0x10] sm:$0xff]  ;;  %v718_v6 = vld [vmem:[%s1035_s1 + $0x8] sm:$0xff]  ;;  %v717_v7 = vld [vmem:[%s1035_s1] sm:$0xff] }
  0x15   : > { %s1046_s14 = smov (!%p288_p7, %s659_s14), 15  ;;  %v817_v14 = vld [vmem:[#allocation3] ss:$0 sm:$0xff]  ;;  %v818_v16 = vld [vmem:[#allocation5] ss:$0 sm:$0xff] }
  0x16   : > { %s660_s24 = sshll.u32 %s1046_s14, 2 }
  0x17   : > { %431 = vmatpush.bf16.msra.mxu0 %v723_v1  ;;  %751 = vmatpush.bf16.msra.mxu1 %v723_v1  ;;  %s294_s29 = scalar_lea.vmem %s1034_s0, %s660_s24  ;;  %s312_s6 = scalar_lea.vmem %s1038_s4, %s660_s24 }
  0x18   : > { %752 = vmatpush.bf16.msra.mxu2 %v723_v1  ;;  %753 = vmatpush.bf16.msra.mxu3 %v723_v1  ;;  %v713_v8 = vld [vmem:[%s294_s29] sm:$0xff]  ;;  %v714_v9 = vld [vmem:[%s294_s29 + $0x8] sm:$0xff]  ;;  %v715_v10 = vld [vmem:[%s294_s29 + $0x10] sm:$0xff] }
  0x19   : > { %v716_v11 = vld [vmem:[%s294_s29 + $0x18] sm:$0xff] }
  0x1b   : > { %432 = vmatpush.bf16.msra.mxu0 %v722_v2  ;;  %754 = vmatpush.bf16.msra.mxu1 %v722_v2 }
  0x1c   : > { %755 = vmatpush.bf16.msra.mxu2 %v722_v2  ;;  %756 = vmatpush.bf16.msra.mxu3 %v722_v2 }
  0x1f   : > { %433 = vmatpush.bf16.msra.mxu0 %v721_v3  ;;  %757 = vmatpush.bf16.msra.mxu1 %v721_v3 }
  0x20   : > { %758 = vmatpush.bf16.msra.mxu2 %v721_v3  ;;  %759 = vmatpush.bf16.msra.mxu3 %v721_v3 }
  0x23   : > { %434 = vmatpush.bf16.msra.mxu0 %v720_v4  ;;  %760 = vmatpush.bf16.msra.mxu1 %v720_v4 }
  0x24   : > { %761 = vmatpush.bf16.msra.mxu2 %v720_v4  ;;  %762 = vmatpush.bf16.msra.mxu3 %v720_v4 }
  0x27   : > { %435 = vmatpush.bf16.msra.mxu0 %v719_v5  ;;  %763 = vmatpush.bf16.msra.mxu1 %v719_v5 }
  0x28   : > { %764 = vmatpush.bf16.msra.mxu2 %v719_v5  ;;  %765 = vmatpush.bf16.msra.mxu3 %v719_v5 }
  0x2b   : > { %436 = vmatpush.bf16.msra.mxu0 %v718_v6  ;;  %766 = vmatpush.bf16.msra.mxu1 %v718_v6 }
  0x2c   : > { %767 = vmatpush.bf16.msra.mxu2 %v718_v6  ;;  %768 = vmatpush.bf16.msra.mxu3 %v718_v6 }
  0x2f   : > { %437 = vmatpush.bf16.msra.mxu0 %v717_v7  ;;  %769 = vmatpush.bf16.msra.mxu1 %v717_v7 }
  0x30   : > { %770 = vmatpush.bf16.msra.mxu2 %v717_v7  ;;  %771 = vmatpush.bf16.msra.mxu3 %v717_v7 }
  0x32   : > { %438 = vmatmul.bf16.vlgmr.msra.gmra.mxu0 %v713_v8  ;;  %443 = vmatmul.bf16.vlgmr.msra.gmra.mxu1 %v714_v9 }
  0x33   : > { %448 = vmatmul.bf16.vlgmr.msra.gmra.mxu2 %v715_v10  ;;  %453 = vmatmul.bf16.vlgmr.msra.gmra.mxu3 %v716_v11 }
  0xaf   : > { %v439_v12 = vpop.f32.mrf.mxu0  ;;  %v444_v13 = vpop.f32.mrf.mxu1 }
  0xb0   : > { %v490_v15 = vmul.f32 %v817_v14, %v439_v12  ;;  %v492_v17 = vmul.f32 %v817_v14, %v444_v13 }
  0xb2   : > { %v502_v24 = vadd.f32 %v818_v16, %v490_v15  ;;  %v504_v25 = vadd.f32 %v818_v16, %v492_v17 }
  0xb6   : > { %v449_v18 = vpop.f32.mrf.mxu2  ;;  %v454_v19 = vpop.f32.mrf.mxu3 }
  0xb7   : > { %v441_v20 = vpop.f32.mrf.mxu0  ;;  %v446_v21 = vpop.f32.mrf.mxu1  ;;  %v494_v30 = vmul.f32 %v817_v14, %v449_v18  ;;  %v496_v31 = vmul.f32 %v817_v14, %v454_v19 }
  0xb8   : > { %v491_v22 = vmul.f32 %v817_v14, %v441_v20  ;;  %v493_v23 = vmul.f32 %v817_v14, %v446_v21 }
  0xb9   : > { %v506_v36 = vadd.f32 %v818_v16, %v494_v30  ;;  %v508_v37 = vadd.f32 %v818_v16, %v496_v31 }
  0xba   : > { %v503_v26 = vadd.f32 %v818_v16, %v491_v22  ;;  %v505_v27 = vadd.f32 %v818_v16, %v493_v23 }
  0xbc   : > { %v728_v28 = vpack.c.bf16 %v503_v26, %v502_v24  ;;  %v733_v29 = vpack.c.bf16 %v505_v27, %v504_v25 }
  0xbe   : > { %729 = vst [vmem:[%s312_s6] sm:$0xff] %v728_v28   ;;  %v451_v32 = vpop.f32.mrf.mxu2  ;;  %v456_v33 = vpop.f32.mrf.mxu3 }
  0xbf   : > { %745 = vst [vmem:[%s312_s6 + $0x8] sm:$0xff] %v733_v29   ;;  %v495_v34 = vmul.f32 %v817_v14, %v451_v32  ;;  %v497_v35 = vmul.f32 %v817_v14, %v456_v33 }
  0xc1   : > { %v507_v38 = vadd.f32 %v818_v16, %v495_v34  ;;  %v509_v39 = vadd.f32 %v818_v16, %v497_v35 }
  0xc3   : > { %v738_v40 = vpack.c.bf16 %v507_v38, %v506_v36  ;;  %v743_v41 = vpack.c.bf16 %v509_v39, %v508_v37 }
  0xc5   : > { %746 = vst [vmem:[%s312_s6 + $0x10] sm:$0xff] %v738_v40  }
  0xc6   : > { %747 = vst [vmem:[%s312_s6 + $0x18] sm:$0xff] %v743_v41  }
  0xc7 PF: > { %s16_s17 = sadd.s32 1, %s909_s17   ;;  %s1041_s15 = smov %s905_s16 }
  0xc8   : > { %p13_p8 = scmp.ge.s32.totalorder %s16_s17, 4   ;;  %s1042_s16 = smov %s1044_s19 }
  0xca   :  { %15 = sbr.rel (!%p13_p8) target bundleno = 3 (0x3), region = 88 }
  0xcf   :  { %554 = vsyncpa [#allocation4], 1 }
  0xd0   :  { %556 = vsyncpa [#allocation4 + $0x1], 1 }
  0xd1   :  { %557 = vsyncpa [#allocation6], 1 }

// kernel: _lambda_.29
= control target key start
LH: loop header
LB: loop body
LE: loop exit
PB: predicated region body
PF: predicated region fallthrough
CT: control target
= control target key end

     0   :  { %10 = vsyncpa [#allocation4], 0  ;;  %s1168_s0 = inlined_call_operand.vmem [shape: bf16[128,128], index: 0, kind: input, shape index: {}]   ;;  %s1169_s1 = inlined_call_operand.vmem [shape: bf16[128,128], index: 1, kind: input, shape index: {}]   ;;  %s1170_s2 = inlined_call_operand.hbm [shape: f32[1,128], index: 2, kind: input, shape index: {}]   ;;  %s1171_s3 = inlined_call_operand.hbm [shape: f32[1,128], index: 3, kind: input, shape index: {}]   ;;  %s1172_s4 = inlined_call_operand.vmem [shape: bf16[128,128], index: 4, kind: input, shape index: {}]   ;;  %s1173_s5 = inlined_call_operand.vmem [shape: bf16[128,128], index: 5, kind: output, shape index: {}]  }
   0x1   :  { %11 = vsyncpa [#allocation6], 0  ;;  %s1071_s18 = smov 0   ;;  %s1073_s19 = smov 0  }
   0x2   :  { %s1075_s20 = smov 0  }
   0x3 LB: > { %s756_s21 = sadd.s32 4294967295, %s1037_s20   ;;  %s36_s22 = sadd.s32 1, %s1033_s19  ;;  %s1037_s20 = sphi %s1075_s20, %s17_s20   ;;  %s1033_s19 = sphi %s1073_s19, %s1177_s19   ;;  %s1029_s18 = sphi %s1071_s18, %s1176_s18  }
   0x4   : > { %p38_p0 = scmp.ge.s32.totalorder %s36_s22, 2  ;;  %p758_p1 = scmp.ge.s32.totalorder %s1037_s20, 1 }
   0x5   : > { %p205_p2 = scmp.lt.s32.totalorder %s1037_s20, 3  ;;  %p1096_p4 = scmp.eq.s32.totalorder %s756_s21, 0 }
   0x6   : > { %s1179_s22 = smov (%p38_p0, %s36_s22), 0  ;;  %s230_s27 = sshll.u32 %s1170_s2, 4  ;;  %s231_s27 = int_to_ptr.hbm [resolvable:$true] %s230_s27 }
   0x7   : > { %p1092_p3 = pnand %p758_p1, %p205_p2  ;;  %s1039_s28 = smov [#allocation3]  }
   0x8   : > { %s232_s29 = sshll.u32 %s1039_s28, 4  ;;  %s243_s7 = sshll.u32 %s1171_s3, 4  ;;  %s233_s29 = int_to_ptr.vmem [resolvable:$true] %s232_s29  ;;  %s244_s7 = int_to_ptr.hbm [resolvable:$true] %s243_s7 }
   0x9   : > { %p908_p5 = pneg %p1092_p3  ;;  %s1040_s8 = smov [#allocation5]  }
   0xa   : > { %s245_s9 = sshll.u32 %s1040_s8, 4  ;;  %282 = sbr.rel (%p1092_p3) target bundleno = 203 (0xcb), region = 40  ;;  %s246_s9 = int_to_ptr.vmem [resolvable:$true] %s245_s9 }
   0xb   : > { %p909_p6 = pnand %p1096_p4, %p908_p5 }
   0xd   : > { %911 = dma.hbm_to_vmem [thread:$0]  (!%p909_p6), %s231_s27, 16, %s233_s29, [#allocation4]  }
   0xe   : > { %914 = dma.hbm_to_vmem [thread:$0]  (!%p909_p6), %s244_s7, 16, %s246_s9, [#allocation6]  }
   0xf   : > { %1020 = dma.done.wait (%p1096_p4), [#allocation4], 16  }
  0x10   : > { %1022 = vsyncadd (%p1096_p4), [#allocation4], 4294967280 }
  0x11   : > { %1024 = dma.done.wait (%p1096_p4), [#allocation6], 16  }
  0x12   : > { %1026 = vsyncadd (%p1096_p4), [#allocation6], 4294967280  ;;  %v833_v0 = vld [vmem:[%s1169_s1 + $0x38] sm:$0xff]  ;;  %v832_v1 = vld [vmem:[%s1169_s1 + $0x30] sm:$0xff]  ;;  %s766_s21 = sshll.u32 %s1029_s18, 3 }
  0x13   : > { %490 = vmatpush.bf16.msra.mxu0 %v833_v0  ;;  %876 = vmatpush.bf16.msra.mxu1 %v833_v0  ;;  %v831_v2 = vld [vmem:[%s1169_s1 + $0x28] sm:$0xff]  ;;  %v830_v3 = vld [vmem:[%s1169_s1 + $0x20] sm:$0xff]  ;;  %v829_v4 = vld [vmem:[%s1169_s1 + $0x18] sm:$0xff]  ;;  %p339_p7 = scmp.lt.s32.totalorder %s766_s21, 15 }
  0x14   : > { %877 = vmatpush.bf16.msra.mxu2 %v833_v0  ;;  %878 = vmatpush.bf16.msra.mxu3 %v833_v0  ;;  %v828_v5 = vld [vmem:[%s1169_s1 + $0x10] sm:$0xff]  ;;  %v827_v6 = vld [vmem:[%s1169_s1 + $0x8] sm:$0xff]  ;;  %v826_v7 = vld [vmem:[%s1169_s1] sm:$0xff] }
  0x15   : > { %s1181_s21 = smov (!%p339_p7, %s766_s21), 15  ;;  %v945_v12 = vld [vmem:[#allocation3] ss:$0 sm:$0xff]  ;;  %v946_v16 = vld [vmem:[#allocation5] ss:$0 sm:$0xff] }
  0x16   : > { %s1142_s28 = sshll.u32 %s1181_s21, 2 }
  0x17   : > { %491 = vmatpush.bf16.msra.mxu0 %v832_v1  ;;  %879 = vmatpush.bf16.msra.mxu1 %v832_v1  ;;  %s345_s8 = scalar_lea.vmem %s1168_s0, %s1142_s28  ;;  %s363_s11 = scalar_lea.vmem %s1172_s4, %s1142_s28 }
  0x18   : > { %880 = vmatpush.bf16.msra.mxu2 %v832_v1  ;;  %881 = vmatpush.bf16.msra.mxu3 %v832_v1  ;;  %v822_v8 = vld [vmem:[%s345_s8] sm:$0xff]  ;;  %v823_v9 = vld [vmem:[%s345_s8 + $0x8] sm:$0xff]  ;;  %v824_v10 = vld [vmem:[%s345_s8 + $0x10] sm:$0xff]  ;;  %s372_s14 = scalar_lea.vmem %s1173_s5, %s1142_s28 }
  0x19   : > { %v825_v11 = vld [vmem:[%s345_s8 + $0x18] sm:$0xff]  ;;  %v835_v18 = vld [vmem:[%s363_s11] sm:$0xff]   ;;  %v870_v19 = vld [vmem:[%s363_s11 + $0x8] sm:$0xff]  }
  0x1a   : > { %v836_v21 = vunpack.c.l.bf16 %v835_v18  ;;  %v840_v23 = vunpack.c.l.bf16 %v870_v19  ;;  %v837_v29 = vunpack.c.h.bf16 %v835_v18  ;;  %v841_v31 = vunpack.c.h.bf16 %v870_v19  ;;  %v871_v36 = vld [vmem:[%s363_s11 + $0x10] sm:$0xff]   ;;  %v872_v37 = vld [vmem:[%s363_s11 + $0x18] sm:$0xff]  }
  0x1b   : > { %492 = vmatpush.bf16.msra.mxu0 %v831_v2  ;;  %882 = vmatpush.bf16.msra.mxu1 %v831_v2  ;;  %v844_v43 = vunpack.c.l.bf16 %v871_v36  ;;  %v848_v45 = vunpack.c.l.bf16 %v872_v37  ;;  %v845_v53 = vunpack.c.h.bf16 %v871_v36  ;;  %v849_v55 = vunpack.c.h.bf16 %v872_v37 }
  0x1c   : > { %883 = vmatpush.bf16.msra.mxu2 %v831_v2  ;;  %884 = vmatpush.bf16.msra.mxu3 %v831_v2 }
  0x1f   : > { %493 = vmatpush.bf16.msra.mxu0 %v830_v3  ;;  %885 = vmatpush.bf16.msra.mxu1 %v830_v3 }
  0x20   : > { %886 = vmatpush.bf16.msra.mxu2 %v830_v3  ;;  %887 = vmatpush.bf16.msra.mxu3 %v830_v3 }
  0x23   : > { %494 = vmatpush.bf16.msra.mxu0 %v829_v4  ;;  %888 = vmatpush.bf16.msra.mxu1 %v829_v4 }
  0x24   : > { %889 = vmatpush.bf16.msra.mxu2 %v829_v4  ;;  %890 = vmatpush.bf16.msra.mxu3 %v829_v4 }
  0x27   : > { %495 = vmatpush.bf16.msra.mxu0 %v828_v5  ;;  %891 = vmatpush.bf16.msra.mxu1 %v828_v5 }
  0x28   : > { %892 = vmatpush.bf16.msra.mxu2 %v828_v5  ;;  %893 = vmatpush.bf16.msra.mxu3 %v828_v5 }
  0x2b   : > { %496 = vmatpush.bf16.msra.mxu0 %v827_v6  ;;  %894 = vmatpush.bf16.msra.mxu1 %v827_v6 }
  0x2c   : > { %895 = vmatpush.bf16.msra.mxu2 %v827_v6  ;;  %896 = vmatpush.bf16.msra.mxu3 %v827_v6 }
  0x2f   : > { %497 = vmatpush.bf16.msra.mxu0 %v826_v7  ;;  %897 = vmatpush.bf16.msra.mxu1 %v826_v7 }
  0x30   : > { %898 = vmatpush.bf16.msra.mxu2 %v826_v7  ;;  %899 = vmatpush.bf16.msra.mxu3 %v826_v7 }
  0x32   : > { %498 = vmatmul.bf16.vlgmr.msra.gmra.mxu0 %v822_v8  ;;  %503 = vmatmul.bf16.vlgmr.msra.gmra.mxu1 %v823_v9 }
  0x33   : > { %508 = vmatmul.bf16.vlgmr.msra.gmra.mxu2 %v824_v10  ;;  %513 = vmatmul.bf16.vlgmr.msra.gmra.mxu3 %v825_v11 }
  0xaf   : > { %v499_v13 = vpop.f32.mrf.mxu0  ;;  %v504_v14 = vpop.f32.mrf.mxu1 }
  0xb0   : > { %v550_v15 = vmul.f32 %v945_v12, %v499_v13  ;;  %v552_v17 = vmul.f32 %v945_v12, %v504_v14 }
  0xb2   : > { %v562_v20 = vadd.f32 %v946_v16, %v550_v15  ;;  %v564_v22 = vadd.f32 %v946_v16, %v552_v17 }
  0xb4   : > { %v586_v34 = vadd.f32 %v836_v21, %v562_v20  ;;  %v588_v35 = vadd.f32 %v840_v23, %v564_v22 }
  0xb6   : > { %v509_v24 = vpop.f32.mrf.mxu2  ;;  %v514_v25 = vpop.f32.mrf.mxu3  ;;  %v594_v46 = vmax.f32 %v586_v34, 0.0  ;;  %v596_v47 = vmax.f32 %v588_v35, 0.0 }
  0xb7   : > { %v501_v26 = vpop.f32.mrf.mxu0  ;;  %v506_v27 = vpop.f32.mrf.mxu1  ;;  %v554_v32 = vmul.f32 %v945_v12, %v509_v24  ;;  %v556_v33 = vmul.f32 %v945_v12, %v514_v25 }
  0xb8   : > { %v551_v28 = vmul.f32 %v945_v12, %v501_v26  ;;  %v553_v30 = vmul.f32 %v945_v12, %v506_v27 }
  0xb9   : > { %v566_v42 = vadd.f32 %v946_v16, %v554_v32  ;;  %v568_v44 = vadd.f32 %v946_v16, %v556_v33 }
  0xba   : > { %v563_v38 = vadd.f32 %v946_v16, %v551_v28  ;;  %v565_v39 = vadd.f32 %v946_v16, %v553_v30 }
  0xbb   : > { %v590_v58 = vadd.f32 %v844_v43, %v566_v42  ;;  %v592_v59 = vadd.f32 %v848_v45, %v568_v44 }
  0xbc   : > { %v587_v40 = vadd.f32 %v837_v29, %v563_v38  ;;  %v589_v41 = vadd.f32 %v841_v31, %v565_v39 }
  0xbd   : > { %v598_v0 = vmax.f32 %v590_v58, 0.0  ;;  %v600_v1 = vmax.f32 %v592_v59, 0.0 }
  0xbe   : > { %v595_v48 = vmax.f32 %v587_v40, 0.0  ;;  %v597_v49 = vmax.f32 %v589_v41, 0.0  ;;  %v511_v50 = vpop.f32.mrf.mxu2  ;;  %v516_v51 = vpop.f32.mrf.mxu3 }
  0xbf   : > { %v555_v52 = vmul.f32 %v945_v12, %v511_v50  ;;  %v557_v54 = vmul.f32 %v945_v12, %v516_v51 }
  0xc0   : > { %v853_v56 = vpack.c.bf16 %v595_v48, %v594_v46  ;;  %v858_v57 = vpack.c.bf16 %v597_v49, %v596_v47 }
  0xc1   : > { %v567_v60 = vadd.f32 %v946_v16, %v555_v52  ;;  %v569_v61 = vadd.f32 %v946_v16, %v557_v54 }
  0xc2   : > { %854 = vst [vmem:[%s372_s14] sm:$0xff] %v853_v56  }
  0xc3   : > { %873 = vst [vmem:[%s372_s14 + $0x8] sm:$0xff] %v858_v57   ;;  %v591_v62 = vadd.f32 %v845_v53, %v567_v60  ;;  %v593_v63 = vadd.f32 %v849_v55, %v569_v61 }
  0xc5   : > { %v599_v2 = vmax.f32 %v591_v62, 0.0  ;;  %v601_v3 = vmax.f32 %v593_v63, 0.0 }
  0xc7   : > { %v863_v4 = vpack.c.bf16 %v599_v2, %v598_v0  ;;  %v868_v5 = vpack.c.bf16 %v601_v3, %v600_v1 }
  0xc9   : > { %874 = vst [vmem:[%s372_s14 + $0x10] sm:$0xff] %v863_v4  }
  0xca   : > { %875 = vst [vmem:[%s372_s14 + $0x18] sm:$0xff] %v868_v5  }
  0xcb PF: > { %s17_s20 = sadd.s32 1, %s1037_s20   ;;  %s1176_s18 = smov %s1033_s19 }
  0xcc   : > { %p14_p8 = scmp.ge.s32.totalorder %s17_s20, 4   ;;  %s1177_s19 = smov %s1179_s22 }
  0xce   :  { %16 = sbr.rel (!%p14_p8) target bundleno = 3 (0x3), region = 95 }
  0xd3   :  { %646 = vsyncpa [#allocation4], 1 }
  0xd4   :  { %648 = vsyncpa [#allocation4 + $0x1], 1 }
  0xd5   :  { %649 = vsyncpa [#allocation6], 1 }

// kernel: _lambda_.30
= control target key start
LH: loop header
LB: loop body
LE: loop exit
PB: predicated region body
PF: predicated region fallthrough
CT: control target
= control target key end

     0   :  { %9 = vsyncpa [#allocation4], 0  ;;  %s894_s15 = smov 0   ;;  %s896_s16 = smov 0   ;;  %s968_s0 = inlined_call_operand.vmem [shape: bf16[128,128], index: 0, kind: input, shape index: {}]   ;;  %s969_s1 = inlined_call_operand.vmem [shape: bf16[128,128], index: 1, kind: input, shape index: {}]   ;;  %s970_s2 = inlined_call_operand.hbm [shape: f32[1,128], index: 2, kind: input, shape index: {}]   ;;  %s971_s3 = inlined_call_operand.vmem [shape: f32[1,128], index: 3, kind: input, shape index: {}]   ;;  %s972_s4 = inlined_call_operand.vmem [shape: bf16[128,128], index: 4, kind: output, shape index: {}]  }
   0x1   :  { %s898_s17 = smov 0  }
   0x2 LB: > { %s651_s18 = sadd.s32 4294967295, %s866_s17   ;;  %s34_s19 = sadd.s32 1, %s862_s16  ;;  %s866_s17 = sphi %s898_s17, %s15_s17   ;;  %s862_s16 = sphi %s896_s16, %s974_s16   ;;  %s858_s15 = sphi %s894_s15, %s973_s15  }
   0x3   : > { %p36_p0 = scmp.ge.s32.totalorder %s34_s19, 2  ;;  %p653_p1 = scmp.ge.s32.totalorder %s866_s17, 1 }
   0x4   : > { %p175_p2 = scmp.lt.s32.totalorder %s866_s17, 3  ;;  %p781_p4 = scmp.eq.s32.totalorder %s651_s18, 0 }
   0x5   : > { %s976_s19 = smov (%p36_p0, %s34_s19), 0  ;;  %s200_s22 = sshll.u32 %s970_s2, 4  ;;  %s201_s22 = int_to_ptr.hbm [resolvable:$true] %s200_s22 }
   0x6   : > { %p176_p3 = pnand %p653_p1, %p175_p2  ;;  %s868_s23 = smov [#allocation3]  }
   0x7   : > { %s202_s24 = sshll.u32 %s868_s23, 4  ;;  %s203_s24 = int_to_ptr.vmem [resolvable:$true] %s202_s24 }
   0x8   : > { %p777_p5 = pneg %p176_p3  ;;  %233 = sbr.rel (%p176_p3) target bundleno = 197 (0xc5), region = 36 }
   0xa   : > { %p778_p6 = pnand %p781_p4, %p777_p5 }
   0xc   : > { %780 = dma.hbm_to_vmem [thread:$0]  (!%p778_p6), %s201_s22, 16, %s203_s24, [#allocation4]  }
   0xd   : > { %853 = dma.done.wait (%p781_p4), [#allocation4], 16  }
   0xe   : > { %855 = vsyncadd (%p781_p4), [#allocation4], 4294967280  ;;  %v725_v0 = vld [vmem:[%s969_s1 + $0x38] sm:$0xff]  ;;  %v724_v1 = vld [vmem:[%s969_s1 + $0x30] sm:$0xff]  ;;  %s660_s7 = sshll.u32 %s858_s15, 3 }
   0xf   : > { %423 = vmatpush.bf16.msra.mxu0 %v725_v0  ;;  %749 = vmatpush.bf16.msra.mxu1 %v725_v0  ;;  %v723_v2 = vld [vmem:[%s969_s1 + $0x28] sm:$0xff]  ;;  %v722_v3 = vld [vmem:[%s969_s1 + $0x20] sm:$0xff]  ;;  %v721_v4 = vld [vmem:[%s969_s1 + $0x18] sm:$0xff]  ;;  %p278_p7 = scmp.lt.s32.totalorder %s660_s7, 15 }
  0x10   : > { %750 = vmatpush.bf16.msra.mxu2 %v725_v0  ;;  %751 = vmatpush.bf16.msra.mxu3 %v725_v0  ;;  %v720_v5 = vld [vmem:[%s969_s1 + $0x10] sm:$0xff]  ;;  %v719_v6 = vld [vmem:[%s969_s1 + $0x8] sm:$0xff]  ;;  %v718_v7 = vld [vmem:[%s969_s1] sm:$0xff] }
  0x11   : > { %s978_s7 = smov (!%p278_p7, %s660_s7), 15  ;;  %v808_v14 = vld [vmem:[#allocation3] ss:$0 sm:$0xff] }
  0x12   : > { %s661_s14 = sshll.u32 %s978_s7, 2  ;;  %v809_v16 = vld [vmem:[%s971_s3] ss:$0 sm:$0xff] }
  0x13   : > { %424 = vmatpush.bf16.msra.mxu0 %v724_v1  ;;  %752 = vmatpush.bf16.msra.mxu1 %v724_v1  ;;  %s284_s22 = scalar_lea.vmem %s968_s0, %s661_s14  ;;  %s305_s27 = scalar_lea.vmem %s972_s4, %s661_s14 }
  0x14   : > { %753 = vmatpush.bf16.msra.mxu2 %v724_v1  ;;  %754 = vmatpush.bf16.msra.mxu3 %v724_v1  ;;  %v714_v8 = vld [vmem:[%s284_s22] sm:$0xff]  ;;  %v715_v9 = vld [vmem:[%s284_s22 + $0x8] sm:$0xff]  ;;  %v716_v10 = vld [vmem:[%s284_s22 + $0x10] sm:$0xff] }
  0x15   : > { %v717_v11 = vld [vmem:[%s284_s22 + $0x18] sm:$0xff] }
  0x17   : > { %425 = vmatpush.bf16.msra.mxu0 %v723_v2  ;;  %755 = vmatpush.bf16.msra.mxu1 %v723_v2 }
  0x18   : > { %756 = vmatpush.bf16.msra.mxu2 %v723_v2  ;;  %757 = vmatpush.bf16.msra.mxu3 %v723_v2 }
  0x1b   : > { %426 = vmatpush.bf16.msra.mxu0 %v722_v3  ;;  %758 = vmatpush.bf16.msra.mxu1 %v722_v3 }
  0x1c   : > { %759 = vmatpush.bf16.msra.mxu2 %v722_v3  ;;  %760 = vmatpush.bf16.msra.mxu3 %v722_v3 }
  0x1f   : > { %427 = vmatpush.bf16.msra.mxu0 %v721_v4  ;;  %761 = vmatpush.bf16.msra.mxu1 %v721_v4 }
  0x20   : > { %762 = vmatpush.bf16.msra.mxu2 %v721_v4  ;;  %763 = vmatpush.bf16.msra.mxu3 %v721_v4 }
  0x23   : > { %428 = vmatpush.bf16.msra.mxu0 %v720_v5  ;;  %764 = vmatpush.bf16.msra.mxu1 %v720_v5 }
  0x24   : > { %765 = vmatpush.bf16.msra.mxu2 %v720_v5  ;;  %766 = vmatpush.bf16.msra.mxu3 %v720_v5 }
  0x27   : > { %429 = vmatpush.bf16.msra.mxu0 %v719_v6  ;;  %767 = vmatpush.bf16.msra.mxu1 %v719_v6 }
  0x28   : > { %768 = vmatpush.bf16.msra.mxu2 %v719_v6  ;;  %769 = vmatpush.bf16.msra.mxu3 %v719_v6 }
  0x2b   : > { %430 = vmatpush.bf16.msra.mxu0 %v718_v7  ;;  %770 = vmatpush.bf16.msra.mxu1 %v718_v7 }
  0x2c   : > { %771 = vmatpush.bf16.msra.mxu2 %v718_v7  ;;  %772 = vmatpush.bf16.msra.mxu3 %v718_v7 }
  0x2e   : > { %431 = vmatmul.bf16.vlgmr.msra.gmra.mxu0 %v714_v8  ;;  %436 = vmatmul.bf16.vlgmr.msra.gmra.mxu1 %v715_v9 }
  0x2f   : > { %441 = vmatmul.bf16.vlgmr.msra.gmra.mxu2 %v716_v10  ;;  %446 = vmatmul.bf16.vlgmr.msra.gmra.mxu3 %v717_v11 }
  0xab   : > { %v432_v12 = vpop.f32.mrf.mxu0  ;;  %v437_v13 = vpop.f32.mrf.mxu1 }
  0xac   : > { %v483_v15 = vmul.f32 %v808_v14, %v432_v12  ;;  %v485_v17 = vmul.f32 %v808_v14, %v437_v13 }
  0xae   : > { %v495_v22 = vadd.f32 %v809_v16, %v483_v15  ;;  %v497_v23 = vadd.f32 %v809_v16, %v485_v17 }
  0xb0   : > { %v503_v30 = vmax.f32 %v495_v22, 0.0  ;;  %v505_v31 = vmax.f32 %v497_v23, 0.0 }
  0xb2   : > { %v442_v18 = vpop.f32.mrf.mxu2  ;;  %v447_v19 = vpop.f32.mrf.mxu3 }
  0xb3   : > { %v434_v20 = vpop.f32.mrf.mxu0  ;;  %v439_v21 = vpop.f32.mrf.mxu1  ;;  %v487_v28 = vmul.f32 %v808_v14, %v442_v18  ;;  %v489_v29 = vmul.f32 %v808_v14, %v447_v19 }
  0xb4   : > { %v484_v24 = vmul.f32 %v808_v14, %v434_v20  ;;  %v486_v25 = vmul.f32 %v808_v14, %v439_v21 }
  0xb5   : > { %v499_v38 = vadd.f32 %v809_v16, %v487_v28  ;;  %v501_v39 = vadd.f32 %v809_v16, %v489_v29 }
  0xb6   : > { %v496_v26 = vadd.f32 %v809_v16, %v484_v24  ;;  %v498_v27 = vadd.f32 %v809_v16, %v486_v25 }
  0xb7   : > { %v507_v44 = vmax.f32 %v499_v38, 0.0  ;;  %v509_v45 = vmax.f32 %v501_v39, 0.0 }
  0xb8   : > { %v504_v32 = vmax.f32 %v496_v26, 0.0  ;;  %v506_v33 = vmax.f32 %v498_v27, 0.0 }
  0xba   : > { %v729_v34 = vpack.c.bf16 %v504_v32, %v503_v30  ;;  %v734_v35 = vpack.c.bf16 %v506_v33, %v505_v31  ;;  %v444_v36 = vpop.f32.mrf.mxu2  ;;  %v449_v37 = vpop.f32.mrf.mxu3 }
  0xbb   : > { %v488_v40 = vmul.f32 %v808_v14, %v444_v36  ;;  %v490_v41 = vmul.f32 %v808_v14, %v449_v37 }
  0xbc   : > { %730 = vst [vmem:[%s305_s27] sm:$0xff] %v729_v34  }
  0xbd   : > { %746 = vst [vmem:[%s305_s27 + $0x8] sm:$0xff] %v734_v35   ;;  %v500_v42 = vadd.f32 %v809_v16, %v488_v40  ;;  %v502_v43 = vadd.f32 %v809_v16, %v490_v41 }
  0xbf   : > { %v508_v46 = vmax.f32 %v500_v42, 0.0  ;;  %v510_v47 = vmax.f32 %v502_v43, 0.0 }
  0xc1   : > { %v739_v48 = vpack.c.bf16 %v508_v46, %v507_v44  ;;  %v744_v49 = vpack.c.bf16 %v510_v47, %v509_v45 }
  0xc3   : > { %747 = vst [vmem:[%s305_s27 + $0x10] sm:$0xff] %v739_v48  }
  0xc4   : > { %748 = vst [vmem:[%s305_s27 + $0x18] sm:$0xff] %v744_v49  }
  0xc5 PF: > { %s15_s17 = sadd.s32 1, %s866_s17   ;;  %s973_s15 = smov %s862_s16 }
  0xc6   : > { %p12_p8 = scmp.ge.s32.totalorder %s15_s17, 4   ;;  %s974_s16 = smov %s976_s19 }
  0xc8   :  { %14 = sbr.rel (!%p12_p8) target bundleno = 2 (0x2), region = 86 }
  0xcd   :  { %555 = vsyncpa [#allocation4], 1 }
  0xce   :  { %557 = vsyncpa [#allocation4 + $0x1], 1 }

// kernel: _lambda_.31
= control target key start
LH: loop header
LB: loop body
LE: loop exit
PB: predicated region body
PF: predicated region fallthrough
CT: control target
= control target key end

     0   :  { %9 = vsyncpa [#allocation5], 0  ;;  %s1056_s0 = inlined_call_operand.vmem [shape: bf16[32,640], index: 0, kind: input, shape index: {}]   ;;  %s1057_s1 = inlined_call_operand.vmem [shape: bf16[640,128], index: 1, kind: input, shape index: {}]   ;;  %s1058_s2 = inlined_call_operand.hbm [shape: f32[1,128], index: 2, kind: input, shape index: {}]   ;;  %s1059_s3 = inlined_call_operand.hbm [shape: f32[1,128], index: 3, kind: input, shape index: {}]   ;;  %s1060_s4 = inlined_call_operand.vmem [shape: bf16[32,128], index: 4, kind: output, shape index: {}]  }
   0x1   :  { %10 = vsyncpa [#allocation7], 0  ;;  %s919_s15 = smov 0   ;;  %s921_s16 = smov 0  }
   0x2   :  { %s923_s17 = smov 0   ;;  %s925_s18 = smov 0  }
   0x3   :  { %s927_s19 = smov 0   ;;  %s929_s20 = smov 0  }
   0x4   :  { %s931_s21 = smov 0  }
   0x5 LB: > { %s614_s22 = sadd.s32 4294967295, %s889_s21   ;;  %s28_s23 = sadd.s32 1, %s881_s19  ;;  %s889_s21 = sphi %s931_s21, %s16_s21   ;;  %s885_s20 = sphi %s929_s20, %s1069_s20   ;;  %s881_s19 = sphi %s927_s19, %s1068_s19   ;;  %s877_s18 = sphi %s925_s18, %s1067_s18   ;;  %s873_s17 = sphi %s923_s17, %s1066_s17   ;;  %s869_s16 = sphi %s921_s16, %s1065_s16   ;;  %s865_s15 = sphi %s919_s15, %s1064_s15  }
   0x6   : > { %p29_p0 = scmp.ge.s32.totalorder %s28_s23, 5  ;;  %s35_s24 = sadd.s32 1, %s885_s20 }
   0x7   : > { %s48_s25 = sadd.s32 1, %s869_s16  ;;  %p55_p1 = scmp.ne.s32.totalorder %s869_s16, %s865_s15 }
   0x8   : > { %s1071_s23 = smov (%p29_p0, %s28_s23), 0  ;;  %s1073_s24 = smov (!%p29_p0, %s35_s24), %s885_s20 }
   0x9   : > { %s44_s26 = ssub.s32 %s881_s19, %s1071_s23  ;;  %p56_p2 = scmp.eq.s32.totalorder %s889_s21, 0 }
   0xa   : > { %p37_p3 = scmp.ge.s32.totalorder %s1073_s24, 2  ;;  %p616_p4 = scmp.ge.s32.totalorder %s889_s21, 1 }
   0xb   : > { %p967_p5 = por %p56_p2, %p55_p1  ;;  %p182_p6 = scmp.lt.s32.totalorder %s889_s21, 11 }
   0xc   : > { %s1075_s24 = smov (%p37_p3, %s1073_s24), 0  ;;  %p980_p8 = scmp.eq.s32.totalorder %s614_s22, 0 }
   0xd   : > { %p974_p7 = pnand %p616_p4, %p182_p6  ;;  %s43_s29 = ssub.s32 %s885_s20, %s1075_s24 }
   0xe   : > { %s45_s5 = sor.u32 %s44_s26, %s43_s29  ;;  %s195_s8 = sshll.u32 %s1058_s2, 4  ;;  %s196_s8 = int_to_ptr.hbm [resolvable:$true] %s195_s8 }
   0xf   : > { %p695_p9 = pneg %p974_p7  ;;  %p46_p10 = scmp.eq.s32.totalorder %s45_s5, 0 }
  0x10   : > { %s891_s10 = smov [#allocation4]   ;;  %s208_s14 = sshll.u32 %s1059_s3, 4  ;;  %s209_s14 = int_to_ptr.hbm [resolvable:$true] %s208_s14 }
  0x11   : > { %s990_s9 = scalar_select %p46_p10, %s869_s16, %s48_s25  }
  0x12   : > { %s197_s11 = sshll.u32 %s891_s10, 4  ;;  %p696_p11 = pnand %p980_p8, %p695_p9  ;;  %s198_s11 = int_to_ptr.vmem [resolvable:$true] %s197_s11 }
  0x13   : > { %s892_s22 = smov [#allocation6]   ;;  %p619_p12 = scmp.ge.s32.totalorder %s889_s21, 10 }
  0x14   : > { %698 = dma.hbm_to_vmem [thread:$0]  (!%p696_p11), %s196_s8, 16, %s198_s11, [#allocation5]  }
  0x15   : > { %s210_s26 = sshll.u32 %s892_s22, 4  ;;  %217 = sbr.rel (%p619_p12) target bundleno = 35 (0x23), region = 24  ;;  %s211_s26 = int_to_ptr.vmem [resolvable:$true] %s210_s26 }
  0x16   : > { %701 = dma.hbm_to_vmem [thread:$0]  (!%p696_p11), %s209_s14, 16, %s211_s26, [#allocation7]  }
  0x1a   : > { %220 = sbr.rel (!%p967_p5) target bundleno = 35 (0x23), region = 28  ;;  %s222_s25 = sand.u32 (%p967_p5), 1, %s869_s16  }
  0x1b   : > { %s686_s29 = smul.u32 (%p967_p5), 10, %s885_s20  ;;  %s620_s5 = sshll.u32 (%p967_p5), %s222_s25, 3 }
  0x1c   : > { %s224_s12 = scalar_lea.vmem (%p967_p5), [#allocation3], %s620_s5 }
  0x1d   : > { %s229_s6 = sadd.s32 (%p967_p5), %s881_s19, %s686_s29 }
  0x1e   : > { %s623_s7 = sshll.u32 (%p967_p5), %s229_s6, 2 }
  0x1f   : > { %s231_s11 = scalar_lea.vmem %s1056_s0, %s623_s7 }
  0x20   : > { %v248_v0 = vld [vmem:[%s231_s11] sm:$0xf]  ;;  %v250_v1 = vld [vmem:[%s231_s11 + $0x14] sm:$0xf] }
  0x21   : > { %249 = vst [vmem:[%s224_s12] sm:$0xf] %v248_v0 }
  0x22   : > { %251 = vst [vmem:[%s224_s12 + $0x4] sm:$0xf] %v250_v1 }
  0x23 PF: > { %295 = sbr.rel (%p974_p7) target bundleno = 242 (0xf2), region = 73  ;;  %s298_s27 = sand.u32 (!%p974_p7), 1, %s865_s15  }
  0x24   : > { %s1009_s13 = sshll.u32 (!%p974_p7), %s298_s27, 3 }
  0x25   : > { %s300_s14 = scalar_lea.vmem (!%p974_p7), [#allocation3], %s1009_s13 }
  0x28   : > { %856 = dma.done.wait (%p980_p8), [#allocation5], 16  }
  0x29   : > { %858 = vsyncadd (%p980_p8), [#allocation5], 4294967280 }
  0x2a   : > { %860 = dma.done.wait (%p980_p8), [#allocation7], 16  }
  0x2b   : > { %862 = vsyncadd (%p980_p8), [#allocation7], 4294967280  ;;  %s628_s28 = sshll.u32 %s873_s17, 4  ;;  %s630_s22 = sshll.u32 %s877_s18, 1 }
  0x2c   : > { %p349_p13 = scmp.lt.s32.totalorder %s628_s28, 79  ;;  %p357_p0 = scmp.lt.s32.totalorder %s630_s22, 3 }
  0x2d   : > { %p632_p1 = scmp.ne.s32.totalorder %s873_s17, 0 }
  0x2e   : > { %s1077_s28 = smov (!%p349_p13, %s628_s28), 79  ;;  %s1079_s22 = smov (!%p357_p0, %s630_s22), 3 }
  0x2f   : > { %s629_s15 = sshll.u32 %s1077_s28, 2  ;;  %s631_s5 = sshll.u32 %s1079_s22, 2 }
  0x30   : > { %s352_s29 = scalar_lea.vmem %s1057_s1, %s629_s15  ;;  %s1028_s8 = scalar_lea.vmem %s1060_s4, %s631_s5 }
  0x31   : > { %368 = sbr.rel (%p632_p1) target bundleno = 57 (0x39), region = 89 }
  0x36   : > { %v893_v2 = vmov 0.0  }
  0x37   : > { %369 = vst [vmem:[#allocation2] sm:$0xff] %v893_v2 }
  0x38   : > { %370 = vst [vmem:[#allocation2 + $0x8] sm:$0xff] %v893_v2 }
  0x39 PF: > { %v680_v3 = vld [vmem:[%s352_s29 + $0x38] sm:$0xff]  ;;  %v679_v4 = vld [vmem:[%s352_s29 + $0x30] sm:$0xff]  ;;  %v678_v5 = vld [vmem:[%s352_s29 + $0x28] sm:$0xff]  ;;  %p669_p2 = scmp.ne.s32.totalorder %s873_s17, 4 }
  0x3a   : > { %445 = vmatpush.bf16.msra.mxu0 %v680_v3  ;;  %v677_v6 = vld [vmem:[%s352_s29 + $0x20] sm:$0xff]  ;;  %v676_v7 = vld [vmem:[%s352_s29 + $0x18] sm:$0xff]  ;;  %v675_v8 = vld [vmem:[%s352_s29 + $0x10] sm:$0xff] }
  0x3b   : > { %v674_v9 = vld [vmem:[%s352_s29 + $0x8] sm:$0xff]  ;;  %v673_v10 = vld [vmem:[%s352_s29] sm:$0xff]  ;;  %v672_v11 = vld [vmem:[%s300_s14] sm:$0xff] }
  0x3e   : > { %446 = vmatpush.bf16.msra.mxu0 %v679_v4  ;;  %v371_v12 = vld [vmem:[#allocation2] sm:$0xff] }
  0x3f   : > { %v372_v15 = vld [vmem:[#allocation2 + $0x8] sm:$0xff] }
  0x42   : > { %447 = vmatpush.bf16.msra.mxu0 %v678_v5 }
  0x46   : > { %448 = vmatpush.bf16.msra.mxu0 %v677_v6 }
  0x4a   : > { %449 = vmatpush.bf16.msra.mxu0 %v676_v7 }
  0x4e   : > { %450 = vmatpush.bf16.msra.mxu0 %v675_v8 }
  0x52   : > { %451 = vmatpush.bf16.msra.mxu0 %v674_v9 }
  0x56   : > { %452 = vmatpush.bf16.msra.mxu0 %v673_v10 }
  0x59   : > { %453 = vmatmul.bf16.vlgmr.msra.gmra.mxu0 %v672_v11 }
  0xd6   : > { %v454_v13 = vpop.f32.mrf.mxu0 }
  0xd7   : > { %v459_v14 = vadd.f32 %v454_v13, %v371_v12 }
  0xd9   : > { %461 = vst [vmem:[#allocation2] sm:$0xff] %v459_v14 }
  0xdd   : > { %466 = sbr.rel (%p669_p2) target bundleno = 242 (0xf2), region = 93 }
  0xde   : > { %v456_v16 = vpop.f32.mrf.mxu0 }
  0xdf   : > { %v460_v17 = vadd.f32 %v456_v16, %v372_v15 }
  0xe1   : > { %462 = vst [vmem:[#allocation2 + $0x8] sm:$0xff] %v460_v17 }
  0xe2   : > { %v467_v18 = vld [vmem:[#allocation2] sm:$0xff] }
  0xe3   : > { %v765_v20 = vld [vmem:[#allocation4] ss:$0 sm:$0xff]  ;;  %v766_v21 = vld [vmem:[#allocation6] ss:$0 sm:$0xff] }
  0xe4   : > { %v473_v22 = vmul.f32 %v765_v20, %v467_v18 }
  0xe6   : > { %v479_v24 = vadd.f32 %v766_v21, %v473_v22 }
  0xe8   : > { %v468_v19 = vld [vmem:[#allocation2 + $0x8] sm:$0xff]  ;;  %v481_v26 = vmax.f32 %v479_v24, 0.0 }
  0xe9   : > { %v474_v23 = vmul.f32 %v765_v20, %v468_v19 }
  0xeb   : > { %v480_v25 = vadd.f32 %v766_v21, %v474_v23 }
  0xed   : > { %v482_v27 = vmax.f32 %v480_v25, 0.0 }
  0xef   : > { %v684_v28 = vpack.c.bf16 %v482_v27, %v481_v26 }
  0xf1   : > { %685 = vst [vmem:[%s1028_s8] sm:$0xff] %v684_v28  }
  0xf2 PF: > { %s16_s21 = sadd.s32 1, %s889_s21   ;;  %s1064_s15 = smov %s869_s16 }
  0xf3   : > { %p13_p3 = scmp.ge.s32.totalorder %s16_s21, 12   ;;  %s1065_s16 = smov %s990_s9 }
  0xf4   : > { %s1066_s17 = smov %s881_s19  ;;  %s1067_s18 = smov %s885_s20 }
  0xf5   : > { %s1068_s19 = smov %s1071_s23  ;;  %s1069_s20 = smov %s1075_s24 }
  0xf6   :  { %15 = sbr.rel (!%p13_p3) target bundleno = 5 (0x5), region = 134 }
  0xfb   :  { %515 = vsyncpa [#allocation5], 1 }
  0xfc   :  { %517 = vsyncpa [#allocation5 + $0x1], 1 }
  0xfd   :  { %518 = vsyncpa [#allocation7], 1 }

// kernel: _lambda_.32
= control target key start
LH: loop header
LB: loop body
LE: loop exit
PB: predicated region body
PF: predicated region fallthrough
CT: control target
= control target key end

     0   :  { %s815_s15 = smov 0   ;;  %s817_s16 = smov 0   ;;  %s957_s0 = inlined_call_operand.vmem [shape: bf16[32,128], index: 0, kind: input, shape index: {}]   ;;  %s958_s1 = inlined_call_operand.vmem [shape: bf16[128,256], index: 1, kind: input, shape index: {}]   ;;  %s959_s2 = inlined_call_operand.vmem [shape: f32[1,256], index: 2, kind: input, shape index: {}]   ;;  %s960_s3 = inlined_call_operand.vmem [shape: f32[1,256], index: 3, kind: input, shape index: {}]   ;;  %s961_s4 = inlined_call_operand.vmem [shape: bf16[32,256], index: 4, kind: output, shape index: {}]  }
   0x1   :  { %s819_s17 = smov 0  }
   0x2 LB: > { %s33_s18 = sadd.s32 1, %s784_s16  ;;  %p648_p0 = scmp.ge.s32.totalorder %s788_s17, 1  ;;  %s788_s17 = sphi %s819_s17, %s14_s17   ;;  %s784_s16 = sphi %s817_s16, %s963_s16   ;;  %s780_s15 = sphi %s815_s15, %s962_s15  }
   0x3   : > { %p35_p1 = scmp.ge.s32.totalorder %s33_s18, 2  ;;  %p228_p2 = scmp.lt.s32.totalorder %s788_s17, 3 }
   0x5   : > { %s965_s18 = smov (%p35_p1, %s33_s18), 0  ;;  %p229_p3 = pnand %p648_p0, %p228_p2 }
   0x6   : > { %s649_s11 = sshll.u32 (!%p229_p3), %s780_s15, 1 }
   0x7   : > { %232 = sbr.rel (%p229_p3) target bundleno = 188 (0xbc), region = 36  ;;  %p281_p4 = scmp.lt.s32.totalorder (!%p229_p3), %s649_s11, 3 }
   0xc   : > { %v716_v0 = vld [vmem:[%s958_s1 + $0x70] sm:$0xf]  ;;  %v741_v1 = vld [vmem:[%s958_s1 + $0x74] sm:$0xf0]  ;;  %v740_v2 = vld [vmem:[%s958_s1 + $0x74] sm:$0xf] }
   0xd   : > { %v717_v3 = vor.u32 %v741_v1, %v716_v0  ;;  %v718_v4 = vld [vmem:[%s958_s1 + $0x78] sm:$0xf0]  ;;  %v708_v5 = vld [vmem:[%s958_s1 + $0x60] sm:$0xf]  ;;  %v739_v6 = vld [vmem:[%s958_s1 + $0x64] sm:$0xf0] }
   0xe   : > { %v721_v7 = vor.u32 %v740_v2, %v718_v4  ;;  %v738_v8 = vld [vmem:[%s958_s1 + $0x64] sm:$0xf]  ;;  %v710_v9 = vld [vmem:[%s958_s1 + $0x68] sm:$0xf0]  ;;  %v709_v10 = vor.u32 %v739_v6, %v708_v5  ;;  %v700_v12 = vld [vmem:[%s958_s1 + $0x50] sm:$0xf] }
   0xf   : > { %439 = vmatpush.bf16.msra.mxu0 %v717_v3  ;;  %v713_v11 = vor.u32 %v738_v8, %v710_v9  ;;  %v737_v13 = vld [vmem:[%s958_s1 + $0x54] sm:$0xf0]  ;;  %v736_v14 = vld [vmem:[%s958_s1 + $0x54] sm:$0xf]  ;;  %v702_v15 = vld [vmem:[%s958_s1 + $0x58] sm:$0xf0] }
  0x10   : > { %453 = vmatpush.bf16.msra.mxu1 %v721_v7  ;;  %v701_v16 = vor.u32 %v737_v13, %v700_v12  ;;  %v705_v17 = vor.u32 %v736_v14, %v702_v15  ;;  %v692_v18 = vld [vmem:[%s958_s1 + $0x40] sm:$0xf]  ;;  %v735_v19 = vld [vmem:[%s958_s1 + $0x44] sm:$0xf0]  ;;  %v734_v20 = vld [vmem:[%s958_s1 + $0x44] sm:$0xf] }
  0x11   : > { %v694_v21 = vld [vmem:[%s958_s1 + $0x48] sm:$0xf0]  ;;  %v693_v22 = vor.u32 %v735_v19, %v692_v18  ;;  %v684_v24 = vld [vmem:[%s958_s1 + $0x30] sm:$0xf]  ;;  %v733_v25 = vld [vmem:[%s958_s1 + $0x34] sm:$0xf0] }
  0x12   : > { %v697_v23 = vor.u32 %v734_v20, %v694_v21  ;;  %v732_v26 = vld [vmem:[%s958_s1 + $0x34] sm:$0xf]  ;;  %v686_v27 = vld [vmem:[%s958_s1 + $0x38] sm:$0xf0]  ;;  %v685_v28 = vor.u32 %v733_v25, %v684_v24  ;;  %v676_v30 = vld [vmem:[%s958_s1 + $0x20] sm:$0xf] }
  0x13   : > { %440 = vmatpush.bf16.msra.mxu0 %v709_v10  ;;  %v689_v29 = vor.u32 %v732_v26, %v686_v27  ;;  %v731_v31 = vld [vmem:[%s958_s1 + $0x24] sm:$0xf0]  ;;  %v730_v32 = vld [vmem:[%s958_s1 + $0x24] sm:$0xf]  ;;  %v678_v33 = vld [vmem:[%s958_s1 + $0x28] sm:$0xf0] }
  0x14   : > { %454 = vmatpush.bf16.msra.mxu1 %v713_v11  ;;  %v677_v34 = vor.u32 %v731_v31, %v676_v30  ;;  %v681_v35 = vor.u32 %v730_v32, %v678_v33  ;;  %v668_v36 = vld [vmem:[%s958_s1 + $0x10] sm:$0xf]  ;;  %v729_v37 = vld [vmem:[%s958_s1 + $0x14] sm:$0xf0]  ;;  %s967_s11 = smov (!%p281_p4, %s649_s11), 3 }
  0x15   : > { %v728_v38 = vld [vmem:[%s958_s1 + $0x14] sm:$0xf]  ;;  %v670_v39 = vld [vmem:[%s958_s1 + $0x18] sm:$0xf0]  ;;  %v669_v40 = vor.u32 %v729_v37, %v668_v36  ;;  %v660_v42 = vld [vmem:[%s958_s1] sm:$0xf] }
  0x16   : > { %v673_v41 = vor.u32 %v728_v38, %v670_v39  ;;  %v727_v43 = vld [vmem:[%s958_s1 + $0x4] sm:$0xf0]  ;;  %s650_s9 = sshll.u32 %s967_s11, 2  ;;  %v726_v44 = vld [vmem:[%s958_s1 + $0x4] sm:$0xf]  ;;  %s724_s25 = sshll.u32 %s967_s11, 3 }
  0x17   : > { %441 = vmatpush.bf16.msra.mxu0 %v701_v16  ;;  %v662_v45 = vld [vmem:[%s958_s1 + $0x8] sm:$0xf0]  ;;  %v661_v46 = vor.u32 %v727_v43, %v660_v42  ;;  %s287_s21 = scalar_lea.vmem %s957_s0, %s650_s9  ;;  %v482_v49 = vld [vmem:[%s959_s2] sm:$0x3]  ;;  %s320_s28 = scalar_lea.vmem %s961_s4, %s724_s25 }
  0x18   : > { %455 = vmatpush.bf16.msra.mxu1 %v705_v17  ;;  %v665_v47 = vor.u32 %v726_v44, %v662_v45  ;;  %v725_v48 = vld [vmem:[%s287_s21] sm:$0xff]  ;;  %v484_v51 = vperm.slane %v482_v49, 0  ;;  %v485_v52 = vperm.slane %v482_v49, 1 }
  0x19   : > { %v492_v50 = vld [vmem:[%s960_s3] sm:$0x3] }
  0x1a   : > { %v494_v53 = vperm.slane %v492_v50, 0  ;;  %v495_v55 = vperm.slane %v492_v50, 1 }
  0x1b   : > { %442 = vmatpush.bf16.msra.mxu0 %v693_v22 }
  0x1c   : > { %456 = vmatpush.bf16.msra.mxu1 %v697_v23 }
  0x1f   : > { %443 = vmatpush.bf16.msra.mxu0 %v685_v28 }
  0x20   : > { %457 = vmatpush.bf16.msra.mxu1 %v689_v29 }
  0x23   : > { %444 = vmatpush.bf16.msra.mxu0 %v677_v34 }
  0x24   : > { %458 = vmatpush.bf16.msra.mxu1 %v681_v35 }
  0x27   : > { %445 = vmatpush.bf16.msra.mxu0 %v669_v40 }
  0x28   : > { %459 = vmatpush.bf16.msra.mxu1 %v673_v41 }
  0x2b   : > { %446 = vmatpush.bf16.msra.mxu0 %v661_v46 }
  0x2c   : > { %460 = vmatpush.bf16.msra.mxu1 %v665_v47 }
  0x2e   : > { %447 = vmatmul.bf16.vlgmr.msra.gmra.mxu0 %v725_v48 }
  0x2f   : > { %461 = vmatmul.bf16.vlgmr.msra.gmra.mxu1 %v725_v48 }
  0xab   : > { %v448_v54 = vpop.f32.mrf.mxu0 }
  0xac   : > { %v488_v56 = vmul.f32 %v484_v51, %v448_v54  ;;  %v462_v57 = vpop.f32.mrf.mxu1 }
  0xad   : > { %v489_v58 = vmul.f32 %v485_v52, %v462_v57 }
  0xae   : > { %v498_v59 = vadd.f32 %v494_v53, %v488_v56 }
  0xaf   : > { %v499_v60 = vadd.f32 %v495_v55, %v489_v58 }
  0xb1   : > { %v502_v61 = vpack.c.bf16 %v499_v60, %v498_v59 }
  0xb3   : > { %504 = vst [vmem:[%s320_s28] sm:$0xff] %v502_v61  ;;  %v450_v62 = vpop.f32.mrf.mxu0 }
  0xb4   : > { %v490_v63 = vmul.f32 %v484_v51, %v450_v62  ;;  %v464_v0 = vpop.f32.mrf.mxu1 }
  0xb5   : > { %v491_v1 = vmul.f32 %v485_v52, %v464_v0 }
  0xb6   : > { %v500_v2 = vadd.f32 %v494_v53, %v490_v63 }
  0xb7   : > { %v501_v3 = vadd.f32 %v495_v55, %v491_v1 }
  0xb9   : > { %v503_v4 = vpack.c.bf16 %v501_v3, %v500_v2 }
  0xbb   : > { %505 = vst [vmem:[%s320_s28 + $0x8] sm:$0xff] %v503_v4 }
  0xbc PF: > { %s14_s17 = sadd.s32 1, %s788_s17   ;;  %s962_s15 = smov %s784_s16 }
  0xbd   : > { %p11_p5 = scmp.ge.s32.totalorder %s14_s17, 4   ;;  %s963_s16 = smov %s965_s18 }
  0xbf   :  { %13 = sbr.rel (!%p11_p5) target bundleno = 2 (0x2), region = 83 }

// kernel: _lambda_.33
= control target key start
LH: loop header
LB: loop body
LE: loop exit
PB: predicated region body
PF: predicated region fallthrough
CT: control target
= control target key end

     0   :  { %s924_s18 = smov 0   ;;  %s926_s19 = smov 0   ;;  %s1069_s0 = inlined_call_operand.vmem [shape: bf16[32,128], index: 0, kind: input, shape index: {}]   ;;  %s1070_s1 = inlined_call_operand.vmem [shape: bf16[128,256], index: 1, kind: input, shape index: {}]   ;;  %s1071_s2 = inlined_call_operand.vmem [shape: f32[1,256], index: 2, kind: input, shape index: {}]   ;;  %s1072_s3 = inlined_call_operand.vmem [shape: f32[1,256], index: 3, kind: input, shape index: {}]   ;;  %s1073_s4 = inlined_call_operand.vmem [shape: bf16[32,256], index: 4, kind: input, shape index: {}]   ;;  %s1074_s5 = inlined_call_operand.vmem [shape: bf16[32,256], index: 5, kind: output, shape index: {}]  }
   0x1   :  { %s928_s20 = smov 0  }
   0x2 LB: > { %s34_s21 = sadd.s32 1, %s888_s19  ;;  %p748_p0 = scmp.ge.s32.totalorder %s892_s20, 1  ;;  %s892_s20 = sphi %s928_s20, %s15_s20   ;;  %s888_s19 = sphi %s926_s19, %s1076_s19   ;;  %s884_s18 = sphi %s924_s18, %s1075_s18  }
   0x3   : > { %p36_p1 = scmp.ge.s32.totalorder %s34_s21, 2  ;;  %p272_p2 = scmp.lt.s32.totalorder %s892_s20, 3 }
   0x5   : > { %s1078_s21 = smov (%p36_p1, %s34_s21), 0  ;;  %p273_p3 = pnand %p748_p0, %p272_p2 }
   0x6   : > { %s749_s16 = sshll.u32 (!%p273_p3), %s884_s18, 1 }
   0x7   : > { %276 = sbr.rel (%p273_p3) target bundleno = 192 (0xc0), region = 40  ;;  %p337_p4 = scmp.lt.s32.totalorder (!%p273_p3), %s749_s16, 3 }
   0xc   : > { %v819_v0 = vld [vmem:[%s1070_s1 + $0x70] sm:$0xf]  ;;  %v845_v1 = vld [vmem:[%s1070_s1 + $0x74] sm:$0xf0]  ;;  %v844_v2 = vld [vmem:[%s1070_s1 + $0x74] sm:$0xf] }
   0xd   : > { %v820_v3 = vor.u32 %v845_v1, %v819_v0  ;;  %v821_v4 = vld [vmem:[%s1070_s1 + $0x78] sm:$0xf0]  ;;  %v811_v5 = vld [vmem:[%s1070_s1 + $0x60] sm:$0xf]  ;;  %v843_v6 = vld [vmem:[%s1070_s1 + $0x64] sm:$0xf0] }
   0xe   : > { %v824_v7 = vor.u32 %v844_v2, %v821_v4  ;;  %v842_v8 = vld [vmem:[%s1070_s1 + $0x64] sm:$0xf]  ;;  %v813_v9 = vld [vmem:[%s1070_s1 + $0x68] sm:$0xf0]  ;;  %v812_v10 = vor.u32 %v843_v6, %v811_v5  ;;  %v803_v12 = vld [vmem:[%s1070_s1 + $0x50] sm:$0xf] }
   0xf   : > { %507 = vmatpush.bf16.msra.mxu0 %v820_v3  ;;  %v816_v11 = vor.u32 %v842_v8, %v813_v9  ;;  %v841_v13 = vld [vmem:[%s1070_s1 + $0x54] sm:$0xf0]  ;;  %v840_v14 = vld [vmem:[%s1070_s1 + $0x54] sm:$0xf]  ;;  %v805_v15 = vld [vmem:[%s1070_s1 + $0x58] sm:$0xf0] }
  0x10   : > { %521 = vmatpush.bf16.msra.mxu1 %v824_v7  ;;  %v804_v16 = vor.u32 %v841_v13, %v803_v12  ;;  %v808_v17 = vor.u32 %v840_v14, %v805_v15  ;;  %v795_v18 = vld [vmem:[%s1070_s1 + $0x40] sm:$0xf]  ;;  %v839_v19 = vld [vmem:[%s1070_s1 + $0x44] sm:$0xf0]  ;;  %v838_v20 = vld [vmem:[%s1070_s1 + $0x44] sm:$0xf] }
  0x11   : > { %v797_v21 = vld [vmem:[%s1070_s1 + $0x48] sm:$0xf0]  ;;  %v796_v22 = vor.u32 %v839_v19, %v795_v18  ;;  %v787_v24 = vld [vmem:[%s1070_s1 + $0x30] sm:$0xf]  ;;  %v837_v25 = vld [vmem:[%s1070_s1 + $0x34] sm:$0xf0] }
  0x12   : > { %v800_v23 = vor.u32 %v838_v20, %v797_v21  ;;  %v836_v26 = vld [vmem:[%s1070_s1 + $0x34] sm:$0xf]  ;;  %v789_v27 = vld [vmem:[%s1070_s1 + $0x38] sm:$0xf0]  ;;  %v788_v28 = vor.u32 %v837_v25, %v787_v24  ;;  %v779_v30 = vld [vmem:[%s1070_s1 + $0x20] sm:$0xf] }
  0x13   : > { %508 = vmatpush.bf16.msra.mxu0 %v812_v10  ;;  %v792_v29 = vor.u32 %v836_v26, %v789_v27  ;;  %v835_v31 = vld [vmem:[%s1070_s1 + $0x24] sm:$0xf0]  ;;  %v834_v32 = vld [vmem:[%s1070_s1 + $0x24] sm:$0xf]  ;;  %v781_v33 = vld [vmem:[%s1070_s1 + $0x28] sm:$0xf0] }
  0x14   : > { %522 = vmatpush.bf16.msra.mxu1 %v816_v11  ;;  %v780_v34 = vor.u32 %v835_v31, %v779_v30  ;;  %v784_v35 = vor.u32 %v834_v32, %v781_v33  ;;  %v771_v36 = vld [vmem:[%s1070_s1 + $0x10] sm:$0xf]  ;;  %v833_v37 = vld [vmem:[%s1070_s1 + $0x14] sm:$0xf0]  ;;  %s1080_s16 = smov (!%p337_p4, %s749_s16), 3 }
  0x15   : > { %v832_v38 = vld [vmem:[%s1070_s1 + $0x14] sm:$0xf]  ;;  %v773_v39 = vld [vmem:[%s1070_s1 + $0x18] sm:$0xf0]  ;;  %v772_v40 = vor.u32 %v833_v37, %v771_v36  ;;  %v763_v42 = vld [vmem:[%s1070_s1] sm:$0xf] }
  0x16   : > { %v776_v41 = vor.u32 %v832_v38, %v773_v39  ;;  %v831_v43 = vld [vmem:[%s1070_s1 + $0x4] sm:$0xf0]  ;;  %s750_s15 = sshll.u32 %s1080_s16, 2  ;;  %v830_v44 = vld [vmem:[%s1070_s1 + $0x4] sm:$0xf]  ;;  %s827_s28 = sshll.u32 %s1080_s16, 3 }
  0x17   : > { %509 = vmatpush.bf16.msra.mxu0 %v804_v16  ;;  %v765_v45 = vld [vmem:[%s1070_s1 + $0x8] sm:$0xf0]  ;;  %v764_v46 = vor.u32 %v831_v43, %v763_v42  ;;  %s343_s27 = scalar_lea.vmem %s1069_s0, %s750_s15  ;;  %v550_v49 = vld [vmem:[%s1071_s2] sm:$0x3]  ;;  %s376_s7 = scalar_lea.vmem %s1073_s4, %s827_s28 }
  0x18   : > { %523 = vmatpush.bf16.msra.mxu1 %v808_v17  ;;  %v768_v47 = vor.u32 %v830_v44, %v765_v45  ;;  %v829_v48 = vld [vmem:[%s343_s27] sm:$0xff]  ;;  %v552_v51 = vperm.slane %v550_v49, 0  ;;  %v553_v53 = vperm.slane %v550_v49, 1  ;;  %v571_v2 = vld [vmem:[%s376_s7 + $0x8] sm:$0xff]  ;;  %s388_s11 = scalar_lea.vmem %s1074_s5, %s827_s28 }
  0x19   : > { %v560_v50 = vld [vmem:[%s1072_s3] sm:$0x3]  ;;  %v574_v7 = vunpack.c.l.bf16 %v571_v2  ;;  %v575_v11 = vunpack.c.h.bf16 %v571_v2 }
  0x1a   : > { %v570_v52 = vld [vmem:[%s376_s7] sm:$0xff]  ;;  %v562_v54 = vperm.slane %v560_v50, 0  ;;  %v563_v56 = vperm.slane %v560_v50, 1 }
  0x1b   : > { %510 = vmatpush.bf16.msra.mxu0 %v796_v22  ;;  %v572_v58 = vunpack.c.l.bf16 %v570_v52  ;;  %v573_v61 = vunpack.c.h.bf16 %v570_v52 }
  0x1c   : > { %524 = vmatpush.bf16.msra.mxu1 %v800_v23 }
  0x1f   : > { %511 = vmatpush.bf16.msra.mxu0 %v788_v28 }
  0x20   : > { %525 = vmatpush.bf16.msra.mxu1 %v792_v29 }
  0x23   : > { %512 = vmatpush.bf16.msra.mxu0 %v780_v34 }
  0x24   : > { %526 = vmatpush.bf16.msra.mxu1 %v784_v35 }
  0x27   : > { %513 = vmatpush.bf16.msra.mxu0 %v772_v40 }
  0x28   : > { %527 = vmatpush.bf16.msra.mxu1 %v776_v41 }
  0x2b   : > { %514 = vmatpush.bf16.msra.mxu0 %v764_v46 }
  0x2c   : > { %528 = vmatpush.bf16.msra.mxu1 %v768_v47 }
  0x2e   : > { %515 = vmatmul.bf16.vlgmr.msra.gmra.mxu0 %v829_v48 }
  0x2f   : > { %529 = vmatmul.bf16.vlgmr.msra.gmra.mxu1 %v829_v48 }
  0xab   : > { %v516_v55 = vpop.f32.mrf.mxu0 }
  0xac   : > { %v556_v57 = vmul.f32 %v552_v51, %v516_v55  ;;  %v530_v59 = vpop.f32.mrf.mxu1 }
  0xad   : > { %v557_v60 = vmul.f32 %v553_v53, %v530_v59 }
  0xae   : > { %v566_v62 = vadd.f32 %v562_v54, %v556_v57 }
  0xaf   : > { %v567_v63 = vadd.f32 %v563_v56, %v557_v60 }
  0xb0   : > { %v576_v0 = vadd.f32 %v572_v58, %v566_v62 }
  0xb1   : > { %v577_v1 = vadd.f32 %v573_v61, %v567_v63 }
  0xb2   : > { %v580_v3 = vmax.f32 %v576_v0, 0.0 }
  0xb3   : > { %v581_v4 = vmax.f32 %v577_v1, 0.0  ;;  %v518_v5 = vpop.f32.mrf.mxu0 }
  0xb4   : > { %v558_v6 = vmul.f32 %v552_v51, %v518_v5  ;;  %v532_v8 = vpop.f32.mrf.mxu1 }
  0xb5   : > { %v584_v9 = vpack.c.bf16 %v581_v4, %v580_v3  ;;  %v559_v10 = vmul.f32 %v553_v53, %v532_v8 }
  0xb6   : > { %v568_v12 = vadd.f32 %v562_v54, %v558_v6 }
  0xb7   : > { %586 = vst [vmem:[%s388_s11] sm:$0xff] %v584_v9  ;;  %v569_v13 = vadd.f32 %v563_v56, %v559_v10 }
  0xb8   : > { %v578_v14 = vadd.f32 %v574_v7, %v568_v12 }
  0xb9   : > { %v579_v15 = vadd.f32 %v575_v11, %v569_v13 }
  0xba   : > { %v582_v16 = vmax.f32 %v578_v14, 0.0 }
  0xbb   : > { %v583_v17 = vmax.f32 %v579_v15, 0.0 }
  0xbd   : > { %v585_v18 = vpack.c.bf16 %v583_v17, %v582_v16 }
  0xbf   : > { %587 = vst [vmem:[%s388_s11 + $0x8] sm:$0xff] %v585_v18 }
  0xc0 PF: > { %s15_s20 = sadd.s32 1, %s892_s20   ;;  %s1075_s18 = smov %s888_s19 }
  0xc1   : > { %p12_p5 = scmp.ge.s32.totalorder %s15_s20, 4   ;;  %s1076_s19 = smov %s1078_s21 }
  0xc3   :  { %14 = sbr.rel (!%p12_p5) target bundleno = 2 (0x2), region = 90 }

// kernel: _lambda_.34
= control target key start
LH: loop header
LB: loop body
LE: loop exit
PB: predicated region body
PF: predicated region fallthrough
CT: control target
= control target key end

     0   :  { %9 = vsyncpa [#allocation4], 0  ;;  %s878_s15 = smov 0   ;;  %s880_s16 = smov 0   ;;  %s973_s0 = inlined_call_operand.vmem [shape: bf16[32,256], index: 0, kind: input, shape index: {}]   ;;  %s974_s1 = inlined_call_operand.vmem [shape: bf16[256,128], index: 1, kind: input, shape index: {}]   ;;  %s975_s2 = inlined_call_operand.hbm [shape: f32[1,128], index: 2, kind: input, shape index: {}]   ;;  %s976_s3 = inlined_call_operand.vmem [shape: f32[1,128], index: 3, kind: input, shape index: {}]   ;;  %s977_s4 = inlined_call_operand.vmem [shape: bf16[32,128], index: 4, kind: output, shape index: {}]  }
   0x1   :  { %s882_s17 = smov 0  }
   0x2 LB: > { %s645_s18 = sadd.s32 4294967295, %s850_s17   ;;  %s34_s19 = sadd.s32 1, %s846_s16  ;;  %s850_s17 = sphi %s882_s17, %s15_s17   ;;  %s846_s16 = sphi %s880_s16, %s979_s16   ;;  %s842_s15 = sphi %s878_s15, %s978_s15  }
   0x3   : > { %p36_p0 = scmp.ge.s32.totalorder %s34_s19, 2  ;;  %p647_p1 = scmp.ge.s32.totalorder %s850_s17, 1 }
   0x4   : > { %p175_p2 = scmp.lt.s32.totalorder %s850_s17, 3  ;;  %p765_p4 = scmp.eq.s32.totalorder %s645_s18, 0 }
   0x5   : > { %s981_s19 = smov (%p36_p0, %s34_s19), 0  ;;  %s200_s22 = sshll.u32 %s975_s2, 4  ;;  %s201_s22 = int_to_ptr.hbm [resolvable:$true] %s200_s22 }
   0x6   : > { %p176_p3 = pnand %p647_p1, %p175_p2  ;;  %s852_s23 = smov [#allocation3]  }
   0x7   : > { %s202_s24 = sshll.u32 %s852_s23, 4  ;;  %s203_s24 = int_to_ptr.vmem [resolvable:$true] %s202_s24 }
   0x8   : > { %p761_p5 = pneg %p176_p3  ;;  %236 = sbr.rel (%p176_p3) target bundleno = 192 (0xc0), region = 36 }
   0xa   : > { %p762_p6 = pnand %p765_p4, %p761_p5 }
   0xc   : > { %764 = dma.hbm_to_vmem [thread:$0]  (!%p762_p6), %s201_s22, 16, %s203_s24, [#allocation4]  }
   0xd   : > { %837 = dma.done.wait (%p765_p4), [#allocation4], 16  }
   0xe   : > { %839 = vsyncadd (%p765_p4), [#allocation4], 4294967280  ;;  %v743_v0 = vld [vmem:[%s974_s1 + $0x38] sm:$0xff]  ;;  %v742_v2 = vld [vmem:[%s974_s1 + $0x30] sm:$0xff]  ;;  %s654_s11 = sshll.u32 %s842_s15, 1 }
   0xf   : > { %v751_v1 = vld [vmem:[%s974_s1 + $0x78] sm:$0xff]  ;;  %463 = vmatpush.bf16.msra.mxu0 %v743_v0  ;;  %v750_v3 = vld [vmem:[%s974_s1 + $0x70] sm:$0xff]  ;;  %v741_v4 = vld [vmem:[%s974_s1 + $0x28] sm:$0xff]  ;;  %p284_p7 = scmp.lt.s32.totalorder %s654_s11, 3 }
  0x10   : > { %477 = vmatpush.bf16.msra.mxu1 %v751_v1  ;;  %v749_v5 = vld [vmem:[%s974_s1 + $0x68] sm:$0xff]  ;;  %v740_v6 = vld [vmem:[%s974_s1 + $0x20] sm:$0xff]  ;;  %v739_v8 = vld [vmem:[%s974_s1 + $0x18] sm:$0xff] }
  0x11   : > { %v748_v7 = vld [vmem:[%s974_s1 + $0x60] sm:$0xff]  ;;  %v747_v9 = vld [vmem:[%s974_s1 + $0x58] sm:$0xff]  ;;  %s983_s11 = smov (!%p284_p7, %s654_s11), 3  ;;  %v738_v10 = vld [vmem:[%s974_s1 + $0x10] sm:$0xff] }
  0x12   : > { %v746_v11 = vld [vmem:[%s974_s1 + $0x50] sm:$0xff]  ;;  %s733_s27 = sshll.u32 %s983_s11, 3  ;;  %v737_v12 = vld [vmem:[%s974_s1 + $0x8] sm:$0xff]  ;;  %v736_v14 = vld [vmem:[%s974_s1] sm:$0xff]  ;;  %s658_s20 = sshll.u32 %s983_s11, 2 }
  0x13   : > { %464 = vmatpush.bf16.msra.mxu0 %v742_v2  ;;  %v745_v13 = vld [vmem:[%s974_s1 + $0x48] sm:$0xff]  ;;  %s291_s8 = scalar_lea.vmem %s973_s0, %s733_s27  ;;  %v744_v15 = vld [vmem:[%s974_s1 + $0x40] sm:$0xff]  ;;  %s313_s23 = scalar_lea.vmem %s977_s4, %s658_s20 }
  0x14   : > { %478 = vmatpush.bf16.msra.mxu1 %v750_v3  ;;  %v661_v16 = vld [vmem:[%s291_s8] sm:$0xf]  ;;  %v735_v17 = vld [vmem:[%s291_s8 + $0x4] sm:$0xf0]  ;;  %v734_v18 = vld [vmem:[%s291_s8 + $0x4] sm:$0xf] }
  0x15   : > { %v663_v19 = vld [vmem:[%s291_s8 + $0x8] sm:$0xf0]  ;;  %v662_v20 = vor.u32 %v735_v17, %v661_v16  ;;  %v792_v25 = vld [vmem:[#allocation3] ss:$0 sm:$0xff] }
  0x16   : > { %v666_v21 = vor.u32 %v734_v18, %v663_v19  ;;  %v793_v27 = vld [vmem:[%s976_s3] ss:$0 sm:$0xff] }
  0x17   : > { %465 = vmatpush.bf16.msra.mxu0 %v741_v4 }
  0x18   : > { %479 = vmatpush.bf16.msra.mxu1 %v749_v5 }
  0x1b   : > { %466 = vmatpush.bf16.msra.mxu0 %v740_v6 }
  0x1c   : > { %480 = vmatpush.bf16.msra.mxu1 %v748_v7 }
  0x1f   : > { %467 = vmatpush.bf16.msra.mxu0 %v739_v8 }
  0x20   : > { %481 = vmatpush.bf16.msra.mxu1 %v747_v9 }
  0x23   : > { %468 = vmatpush.bf16.msra.mxu0 %v738_v10 }
  0x24   : > { %482 = vmatpush.bf16.msra.mxu1 %v746_v11 }
  0x27   : > { %469 = vmatpush.bf16.msra.mxu0 %v737_v12 }
  0x28   : > { %483 = vmatpush.bf16.msra.mxu1 %v745_v13 }
  0x2b   : > { %470 = vmatpush.bf16.msra.mxu0 %v736_v14 }
  0x2c   : > { %484 = vmatpush.bf16.msra.mxu1 %v744_v15 }
  0x2e   : > { %471 = vmatmul.bf16.vlgmr.msra.gmra.mxu0 %v662_v20 }
  0x2f   : > { %485 = vmatmul.bf16.vlgmr.msra.gmra.mxu1 %v666_v21 }
  0xab   : > { %v472_v22 = vpop.f32.mrf.mxu0 }
  0xac   : > { %v486_v23 = vpop.f32.mrf.mxu1 }
  0xad   : > { %v487_v24 = vadd.f32 %v486_v23, %v472_v22 }
  0xaf   : > { %v504_v26 = vmul.f32 %v792_v25, %v487_v24 }
  0xb1   : > { %v510_v31 = vadd.f32 %v793_v27, %v504_v26 }
  0xb3   : > { %v474_v28 = vpop.f32.mrf.mxu0  ;;  %v512_v34 = vmax.f32 %v510_v31, 0.0 }
  0xb4   : > { %v488_v29 = vpop.f32.mrf.mxu1 }
  0xb5   : > { %v489_v30 = vadd.f32 %v488_v29, %v474_v28 }
  0xb7   : > { %v505_v32 = vmul.f32 %v792_v25, %v489_v30 }
  0xb9   : > { %v511_v33 = vadd.f32 %v793_v27, %v505_v32 }
  0xbb   : > { %v513_v35 = vmax.f32 %v511_v33, 0.0 }
  0xbd   : > { %v755_v36 = vpack.c.bf16 %v513_v35, %v512_v34 }
  0xbf   : > { %756 = vst [vmem:[%s313_s23] sm:$0xff] %v755_v36  }
  0xc0 PF: > { %s15_s17 = sadd.s32 1, %s850_s17   ;;  %s978_s15 = smov %s846_s16 }
  0xc1   : > { %p12_p8 = scmp.ge.s32.totalorder %s15_s17, 4   ;;  %s979_s16 = smov %s981_s19 }
  0xc3   :  { %14 = sbr.rel (!%p12_p8) target bundleno = 2 (0x2), region = 86 }
  0xc8   :  { %546 = vsyncpa [#allocation4], 1 }
  0xc9   :  { %548 = vsyncpa [#allocation4 + $0x1], 1 }

// kernel: _lambda_.37
= control target key start
LH: loop header
LB: loop body
LE: loop exit
PB: predicated region body
PF: predicated region fallthrough
CT: control target
= control target key end

     0   :  { %9 = vsyncpa [#allocation4], 0  ;;  %s1047_s0 = inlined_call_operand.vmem [shape: bf16[32,256], index: 0, kind: input, shape index: {}]   ;;  %s1048_s1 = inlined_call_operand.vmem [shape: bf16[256,128], index: 1, kind: input, shape index: {}]   ;;  %s1049_s2 = inlined_call_operand.hbm [shape: f32[1,128], index: 2, kind: input, shape index: {}]   ;;  %s1050_s3 = inlined_call_operand.hbm [shape: f32[1,128], index: 3, kind: input, shape index: {}]   ;;  %s1051_s4 = inlined_call_operand.vmem [shape: bf16[32,128], index: 4, kind: output, shape index: {}]  }
   0x1   :  { %10 = vsyncpa [#allocation6], 0  ;;  %s930_s15 = smov 0   ;;  %s932_s16 = smov 0  }
   0x2   :  { %s934_s17 = smov 0  }
   0x3 LB: > { %s651_s18 = sadd.s32 4294967295, %s901_s17   ;;  %s35_s19 = sadd.s32 1, %s897_s16  ;;  %s901_s17 = sphi %s934_s17, %s16_s17   ;;  %s897_s16 = sphi %s932_s16, %s1055_s16   ;;  %s893_s15 = sphi %s930_s15, %s1054_s15  }
   0x4   : > { %p37_p0 = scmp.ge.s32.totalorder %s35_s19, 2  ;;  %p653_p1 = scmp.ge.s32.totalorder %s901_s17, 1 }
   0x5   : > { %p176_p2 = scmp.lt.s32.totalorder %s901_s17, 3  ;;  %p955_p4 = scmp.eq.s32.totalorder %s651_s18, 0 }
   0x6   : > { %s1057_s19 = smov (%p37_p0, %s35_s19), 0  ;;  %s201_s24 = sshll.u32 %s1049_s2, 4  ;;  %s202_s24 = int_to_ptr.hbm [resolvable:$true] %s201_s24 }
   0x7   : > { %p951_p3 = pnand %p653_p1, %p176_p2  ;;  %s903_s25 = smov [#allocation3]  }
   0x8   : > { %s203_s26 = sshll.u32 %s903_s25, 4  ;;  %s214_s29 = sshll.u32 %s1050_s3, 4  ;;  %s204_s26 = int_to_ptr.vmem [resolvable:$true] %s203_s26  ;;  %s215_s29 = int_to_ptr.hbm [resolvable:$true] %s214_s29 }
   0x9   : > { %p772_p5 = pneg %p951_p3  ;;  %s904_s30 = smov [#allocation5]  }
   0xa   : > { %s216_s5 = sshll.u32 %s904_s30, 4  ;;  %244 = sbr.rel (%p951_p3) target bundleno = 196 (0xc4), region = 36  ;;  %s217_s5 = int_to_ptr.vmem [resolvable:$true] %s216_s5 }
   0xb   : > { %p773_p6 = pnand %p955_p4, %p772_p5 }
   0xd   : > { %775 = dma.hbm_to_vmem [thread:$0]  (!%p773_p6), %s202_s24, 16, %s204_s26, [#allocation4]  }
   0xe   : > { %778 = dma.hbm_to_vmem [thread:$0]  (!%p773_p6), %s215_s29, 16, %s217_s5, [#allocation6]  }
   0xf   : > { %884 = dma.done.wait (%p955_p4), [#allocation4], 16  }
  0x10   : > { %886 = vsyncadd (%p955_p4), [#allocation4], 4294967280 }
  0x11   : > { %888 = dma.done.wait (%p955_p4), [#allocation6], 16  }
  0x12   : > { %890 = vsyncadd (%p955_p4), [#allocation6], 4294967280  ;;  %v750_v0 = vld [vmem:[%s1048_s1 + $0x38] sm:$0xff]  ;;  %v749_v2 = vld [vmem:[%s1048_s1 + $0x30] sm:$0xff]  ;;  %s661_s22 = sshll.u32 %s893_s15, 1 }
  0x13   : > { %v758_v1 = vld [vmem:[%s1048_s1 + $0x78] sm:$0xff]  ;;  %470 = vmatpush.bf16.msra.mxu0 %v750_v0  ;;  %v757_v3 = vld [vmem:[%s1048_s1 + $0x70] sm:$0xff]  ;;  %v748_v4 = vld [vmem:[%s1048_s1 + $0x28] sm:$0xff]  ;;  %p294_p7 = scmp.lt.s32.totalorder %s661_s22, 3 }
  0x14   : > { %484 = vmatpush.bf16.msra.mxu1 %v758_v1  ;;  %v756_v5 = vld [vmem:[%s1048_s1 + $0x68] sm:$0xff]  ;;  %v747_v6 = vld [vmem:[%s1048_s1 + $0x20] sm:$0xff]  ;;  %v746_v8 = vld [vmem:[%s1048_s1 + $0x18] sm:$0xff] }
  0x15   : > { %v755_v7 = vld [vmem:[%s1048_s1 + $0x60] sm:$0xff]  ;;  %v754_v9 = vld [vmem:[%s1048_s1 + $0x58] sm:$0xff]  ;;  %s1059_s22 = smov (!%p294_p7, %s661_s22), 3  ;;  %v745_v10 = vld [vmem:[%s1048_s1 + $0x10] sm:$0xff] }
  0x16   : > { %v753_v11 = vld [vmem:[%s1048_s1 + $0x50] sm:$0xff]  ;;  %s740_s8 = sshll.u32 %s1059_s22, 3  ;;  %v744_v12 = vld [vmem:[%s1048_s1 + $0x8] sm:$0xff]  ;;  %v743_v14 = vld [vmem:[%s1048_s1] sm:$0xff]  ;;  %s665_s25 = sshll.u32 %s1059_s22, 2 }
  0x17   : > { %471 = vmatpush.bf16.msra.mxu0 %v749_v2  ;;  %v752_v13 = vld [vmem:[%s1048_s1 + $0x48] sm:$0xff]  ;;  %s301_s18 = scalar_lea.vmem %s1047_s0, %s740_s8  ;;  %v751_v15 = vld [vmem:[%s1048_s1 + $0x40] sm:$0xff]  ;;  %s320_s28 = scalar_lea.vmem %s1051_s4, %s665_s25 }
  0x18   : > { %485 = vmatpush.bf16.msra.mxu1 %v757_v3  ;;  %v668_v16 = vld [vmem:[%s301_s18] sm:$0xf]  ;;  %v742_v17 = vld [vmem:[%s301_s18 + $0x4] sm:$0xf0]  ;;  %v741_v18 = vld [vmem:[%s301_s18 + $0x4] sm:$0xf] }
  0x19   : > { %v670_v19 = vld [vmem:[%s301_s18 + $0x8] sm:$0xf0]  ;;  %v669_v20 = vor.u32 %v742_v17, %v668_v16  ;;  %v809_v25 = vld [vmem:[#allocation3] ss:$0 sm:$0xff]  ;;  %v810_v27 = vld [vmem:[#allocation5] ss:$0 sm:$0xff] }
  0x1a   : > { %v673_v21 = vor.u32 %v741_v18, %v670_v19 }
  0x1b   : > { %472 = vmatpush.bf16.msra.mxu0 %v748_v4 }
  0x1c   : > { %486 = vmatpush.bf16.msra.mxu1 %v756_v5 }
  0x1f   : > { %473 = vmatpush.bf16.msra.mxu0 %v747_v6 }
  0x20   : > { %487 = vmatpush.bf16.msra.mxu1 %v755_v7 }
  0x23   : > { %474 = vmatpush.bf16.msra.mxu0 %v746_v8 }
  0x24   : > { %488 = vmatpush.bf16.msra.mxu1 %v754_v9 }
  0x27   : > { %475 = vmatpush.bf16.msra.mxu0 %v745_v10 }
  0x28   : > { %489 = vmatpush.bf16.msra.mxu1 %v753_v11 }
  0x2b   : > { %476 = vmatpush.bf16.msra.mxu0 %v744_v12 }
  0x2c   : > { %490 = vmatpush.bf16.msra.mxu1 %v752_v13 }
  0x2f   : > { %477 = vmatpush.bf16.msra.mxu0 %v743_v14 }
  0x30   : > { %491 = vmatpush.bf16.msra.mxu1 %v751_v15 }
  0x32   : > { %478 = vmatmul.bf16.vlgmr.msra.gmra.mxu0 %v669_v20 }
  0x33   : > { %492 = vmatmul.bf16.vlgmr.msra.gmra.mxu1 %v673_v21 }
  0xaf   : > { %v479_v22 = vpop.f32.mrf.mxu0 }
  0xb0   : > { %v493_v23 = vpop.f32.mrf.mxu1 }
  0xb1   : > { %v494_v24 = vadd.f32 %v493_v23, %v479_v22 }
  0xb3   : > { %v511_v26 = vmul.f32 %v809_v25, %v494_v24 }
  0xb5   : > { %v517_v31 = vadd.f32 %v810_v27, %v511_v26 }
  0xb7   : > { %v481_v28 = vpop.f32.mrf.mxu0  ;;  %v519_v34 = vmax.f32 %v517_v31, 0.0 }
  0xb8   : > { %v495_v29 = vpop.f32.mrf.mxu1 }
  0xb9   : > { %v496_v30 = vadd.f32 %v495_v29, %v481_v28 }
  0xbb   : > { %v512_v32 = vmul.f32 %v809_v25, %v496_v30 }
  0xbd   : > { %v518_v33 = vadd.f32 %v810_v27, %v512_v32 }
  0xbf   : > { %v520_v35 = vmax.f32 %v518_v33, 0.0 }
  0xc1   : > { %v762_v36 = vpack.c.bf16 %v520_v35, %v519_v34 }
  0xc3   : > { %763 = vst [vmem:[%s320_s28] sm:$0xff] %v762_v36  }
  0xc4 PF: > { %s16_s17 = sadd.s32 1, %s901_s17   ;;  %s1054_s15 = smov %s897_s16 }
  0xc5   : > { %p13_p8 = scmp.ge.s32.totalorder %s16_s17, 4   ;;  %s1055_s16 = smov %s1057_s19 }
  0xc7   :  { %15 = sbr.rel (!%p13_p8) target bundleno = 3 (0x3), region = 88 }
  0xcc   :  { %553 = vsyncpa [#allocation4], 1 }
  0xcd   :  { %555 = vsyncpa [#allocation4 + $0x1], 1 }
  0xce   :  { %556 = vsyncpa [#allocation6], 1 }

// kernel: _lambda_.38
= control target key start
LH: loop header
LB: loop body
LE: loop exit
PB: predicated region body
PF: predicated region fallthrough
CT: control target
= control target key end

     0   :  { %9 = vsyncpa [#allocation4], 0  ;;  %s966_s15 = smov 0   ;;  %s968_s16 = smov 0   ;;  %s1045_s0 = inlined_call_operand.vmem [shape: bf16[8,1152], index: 0, kind: input, shape index: {}]   ;;  %s1046_s1 = inlined_call_operand.vmem [shape: bf16[1152,128], index: 1, kind: input, shape index: {}]   ;;  %s1047_s2 = inlined_call_operand.hbm [shape: f32[1,128], index: 2, kind: input, shape index: {}]   ;;  %s1048_s3 = inlined_call_operand.vmem [shape: f32[1,128], index: 3, kind: input, shape index: {}]   ;;  %s1049_s4 = inlined_call_operand.vmem [shape: bf16[8,128], index: 4, kind: output, shape index: {}]  }
   0x1   :  { %s970_s17 = smov 0  }
   0x2 LB: > { %s709_s18 = sadd.s32 4294967295, %s937_s17   ;;  %s27_s19 = sadd.s32 1, %s933_s16  ;;  %s937_s17 = sphi %s970_s17, %s15_s17   ;;  %s933_s16 = sphi %s968_s16, %s1051_s16   ;;  %s929_s15 = sphi %s966_s15, %s1050_s15  }
   0x3   : > { %p28_p0 = scmp.ge.s32.totalorder %s27_s19, 3  ;;  %p710_p1 = scmp.ge.s32.totalorder %s937_s17, 1 }
   0x4   : > { %p181_p2 = scmp.lt.s32.totalorder %s937_s17, 4  ;;  %p851_p4 = scmp.eq.s32.totalorder %s709_s18, 0 }
   0x5   : > { %s1053_s19 = smov (%p28_p0, %s27_s19), 0  ;;  %s194_s22 = sshll.u32 %s1047_s2, 4  ;;  %s195_s22 = int_to_ptr.hbm [resolvable:$true] %s194_s22 }
   0x6   : > { %p182_p3 = pnand %p710_p1, %p181_p2  ;;  %s939_s23 = smov [#allocation3]  }
   0x7   : > { %s196_s24 = sshll.u32 %s939_s23, 4  ;;  %s197_s24 = int_to_ptr.vmem [resolvable:$true] %s196_s24 }
   0x8   : > { %p847_p5 = pneg %p182_p3  ;;  %245 = sbr.rel (%p182_p3) target bundleno = 211 (0xd3), region = 36 }
   0xa   : > { %p848_p6 = pnand %p851_p4, %p847_p5 }
   0xc   : > { %850 = dma.hbm_to_vmem [thread:$0]  (!%p848_p6), %s195_s22, 16, %s197_s24, [#allocation4]  }
   0xd   : > { %924 = dma.done.wait (%p851_p4), [#allocation4], 16  }
   0xe   : > { %926 = vsyncadd (%p851_p4), [#allocation4], 4294967280  ;;  %s292_s25 = smul.u32 3, %s929_s15  ;;  %p718_p9 = scmp.ne.s32.totalorder %s929_s15, 0 }
   0xf   : > { %s306_s26 = smul.u32 48, %s929_s15 }
  0x10   : > { %p295_p7 = scmp.lt.s32.totalorder %s292_s25, 8 }
  0x11   : > { %p307_p8 = scmp.lt.s32.totalorder %s306_s26, 143  ;;  %327 = sbr.rel (%p718_p9) target bundleno = 24 (0x18), region = 44 }
  0x12   : > { %s1055_s25 = smov (!%p295_p7, %s292_s25), 8 }
  0x13   : > { %s1057_s26 = smov (!%p307_p8, %s306_s26), 143  ;;  %s716_s27 = sshll.u32 %s1055_s25, 2 }
  0x14   : > { %s995_s30 = scalar_lea.vmem %s1045_s0, %s716_s27  ;;  %s717_s5 = sshll.u32 %s1057_s26, 2 }
  0x15   : > { %s1000_s8 = scalar_lea.vmem %s1046_s1, %s717_s5 }
  0x16   : > { %v940_v0 = vmov 0.0  }
  0x17   : > { %328 = vst [vmem:[#allocation2] sm:$0xff] %v940_v0 }
  0x18 PF: > { %v826_v1 = vld [vmem:[%s1000_s8 + $0x38] sm:$0xff]  ;;  %v825_v4 = vld [vmem:[%s1000_s8 + $0x30] sm:$0xff]  ;;  %v824_v7 = vld [vmem:[%s1000_s8 + $0x28] sm:$0xff]  ;;  %p815_p10 = scmp.ne.s32.totalorder %s929_s15, 2 }
  0x19   : > { %v834_v2 = vld [vmem:[%s1000_s8 + $0x78] sm:$0xff]  ;;  %535 = vmatpush.bf16.msra.mxu0 %v826_v1  ;;  %v833_v5 = vld [vmem:[%s1000_s8 + $0x70] sm:$0xff]  ;;  %v832_v8 = vld [vmem:[%s1000_s8 + $0x68] sm:$0xff] }
  0x1a   : > { %v842_v3 = vld [vmem:[%s1000_s8 + $0xb8] sm:$0xff]  ;;  %548 = vmatpush.bf16.msra.mxu1 %v834_v2  ;;  %v841_v6 = vld [vmem:[%s1000_s8 + $0xb0] sm:$0xff]  ;;  %v840_v9 = vld [vmem:[%s1000_s8 + $0xa8] sm:$0xff] }
  0x1b   : > { %561 = vmatpush.bf16.msra.mxu2 %v842_v3  ;;  %v823_v10 = vld [vmem:[%s1000_s8 + $0x20] sm:$0xff]  ;;  %v822_v13 = vld [vmem:[%s1000_s8 + $0x18] sm:$0xff]  ;;  %v821_v16 = vld [vmem:[%s1000_s8 + $0x10] sm:$0xff] }
  0x1c   : > { %v831_v11 = vld [vmem:[%s1000_s8 + $0x60] sm:$0xff]  ;;  %v830_v14 = vld [vmem:[%s1000_s8 + $0x58] sm:$0xff]  ;;  %v829_v17 = vld [vmem:[%s1000_s8 + $0x50] sm:$0xff] }
  0x1d   : > { %536 = vmatpush.bf16.msra.mxu0 %v825_v4  ;;  %v839_v12 = vld [vmem:[%s1000_s8 + $0xa0] sm:$0xff]  ;;  %v838_v15 = vld [vmem:[%s1000_s8 + $0x98] sm:$0xff]  ;;  %v837_v18 = vld [vmem:[%s1000_s8 + $0x90] sm:$0xff] }
  0x1e   : > { %549 = vmatpush.bf16.msra.mxu1 %v833_v5  ;;  %v820_v19 = vld [vmem:[%s1000_s8 + $0x8] sm:$0xff]  ;;  %v330_v21 = vld [vmem:[%s995_s30] sm:$0xff] }
  0x1f   : > { %562 = vmatpush.bf16.msra.mxu2 %v841_v6  ;;  %v828_v20 = vld [vmem:[%s1000_s8 + $0x48] sm:$0xff]  ;;  %v382_v24 = vunpack.c.l.b16 %v330_v21  ;;  %v383_v25 = vunpack.c.h.b16 %v330_v21  ;;  %v819_v26 = vld [vmem:[%s1000_s8] sm:$0xff] }
  0x20   : > { %v836_v22 = vld [vmem:[%s1000_s8 + $0x88] sm:$0xff]  ;;  %v827_v27 = vld [vmem:[%s1000_s8 + $0x40] sm:$0xff] }
  0x21   : > { %537 = vmatpush.bf16.msra.mxu0 %v824_v7  ;;  %v331_v23 = vld [vmem:[%s995_s30 + $0x8] sm:$0xf]  ;;  %v835_v29 = vld [vmem:[%s1000_s8 + $0x80] sm:$0xff]  ;;  %v385_v30 = vpack.c.b16 %v382_v24, %v382_v24  ;;  %v386_v31 = vpack.c.b16 %v383_v25, %v383_v25 }
  0x22   : > { %550 = vmatpush.bf16.msra.mxu1 %v832_v8  ;;  %v384_v28 = vunpack.c.l.b16 %v331_v23  ;;  %v329_v36 = vld [vmem:[#allocation2] sm:$0xff] }
  0x23   : > { %563 = vmatpush.bf16.msra.mxu2 %v840_v9 }
  0x24   : > { %v387_v32 = vpack.c.b16 %v384_v28, %v384_v28 }
  0x25   : > { %538 = vmatpush.bf16.msra.mxu0 %v823_v10 }
  0x26   : > { %551 = vmatpush.bf16.msra.mxu1 %v831_v11 }
  0x27   : > { %564 = vmatpush.bf16.msra.mxu2 %v839_v12 }
  0x29   : > { %539 = vmatpush.bf16.msra.mxu0 %v822_v13 }
  0x2a   : > { %552 = vmatpush.bf16.msra.mxu1 %v830_v14 }
  0x2b   : > { %565 = vmatpush.bf16.msra.mxu2 %v838_v15 }
  0x2d   : > { %540 = vmatpush.bf16.msra.mxu0 %v821_v16 }
  0x2e   : > { %553 = vmatpush.bf16.msra.mxu1 %v829_v17 }
  0x2f   : > { %566 = vmatpush.bf16.msra.mxu2 %v837_v18 }
  0x31   : > { %541 = vmatpush.bf16.msra.mxu0 %v820_v19 }
  0x32   : > { %554 = vmatpush.bf16.msra.mxu1 %v828_v20 }
  0x33   : > { %567 = vmatpush.bf16.msra.mxu2 %v836_v22 }
  0x35   : > { %542 = vmatpush.bf16.msra.mxu0 %v819_v26 }
  0x36   : > { %555 = vmatpush.bf16.msra.mxu1 %v827_v27 }
  0x37   : > { %568 = vmatpush.bf16.msra.mxu2 %v835_v29 }
  0x38   : > { %543 = vmatmul.bf16.vlgmr.msra.gmra.mxu0 %v385_v30 }
  0x39   : > { %556 = vmatmul.bf16.vlgmr.msra.gmra.mxu1 %v386_v31 }
  0x3a   : > { %569 = vmatmul.bf16.vlgmr.msra.gmra.mxu2 %v387_v32 }
  0xb5   : > { %v544_v33 = vpop.f32.mrf.mxu0 }
  0xb6   : > { %v557_v34 = vpop.f32.mrf.mxu1 }
  0xb7   : > { %v558_v35 = vadd.f32 %v557_v34, %v544_v33 }
  0xbd   : > { %v570_v37 = vpop.f32.mrf.mxu2  ;;  %v546_v39 = vpop.f32.mrf.mxu0 }
  0xbe   : > { %v571_v38 = vadd.f32 %v570_v37, %v558_v35  ;;  %v559_v40 = vpop.f32.mrf.mxu1 }
  0xc0   : > { %v574_v41 = vadd.f32 %v571_v38, %v329_v36 }
  0xc1   : > { %579 = sbr.rel (%p815_p10) target bundleno = 211 (0xd3), region = 48 }
  0xc2   : > { %575 = vst [vmem:[#allocation2] sm:$0xff] %v574_v41 }
  0xc5   : > { %v572_v42 = vpop.f32.mrf.mxu2 }
  0xc6   : > { %v879_v44 = vld [vmem:[#allocation3] ss:$0 sm:$0xff]  ;;  %v880_v45 = vld [vmem:[%s1048_s3] ss:$0 sm:$0xff] }
  0xc9   : > { %v580_v43 = vld [vmem:[#allocation2] sm:$0xff] }
  0xca   : > { %v585_v46 = vmul.f32 %v879_v44, %v580_v43 }
  0xcc   : > { %v590_v47 = vadd.f32 %v880_v45, %v585_v46 }
  0xce   : > { %v591_v48 = vmax.f32 %v590_v47, 0.0 }
  0xd0   : > { %v592_v49 = vpack.c.bf16 %v591_v48, %v591_v48 }
  0xd2   : > { %593 = vst [vmem:[%s1049_s4] sm:$0xf] %v592_v49 }
  0xd3 PF: > { %s15_s17 = sadd.s32 1, %s937_s17   ;;  %s1050_s15 = smov %s933_s16 }
  0xd4   : > { %p12_p11 = scmp.ge.s32.totalorder %s15_s17, 5   ;;  %s1051_s16 = smov %s1053_s19 }
  0xd6   :  { %14 = sbr.rel (!%p12_p11) target bundleno = 2 (0x2), region = 86 }
  0xdb   :  { %619 = vsyncpa [#allocation4], 1 }
  0xdc   :  { %621 = vsyncpa [#allocation4 + $0x1], 1 }

// kernel: _lambda_.40
= control target key start
LH: loop header
LB: loop body
LE: loop exit
PB: predicated region body
PF: predicated region fallthrough
CT: control target
= control target key end

     0   :  { %s981_s18 = smov 0   ;;  %s983_s19 = smov 0   ;;  %s1110_s0 = inlined_call_operand.vmem [shape: bf16[8,128], index: 0, kind: input, shape index: {}]   ;;  %s1111_s1 = inlined_call_operand.vmem [shape: bf16[128,512], index: 1, kind: input, shape index: {}]   ;;  %s1112_s2 = inlined_call_operand.vmem [shape: f32[1,512], index: 2, kind: input, shape index: {}]   ;;  %s1113_s3 = inlined_call_operand.vmem [shape: f32[1,512], index: 3, kind: input, shape index: {}]   ;;  %s1114_s4 = inlined_call_operand.vmem [shape: bf16[8,512], index: 4, kind: input, shape index: {}]   ;;  %s1115_s5 = inlined_call_operand.vmem [shape: bf16[8,512], index: 5, kind: output, shape index: {}]  }
   0x1   :  { %s985_s20 = smov 0   ;;  %s987_s21 = smov 0  }
   0x2   :  { %s989_s22 = smov 0  }
   0x3 LB: > { %s30_s23 = sadd.s32 1, %s945_s21  ;;  %p78_p1 = scmp.ne.s32.totalorder %s937_s19, %s933_s18  ;;  %s949_s22 = sphi %s989_s22, %s15_s22   ;;  %s945_s21 = sphi %s987_s21, %s1119_s21   ;;  %s941_s20 = sphi %s985_s20, %s1118_s20   ;;  %s937_s19 = sphi %s983_s19, %s1117_s19   ;;  %s933_s18 = sphi %s981_s18, %s1116_s18  }
   0x4   : > { %p32_p0 = scmp.ge.s32.totalorder %s30_s23, 2  ;;  %p79_p2 = scmp.eq.s32.totalorder %s949_s22, 0 }
   0x5   : > { %s71_s25 = sadd.s32 1, %s937_s19  ;;  %p776_p5 = scmp.ge.s32.totalorder %s949_s22, 2 }
   0x6   : > { %s1121_s23 = smov (%p32_p0, %s30_s23), 0  ;;  %p80_p3 = por %p79_p2, %p78_p1 }
   0x7   : > { %s67_s24 = ssub.s32 %s945_s21, %s1121_s23  ;;  %222 = sbr.rel (%p776_p5) target bundleno = 32 (0x20), region = 20 }
   0x8   : > { %p69_p4 = scmp.eq.s32.totalorder %s67_s24, 0 }
   0xa   : > { %s1016_s26 = scalar_select %p69_p4, %s937_s19, %s71_s25  }
   0xc   : > { %225 = sbr.rel (!%p80_p3) target bundleno = 32 (0x20), region = 24  ;;  %s227_s27 = sand.u32 (%p80_p3), 1, %s937_s19  }
   0xd   : > { %s854_s28 = sshll.u32 (%p80_p3), %s945_s21, 3  ;;  %s777_s29 = sshll.u32 (%p80_p3), %s227_s27, 7 }
   0xe   : > { %s1024_s7 = scalar_lea.vmem (%p80_p3), %s1111_s1, %s854_s28  ;;  %s229_s8 = scalar_lea.vmem (%p80_p3), [#allocation3], %s777_s29 }
   0xf   : > { %v294_v0 = vld [vmem:[%s1024_s7] sm:$0xff] (%p80_p3)  ;;  %v296_v1 = vld [vmem:[%s1024_s7 + $0x10] sm:$0xff] (%p80_p3) }
  0x10   : > { %v298_v2 = vld [vmem:[%s1024_s7 + $0x20] sm:$0xff] (%p80_p3)  ;;  %295 = vst [vmem:[%s229_s8] sm:$0xff] (%p80_p3), %v294_v0  ;;  %v300_v3 = vld [vmem:[%s1024_s7 + $0x30] sm:$0xff] (%p80_p3) }
  0x11   : > { %297 = vst [vmem:[%s229_s8 + $0x8] sm:$0xff] %v296_v1  ;;  %v302_v4 = vld [vmem:[%s1024_s7 + $0x40] sm:$0xff]  ;;  %v304_v5 = vld [vmem:[%s1024_s7 + $0x50] sm:$0xff] }
  0x12   : > { %299 = vst [vmem:[%s229_s8 + $0x10] sm:$0xff] %v298_v2  ;;  %v306_v6 = vld [vmem:[%s1024_s7 + $0x60] sm:$0xff]  ;;  %v308_v7 = vld [vmem:[%s1024_s7 + $0x70] sm:$0xff] }
  0x13   : > { %301 = vst [vmem:[%s229_s8 + $0x18] sm:$0xff] %v300_v3  ;;  %v310_v8 = vld [vmem:[%s1024_s7 + $0x80] sm:$0xff]  ;;  %v312_v9 = vld [vmem:[%s1024_s7 + $0x90] sm:$0xff] }
  0x14   : > { %303 = vst [vmem:[%s229_s8 + $0x20] sm:$0xff] %v302_v4  ;;  %v314_v10 = vld [vmem:[%s1024_s7 + $0xa0] sm:$0xff]  ;;  %v316_v11 = vld [vmem:[%s1024_s7 + $0xb0] sm:$0xff] }
  0x15   : > { %305 = vst [vmem:[%s229_s8 + $0x28] sm:$0xff] %v304_v5  ;;  %v318_v12 = vld [vmem:[%s1024_s7 + $0xc0] sm:$0xff]  ;;  %v320_v13 = vld [vmem:[%s1024_s7 + $0xd0] sm:$0xff] }
  0x16   : > { %307 = vst [vmem:[%s229_s8 + $0x30] sm:$0xff] %v306_v6  ;;  %v322_v14 = vld [vmem:[%s1024_s7 + $0xe0] sm:$0xff]  ;;  %v324_v15 = vld [vmem:[%s1024_s7 + $0xf0] sm:$0xff] }
  0x17   : > { %309 = vst [vmem:[%s229_s8 + $0x38] sm:$0xff] %v308_v7 }
  0x18   : > { %311 = vst [vmem:[%s229_s8 + $0x40] sm:$0xff] %v310_v8 }
  0x19   : > { %313 = vst [vmem:[%s229_s8 + $0x48] sm:$0xff] %v312_v9 }
  0x1a   : > { %315 = vst [vmem:[%s229_s8 + $0x50] sm:$0xff] %v314_v10 }
  0x1b   : > { %317 = vst [vmem:[%s229_s8 + $0x58] sm:$0xff] %v316_v11 }
  0x1c   : > { %319 = vst [vmem:[%s229_s8 + $0x60] sm:$0xff] %v318_v12 }
  0x1d   : > { %321 = vst [vmem:[%s229_s8 + $0x68] sm:$0xff] %v320_v13 }
  0x1e   : > { %323 = vst [vmem:[%s229_s8 + $0x70] sm:$0xff] %v322_v14 }
  0x1f   : > { %325 = vst [vmem:[%s229_s8 + $0x78] sm:$0xff] %v324_v15 }
  0x20 PF: > { %p780_p6 = scmp.ge.s32.totalorder %s949_s22, 1  ;;  %p359_p7 = scmp.lt.s32.totalorder %s949_s22, 3 }
  0x22   : > { %p360_p8 = pnand %p780_p6, %p359_p7 }
  0x23   : > { %s366_s9 = sand.u32 (!%p360_p8), 1, %s933_s18   ;;  %s782_s14 = sshll.u32 (!%p360_p8), %s941_s20, 1 }
  0x24   : > { %363 = sbr.rel (%p360_p8) target bundleno = 213 (0xd5), region = 74  ;;  %s781_s10 = sshll.u32 (!%p360_p8), %s366_s9, 7 }
  0x25   : > { %s1045_s11 = scalar_lea.vmem (!%p360_p8), [#allocation3], %s781_s10  ;;  %p431_p9 = scmp.lt.s32.totalorder (!%p360_p8), %s782_s14, 3 }
  0x29   : > { %v846_v16 = vld [vmem:[%s1045_s11 + $0x70] sm:$0xf]  ;;  %v870_v17 = vld [vmem:[%s1045_s11 + $0x74] sm:$0xf0]  ;;  %v869_v18 = vld [vmem:[%s1045_s11 + $0x74] sm:$0xf] }
  0x2a   : > { %v847_v19 = vor.u32 %v870_v17, %v846_v16  ;;  %v848_v20 = vld [vmem:[%s1045_s11 + $0x78] sm:$0xf0]  ;;  %v838_v21 = vld [vmem:[%s1045_s11 + $0x60] sm:$0xf]  ;;  %v868_v22 = vld [vmem:[%s1045_s11 + $0x64] sm:$0xf0] }
  0x2b   : > { %v851_v23 = vor.u32 %v869_v18, %v848_v20  ;;  %v867_v24 = vld [vmem:[%s1045_s11 + $0x64] sm:$0xf]  ;;  %v840_v25 = vld [vmem:[%s1045_s11 + $0x68] sm:$0xf0]  ;;  %v839_v26 = vor.u32 %v868_v22, %v838_v21  ;;  %v830_v28 = vld [vmem:[%s1045_s11 + $0x50] sm:$0xf] }
  0x2c   : > { %565 = vmatpush.bf16.msra.mxu0 %v847_v19  ;;  %v843_v27 = vor.u32 %v867_v24, %v840_v25  ;;  %v866_v29 = vld [vmem:[%s1045_s11 + $0x54] sm:$0xf0]  ;;  %v865_v30 = vld [vmem:[%s1045_s11 + $0x54] sm:$0xf]  ;;  %v832_v31 = vld [vmem:[%s1045_s11 + $0x58] sm:$0xf0] }
  0x2d   : > { %578 = vmatpush.bf16.msra.mxu1 %v851_v23  ;;  %v831_v32 = vor.u32 %v866_v29, %v830_v28  ;;  %v835_v33 = vor.u32 %v865_v30, %v832_v31  ;;  %v822_v34 = vld [vmem:[%s1045_s11 + $0x40] sm:$0xf]  ;;  %v864_v35 = vld [vmem:[%s1045_s11 + $0x44] sm:$0xf0]  ;;  %v863_v36 = vld [vmem:[%s1045_s11 + $0x44] sm:$0xf] }
  0x2e   : > { %v824_v37 = vld [vmem:[%s1045_s11 + $0x48] sm:$0xf0]  ;;  %v823_v38 = vor.u32 %v864_v35, %v822_v34  ;;  %v814_v40 = vld [vmem:[%s1045_s11 + $0x30] sm:$0xf]  ;;  %v862_v41 = vld [vmem:[%s1045_s11 + $0x34] sm:$0xf0] }
  0x2f   : > { %v827_v39 = vor.u32 %v863_v36, %v824_v37  ;;  %v861_v42 = vld [vmem:[%s1045_s11 + $0x34] sm:$0xf]  ;;  %v816_v43 = vld [vmem:[%s1045_s11 + $0x38] sm:$0xf0]  ;;  %v815_v44 = vor.u32 %v862_v41, %v814_v40  ;;  %v806_v46 = vld [vmem:[%s1045_s11 + $0x20] sm:$0xf] }
  0x30   : > { %566 = vmatpush.bf16.msra.mxu0 %v839_v26  ;;  %v819_v45 = vor.u32 %v861_v42, %v816_v43  ;;  %v860_v47 = vld [vmem:[%s1045_s11 + $0x24] sm:$0xf0]  ;;  %v859_v48 = vld [vmem:[%s1045_s11 + $0x24] sm:$0xf]  ;;  %v808_v49 = vld [vmem:[%s1045_s11 + $0x28] sm:$0xf0] }
  0x31   : > { %579 = vmatpush.bf16.msra.mxu1 %v843_v27  ;;  %v807_v50 = vor.u32 %v860_v47, %v806_v46  ;;  %v811_v51 = vor.u32 %v859_v48, %v808_v49  ;;  %v798_v52 = vld [vmem:[%s1045_s11 + $0x10] sm:$0xf]  ;;  %v858_v53 = vld [vmem:[%s1045_s11 + $0x14] sm:$0xf0]  ;;  %v857_v54 = vld [vmem:[%s1045_s11 + $0x14] sm:$0xf] }
  0x32   : > { %v800_v55 = vld [vmem:[%s1045_s11 + $0x18] sm:$0xf0]  ;;  %v799_v56 = vor.u32 %v858_v53, %v798_v52  ;;  %v790_v58 = vld [vmem:[%s1045_s11] sm:$0xf]  ;;  %v856_v59 = vld [vmem:[%s1045_s11 + $0x4] sm:$0xf0] }
  0x33   : > { %v803_v57 = vor.u32 %v857_v54, %v800_v55  ;;  %v855_v60 = vld [vmem:[%s1045_s11 + $0x4] sm:$0xf]  ;;  %v792_v61 = vld [vmem:[%s1045_s11 + $0x8] sm:$0xf0]  ;;  %v791_v62 = vor.u32 %v856_v59, %v790_v58  ;;  %v468_v0 = vld [vmem:[%s1110_s0] sm:$0xf] }
  0x34   : > { %567 = vmatpush.bf16.msra.mxu0 %v831_v32  ;;  %v795_v63 = vor.u32 %v855_v60, %v792_v61  ;;  %s1123_s14 = smov (!%p431_p9, %s782_s14), 3 }
  0x35   : > { %580 = vmatpush.bf16.msra.mxu1 %v835_v33  ;;  %s433_s17 = scalar_lea.vmem %s1112_s2, %s1123_s14  ;;  %s785_s18 = sshll.u32 %s1123_s14, 2 }
  0x36   : > { %s438_s27 = scalar_lea.vmem %s1113_s3, %s1123_s14  ;;  %v600_v1 = vld [vmem:[%s433_s17] sm:$0x3]  ;;  %s448_s30 = scalar_lea.vmem %s1114_s4, %s785_s18 }
  0x37   : > { %v608_v2 = vld [vmem:[%s438_s27] sm:$0x3]  ;;  %v602_v3 = vperm.slane %v600_v1, 0  ;;  %v603_v5 = vperm.slane %v600_v1, 1  ;;  %s458_s7 = scalar_lea.vmem %s1115_s5, %s785_s18 }
  0x38   : > { %568 = vmatpush.bf16.msra.mxu0 %v823_v38  ;;  %v616_v4 = vld [vmem:[%s448_s30] sm:$0xff]  ;;  %v610_v6 = vperm.slane %v608_v2, 0  ;;  %v611_v8 = vperm.slane %v608_v2, 1 }
  0x39   : > { %581 = vmatpush.bf16.msra.mxu1 %v827_v39  ;;  %v617_v10 = vunpack.c.l.bf16 %v616_v4  ;;  %v618_v13 = vunpack.c.h.bf16 %v616_v4 }
  0x3c   : > { %569 = vmatpush.bf16.msra.mxu0 %v815_v44 }
  0x3d   : > { %582 = vmatpush.bf16.msra.mxu1 %v819_v45 }
  0x40   : > { %570 = vmatpush.bf16.msra.mxu0 %v807_v50 }
  0x41   : > { %583 = vmatpush.bf16.msra.mxu1 %v811_v51 }
  0x44   : > { %571 = vmatpush.bf16.msra.mxu0 %v799_v56 }
  0x45   : > { %584 = vmatpush.bf16.msra.mxu1 %v803_v57 }
  0x48   : > { %572 = vmatpush.bf16.msra.mxu0 %v791_v62 }
  0x49   : > { %585 = vmatpush.bf16.msra.mxu1 %v795_v63 }
  0x4b   : > { %573 = vmatmul.bf16.vlgmr.msra.gmra.mxu0 %v468_v0 }
  0x4c   : > { %586 = vmatmul.bf16.vlgmr.msra.gmra.mxu1 %v468_v0 }
  0xc8   : > { %v574_v7 = vpop.f32.mrf.mxu0 }
  0xc9   : > { %v606_v9 = vmul.f32 %v602_v3, %v574_v7  ;;  %v587_v11 = vpop.f32.mrf.mxu1 }
  0xca   : > { %v607_v12 = vmul.f32 %v603_v5, %v587_v11 }
  0xcb   : > { %v614_v14 = vadd.f32 %v610_v6, %v606_v9 }
  0xcc   : > { %v615_v15 = vadd.f32 %v611_v8, %v607_v12 }
  0xcd   : > { %v619_v16 = vadd.f32 %v617_v10, %v614_v14 }
  0xce   : > { %v620_v17 = vadd.f32 %v618_v13, %v615_v15 }
  0xcf   : > { %v621_v18 = vmax.f32 %v619_v16, 0.0 }
  0xd0   : > { %v622_v19 = vmax.f32 %v620_v17, 0.0  ;;  %v576_v20 = vpop.f32.mrf.mxu0 }
  0xd1   : > { %v589_v21 = vpop.f32.mrf.mxu1 }
  0xd2   : > { %v623_v22 = vpack.c.bf16 %v622_v19, %v621_v18 }
  0xd4   : > { %624 = vst [vmem:[%s458_s7] sm:$0xff] %v623_v22 }
  0xd5 PF: > { %s15_s22 = sadd.s32 1, %s949_s22   ;;  %s1116_s18 = smov %s937_s19 }
  0xd6   : > { %p12_p10 = scmp.ge.s32.totalorder %s15_s22, 4   ;;  %s1117_s19 = smov %s1016_s26 }
  0xd7   : > { %s1118_s20 = smov %s945_s21  ;;  %s1119_s21 = smov %s1121_s23 }
  0xd8   :  { %14 = sbr.rel (!%p12_p10) target bundleno = 3 (0x3), region = 133 }

// kernel: _lambda_.39
= control target key start
LH: loop header
LB: loop body
LE: loop exit
PB: predicated region body
PF: predicated region fallthrough
CT: control target
= control target key end

     0   :  { %s1170_s15 = smov 0   ;;  %s1172_s16 = smov 0   ;;  %s1378_s0 = inlined_call_operand.vmem [shape: bf16[8,256], index: 0, kind: input, shape index: {}]   ;;  %s1379_s1 = inlined_call_operand.vmem [shape: bf16[256,512], index: 1, kind: input, shape index: {}]   ;;  %s1380_s2 = inlined_call_operand.vmem [shape: f32[1,512], index: 2, kind: input, shape index: {}]   ;;  %s1381_s3 = inlined_call_operand.vmem [shape: f32[1,512], index: 3, kind: input, shape index: {}]   ;;  %s1382_s4 = inlined_call_operand.vmem [shape: bf16[8,512], index: 4, kind: output, shape index: {}]  }
   0x1   :  { %s1174_s17 = smov 0   ;;  %s1176_s18 = smov 0  }
   0x2   :  { %s1178_s19 = smov 0  }
   0x3 LB: > { %s29_s20 = sadd.s32 1, %s1139_s18  ;;  %p77_p1 = scmp.ne.s32.totalorder %s1131_s16, %s1127_s15  ;;  %s1143_s19 = sphi %s1178_s19, %s14_s19   ;;  %s1139_s18 = sphi %s1176_s18, %s1386_s18   ;;  %s1135_s17 = sphi %s1174_s17, %s1385_s17   ;;  %s1131_s16 = sphi %s1172_s16, %s1384_s16   ;;  %s1127_s15 = sphi %s1170_s15, %s1383_s15  }
   0x4   : > { %p31_p0 = scmp.ge.s32.totalorder %s29_s20, 2  ;;  %p78_p2 = scmp.eq.s32.totalorder %s1143_s19, 0 }
   0x5   : > { %s70_s22 = sadd.s32 1, %s1131_s16  ;;  %p892_p5 = scmp.ge.s32.totalorder %s1143_s19, 2 }
   0x6   : > { %s1388_s20 = smov (%p31_p0, %s29_s20), 0  ;;  %p79_p3 = por %p78_p2, %p77_p1 }
   0x7   : > { %s66_s21 = ssub.s32 %s1139_s18, %s1388_s20  ;;  %196 = sbr.rel (%p892_p5) target bundleno = 48 (0x30), region = 20 }
   0x8   : > { %p68_p4 = scmp.eq.s32.totalorder %s66_s21, 0 }
   0xa   : > { %s1205_s23 = scalar_select %p68_p4, %s1131_s16, %s70_s22  }
   0xc   : > { %199 = sbr.rel (!%p79_p3) target bundleno = 48 (0x30), region = 24  ;;  %s201_s24 = sand.u32 (%p79_p3), 1, %s1131_s16  }
   0xd   : > { %s1032_s25 = sshll.u32 (%p79_p3), %s1139_s18, 3  ;;  %s893_s26 = sshll.u32 (%p79_p3), %s201_s24, 8 }
   0xe   : > { %s1213_s29 = scalar_lea.vmem (%p79_p3), %s1379_s1, %s1032_s25  ;;  %s1218_s30 = scalar_lea.vmem (%p79_p3), [#allocation3], %s893_s26 }
   0xf   : > { %v300_v0 = vld [vmem:[%s1213_s29] sm:$0xff] (%p79_p3)  ;;  %v302_v1 = vld [vmem:[%s1213_s29 + $0x10] sm:$0xff] (%p79_p3) }
  0x10   : > { %v304_v2 = vld [vmem:[%s1213_s29 + $0x20] sm:$0xff] (%p79_p3)  ;;  %301 = vst [vmem:[%s1218_s30] sm:$0xff] (%p79_p3), %v300_v0  ;;  %v306_v3 = vld [vmem:[%s1213_s29 + $0x30] sm:$0xff] (%p79_p3) }
  0x11   : > { %303 = vst [vmem:[%s1218_s30 + $0x8] sm:$0xff] %v302_v1  ;;  %v308_v4 = vld [vmem:[%s1213_s29 + $0x40] sm:$0xff]  ;;  %v310_v5 = vld [vmem:[%s1213_s29 + $0x50] sm:$0xff] }
  0x12   : > { %305 = vst [vmem:[%s1218_s30 + $0x10] sm:$0xff] %v304_v2  ;;  %v312_v6 = vld [vmem:[%s1213_s29 + $0x60] sm:$0xff]  ;;  %v314_v7 = vld [vmem:[%s1213_s29 + $0x70] sm:$0xff] }
  0x13   : > { %307 = vst [vmem:[%s1218_s30 + $0x18] sm:$0xff] %v306_v3  ;;  %v316_v8 = vld [vmem:[%s1213_s29 + $0x80] sm:$0xff]  ;;  %v318_v9 = vld [vmem:[%s1213_s29 + $0x90] sm:$0xff] }
  0x14   : > { %309 = vst [vmem:[%s1218_s30 + $0x20] sm:$0xff] %v308_v4  ;;  %v320_v10 = vld [vmem:[%s1213_s29 + $0xa0] sm:$0xff]  ;;  %v322_v11 = vld [vmem:[%s1213_s29 + $0xb0] sm:$0xff] }
  0x15   : > { %311 = vst [vmem:[%s1218_s30 + $0x28] sm:$0xff] %v310_v5  ;;  %v324_v12 = vld [vmem:[%s1213_s29 + $0xc0] sm:$0xff]  ;;  %v326_v13 = vld [vmem:[%s1213_s29 + $0xd0] sm:$0xff] }
  0x16   : > { %313 = vst [vmem:[%s1218_s30 + $0x30] sm:$0xff] %v312_v6  ;;  %v328_v14 = vld [vmem:[%s1213_s29 + $0xe0] sm:$0xff]  ;;  %v330_v15 = vld [vmem:[%s1213_s29 + $0xf0] sm:$0xff] }
  0x17   : > { %315 = vst [vmem:[%s1218_s30 + $0x38] sm:$0xff] %v314_v7  ;;  %v332_v16 = vld [vmem:[%s1213_s29 + $0x100] sm:$0xff]  ;;  %v334_v17 = vld [vmem:[%s1213_s29 + $0x110] sm:$0xff] }
  0x18   : > { %317 = vst [vmem:[%s1218_s30 + $0x40] sm:$0xff] %v316_v8  ;;  %v336_v18 = vld [vmem:[%s1213_s29 + $0x120] sm:$0xff]  ;;  %v338_v19 = vld [vmem:[%s1213_s29 + $0x130] sm:$0xff] }
  0x19   : > { %319 = vst [vmem:[%s1218_s30 + $0x48] sm:$0xff] %v318_v9  ;;  %v340_v20 = vld [vmem:[%s1213_s29 + $0x140] sm:$0xff]  ;;  %v342_v21 = vld [vmem:[%s1213_s29 + $0x150] sm:$0xff] }
  0x1a   : > { %321 = vst [vmem:[%s1218_s30 + $0x50] sm:$0xff] %v320_v10  ;;  %v344_v22 = vld [vmem:[%s1213_s29 + $0x160] sm:$0xff]  ;;  %v346_v23 = vld [vmem:[%s1213_s29 + $0x170] sm:$0xff] }
  0x1b   : > { %323 = vst [vmem:[%s1218_s30 + $0x58] sm:$0xff] %v322_v11  ;;  %v348_v24 = vld [vmem:[%s1213_s29 + $0x180] sm:$0xff]  ;;  %v350_v25 = vld [vmem:[%s1213_s29 + $0x190] sm:$0xff] }
  0x1c   : > { %325 = vst [vmem:[%s1218_s30 + $0x60] sm:$0xff] %v324_v12  ;;  %v352_v26 = vld [vmem:[%s1213_s29 + $0x1a0] sm:$0xff]  ;;  %v354_v27 = vld [vmem:[%s1213_s29 + $0x1b0] sm:$0xff] }
  0x1d   : > { %327 = vst [vmem:[%s1218_s30 + $0x68] sm:$0xff] %v326_v13  ;;  %v356_v28 = vld [vmem:[%s1213_s29 + $0x1c0] sm:$0xff]  ;;  %v358_v29 = vld [vmem:[%s1213_s29 + $0x1d0] sm:$0xff] }
  0x1e   : > { %329 = vst [vmem:[%s1218_s30 + $0x70] sm:$0xff] %v328_v14  ;;  %v360_v30 = vld [vmem:[%s1213_s29 + $0x1e0] sm:$0xff]  ;;  %v362_v31 = vld [vmem:[%s1213_s29 + $0x1f0] sm:$0xff] }
  0x1f   : > { %331 = vst [vmem:[%s1218_s30 + $0x78] sm:$0xff] %v330_v15 }
  0x20   : > { %333 = vst [vmem:[%s1218_s30 + $0x80] sm:$0xff] %v332_v16 }
  0x21   : > { %335 = vst [vmem:[%s1218_s30 + $0x88] sm:$0xff] %v334_v17 }
  0x22   : > { %337 = vst [vmem:[%s1218_s30 + $0x90] sm:$0xff] %v336_v18 }
  0x23   : > { %339 = vst [vmem:[%s1218_s30 + $0x98] sm:$0xff] %v338_v19 }
  0x24   : > { %341 = vst [vmem:[%s1218_s30 + $0xa0] sm:$0xff] %v340_v20 }
  0x25   : > { %343 = vst [vmem:[%s1218_s30 + $0xa8] sm:$0xff] %v342_v21 }
  0x26   : > { %345 = vst [vmem:[%s1218_s30 + $0xb0] sm:$0xff] %v344_v22 }
  0x27   : > { %347 = vst [vmem:[%s1218_s30 + $0xb8] sm:$0xff] %v346_v23 }
  0x28   : > { %349 = vst [vmem:[%s1218_s30 + $0xc0] sm:$0xff] %v348_v24 }
  0x29   : > { %351 = vst [vmem:[%s1218_s30 + $0xc8] sm:$0xff] %v350_v25 }
  0x2a   : > { %353 = vst [vmem:[%s1218_s30 + $0xd0] sm:$0xff] %v352_v26 }
  0x2b   : > { %355 = vst [vmem:[%s1218_s30 + $0xd8] sm:$0xff] %v354_v27 }
  0x2c   : > { %357 = vst [vmem:[%s1218_s30 + $0xe0] sm:$0xff] %v356_v28 }
  0x2d   : > { %359 = vst [vmem:[%s1218_s30 + $0xe8] sm:$0xff] %v358_v29 }
  0x2e   : > { %361 = vst [vmem:[%s1218_s30 + $0xf0] sm:$0xff] %v360_v30 }
  0x2f   : > { %363 = vst [vmem:[%s1218_s30 + $0xf8] sm:$0xff] %v362_v31 }
  0x30 PF: > { %p896_p6 = scmp.ge.s32.totalorder %s1143_s19, 1  ;;  %p384_p7 = scmp.lt.s32.totalorder %s1143_s19, 3 }
  0x32   : > { %p385_p8 = pnand %p896_p6, %p384_p7 }
  0x33   : > { %s391_s5 = sand.u32 (!%p385_p8), 1, %s1127_s15   ;;  %s898_s10 = sshll.u32 (!%p385_p8), %s1135_s17, 1 }
  0x34   : > { %388 = sbr.rel (%p385_p8) target bundleno = 234 (0xea), region = 70  ;;  %s897_s6 = sshll.u32 (!%p385_p8), %s391_s5, 8 }
  0x35   : > { %s1284_s7 = scalar_lea.vmem (!%p385_p8), [#allocation3], %s897_s6  ;;  %p450_p9 = scmp.lt.s32.totalorder (!%p385_p8), %s898_s10, 3 }
  0x39   : > { %v960_v32 = vld [vmem:[%s1284_s7 + $0x70] sm:$0xf]  ;;  %v1048_v33 = vld [vmem:[%s1284_s7 + $0x74] sm:$0xf0]  ;;  %v1047_v37 = vld [vmem:[%s1284_s7 + $0x74] sm:$0xf] }
  0x3a   : > { %v1024_v34 = vld [vmem:[%s1284_s7 + $0xf0] sm:$0xf]  ;;  %v961_v35 = vor.u32 %v1048_v33, %v960_v32  ;;  %v1064_v36 = vld [vmem:[%s1284_s7 + $0xf4] sm:$0xf0]  ;;  %v962_v38 = vld [vmem:[%s1284_s7 + $0x78] sm:$0xf0] }
  0x3b   : > { %v1025_v39 = vor.u32 %v1064_v36, %v1024_v34  ;;  %v965_v40 = vor.u32 %v1047_v37, %v962_v38  ;;  %v1063_v41 = vld [vmem:[%s1284_s7 + $0xf4] sm:$0xf]  ;;  %v1026_v42 = vld [vmem:[%s1284_s7 + $0xf8] sm:$0xf0]  ;;  %v952_v43 = vld [vmem:[%s1284_s7 + $0x60] sm:$0xf] }
  0x3c   : > { %677 = vmatpush.bf16.msra.mxu0 %v961_v35  ;;  %v1029_v44 = vor.u32 %v1063_v41, %v1026_v42  ;;  %v1046_v45 = vld [vmem:[%s1284_s7 + $0x64] sm:$0xf0]  ;;  %v1016_v46 = vld [vmem:[%s1284_s7 + $0xe0] sm:$0xf]  ;;  %v1045_v50 = vld [vmem:[%s1284_s7 + $0x64] sm:$0xf] }
  0x3d   : > { %v1062_v47 = vld [vmem:[%s1284_s7 + $0xe4] sm:$0xf0]  ;;  %690 = vmatpush.bf16.msra.mxu1 %v1025_v39  ;;  %703 = vmatpush.bf16.msra.mxu2 %v965_v40  ;;  %v953_v48 = vor.u32 %v1046_v45, %v952_v43  ;;  %v954_v51 = vld [vmem:[%s1284_s7 + $0x68] sm:$0xf0]  ;;  %v1061_v52 = vld [vmem:[%s1284_s7 + $0xe4] sm:$0xf] }
  0x3e   : > { %v1017_v49 = vor.u32 %v1062_v47, %v1016_v46  ;;  %716 = vmatpush.bf16.msra.mxu3 %v1029_v44  ;;  %v957_v53 = vor.u32 %v1045_v50, %v954_v51  ;;  %v1018_v54 = vld [vmem:[%s1284_s7 + $0xe8] sm:$0xf0]  ;;  %v944_v55 = vld [vmem:[%s1284_s7 + $0x50] sm:$0xf]  ;;  %v1044_v56 = vld [vmem:[%s1284_s7 + $0x54] sm:$0xf0] }
  0x3f   : > { %v1021_v57 = vor.u32 %v1061_v52, %v1018_v54  ;;  %v1008_v58 = vld [vmem:[%s1284_s7 + $0xd0] sm:$0xf]  ;;  %v1060_v59 = vld [vmem:[%s1284_s7 + $0xd4] sm:$0xf0]  ;;  %v1043_v60 = vld [vmem:[%s1284_s7 + $0x54] sm:$0xf]  ;;  %v945_v61 = vor.u32 %v1044_v56, %v944_v55 }
  0x40   : > { %678 = vmatpush.bf16.msra.mxu0 %v953_v48  ;;  %v946_v62 = vld [vmem:[%s1284_s7 + $0x58] sm:$0xf0]  ;;  %v1059_v63 = vld [vmem:[%s1284_s7 + $0xd4] sm:$0xf]  ;;  %v1009_v1 = vor.u32 %v1060_v59, %v1008_v58  ;;  %v936_v3 = vld [vmem:[%s1284_s7 + $0x40] sm:$0xf] }
  0x41   : > { %v1010_v0 = vld [vmem:[%s1284_s7 + $0xd8] sm:$0xf0]  ;;  %691 = vmatpush.bf16.msra.mxu1 %v1017_v49  ;;  %704 = vmatpush.bf16.msra.mxu2 %v957_v53  ;;  %v949_v2 = vor.u32 %v1043_v60, %v946_v62  ;;  %v1042_v4 = vld [vmem:[%s1284_s7 + $0x44] sm:$0xf0]  ;;  %v1000_v5 = vld [vmem:[%s1284_s7 + $0xc0] sm:$0xf] }
  0x42   : > { %717 = vmatpush.bf16.msra.mxu3 %v1021_v57  ;;  %v1013_v6 = vor.u32 %v1059_v63, %v1010_v0  ;;  %v1058_v7 = vld [vmem:[%s1284_s7 + $0xc4] sm:$0xf0]  ;;  %v1041_v8 = vld [vmem:[%s1284_s7 + $0x44] sm:$0xf]  ;;  %v938_v9 = vld [vmem:[%s1284_s7 + $0x48] sm:$0xf0]  ;;  %v937_v12 = vor.u32 %v1042_v4, %v936_v3 }
  0x43   : > { %v1057_v10 = vld [vmem:[%s1284_s7 + $0xc4] sm:$0xf]  ;;  %v1002_v11 = vld [vmem:[%s1284_s7 + $0xc8] sm:$0xf0]  ;;  %v1001_v13 = vor.u32 %v1058_v7, %v1000_v5  ;;  %v941_v14 = vor.u32 %v1041_v8, %v938_v9  ;;  %v928_v15 = vld [vmem:[%s1284_s7 + $0x30] sm:$0xf] }
  0x44   : > { %679 = vmatpush.bf16.msra.mxu0 %v945_v61  ;;  %v1040_v16 = vld [vmem:[%s1284_s7 + $0x34] sm:$0xf0]  ;;  %v992_v17 = vld [vmem:[%s1284_s7 + $0xb0] sm:$0xf]  ;;  %v1005_v18 = vor.u32 %v1057_v10, %v1002_v11  ;;  %v1039_v20 = vld [vmem:[%s1284_s7 + $0x34] sm:$0xf] }
  0x45   : > { %692 = vmatpush.bf16.msra.mxu1 %v1009_v1  ;;  %705 = vmatpush.bf16.msra.mxu2 %v949_v2  ;;  %v1056_v19 = vld [vmem:[%s1284_s7 + $0xb4] sm:$0xf0]  ;;  %v930_v21 = vld [vmem:[%s1284_s7 + $0x38] sm:$0xf0]  ;;  %v1055_v22 = vld [vmem:[%s1284_s7 + $0xb4] sm:$0xf]  ;;  %v929_v24 = vor.u32 %v1040_v16, %v928_v15 }
  0x46   : > { %718 = vmatpush.bf16.msra.mxu3 %v1013_v6  ;;  %v994_v23 = vld [vmem:[%s1284_s7 + $0xb8] sm:$0xf0]  ;;  %v993_v25 = vor.u32 %v1056_v19, %v992_v17  ;;  %v933_v26 = vor.u32 %v1039_v20, %v930_v21  ;;  %v920_v27 = vld [vmem:[%s1284_s7 + $0x20] sm:$0xf]  ;;  %v1038_v28 = vld [vmem:[%s1284_s7 + $0x24] sm:$0xf0] }
  0x47   : > { %v984_v29 = vld [vmem:[%s1284_s7 + $0xa0] sm:$0xf]  ;;  %v997_v30 = vor.u32 %v1055_v22, %v994_v23  ;;  %v1054_v31 = vld [vmem:[%s1284_s7 + $0xa4] sm:$0xf0]  ;;  %v1037_v32 = vld [vmem:[%s1284_s7 + $0x24] sm:$0xf]  ;;  %v921_v36 = vor.u32 %v1038_v28, %v920_v27 }
  0x48   : > { %680 = vmatpush.bf16.msra.mxu0 %v937_v12  ;;  %v922_v33 = vld [vmem:[%s1284_s7 + $0x28] sm:$0xf0]  ;;  %v1053_v34 = vld [vmem:[%s1284_s7 + $0xa4] sm:$0xf]  ;;  %v985_v37 = vor.u32 %v1054_v31, %v984_v29  ;;  %v912_v39 = vld [vmem:[%s1284_s7 + $0x10] sm:$0xf] }
  0x49   : > { %693 = vmatpush.bf16.msra.mxu1 %v1001_v13  ;;  %706 = vmatpush.bf16.msra.mxu2 %v941_v14  ;;  %v986_v35 = vld [vmem:[%s1284_s7 + $0xa8] sm:$0xf0]  ;;  %v925_v38 = vor.u32 %v1037_v32, %v922_v33  ;;  %v1036_v40 = vld [vmem:[%s1284_s7 + $0x14] sm:$0xf0]  ;;  %v976_v41 = vld [vmem:[%s1284_s7 + $0x90] sm:$0xf] }
  0x4a   : > { %719 = vmatpush.bf16.msra.mxu3 %v1005_v18  ;;  %v989_v42 = vor.u32 %v1053_v34, %v986_v35  ;;  %v1052_v43 = vld [vmem:[%s1284_s7 + $0x94] sm:$0xf0]  ;;  %v1035_v44 = vld [vmem:[%s1284_s7 + $0x14] sm:$0xf]  ;;  %v914_v45 = vld [vmem:[%s1284_s7 + $0x18] sm:$0xf0]  ;;  %v913_v48 = vor.u32 %v1036_v40, %v912_v39 }
  0x4b   : > { %v1051_v46 = vld [vmem:[%s1284_s7 + $0x94] sm:$0xf]  ;;  %v978_v47 = vld [vmem:[%s1284_s7 + $0x98] sm:$0xf0]  ;;  %v477_v49 = vld [vmem:[%s1378_s0] sm:$0xff]  ;;  %v977_v50 = vor.u32 %v1052_v43, %v976_v41  ;;  %v917_v51 = vor.u32 %v1035_v44, %v914_v45  ;;  %s1390_s10 = smov (!%p450_p9, %s898_s10), 3 }
  0x4c   : > { %681 = vmatpush.bf16.msra.mxu0 %v929_v24  ;;  %v904_v52 = vld [vmem:[%s1284_s7] sm:$0xf]  ;;  %v1034_v53 = vld [vmem:[%s1284_s7 + $0x4] sm:$0xf0]  ;;  %v981_v55 = vor.u32 %v1051_v46, %v978_v47  ;;  %v1033_v57 = vld [vmem:[%s1284_s7 + $0x4] sm:$0xf]  ;;  %v511_v61 = vunpack.c.l.b16 %v477_v49  ;;  %v512_v63 = vunpack.c.h.b16 %v477_v49  ;;  %s452_s13 = scalar_lea.vmem %s1380_s2, %s1390_s10  ;;  %s457_s21 = scalar_lea.vmem %s1381_s3, %s1390_s10 }
  0x4d   : > { %694 = vmatpush.bf16.msra.mxu1 %v993_v25  ;;  %707 = vmatpush.bf16.msra.mxu2 %v933_v26  ;;  %v968_v54 = vld [vmem:[%s1284_s7 + $0x80] sm:$0xf]  ;;  %v1050_v56 = vld [vmem:[%s1284_s7 + $0x84] sm:$0xf0]  ;;  %v906_v58 = vld [vmem:[%s1284_s7 + $0x8] sm:$0xf0]  ;;  %v905_v62 = vor.u32 %v1034_v53, %v904_v52 }
  0x4e   : > { %720 = vmatpush.bf16.msra.mxu3 %v997_v30  ;;  %v1049_v59 = vld [vmem:[%s1284_s7 + $0x84] sm:$0xf]  ;;  %v970_v60 = vld [vmem:[%s1284_s7 + $0x88] sm:$0xf0]  ;;  %v969_v0 = vor.u32 %v1050_v56, %v968_v54  ;;  %v909_v1 = vor.u32 %v1033_v57, %v906_v58  ;;  %v513_v3 = vpack.c.b16 %v511_v61, %v511_v61  ;;  %v514_v4 = vpack.c.b16 %v512_v63, %v512_v63  ;;  %v738_v6 = vld [vmem:[%s452_s13] sm:$0x3] }
  0x4f   : > { %v973_v2 = vor.u32 %v1049_v59, %v970_v60  ;;  %v740_v9 = vperm.slane %v738_v6, 0  ;;  %v746_v10 = vld [vmem:[%s457_s21] sm:$0x3]  ;;  %v741_v14 = vperm.slane %v738_v6, 1  ;;  %s901_s17 = sshll.u32 %s1390_s10, 2 }
  0x50   : > { %682 = vmatpush.bf16.msra.mxu0 %v921_v36  ;;  %v748_v12 = vperm.slane %v746_v10, 0  ;;  %v749_v18 = vperm.slane %v746_v10, 1  ;;  %s467_s25 = scalar_lea.vmem %s1382_s4, %s901_s17 }
  0x51   : > { %695 = vmatpush.bf16.msra.mxu1 %v985_v37  ;;  %708 = vmatpush.bf16.msra.mxu2 %v925_v38 }
  0x52   : > { %721 = vmatpush.bf16.msra.mxu3 %v989_v42 }
  0x54   : > { %683 = vmatpush.bf16.msra.mxu0 %v913_v48 }
  0x55   : > { %696 = vmatpush.bf16.msra.mxu1 %v977_v50  ;;  %709 = vmatpush.bf16.msra.mxu2 %v917_v51 }
  0x56   : > { %722 = vmatpush.bf16.msra.mxu3 %v981_v55 }
  0x58   : > { %684 = vmatpush.bf16.msra.mxu0 %v905_v62 }
  0x59   : > { %697 = vmatpush.bf16.msra.mxu1 %v969_v0  ;;  %710 = vmatpush.bf16.msra.mxu2 %v909_v1 }
  0x5a   : > { %723 = vmatpush.bf16.msra.mxu3 %v973_v2 }
  0x5b   : > { %685 = vmatmul.bf16.vlgmr.msra.gmra.mxu0 %v513_v3 }
  0x5c   : > { %698 = vmatmul.bf16.vlgmr.msra.gmra.mxu1 %v514_v4  ;;  %711 = vmatmul.bf16.vlgmr.msra.gmra.mxu2 %v513_v3 }
  0x5d   : > { %724 = vmatmul.bf16.vlgmr.msra.gmra.mxu3 %v514_v4 }
  0xd8   : > { %v686_v5 = vpop.f32.mrf.mxu0 }
  0xd9   : > { %v699_v7 = vpop.f32.mrf.mxu1 }
  0xda   : > { %v700_v8 = vadd.f32 %v699_v7, %v686_v5 }
  0xdc   : > { %v744_v11 = vmul.f32 %v740_v9, %v700_v8 }
  0xde   : > { %v752_v20 = vadd.f32 %v748_v12, %v744_v11 }
  0xdf   : > { %v712_v13 = vpop.f32.mrf.mxu2 }
  0xe0   : > { %v725_v15 = vpop.f32.mrf.mxu3  ;;  %v688_v16 = vpop.f32.mrf.mxu0 }
  0xe1   : > { %v726_v17 = vadd.f32 %v725_v15, %v712_v13  ;;  %v701_v19 = vpop.f32.mrf.mxu1 }
  0xe3   : > { %v745_v21 = vmul.f32 %v741_v14, %v726_v17 }
  0xe5   : > { %v753_v22 = vadd.f32 %v749_v18, %v745_v21 }
  0xe7   : > { %v754_v23 = vpack.c.bf16 %v753_v22, %v752_v20  ;;  %v714_v24 = vpop.f32.mrf.mxu2 }
  0xe8   : > { %v727_v25 = vpop.f32.mrf.mxu3 }
  0xe9   : > { %755 = vst [vmem:[%s467_s25] sm:$0xff] %v754_v23 }
  0xea PF: > { %s14_s19 = sadd.s32 1, %s1143_s19   ;;  %s1383_s15 = smov %s1131_s16 }
  0xeb   : > { %p11_p10 = scmp.ge.s32.totalorder %s14_s19, 4   ;;  %s1384_s16 = smov %s1205_s23 }
  0xec   : > { %s1385_s17 = smov %s1139_s18  ;;  %s1386_s18 = smov %s1388_s20 }
  0xed   :  { %13 = sbr.rel (!%p11_p10) target bundleno = 3 (0x3), region = 126 }

// kernel: _lambda_.41
= control target key start
LH: loop header
LB: loop body
LE: loop exit
PB: predicated region body
PF: predicated region fallthrough
CT: control target
= control target key end

     0   :  { %s1346_s15 = smov 0   ;;  %s1348_s16 = smov 0   ;;  %s1590_s0 = inlined_call_operand.vmem [shape: bf16[8,512], index: 0, kind: input, shape index: {}]   ;;  %s1591_s1 = inlined_call_operand.vmem [shape: bf16[512,256], index: 1, kind: input, shape index: {}]   ;;  %s1592_s2 = inlined_call_operand.vmem [shape: f32[1,256], index: 2, kind: input, shape index: {}]   ;;  %s1593_s3 = inlined_call_operand.vmem [shape: f32[1,256], index: 3, kind: input, shape index: {}]   ;;  %s1594_s4 = inlined_call_operand.vmem [shape: bf16[8,256], index: 4, kind: output, shape index: {}]  }
   0x1   :  { %s1350_s17 = smov 0   ;;  %s1352_s18 = smov 0  }
   0x2   :  { %s1354_s19 = smov 0  }
   0x3 LB: > { %s29_s20 = sadd.s32 1, %s1315_s18  ;;  %p77_p1 = scmp.ne.s32.totalorder %s1307_s16, %s1303_s15  ;;  %s1319_s19 = sphi %s1354_s19, %s14_s19   ;;  %s1315_s18 = sphi %s1352_s18, %s1598_s18   ;;  %s1311_s17 = sphi %s1350_s17, %s1597_s17   ;;  %s1307_s16 = sphi %s1348_s16, %s1596_s16   ;;  %s1303_s15 = sphi %s1346_s15, %s1595_s15  }
   0x4   : > { %p31_p0 = scmp.ge.s32.totalorder %s29_s20, 2  ;;  %p78_p2 = scmp.eq.s32.totalorder %s1319_s19, 0 }
   0x5   : > { %s70_s22 = sadd.s32 1, %s1307_s16  ;;  %p1071_p5 = scmp.ge.s32.totalorder %s1319_s19, 2 }
   0x6   : > { %s1600_s20 = smov (%p31_p0, %s29_s20), 0  ;;  %p79_p3 = por %p78_p2, %p77_p1 }
   0x7   : > { %s66_s21 = ssub.s32 %s1315_s18, %s1600_s20  ;;  %196 = sbr.rel (%p1071_p5) target bundleno = 80 (0x50), region = 20 }
   0x8   : > { %p68_p4 = scmp.eq.s32.totalorder %s66_s21, 0 }
   0xa   : > { %s1381_s23 = scalar_select %p68_p4, %s1307_s16, %s70_s22  }
   0xc   : > { %199 = sbr.rel (!%p79_p3) target bundleno = 80 (0x50), region = 24  ;;  %s201_s24 = sand.u32 (%p79_p3), 1, %s1307_s16  }
   0xd   : > { %s1073_s25 = sshll.u32 (%p79_p3), %s1315_s18, 2  ;;  %s1072_s26 = sshll.u32 (%p79_p3), %s201_s24, 8 }
   0xe   : > { %s1389_s29 = scalar_lea.vmem (%p79_p3), %s1591_s1, %s1073_s25  ;;  %s1393_s30 = scalar_lea.vmem (%p79_p3), [#allocation3], %s1072_s26 }
   0xf   : > { %v225_v0 = vld [vmem:[%s1389_s29] sm:$0xf] (%p79_p3)  ;;  %v227_v1 = vld [vmem:[%s1389_s29 + $0x8] sm:$0xf] (%p79_p3)  ;;  %v229_v2 = vld [vmem:[%s1389_s29 + $0x10] sm:$0xf] (%p79_p3) }
  0x10   : > { %226 = vst [vmem:[%s1393_s30] sm:$0xf] (%p79_p3), %v225_v0  ;;  %v231_v3 = vld [vmem:[%s1389_s29 + $0x18] sm:$0xf] (%p79_p3)  ;;  %v233_v4 = vld [vmem:[%s1389_s29 + $0x20] sm:$0xf] (%p79_p3) }
  0x11   : > { %228 = vst [vmem:[%s1393_s30 + $0x4] sm:$0xf] %v227_v1  ;;  %v235_v5 = vld [vmem:[%s1389_s29 + $0x28] sm:$0xf]  ;;  %v237_v6 = vld [vmem:[%s1389_s29 + $0x30] sm:$0xf] }
  0x12   : > { %230 = vst [vmem:[%s1393_s30 + $0x8] sm:$0xf] %v229_v2  ;;  %v239_v7 = vld [vmem:[%s1389_s29 + $0x38] sm:$0xf]  ;;  %v241_v8 = vld [vmem:[%s1389_s29 + $0x40] sm:$0xf] }
  0x13   : > { %232 = vst [vmem:[%s1393_s30 + $0xc] sm:$0xf] %v231_v3  ;;  %v243_v9 = vld [vmem:[%s1389_s29 + $0x48] sm:$0xf]  ;;  %v245_v10 = vld [vmem:[%s1389_s29 + $0x50] sm:$0xf] }
  0x14   : > { %234 = vst [vmem:[%s1393_s30 + $0x10] sm:$0xf] %v233_v4  ;;  %v247_v11 = vld [vmem:[%s1389_s29 + $0x58] sm:$0xf]  ;;  %v249_v12 = vld [vmem:[%s1389_s29 + $0x60] sm:$0xf] }
  0x15   : > { %236 = vst [vmem:[%s1393_s30 + $0x14] sm:$0xf] %v235_v5  ;;  %v251_v13 = vld [vmem:[%s1389_s29 + $0x68] sm:$0xf]  ;;  %v253_v14 = vld [vmem:[%s1389_s29 + $0x70] sm:$0xf] }
  0x16   : > { %238 = vst [vmem:[%s1393_s30 + $0x18] sm:$0xf] %v237_v6  ;;  %v255_v15 = vld [vmem:[%s1389_s29 + $0x78] sm:$0xf]  ;;  %v257_v16 = vld [vmem:[%s1389_s29 + $0x80] sm:$0xf] }
  0x17   : > { %240 = vst [vmem:[%s1393_s30 + $0x1c] sm:$0xf] %v239_v7  ;;  %v259_v17 = vld [vmem:[%s1389_s29 + $0x88] sm:$0xf]  ;;  %v261_v18 = vld [vmem:[%s1389_s29 + $0x90] sm:$0xf] }
  0x18   : > { %242 = vst [vmem:[%s1393_s30 + $0x20] sm:$0xf] %v241_v8  ;;  %v263_v19 = vld [vmem:[%s1389_s29 + $0x98] sm:$0xf]  ;;  %v265_v20 = vld [vmem:[%s1389_s29 + $0xa0] sm:$0xf] }
  0x19   : > { %244 = vst [vmem:[%s1393_s30 + $0x24] sm:$0xf] %v243_v9  ;;  %v267_v21 = vld [vmem:[%s1389_s29 + $0xa8] sm:$0xf]  ;;  %v269_v22 = vld [vmem:[%s1389_s29 + $0xb0] sm:$0xf] }
  0x1a   : > { %246 = vst [vmem:[%s1393_s30 + $0x28] sm:$0xf] %v245_v10  ;;  %v271_v23 = vld [vmem:[%s1389_s29 + $0xb8] sm:$0xf]  ;;  %v273_v24 = vld [vmem:[%s1389_s29 + $0xc0] sm:$0xf] }
  0x1b   : > { %248 = vst [vmem:[%s1393_s30 + $0x2c] sm:$0xf] %v247_v11  ;;  %v275_v25 = vld [vmem:[%s1389_s29 + $0xc8] sm:$0xf]  ;;  %v277_v26 = vld [vmem:[%s1389_s29 + $0xd0] sm:$0xf] }
  0x1c   : > { %250 = vst [vmem:[%s1393_s30 + $0x30] sm:$0xf] %v249_v12  ;;  %v279_v27 = vld [vmem:[%s1389_s29 + $0xd8] sm:$0xf]  ;;  %v281_v28 = vld [vmem:[%s1389_s29 + $0xe0] sm:$0xf] }
  0x1d   : > { %252 = vst [vmem:[%s1393_s30 + $0x34] sm:$0xf] %v251_v13  ;;  %v283_v29 = vld [vmem:[%s1389_s29 + $0xe8] sm:$0xf]  ;;  %v285_v30 = vld [vmem:[%s1389_s29 + $0xf0] sm:$0xf] }
  0x1e   : > { %254 = vst [vmem:[%s1393_s30 + $0x38] sm:$0xf] %v253_v14  ;;  %v287_v31 = vld [vmem:[%s1389_s29 + $0xf8] sm:$0xf]  ;;  %v289_v32 = vld [vmem:[%s1389_s29 + $0x100] sm:$0xf] }
  0x1f   : > { %256 = vst [vmem:[%s1393_s30 + $0x3c] sm:$0xf] %v255_v15  ;;  %v291_v33 = vld [vmem:[%s1389_s29 + $0x108] sm:$0xf]  ;;  %v293_v34 = vld [vmem:[%s1389_s29 + $0x110] sm:$0xf] }
  0x20   : > { %258 = vst [vmem:[%s1393_s30 + $0x40] sm:$0xf] %v257_v16  ;;  %v295_v35 = vld [vmem:[%s1389_s29 + $0x118] sm:$0xf]  ;;  %v297_v36 = vld [vmem:[%s1389_s29 + $0x120] sm:$0xf] }
  0x21   : > { %260 = vst [vmem:[%s1393_s30 + $0x44] sm:$0xf] %v259_v17  ;;  %v299_v37 = vld [vmem:[%s1389_s29 + $0x128] sm:$0xf]  ;;  %v301_v38 = vld [vmem:[%s1389_s29 + $0x130] sm:$0xf] }
  0x22   : > { %262 = vst [vmem:[%s1393_s30 + $0x48] sm:$0xf] %v261_v18  ;;  %v303_v39 = vld [vmem:[%s1389_s29 + $0x138] sm:$0xf]  ;;  %v305_v40 = vld [vmem:[%s1389_s29 + $0x140] sm:$0xf] }
  0x23   : > { %264 = vst [vmem:[%s1393_s30 + $0x4c] sm:$0xf] %v263_v19  ;;  %v307_v41 = vld [vmem:[%s1389_s29 + $0x148] sm:$0xf]  ;;  %v309_v42 = vld [vmem:[%s1389_s29 + $0x150] sm:$0xf] }
  0x24   : > { %266 = vst [vmem:[%s1393_s30 + $0x50] sm:$0xf] %v265_v20  ;;  %v311_v43 = vld [vmem:[%s1389_s29 + $0x158] sm:$0xf]  ;;  %v313_v44 = vld [vmem:[%s1389_s29 + $0x160] sm:$0xf] }
  0x25   : > { %268 = vst [vmem:[%s1393_s30 + $0x54] sm:$0xf] %v267_v21  ;;  %v315_v45 = vld [vmem:[%s1389_s29 + $0x168] sm:$0xf]  ;;  %v317_v46 = vld [vmem:[%s1389_s29 + $0x170] sm:$0xf] }
  0x26   : > { %270 = vst [vmem:[%s1393_s30 + $0x58] sm:$0xf] %v269_v22  ;;  %v319_v47 = vld [vmem:[%s1389_s29 + $0x178] sm:$0xf]  ;;  %v321_v48 = vld [vmem:[%s1389_s29 + $0x180] sm:$0xf] }
  0x27   : > { %272 = vst [vmem:[%s1393_s30 + $0x5c] sm:$0xf] %v271_v23  ;;  %v323_v49 = vld [vmem:[%s1389_s29 + $0x188] sm:$0xf]  ;;  %v325_v50 = vld [vmem:[%s1389_s29 + $0x190] sm:$0xf] }
  0x28   : > { %274 = vst [vmem:[%s1393_s30 + $0x60] sm:$0xf] %v273_v24  ;;  %v327_v51 = vld [vmem:[%s1389_s29 + $0x198] sm:$0xf]  ;;  %v329_v52 = vld [vmem:[%s1389_s29 + $0x1a0] sm:$0xf] }
  0x29   : > { %276 = vst [vmem:[%s1393_s30 + $0x64] sm:$0xf] %v275_v25  ;;  %v331_v53 = vld [vmem:[%s1389_s29 + $0x1a8] sm:$0xf]  ;;  %v333_v54 = vld [vmem:[%s1389_s29 + $0x1b0] sm:$0xf] }
  0x2a   : > { %278 = vst [vmem:[%s1393_s30 + $0x68] sm:$0xf] %v277_v26  ;;  %v335_v55 = vld [vmem:[%s1389_s29 + $0x1b8] sm:$0xf]  ;;  %v337_v56 = vld [vmem:[%s1389_s29 + $0x1c0] sm:$0xf] }
  0x2b   : > { %280 = vst [vmem:[%s1393_s30 + $0x6c] sm:$0xf] %v279_v27  ;;  %v339_v57 = vld [vmem:[%s1389_s29 + $0x1c8] sm:$0xf]  ;;  %v341_v58 = vld [vmem:[%s1389_s29 + $0x1d0] sm:$0xf] }
  0x2c   : > { %282 = vst [vmem:[%s1393_s30 + $0x70] sm:$0xf] %v281_v28  ;;  %v343_v59 = vld [vmem:[%s1389_s29 + $0x1d8] sm:$0xf]  ;;  %v345_v60 = vld [vmem:[%s1389_s29 + $0x1e0] sm:$0xf] }
  0x2d   : > { %284 = vst [vmem:[%s1393_s30 + $0x74] sm:$0xf] %v283_v29  ;;  %v347_v61 = vld [vmem:[%s1389_s29 + $0x1e8] sm:$0xf]  ;;  %v349_v62 = vld [vmem:[%s1389_s29 + $0x1f0] sm:$0xf] }
  0x2e   : > { %286 = vst [vmem:[%s1393_s30 + $0x78] sm:$0xf] %v285_v30  ;;  %v351_v63 = vld [vmem:[%s1389_s29 + $0x1f8] sm:$0xf] }
  0x2f   : > { %288 = vst [vmem:[%s1393_s30 + $0x7c] sm:$0xf] %v287_v31 }
  0x30   : > { %290 = vst [vmem:[%s1393_s30 + $0x80] sm:$0xf] %v289_v32 }
  0x31   : > { %292 = vst [vmem:[%s1393_s30 + $0x84] sm:$0xf] %v291_v33 }
  0x32   : > { %294 = vst [vmem:[%s1393_s30 + $0x88] sm:$0xf] %v293_v34 }
  0x33   : > { %296 = vst [vmem:[%s1393_s30 + $0x8c] sm:$0xf] %v295_v35 }
  0x34   : > { %298 = vst [vmem:[%s1393_s30 + $0x90] sm:$0xf] %v297_v36 }
  0x35   : > { %300 = vst [vmem:[%s1393_s30 + $0x94] sm:$0xf] %v299_v37 }
  0x36   : > { %302 = vst [vmem:[%s1393_s30 + $0x98] sm:$0xf] %v301_v38 }
  0x37   : > { %304 = vst [vmem:[%s1393_s30 + $0x9c] sm:$0xf] %v303_v39 }
  0x38   : > { %306 = vst [vmem:[%s1393_s30 + $0xa0] sm:$0xf] %v305_v40 }
  0x39   : > { %308 = vst [vmem:[%s1393_s30 + $0xa4] sm:$0xf] %v307_v41 }
  0x3a   : > { %310 = vst [vmem:[%s1393_s30 + $0xa8] sm:$0xf] %v309_v42 }
  0x3b   : > { %312 = vst [vmem:[%s1393_s30 + $0xac] sm:$0xf] %v311_v43 }
  0x3c   : > { %314 = vst [vmem:[%s1393_s30 + $0xb0] sm:$0xf] %v313_v44 }
  0x3d   : > { %316 = vst [vmem:[%s1393_s30 + $0xb4] sm:$0xf] %v315_v45 }
  0x3e   : > { %318 = vst [vmem:[%s1393_s30 + $0xb8] sm:$0xf] %v317_v46 }
  0x3f   : > { %320 = vst [vmem:[%s1393_s30 + $0xbc] sm:$0xf] %v319_v47 }
  0x40   : > { %322 = vst [vmem:[%s1393_s30 + $0xc0] sm:$0xf] %v321_v48 }
  0x41   : > { %324 = vst [vmem:[%s1393_s30 + $0xc4] sm:$0xf] %v323_v49 }
  0x42   : > { %326 = vst [vmem:[%s1393_s30 + $0xc8] sm:$0xf] %v325_v50 }
  0x43   : > { %328 = vst [vmem:[%s1393_s30 + $0xcc] sm:$0xf] %v327_v51 }
  0x44   : > { %330 = vst [vmem:[%s1393_s30 + $0xd0] sm:$0xf] %v329_v52 }
  0x45   : > { %332 = vst [vmem:[%s1393_s30 + $0xd4] sm:$0xf] %v331_v53 }
  0x46   : > { %334 = vst [vmem:[%s1393_s30 + $0xd8] sm:$0xf] %v333_v54 }
  0x47   : > { %336 = vst [vmem:[%s1393_s30 + $0xdc] sm:$0xf] %v335_v55 }
  0x48   : > { %338 = vst [vmem:[%s1393_s30 + $0xe0] sm:$0xf] %v337_v56 }
  0x49   : > { %340 = vst [vmem:[%s1393_s30 + $0xe4] sm:$0xf] %v339_v57 }
  0x4a   : > { %342 = vst [vmem:[%s1393_s30 + $0xe8] sm:$0xf] %v341_v58 }
  0x4b   : > { %344 = vst [vmem:[%s1393_s30 + $0xec] sm:$0xf] %v343_v59 }
  0x4c   : > { %346 = vst [vmem:[%s1393_s30 + $0xf0] sm:$0xf] %v345_v60 }
  0x4d   : > { %348 = vst [vmem:[%s1393_s30 + $0xf4] sm:$0xf] %v347_v61 }
  0x4e   : > { %350 = vst [vmem:[%s1393_s30 + $0xf8] sm:$0xf] %v349_v62 }
  0x4f   : > { %352 = vst [vmem:[%s1393_s30 + $0xfc] sm:$0xf] %v351_v63 }
  0x50 PF: > { %p1074_p6 = scmp.ge.s32.totalorder %s1319_s19, 1  ;;  %p515_p7 = scmp.lt.s32.totalorder %s1319_s19, 3 }
  0x52   : > { %p516_p8 = pnand %p1074_p6, %p515_p7 }
  0x53   : > { %s522_s5 = sand.u32 (!%p516_p8), 1, %s1303_s15   ;;  %p576_p9 = scmp.lt.s32.totalorder (!%p516_p8), %s1311_s17, 1 }
  0x54   : > { %519 = sbr.rel (%p516_p8) target bundleno = 268 (0x10c), region = 73  ;;  %s1075_s6 = sshll.u32 (!%p516_p8), %s522_s5, 8 }
  0x55   : > { %s1524_s7 = scalar_lea.vmem (!%p516_p8), [#allocation3], %s1075_s6 }
  0x59   : > { %v1214_v0 = vld [vmem:[%s1524_s7 + $0x38] sm:$0xff]  ;;  %v1213_v4 = vld [vmem:[%s1524_s7 + $0x30] sm:$0xff]  ;;  %v1212_v8 = vld [vmem:[%s1524_s7 + $0x28] sm:$0xff]  ;;  %s1602_s17 = smov (!%p576_p9, %s1311_s17), 1 }
  0x5a   : > { %v1222_v1 = vld [vmem:[%s1524_s7 + $0x78] sm:$0xff]  ;;  %868 = vmatpush.bf16.msra.mxu0 %v1214_v0  ;;  %v1221_v5 = vld [vmem:[%s1524_s7 + $0x70] sm:$0xff]  ;;  %v1220_v9 = vld [vmem:[%s1524_s7 + $0x68] sm:$0xff]  ;;  %s578_s14 = scalar_lea.vmem %s1592_s2, %s1602_s17  ;;  %s581_s22 = scalar_lea.vmem %s1593_s3, %s1602_s17 }
  0x5b   : > { %v1230_v2 = vld [vmem:[%s1524_s7 + $0xb8] sm:$0xff]  ;;  %881 = vmatpush.bf16.msra.mxu1 %v1222_v1  ;;  %v1229_v6 = vld [vmem:[%s1524_s7 + $0xb0] sm:$0xff]  ;;  %v1228_v10 = vld [vmem:[%s1524_s7 + $0xa8] sm:$0xff]  ;;  %s1076_s24 = sshll.u32 %s1602_s17, 2 }
  0x5c   : > { %v1238_v3 = vld [vmem:[%s1524_s7 + $0xf8] sm:$0xff]  ;;  %894 = vmatpush.bf16.msra.mxu2 %v1230_v2  ;;  %v1237_v7 = vld [vmem:[%s1524_s7 + $0xf0] sm:$0xff]  ;;  %v1236_v11 = vld [vmem:[%s1524_s7 + $0xe8] sm:$0xff]  ;;  %s589_s27 = scalar_lea.vmem %s1594_s4, %s1076_s24 }
  0x5d   : > { %907 = vmatpush.bf16.msra.mxu3 %v1238_v3  ;;  %v1211_v12 = vld [vmem:[%s1524_s7 + $0x20] sm:$0xff]  ;;  %v1210_v16 = vld [vmem:[%s1524_s7 + $0x18] sm:$0xff]  ;;  %v1209_v20 = vld [vmem:[%s1524_s7 + $0x10] sm:$0xff] }
  0x5e   : > { %869 = vmatpush.bf16.msra.mxu0 %v1213_v4  ;;  %v1219_v13 = vld [vmem:[%s1524_s7 + $0x60] sm:$0xff]  ;;  %v1218_v17 = vld [vmem:[%s1524_s7 + $0x58] sm:$0xff]  ;;  %v1217_v21 = vld [vmem:[%s1524_s7 + $0x50] sm:$0xff] }
  0x5f   : > { %882 = vmatpush.bf16.msra.mxu1 %v1221_v5  ;;  %v1227_v14 = vld [vmem:[%s1524_s7 + $0xa0] sm:$0xff]  ;;  %v1226_v18 = vld [vmem:[%s1524_s7 + $0x98] sm:$0xff]  ;;  %v1225_v22 = vld [vmem:[%s1524_s7 + $0x90] sm:$0xff] }
  0x60   : > { %895 = vmatpush.bf16.msra.mxu2 %v1229_v6  ;;  %v1235_v15 = vld [vmem:[%s1524_s7 + $0xe0] sm:$0xff]  ;;  %v1234_v19 = vld [vmem:[%s1524_s7 + $0xd8] sm:$0xff]  ;;  %v1233_v23 = vld [vmem:[%s1524_s7 + $0xd0] sm:$0xff] }
  0x61   : > { %908 = vmatpush.bf16.msra.mxu3 %v1237_v7  ;;  %v1208_v24 = vld [vmem:[%s1524_s7 + $0x8] sm:$0xff]  ;;  %v596_v26 = vld [vmem:[%s1590_s0] sm:$0xff] }
  0x62   : > { %870 = vmatpush.bf16.msra.mxu0 %v1212_v8  ;;  %v1216_v25 = vld [vmem:[%s1524_s7 + $0x48] sm:$0xff]  ;;  %v664_v30 = vunpack.c.l.b16 %v596_v26  ;;  %v665_v31 = vunpack.c.h.b16 %v596_v26  ;;  %v1207_v32 = vld [vmem:[%s1524_s7] sm:$0xff] }
  0x63   : > { %883 = vmatpush.bf16.msra.mxu1 %v1220_v9  ;;  %v1224_v27 = vld [vmem:[%s1524_s7 + $0x88] sm:$0xff]  ;;  %v1215_v33 = vld [vmem:[%s1524_s7 + $0x40] sm:$0xff] }
  0x64   : > { %896 = vmatpush.bf16.msra.mxu2 %v1228_v10  ;;  %v1232_v28 = vld [vmem:[%s1524_s7 + $0xc8] sm:$0xff]  ;;  %v1223_v36 = vld [vmem:[%s1524_s7 + $0x80] sm:$0xff]  ;;  %v668_v38 = vpack.c.b16 %v664_v30, %v664_v30  ;;  %v669_v39 = vpack.c.b16 %v665_v31, %v665_v31 }
  0x65   : > { %909 = vmatpush.bf16.msra.mxu3 %v1236_v11  ;;  %v597_v29 = vld [vmem:[%s1590_s0 + $0x8] sm:$0xff]  ;;  %v1231_v37 = vld [vmem:[%s1524_s7 + $0xc0] sm:$0xff] }
  0x66   : > { %871 = vmatpush.bf16.msra.mxu0 %v1211_v12  ;;  %v666_v34 = vunpack.c.l.b16 %v597_v29  ;;  %v667_v35 = vunpack.c.h.b16 %v597_v29  ;;  %v1279_v48 = vld [vmem:[%s578_s14] ss:$0 sm:$0xff] }
  0x67   : > { %884 = vmatpush.bf16.msra.mxu1 %v1219_v13  ;;  %v1280_v52 = vld [vmem:[%s581_s22] ss:$0 sm:$0xff] }
  0x68   : > { %897 = vmatpush.bf16.msra.mxu2 %v1227_v14  ;;  %v670_v40 = vpack.c.b16 %v666_v34, %v666_v34  ;;  %v671_v41 = vpack.c.b16 %v667_v35, %v667_v35 }
  0x69   : > { %910 = vmatpush.bf16.msra.mxu3 %v1235_v15 }
  0x6a   : > { %872 = vmatpush.bf16.msra.mxu0 %v1210_v16 }
  0x6b   : > { %885 = vmatpush.bf16.msra.mxu1 %v1218_v17 }
  0x6c   : > { %898 = vmatpush.bf16.msra.mxu2 %v1226_v18 }
  0x6d   : > { %911 = vmatpush.bf16.msra.mxu3 %v1234_v19 }
  0x6e   : > { %873 = vmatpush.bf16.msra.mxu0 %v1209_v20 }
  0x6f   : > { %886 = vmatpush.bf16.msra.mxu1 %v1217_v21 }
  0x70   : > { %899 = vmatpush.bf16.msra.mxu2 %v1225_v22 }
  0x71   : > { %912 = vmatpush.bf16.msra.mxu3 %v1233_v23 }
  0x72   : > { %874 = vmatpush.bf16.msra.mxu0 %v1208_v24 }
  0x73   : > { %887 = vmatpush.bf16.msra.mxu1 %v1216_v25 }
  0x74   : > { %900 = vmatpush.bf16.msra.mxu2 %v1224_v27 }
  0x75   : > { %913 = vmatpush.bf16.msra.mxu3 %v1232_v28 }
  0x76   : > { %875 = vmatpush.bf16.msra.mxu0 %v1207_v32 }
  0x77   : > { %888 = vmatpush.bf16.msra.mxu1 %v1215_v33 }
  0x78   : > { %901 = vmatpush.bf16.msra.mxu2 %v1223_v36 }
  0x79   : > { %914 = vmatpush.bf16.msra.mxu3 %v1231_v37  ;;  %876 = vmatmul.bf16.vlgmr.msra.gmra.mxu0 %v668_v38 }
  0x7a   : > { %889 = vmatmul.bf16.vlgmr.msra.gmra.mxu1 %v669_v39 }
  0x7b   : > { %902 = vmatmul.bf16.vlgmr.msra.gmra.mxu2 %v670_v40 }
  0x7c   : > { %915 = vmatmul.bf16.vlgmr.msra.gmra.mxu3 %v671_v41 }
  0xf6   : > { %v877_v42 = vpop.f32.mrf.mxu0 }
  0xf7   : > { %v890_v43 = vpop.f32.mrf.mxu1 }
  0xf8   : > { %v891_v44 = vadd.f32 %v890_v43, %v877_v42 }
  0xfe   : > { %v903_v45 = vpop.f32.mrf.mxu2  ;;  %v879_v49 = vpop.f32.mrf.mxu0 }
  0xff   : > { %v916_v46 = vpop.f32.mrf.mxu3  ;;  %v904_v47 = vadd.f32 %v903_v45, %v891_v44  ;;  %v892_v50 = vpop.f32.mrf.mxu1 }
 0x101   : > { %v917_v51 = vadd.f32 %v916_v46, %v904_v47 }
 0x103   : > { %v930_v53 = vmul.f32 %v1279_v48, %v917_v51 }
 0x105   : > { %v935_v54 = vadd.f32 %v1280_v52, %v930_v53 }
 0x106   : > { %v905_v55 = vpop.f32.mrf.mxu2 }
 0x107   : > { %v918_v56 = vpop.f32.mrf.mxu3  ;;  %v936_v57 = vmax.f32 %v935_v54, 0.0 }
 0x109   : > { %v937_v58 = vpack.c.bf16 %v936_v57, %v936_v57 }
 0x10b   : > { %938 = vst [vmem:[%s589_s27] sm:$0xf] %v937_v58 }
 0x10c PF: > { %s14_s19 = sadd.s32 1, %s1319_s19   ;;  %s1595_s15 = smov %s1307_s16 }
 0x10d   : > { %p11_p10 = scmp.ge.s32.totalorder %s14_s19, 4   ;;  %s1596_s16 = smov %s1381_s23 }
 0x10e   : > { %s1597_s17 = smov %s1315_s18  ;;  %s1598_s18 = smov %s1600_s20 }
 0x10f   :  { %13 = sbr.rel (!%p11_p10) target bundleno = 3 (0x3), region = 129 }

// kernel: _lambda_.42
= control target key start
LH: loop header
LB: loop body
LE: loop exit
PB: predicated region body
PF: predicated region fallthrough
CT: control target
= control target key end

     0   :  { %s949_s15 = smov 0   ;;  %s951_s16 = smov 0   ;;  %s1062_s0 = inlined_call_operand.vmem [shape: bf16[8,2304], index: 0, kind: input, shape index: {}]   ;;  %s1063_s1 = inlined_call_operand.vmem [shape: bf16[2304,128], index: 1, kind: input, shape index: {}]   ;;  %s1064_s2 = inlined_call_operand.vmem [shape: f32[1,256], index: 2, kind: input, shape index: {}]   ;;  %s1065_s3 = inlined_call_operand.vmem [shape: f32[1,256], index: 3, kind: input, shape index: {}]   ;;  %s1066_s4 = inlined_call_operand.vmem [shape: bf16[8,256], index: 4, kind: output, shape index: {}]  }
   0x1   :  { %s953_s17 = smov 0   ;;  %s955_s18 = smov 0  }
   0x2   :  { %s957_s19 = smov 0  }
   0x3 LB: > { %s26_s20 = sadd.s32 1, %s913_s17  ;;  %s29_s21 = sadd.s32 1, %s917_s18  ;;  %s921_s19 = sphi %s957_s19, %s14_s19   ;;  %s917_s18 = sphi %s955_s18, %s1070_s18   ;;  %s913_s17 = sphi %s953_s17, %s1069_s17   ;;  %s909_s16 = sphi %s951_s16, %s1068_s16   ;;  %s905_s15 = sphi %s949_s15, %s1067_s15  }
   0x4   : > { %p27_p0 = scmp.ge.s32.totalorder %s26_s20, 3  ;;  %p712_p1 = scmp.ge.s32.totalorder %s921_s19, 1 }
   0x5   : > { %p233_p2 = scmp.lt.s32.totalorder %s921_s19, 7 }
   0x6   : > { %s1072_s20 = smov (%p27_p0, %s26_s20), 0  ;;  %s1074_s21 = smov (!%p27_p0, %s29_s21), %s917_s18 }
   0x7   : > { %p234_p3 = pnand %p712_p1, %p233_p2  ;;  %p31_p4 = scmp.ge.s32.totalorder %s1074_s21, 2 }
   0x8   : > { %s281_s22 = smul.u32 (!%p234_p3), 3, %s909_s16  ;;  %p305_p7 = scmp.lt.s32.totalorder (!%p234_p3), %s909_s16, 1 }
   0x9   : > { %s1076_s21 = smov (%p31_p4, %s1074_s21), 0  ;;  %237 = sbr.rel (%p234_p3) target bundleno = 213 (0xd5), region = 36 }
   0xa   : > { %s282_s23 = sadd.s32 (!%p234_p3), %s905_s15, %s281_s22  ;;  %p716_p8 = scmp.ne.s32.totalorder (!%p234_p3), %s905_s15, 0 }
   0xb   : > { %s283_s24 = smul.u32 (!%p234_p3), 3, %s282_s23 }
   0xc   : > { %s297_s25 = smul.u32 (!%p234_p3), 48, %s282_s23 }
   0xd   : > { %p286_p5 = scmp.lt.s32.totalorder (!%p234_p3), %s283_s24, 17 }
   0xe   : > { %p298_p6 = scmp.lt.s32.totalorder %s297_s25, 287  ;;  %s1082_s16 = smov (!%p305_p7, %s909_s16), 1 }
   0xf   : > { %s1078_s24 = smov (!%p286_p5, %s283_s24), 17  ;;  %s307_s10 = scalar_lea.vmem %s1064_s2, %s1082_s16 }
  0x10   : > { %s1080_s25 = smov (!%p298_p6, %s297_s25), 287  ;;  %s713_s26 = sshll.u32 %s1078_s24, 2 }
  0x11   : > { %s985_s29 = scalar_lea.vmem %s1062_s0, %s713_s26  ;;  %s714_s30 = sshll.u32 %s1080_s25, 2 }
  0x12   : > { %s990_s7 = scalar_lea.vmem %s1063_s1, %s714_s30  ;;  %s310_s13 = scalar_lea.vmem %s1065_s3, %s1082_s16 }
  0x13   : > { %s715_s14 = sshll.u32 %s1082_s16, 2  ;;  %322 = sbr.rel (%p716_p8) target bundleno = 26 (0x1a), region = 40 }
  0x14   : > { %s1006_s24 = scalar_lea.vmem %s1066_s4, %s715_s14 }
  0x18   : > { %v923_v0 = vmov 0.0  }
  0x19   : > { %323 = vst [vmem:[#allocation2] sm:$0xff] %v923_v0 }
  0x1a PF: > { %v823_v1 = vld [vmem:[%s990_s7 + $0x38] sm:$0xff]  ;;  %v822_v4 = vld [vmem:[%s990_s7 + $0x30] sm:$0xff]  ;;  %v821_v7 = vld [vmem:[%s990_s7 + $0x28] sm:$0xff]  ;;  %p813_p9 = scmp.ne.s32.totalorder %s905_s15, 2 }
  0x1b   : > { %v831_v2 = vld [vmem:[%s990_s7 + $0x78] sm:$0xff]  ;;  %530 = vmatpush.bf16.msra.mxu0 %v823_v1  ;;  %v830_v5 = vld [vmem:[%s990_s7 + $0x70] sm:$0xff]  ;;  %v829_v8 = vld [vmem:[%s990_s7 + $0x68] sm:$0xff] }
  0x1c   : > { %v839_v3 = vld [vmem:[%s990_s7 + $0xb8] sm:$0xff]  ;;  %543 = vmatpush.bf16.msra.mxu1 %v831_v2  ;;  %v838_v6 = vld [vmem:[%s990_s7 + $0xb0] sm:$0xff]  ;;  %v837_v9 = vld [vmem:[%s990_s7 + $0xa8] sm:$0xff] }
  0x1d   : > { %556 = vmatpush.bf16.msra.mxu2 %v839_v3  ;;  %v820_v10 = vld [vmem:[%s990_s7 + $0x20] sm:$0xff]  ;;  %v819_v13 = vld [vmem:[%s990_s7 + $0x18] sm:$0xff]  ;;  %v818_v16 = vld [vmem:[%s990_s7 + $0x10] sm:$0xff] }
  0x1e   : > { %v828_v11 = vld [vmem:[%s990_s7 + $0x60] sm:$0xff]  ;;  %v827_v14 = vld [vmem:[%s990_s7 + $0x58] sm:$0xff]  ;;  %v826_v17 = vld [vmem:[%s990_s7 + $0x50] sm:$0xff] }
  0x1f   : > { %531 = vmatpush.bf16.msra.mxu0 %v822_v4  ;;  %v836_v12 = vld [vmem:[%s990_s7 + $0xa0] sm:$0xff]  ;;  %v835_v15 = vld [vmem:[%s990_s7 + $0x98] sm:$0xff]  ;;  %v834_v18 = vld [vmem:[%s990_s7 + $0x90] sm:$0xff] }
  0x20   : > { %544 = vmatpush.bf16.msra.mxu1 %v830_v5  ;;  %v817_v19 = vld [vmem:[%s990_s7 + $0x8] sm:$0xff]  ;;  %v325_v21 = vld [vmem:[%s985_s29] sm:$0xff] }
  0x21   : > { %557 = vmatpush.bf16.msra.mxu2 %v838_v6  ;;  %v825_v20 = vld [vmem:[%s990_s7 + $0x48] sm:$0xff]  ;;  %v377_v24 = vunpack.c.l.b16 %v325_v21  ;;  %v378_v25 = vunpack.c.h.b16 %v325_v21  ;;  %v816_v26 = vld [vmem:[%s990_s7] sm:$0xff] }
  0x22   : > { %v833_v22 = vld [vmem:[%s990_s7 + $0x88] sm:$0xff]  ;;  %v824_v27 = vld [vmem:[%s990_s7 + $0x40] sm:$0xff] }
  0x23   : > { %532 = vmatpush.bf16.msra.mxu0 %v821_v7  ;;  %v326_v23 = vld [vmem:[%s985_s29 + $0x8] sm:$0xf]  ;;  %v832_v29 = vld [vmem:[%s990_s7 + $0x80] sm:$0xff]  ;;  %v380_v30 = vpack.c.b16 %v377_v24, %v377_v24  ;;  %v381_v31 = vpack.c.b16 %v378_v25, %v378_v25 }
  0x24   : > { %545 = vmatpush.bf16.msra.mxu1 %v829_v8  ;;  %v379_v28 = vunpack.c.l.b16 %v326_v23  ;;  %v324_v36 = vld [vmem:[#allocation2] sm:$0xff] }
  0x25   : > { %558 = vmatpush.bf16.msra.mxu2 %v837_v9 }
  0x26   : > { %v382_v32 = vpack.c.b16 %v379_v28, %v379_v28 }
  0x27   : > { %533 = vmatpush.bf16.msra.mxu0 %v820_v10 }
  0x28   : > { %546 = vmatpush.bf16.msra.mxu1 %v828_v11 }
  0x29   : > { %559 = vmatpush.bf16.msra.mxu2 %v836_v12 }
  0x2b   : > { %534 = vmatpush.bf16.msra.mxu0 %v819_v13 }
  0x2c   : > { %547 = vmatpush.bf16.msra.mxu1 %v827_v14 }
  0x2d   : > { %560 = vmatpush.bf16.msra.mxu2 %v835_v15 }
  0x2f   : > { %535 = vmatpush.bf16.msra.mxu0 %v818_v16 }
  0x30   : > { %548 = vmatpush.bf16.msra.mxu1 %v826_v17 }
  0x31   : > { %561 = vmatpush.bf16.msra.mxu2 %v834_v18 }
  0x33   : > { %536 = vmatpush.bf16.msra.mxu0 %v817_v19 }
  0x34   : > { %549 = vmatpush.bf16.msra.mxu1 %v825_v20 }
  0x35   : > { %562 = vmatpush.bf16.msra.mxu2 %v833_v22 }
  0x37   : > { %537 = vmatpush.bf16.msra.mxu0 %v816_v26 }
  0x38   : > { %550 = vmatpush.bf16.msra.mxu1 %v824_v27 }
  0x39   : > { %563 = vmatpush.bf16.msra.mxu2 %v832_v29 }
  0x3a   : > { %538 = vmatmul.bf16.vlgmr.msra.gmra.mxu0 %v380_v30 }
  0x3b   : > { %551 = vmatmul.bf16.vlgmr.msra.gmra.mxu1 %v381_v31 }
  0x3c   : > { %564 = vmatmul.bf16.vlgmr.msra.gmra.mxu2 %v382_v32 }
  0xb7   : > { %v539_v33 = vpop.f32.mrf.mxu0 }
  0xb8   : > { %v552_v34 = vpop.f32.mrf.mxu1 }
  0xb9   : > { %v553_v35 = vadd.f32 %v552_v34, %v539_v33 }
  0xbf   : > { %v565_v37 = vpop.f32.mrf.mxu2  ;;  %v541_v39 = vpop.f32.mrf.mxu0 }
  0xc0   : > { %v566_v38 = vadd.f32 %v565_v37, %v553_v35  ;;  %v554_v40 = vpop.f32.mrf.mxu1 }
  0xc2   : > { %v569_v41 = vadd.f32 %v566_v38, %v324_v36 }
  0xc3   : > { %574 = sbr.rel (%p813_p9) target bundleno = 213 (0xd5), region = 44 }
  0xc4   : > { %570 = vst [vmem:[#allocation2] sm:$0xff] %v569_v41 }
  0xc7   : > { %v567_v42 = vpop.f32.mrf.mxu2 }
  0xc8   : > { %v881_v44 = vld [vmem:[%s307_s10] ss:$0 sm:$0xff] }
  0xc9   : > { %v882_v45 = vld [vmem:[%s310_s13] ss:$0 sm:$0xff] }
  0xcb   : > { %v575_v43 = vld [vmem:[#allocation2] sm:$0xff] }
  0xcc   : > { %v580_v46 = vmul.f32 %v881_v44, %v575_v43 }
  0xce   : > { %v585_v47 = vadd.f32 %v882_v45, %v580_v46 }
  0xd0   : > { %v586_v48 = vmax.f32 %v585_v47, 0.0 }
  0xd2   : > { %v587_v49 = vpack.c.bf16 %v586_v48, %v586_v48 }
  0xd4   : > { %588 = vst [vmem:[%s1006_s24] sm:$0xf] %v587_v49 }
  0xd5 PF: > { %s14_s19 = sadd.s32 1, %s921_s19   ;;  %s1067_s15 = smov %s913_s17 }
  0xd6   : > { %p11_p10 = scmp.ge.s32.totalorder %s14_s19, 8   ;;  %s1068_s16 = smov %s917_s18 }
  0xd7   : > { %s1069_s17 = smov %s1072_s20  ;;  %s1070_s18 = smov %s1076_s21 }
  0xd8   :  { %13 = sbr.rel (!%p11_p10) target bundleno = 3 (0x3), region = 83 }

// kernel: _lambda_.44
= control target key start
LH: loop header
LB: loop body
LE: loop exit
PB: predicated region body
PF: predicated region fallthrough
CT: control target
= control target key end

     0   :  { %s1686_s18 = smov 0   ;;  %s1688_s19 = smov 0   ;;  %s2050_s0 = inlined_call_operand.vmem [shape: bf16[8,256], index: 0, kind: input, shape index: {}]   ;;  %s2051_s1 = inlined_call_operand.vmem [shape: bf16[256,1024], index: 1, kind: input, shape index: {}]   ;;  %s2052_s2 = inlined_call_operand.vmem [shape: f32[1,1024], index: 2, kind: input, shape index: {}]   ;;  %s2053_s3 = inlined_call_operand.vmem [shape: f32[1,1024], index: 3, kind: input, shape index: {}]   ;;  %s2054_s4 = inlined_call_operand.vmem [shape: bf16[8,1024], index: 4, kind: input, shape index: {}]   ;;  %s2055_s5 = inlined_call_operand.vmem [shape: bf16[8,1024], index: 5, kind: output, shape index: {}]  }
   0x1   :  { %s1690_s20 = smov 0   ;;  %s1692_s21 = smov 0  }
   0x2   :  { %s1694_s22 = smov 0  }
   0x3 LB: > { %s30_s23 = sadd.s32 1, %s1650_s21  ;;  %p78_p1 = scmp.ne.s32.totalorder %s1642_s19, %s1638_s18  ;;  %s1654_s22 = sphi %s1694_s22, %s15_s22   ;;  %s1650_s21 = sphi %s1692_s21, %s2059_s21   ;;  %s1646_s20 = sphi %s1690_s20, %s2058_s20   ;;  %s1642_s19 = sphi %s1688_s19, %s2057_s19   ;;  %s1638_s18 = sphi %s1686_s18, %s2056_s18  }
   0x4   : > { %p32_p0 = scmp.ge.s32.totalorder %s30_s23, 2  ;;  %p79_p2 = scmp.eq.s32.totalorder %s1654_s22, 0 }
   0x5   : > { %s71_s25 = sadd.s32 1, %s1642_s19  ;;  %p1241_p5 = scmp.ge.s32.totalorder %s1654_s22, 2 }
   0x6   : > { %s2061_s23 = smov (%p32_p0, %s30_s23), 0  ;;  %p80_p3 = por %p79_p2, %p78_p1 }
   0x7   : > { %s67_s24 = ssub.s32 %s1650_s21, %s2061_s23  ;;  %225 = sbr.rel (%p1241_p5) target bundleno = 80 (0x50), region = 20 }
   0x8   : > { %p69_p4 = scmp.eq.s32.totalorder %s67_s24, 0 }
   0xa   : > { %s1721_s26 = scalar_select %p69_p4, %s1642_s19, %s71_s25  }
   0xc   : > { %228 = sbr.rel (!%p80_p3) target bundleno = 80 (0x50), region = 24  ;;  %s230_s27 = sand.u32 (%p80_p3), 1, %s1642_s19  }
   0xd   : > { %s1511_s28 = sshll.u32 (%p80_p3), %s1650_s21, 4  ;;  %s1242_s29 = sshll.u32 (%p80_p3), %s230_s27, 9 }
   0xe   : > { %s1729_s7 = scalar_lea.vmem (%p80_p3), %s2051_s1, %s1511_s28  ;;  %s1734_s8 = scalar_lea.vmem (%p80_p3), [#allocation3], %s1242_s29 }
   0xf   : > { %v251_v0 = vld [vmem:[%s1729_s7] sm:$0xff] (%p80_p3)  ;;  %v253_v1 = vld [vmem:[%s1729_s7 + $0x8] sm:$0xff] (%p80_p3) }
  0x10   : > { %v255_v2 = vld [vmem:[%s1729_s7 + $0x20] sm:$0xff] (%p80_p3)  ;;  %252 = vst [vmem:[%s1734_s8] sm:$0xff] (%p80_p3), %v251_v0  ;;  %v257_v3 = vld [vmem:[%s1729_s7 + $0x28] sm:$0xff] (%p80_p3) }
  0x11   : > { %254 = vst [vmem:[%s1734_s8 + $0x8] sm:$0xff] %v253_v1  ;;  %v259_v4 = vld [vmem:[%s1729_s7 + $0x40] sm:$0xff]  ;;  %v261_v5 = vld [vmem:[%s1729_s7 + $0x48] sm:$0xff] }
  0x12   : > { %256 = vst [vmem:[%s1734_s8 + $0x10] sm:$0xff] %v255_v2  ;;  %v263_v6 = vld [vmem:[%s1729_s7 + $0x60] sm:$0xff]  ;;  %v265_v7 = vld [vmem:[%s1729_s7 + $0x68] sm:$0xff] }
  0x13   : > { %258 = vst [vmem:[%s1734_s8 + $0x18] sm:$0xff] %v257_v3  ;;  %v267_v8 = vld [vmem:[%s1729_s7 + $0x80] sm:$0xff]  ;;  %v269_v9 = vld [vmem:[%s1729_s7 + $0x88] sm:$0xff] }
  0x14   : > { %260 = vst [vmem:[%s1734_s8 + $0x20] sm:$0xff] %v259_v4  ;;  %v271_v10 = vld [vmem:[%s1729_s7 + $0xa0] sm:$0xff]  ;;  %v273_v11 = vld [vmem:[%s1729_s7 + $0xa8] sm:$0xff] }
  0x15   : > { %262 = vst [vmem:[%s1734_s8 + $0x28] sm:$0xff] %v261_v5  ;;  %v275_v12 = vld [vmem:[%s1729_s7 + $0xc0] sm:$0xff]  ;;  %v277_v13 = vld [vmem:[%s1729_s7 + $0xc8] sm:$0xff] }
  0x16   : > { %264 = vst [vmem:[%s1734_s8 + $0x30] sm:$0xff] %v263_v6  ;;  %v279_v14 = vld [vmem:[%s1729_s7 + $0xe0] sm:$0xff]  ;;  %v281_v15 = vld [vmem:[%s1729_s7 + $0xe8] sm:$0xff] }
  0x17   : > { %266 = vst [vmem:[%s1734_s8 + $0x38] sm:$0xff] %v265_v7  ;;  %v283_v16 = vld [vmem:[%s1729_s7 + $0x100] sm:$0xff]  ;;  %v285_v17 = vld [vmem:[%s1729_s7 + $0x108] sm:$0xff] }
  0x18   : > { %268 = vst [vmem:[%s1734_s8 + $0x40] sm:$0xff] %v267_v8  ;;  %v287_v18 = vld [vmem:[%s1729_s7 + $0x120] sm:$0xff]  ;;  %v289_v19 = vld [vmem:[%s1729_s7 + $0x128] sm:$0xff] }
  0x19   : > { %270 = vst [vmem:[%s1734_s8 + $0x48] sm:$0xff] %v269_v9  ;;  %v291_v20 = vld [vmem:[%s1729_s7 + $0x140] sm:$0xff]  ;;  %v293_v21 = vld [vmem:[%s1729_s7 + $0x148] sm:$0xff] }
  0x1a   : > { %272 = vst [vmem:[%s1734_s8 + $0x50] sm:$0xff] %v271_v10  ;;  %v295_v22 = vld [vmem:[%s1729_s7 + $0x160] sm:$0xff]  ;;  %v297_v23 = vld [vmem:[%s1729_s7 + $0x168] sm:$0xff] }
  0x1b   : > { %274 = vst [vmem:[%s1734_s8 + $0x58] sm:$0xff] %v273_v11  ;;  %v299_v24 = vld [vmem:[%s1729_s7 + $0x180] sm:$0xff]  ;;  %v301_v25 = vld [vmem:[%s1729_s7 + $0x188] sm:$0xff] }
  0x1c   : > { %276 = vst [vmem:[%s1734_s8 + $0x60] sm:$0xff] %v275_v12  ;;  %v303_v26 = vld [vmem:[%s1729_s7 + $0x1a0] sm:$0xff]  ;;  %v305_v27 = vld [vmem:[%s1729_s7 + $0x1a8] sm:$0xff] }
  0x1d   : > { %278 = vst [vmem:[%s1734_s8 + $0x68] sm:$0xff] %v277_v13  ;;  %v307_v28 = vld [vmem:[%s1729_s7 + $0x1c0] sm:$0xff]  ;;  %v309_v29 = vld [vmem:[%s1729_s7 + $0x1c8] sm:$0xff] }
  0x1e   : > { %280 = vst [vmem:[%s1734_s8 + $0x70] sm:$0xff] %v279_v14  ;;  %v311_v30 = vld [vmem:[%s1729_s7 + $0x1e0] sm:$0xff]  ;;  %v313_v31 = vld [vmem:[%s1729_s7 + $0x1e8] sm:$0xff] }
  0x1f   : > { %282 = vst [vmem:[%s1734_s8 + $0x78] sm:$0xff] %v281_v15  ;;  %v315_v32 = vld [vmem:[%s1729_s7 + $0x200] sm:$0xff]  ;;  %v317_v33 = vld [vmem:[%s1729_s7 + $0x208] sm:$0xff] }
  0x20   : > { %284 = vst [vmem:[%s1734_s8 + $0x80] sm:$0xff] %v283_v16  ;;  %v319_v34 = vld [vmem:[%s1729_s7 + $0x220] sm:$0xff]  ;;  %v321_v35 = vld [vmem:[%s1729_s7 + $0x228] sm:$0xff] }
  0x21   : > { %286 = vst [vmem:[%s1734_s8 + $0x88] sm:$0xff] %v285_v17  ;;  %v323_v36 = vld [vmem:[%s1729_s7 + $0x240] sm:$0xff]  ;;  %v325_v37 = vld [vmem:[%s1729_s7 + $0x248] sm:$0xff] }
  0x22   : > { %288 = vst [vmem:[%s1734_s8 + $0x90] sm:$0xff] %v287_v18  ;;  %v327_v38 = vld [vmem:[%s1729_s7 + $0x260] sm:$0xff]  ;;  %v329_v39 = vld [vmem:[%s1729_s7 + $0x268] sm:$0xff] }
  0x23   : > { %290 = vst [vmem:[%s1734_s8 + $0x98] sm:$0xff] %v289_v19  ;;  %v331_v40 = vld [vmem:[%s1729_s7 + $0x280] sm:$0xff]  ;;  %v333_v41 = vld [vmem:[%s1729_s7 + $0x288] sm:$0xff] }
  0x24   : > { %292 = vst [vmem:[%s1734_s8 + $0xa0] sm:$0xff] %v291_v20  ;;  %v335_v42 = vld [vmem:[%s1729_s7 + $0x2a0] sm:$0xff]  ;;  %v337_v43 = vld [vmem:[%s1729_s7 + $0x2a8] sm:$0xff] }
  0x25   : > { %294 = vst [vmem:[%s1734_s8 + $0xa8] sm:$0xff] %v293_v21  ;;  %v339_v44 = vld [vmem:[%s1729_s7 + $0x2c0] sm:$0xff]  ;;  %v341_v45 = vld [vmem:[%s1729_s7 + $0x2c8] sm:$0xff] }
  0x26   : > { %296 = vst [vmem:[%s1734_s8 + $0xb0] sm:$0xff] %v295_v22  ;;  %v343_v46 = vld [vmem:[%s1729_s7 + $0x2e0] sm:$0xff]  ;;  %v345_v47 = vld [vmem:[%s1729_s7 + $0x2e8] sm:$0xff] }
  0x27   : > { %298 = vst [vmem:[%s1734_s8 + $0xb8] sm:$0xff] %v297_v23  ;;  %v347_v48 = vld [vmem:[%s1729_s7 + $0x300] sm:$0xff]  ;;  %v349_v49 = vld [vmem:[%s1729_s7 + $0x308] sm:$0xff] }
  0x28   : > { %300 = vst [vmem:[%s1734_s8 + $0xc0] sm:$0xff] %v299_v24  ;;  %v351_v50 = vld [vmem:[%s1729_s7 + $0x320] sm:$0xff]  ;;  %v353_v51 = vld [vmem:[%s1729_s7 + $0x328] sm:$0xff] }
  0x29   : > { %302 = vst [vmem:[%s1734_s8 + $0xc8] sm:$0xff] %v301_v25  ;;  %v355_v52 = vld [vmem:[%s1729_s7 + $0x340] sm:$0xff]  ;;  %v357_v53 = vld [vmem:[%s1729_s7 + $0x348] sm:$0xff] }
  0x2a   : > { %304 = vst [vmem:[%s1734_s8 + $0xd0] sm:$0xff] %v303_v26  ;;  %v359_v54 = vld [vmem:[%s1729_s7 + $0x360] sm:$0xff]  ;;  %v361_v55 = vld [vmem:[%s1729_s7 + $0x368] sm:$0xff] }
  0x2b   : > { %306 = vst [vmem:[%s1734_s8 + $0xd8] sm:$0xff] %v305_v27  ;;  %v363_v56 = vld [vmem:[%s1729_s7 + $0x380] sm:$0xff]  ;;  %v365_v57 = vld [vmem:[%s1729_s7 + $0x388] sm:$0xff] }
  0x2c   : > { %308 = vst [vmem:[%s1734_s8 + $0xe0] sm:$0xff] %v307_v28  ;;  %v367_v58 = vld [vmem:[%s1729_s7 + $0x3a0] sm:$0xff]  ;;  %v369_v59 = vld [vmem:[%s1729_s7 + $0x3a8] sm:$0xff] }
  0x2d   : > { %310 = vst [vmem:[%s1734_s8 + $0xe8] sm:$0xff] %v309_v29  ;;  %v371_v60 = vld [vmem:[%s1729_s7 + $0x3c0] sm:$0xff]  ;;  %v373_v61 = vld [vmem:[%s1729_s7 + $0x3c8] sm:$0xff] }
  0x2e   : > { %312 = vst [vmem:[%s1734_s8 + $0xf0] sm:$0xff] %v311_v30  ;;  %v375_v62 = vld [vmem:[%s1729_s7 + $0x3e0] sm:$0xff]  ;;  %v377_v63 = vld [vmem:[%s1729_s7 + $0x3e8] sm:$0xff] }
  0x2f   : > { %314 = vst [vmem:[%s1734_s8 + $0xf8] sm:$0xff] %v313_v31 }
  0x30   : > { %316 = vst [vmem:[%s1734_s8 + $0x100] sm:$0xff] %v315_v32 }
  0x31   : > { %318 = vst [vmem:[%s1734_s8 + $0x108] sm:$0xff] %v317_v33 }
  0x32   : > { %320 = vst [vmem:[%s1734_s8 + $0x110] sm:$0xff] %v319_v34 }
  0x33   : > { %322 = vst [vmem:[%s1734_s8 + $0x118] sm:$0xff] %v321_v35 }
  0x34   : > { %324 = vst [vmem:[%s1734_s8 + $0x120] sm:$0xff] %v323_v36 }
  0x35   : > { %326 = vst [vmem:[%s1734_s8 + $0x128] sm:$0xff] %v325_v37 }
  0x36   : > { %328 = vst [vmem:[%s1734_s8 + $0x130] sm:$0xff] %v327_v38 }
  0x37   : > { %330 = vst [vmem:[%s1734_s8 + $0x138] sm:$0xff] %v329_v39 }
  0x38   : > { %332 = vst [vmem:[%s1734_s8 + $0x140] sm:$0xff] %v331_v40 }
  0x39   : > { %334 = vst [vmem:[%s1734_s8 + $0x148] sm:$0xff] %v333_v41 }
  0x3a   : > { %336 = vst [vmem:[%s1734_s8 + $0x150] sm:$0xff] %v335_v42 }
  0x3b   : > { %338 = vst [vmem:[%s1734_s8 + $0x158] sm:$0xff] %v337_v43 }
  0x3c   : > { %340 = vst [vmem:[%s1734_s8 + $0x160] sm:$0xff] %v339_v44 }
  0x3d   : > { %342 = vst [vmem:[%s1734_s8 + $0x168] sm:$0xff] %v341_v45 }
  0x3e   : > { %344 = vst [vmem:[%s1734_s8 + $0x170] sm:$0xff] %v343_v46 }
  0x3f   : > { %346 = vst [vmem:[%s1734_s8 + $0x178] sm:$0xff] %v345_v47 }
  0x40   : > { %348 = vst [vmem:[%s1734_s8 + $0x180] sm:$0xff] %v347_v48 }
  0x41   : > { %350 = vst [vmem:[%s1734_s8 + $0x188] sm:$0xff] %v349_v49 }
  0x42   : > { %352 = vst [vmem:[%s1734_s8 + $0x190] sm:$0xff] %v351_v50 }
  0x43   : > { %354 = vst [vmem:[%s1734_s8 + $0x198] sm:$0xff] %v353_v51 }
  0x44   : > { %356 = vst [vmem:[%s1734_s8 + $0x1a0] sm:$0xff] %v355_v52 }
  0x45   : > { %358 = vst [vmem:[%s1734_s8 + $0x1a8] sm:$0xff] %v357_v53 }
  0x46   : > { %360 = vst [vmem:[%s1734_s8 + $0x1b0] sm:$0xff] %v359_v54 }
  0x47   : > { %362 = vst [vmem:[%s1734_s8 + $0x1b8] sm:$0xff] %v361_v55 }
  0x48   : > { %364 = vst [vmem:[%s1734_s8 + $0x1c0] sm:$0xff] %v363_v56 }
  0x49   : > { %366 = vst [vmem:[%s1734_s8 + $0x1c8] sm:$0xff] %v365_v57 }
  0x4a   : > { %368 = vst [vmem:[%s1734_s8 + $0x1d0] sm:$0xff] %v367_v58 }
  0x4b   : > { %370 = vst [vmem:[%s1734_s8 + $0x1d8] sm:$0xff] %v369_v59 }
  0x4c   : > { %372 = vst [vmem:[%s1734_s8 + $0x1e0] sm:$0xff] %v371_v60 }
  0x4d   : > { %374 = vst [vmem:[%s1734_s8 + $0x1e8] sm:$0xff] %v373_v61 }
  0x4e   : > { %376 = vst [vmem:[%s1734_s8 + $0x1f0] sm:$0xff] %v375_v62 }
  0x4f   : > { %378 = vst [vmem:[%s1734_s8 + $0x1f8] sm:$0xff] %v377_v63 }
  0x50 PF: > { %p1245_p6 = scmp.ge.s32.totalorder %s1654_s22, 1  ;;  %p412_p7 = scmp.lt.s32.totalorder %s1654_s22, 3 }
  0x52   : > { %p413_p8 = pnand %p1245_p6, %p412_p7 }
  0x53   : > { %s419_s9 = sand.u32 (!%p413_p8), 1, %s1638_s18   ;;  %s1247_s14 = sshll.u32 (!%p413_p8), %s1646_s20, 2 }
  0x54   : > { %416 = sbr.rel (%p413_p8) target bundleno = 302 (0x12e), region = 59  ;;  %s1246_s10 = sshll.u32 (!%p413_p8), %s419_s9, 9 }
  0x55   : > { %s1864_s11 = scalar_lea.vmem (!%p413_p8), [#allocation3], %s1246_s10  ;;  %p489_p9 = scmp.lt.s32.totalorder (!%p413_p8), %s1247_s14, 7 }
  0x59   : > { %v1367_v0 = vld [vmem:[%s1864_s11 + $0xe0] sm:$0xf]  ;;  %v1542_v1 = vld [vmem:[%s1864_s11 + $0xec] sm:$0xf0]  ;;  %v1540_v5 = vld [vmem:[%s1864_s11 + $0xe4] sm:$0xf] }
  0x5a   : > { %v1495_v2 = vld [vmem:[%s1864_s11 + $0x1e0] sm:$0xf]  ;;  %v1368_v3 = vor.u32 %v1542_v1, %v1367_v0  ;;  %v1574_v4 = vld [vmem:[%s1864_s11 + $0x1ec] sm:$0xf0]  ;;  %v1369_v6 = vld [vmem:[%s1864_s11 + $0xf0] sm:$0xf0] }
  0x5b   : > { %v1496_v7 = vor.u32 %v1574_v4, %v1495_v2  ;;  %v1372_v8 = vor.u32 %v1540_v5, %v1369_v6  ;;  %v1572_v9 = vld [vmem:[%s1864_s11 + $0x1e4] sm:$0xf]  ;;  %v1497_v10 = vld [vmem:[%s1864_s11 + $0x1f0] sm:$0xf0]  ;;  %v1351_v11 = vld [vmem:[%s1864_s11 + $0xc0] sm:$0xf] }
  0x5c   : > { %922 = vmatpush.bf16.msra.mxu0 %v1368_v3  ;;  %v1500_v12 = vor.u32 %v1572_v9, %v1497_v10  ;;  %v1538_v13 = vld [vmem:[%s1864_s11 + $0xcc] sm:$0xf0]  ;;  %v1479_v14 = vld [vmem:[%s1864_s11 + $0x1c0] sm:$0xf]  ;;  %v1536_v18 = vld [vmem:[%s1864_s11 + $0xc4] sm:$0xf] }
  0x5d   : > { %v1570_v15 = vld [vmem:[%s1864_s11 + $0x1cc] sm:$0xf0]  ;;  %935 = vmatpush.bf16.msra.mxu1 %v1496_v7  ;;  %948 = vmatpush.bf16.msra.mxu2 %v1372_v8  ;;  %v1352_v16 = vor.u32 %v1538_v13, %v1351_v11  ;;  %v1353_v19 = vld [vmem:[%s1864_s11 + $0xd0] sm:$0xf0]  ;;  %v1568_v20 = vld [vmem:[%s1864_s11 + $0x1c4] sm:$0xf] }
  0x5e   : > { %v1480_v17 = vor.u32 %v1570_v15, %v1479_v14  ;;  %961 = vmatpush.bf16.msra.mxu3 %v1500_v12  ;;  %v1356_v21 = vor.u32 %v1536_v18, %v1353_v19  ;;  %v1481_v22 = vld [vmem:[%s1864_s11 + $0x1d0] sm:$0xf0]  ;;  %v1335_v23 = vld [vmem:[%s1864_s11 + $0xa0] sm:$0xf]  ;;  %v1534_v24 = vld [vmem:[%s1864_s11 + $0xac] sm:$0xf0] }
  0x5f   : > { %v1484_v25 = vor.u32 %v1568_v20, %v1481_v22  ;;  %v1463_v26 = vld [vmem:[%s1864_s11 + $0x1a0] sm:$0xf]  ;;  %v1566_v27 = vld [vmem:[%s1864_s11 + $0x1ac] sm:$0xf0]  ;;  %v1532_v28 = vld [vmem:[%s1864_s11 + $0xa4] sm:$0xf]  ;;  %v1336_v29 = vor.u32 %v1534_v24, %v1335_v23 }
  0x60   : > { %923 = vmatpush.bf16.msra.mxu0 %v1352_v16  ;;  %v1337_v30 = vld [vmem:[%s1864_s11 + $0xb0] sm:$0xf0]  ;;  %v1564_v31 = vld [vmem:[%s1864_s11 + $0x1a4] sm:$0xf]  ;;  %v1464_v33 = vor.u32 %v1566_v27, %v1463_v26  ;;  %v1319_v35 = vld [vmem:[%s1864_s11 + $0x80] sm:$0xf] }
  0x61   : > { %v1465_v32 = vld [vmem:[%s1864_s11 + $0x1b0] sm:$0xf0]  ;;  %936 = vmatpush.bf16.msra.mxu1 %v1480_v17  ;;  %949 = vmatpush.bf16.msra.mxu2 %v1356_v21  ;;  %v1340_v34 = vor.u32 %v1532_v28, %v1337_v30  ;;  %v1530_v36 = vld [vmem:[%s1864_s11 + $0x8c] sm:$0xf0]  ;;  %v1447_v37 = vld [vmem:[%s1864_s11 + $0x180] sm:$0xf] }
  0x62   : > { %962 = vmatpush.bf16.msra.mxu3 %v1484_v25  ;;  %v1468_v38 = vor.u32 %v1564_v31, %v1465_v32  ;;  %v1562_v39 = vld [vmem:[%s1864_s11 + $0x18c] sm:$0xf0]  ;;  %v1528_v40 = vld [vmem:[%s1864_s11 + $0x84] sm:$0xf]  ;;  %v1321_v41 = vld [vmem:[%s1864_s11 + $0x90] sm:$0xf0]  ;;  %v1320_v44 = vor.u32 %v1530_v36, %v1319_v35 }
  0x63   : > { %v1560_v42 = vld [vmem:[%s1864_s11 + $0x184] sm:$0xf]  ;;  %v1449_v43 = vld [vmem:[%s1864_s11 + $0x190] sm:$0xf0]  ;;  %v1448_v45 = vor.u32 %v1562_v39, %v1447_v37  ;;  %v1324_v46 = vor.u32 %v1528_v40, %v1321_v41  ;;  %v1303_v47 = vld [vmem:[%s1864_s11 + $0x60] sm:$0xf] }
  0x64   : > { %924 = vmatpush.bf16.msra.mxu0 %v1336_v29  ;;  %v1526_v48 = vld [vmem:[%s1864_s11 + $0x6c] sm:$0xf0]  ;;  %v1431_v49 = vld [vmem:[%s1864_s11 + $0x160] sm:$0xf]  ;;  %v1452_v50 = vor.u32 %v1560_v42, %v1449_v43  ;;  %v1524_v52 = vld [vmem:[%s1864_s11 + $0x64] sm:$0xf] }
  0x65   : > { %937 = vmatpush.bf16.msra.mxu1 %v1464_v33  ;;  %950 = vmatpush.bf16.msra.mxu2 %v1340_v34  ;;  %v1558_v51 = vld [vmem:[%s1864_s11 + $0x16c] sm:$0xf0]  ;;  %v1305_v53 = vld [vmem:[%s1864_s11 + $0x70] sm:$0xf0]  ;;  %v1556_v54 = vld [vmem:[%s1864_s11 + $0x164] sm:$0xf]  ;;  %v1304_v56 = vor.u32 %v1526_v48, %v1303_v47 }
  0x66   : > { %963 = vmatpush.bf16.msra.mxu3 %v1468_v38  ;;  %v1433_v55 = vld [vmem:[%s1864_s11 + $0x170] sm:$0xf0]  ;;  %v1432_v57 = vor.u32 %v1558_v51, %v1431_v49  ;;  %v1308_v58 = vor.u32 %v1524_v52, %v1305_v53  ;;  %v1287_v59 = vld [vmem:[%s1864_s11 + $0x40] sm:$0xf]  ;;  %v1522_v60 = vld [vmem:[%s1864_s11 + $0x4c] sm:$0xf0] }
  0x67   : > { %v1415_v61 = vld [vmem:[%s1864_s11 + $0x140] sm:$0xf]  ;;  %v1436_v62 = vor.u32 %v1556_v54, %v1433_v55  ;;  %v1554_v63 = vld [vmem:[%s1864_s11 + $0x14c] sm:$0xf0]  ;;  %v1520_v0 = vld [vmem:[%s1864_s11 + $0x44] sm:$0xf]  ;;  %v1288_v4 = vor.u32 %v1522_v60, %v1287_v59 }
  0x68   : > { %925 = vmatpush.bf16.msra.mxu0 %v1320_v44  ;;  %v1289_v1 = vld [vmem:[%s1864_s11 + $0x50] sm:$0xf0]  ;;  %v1552_v2 = vld [vmem:[%s1864_s11 + $0x144] sm:$0xf]  ;;  %v1416_v5 = vor.u32 %v1554_v63, %v1415_v61  ;;  %v1271_v7 = vld [vmem:[%s1864_s11 + $0x20] sm:$0xf] }
  0x69   : > { %938 = vmatpush.bf16.msra.mxu1 %v1448_v45  ;;  %951 = vmatpush.bf16.msra.mxu2 %v1324_v46  ;;  %v1417_v3 = vld [vmem:[%s1864_s11 + $0x150] sm:$0xf0]  ;;  %v1292_v6 = vor.u32 %v1520_v0, %v1289_v1  ;;  %v1518_v8 = vld [vmem:[%s1864_s11 + $0x2c] sm:$0xf0]  ;;  %v1399_v9 = vld [vmem:[%s1864_s11 + $0x120] sm:$0xf] }
  0x6a   : > { %964 = vmatpush.bf16.msra.mxu3 %v1452_v50  ;;  %v1420_v10 = vor.u32 %v1552_v2, %v1417_v3  ;;  %v1550_v11 = vld [vmem:[%s1864_s11 + $0x12c] sm:$0xf0]  ;;  %v1516_v12 = vld [vmem:[%s1864_s11 + $0x24] sm:$0xf]  ;;  %v1273_v13 = vld [vmem:[%s1864_s11 + $0x30] sm:$0xf0]  ;;  %v1272_v16 = vor.u32 %v1518_v8, %v1271_v7 }
  0x6b   : > { %v1548_v14 = vld [vmem:[%s1864_s11 + $0x124] sm:$0xf]  ;;  %v1401_v15 = vld [vmem:[%s1864_s11 + $0x130] sm:$0xf0]  ;;  %v1255_v17 = vld [vmem:[%s1864_s11] sm:$0xf]  ;;  %v1400_v20 = vor.u32 %v1550_v11, %v1399_v9  ;;  %v1276_v21 = vor.u32 %v1516_v12, %v1273_v13 }
  0x6c   : > { %926 = vmatpush.bf16.msra.mxu0 %v1304_v56  ;;  %v1514_v18 = vld [vmem:[%s1864_s11 + $0xc] sm:$0xf0]  ;;  %v1383_v19 = vld [vmem:[%s1864_s11 + $0x100] sm:$0xf]  ;;  %v1512_v23 = vld [vmem:[%s1864_s11 + $0x4] sm:$0xf]  ;;  %v1404_v25 = vor.u32 %v1548_v14, %v1401_v15 }
  0x6d   : > { %939 = vmatpush.bf16.msra.mxu1 %v1432_v57  ;;  %952 = vmatpush.bf16.msra.mxu2 %v1308_v58  ;;  %v1546_v22 = vld [vmem:[%s1864_s11 + $0x10c] sm:$0xf0]  ;;  %v1257_v24 = vld [vmem:[%s1864_s11 + $0x10] sm:$0xf0]  ;;  %v1544_v26 = vld [vmem:[%s1864_s11 + $0x104] sm:$0xf]  ;;  %v1256_v32 = vor.u32 %v1514_v18, %v1255_v17 }
  0x6e   : > { %965 = vmatpush.bf16.msra.mxu3 %v1436_v62  ;;  %v1385_v27 = vld [vmem:[%s1864_s11 + $0x110] sm:$0xf0]  ;;  %v1375_v28 = vld [vmem:[%s1864_s11 + $0xe8] sm:$0xf]  ;;  %v1543_v29 = vld [vmem:[%s1864_s11 + $0xf4] sm:$0xf0]  ;;  %v1384_v37 = vor.u32 %v1546_v22, %v1383_v19  ;;  %v1260_v38 = vor.u32 %v1512_v23, %v1257_v24 }
  0x6f   : > { %v1503_v30 = vld [vmem:[%s1864_s11 + $0x1e8] sm:$0xf]  ;;  %v530_v31 = vld [vmem:[%s2050_s0] sm:$0xff]  ;;  %v1575_v33 = vld [vmem:[%s1864_s11 + $0x1f4] sm:$0xf0]  ;;  %v1388_v42 = vor.u32 %v1544_v26, %v1385_v27  ;;  %v1376_v43 = vor.u32 %v1543_v29, %v1375_v28  ;;  %s2063_s14 = smov (!%p489_p9, %s1247_s14), 7 }
  0x70   : > { %927 = vmatpush.bf16.msra.mxu0 %v1288_v4  ;;  %v1541_v34 = vld [vmem:[%s1864_s11 + $0xec] sm:$0xf]  ;;  %v1377_v35 = vld [vmem:[%s1864_s11 + $0xf8] sm:$0xf0]  ;;  %v596_v36 = vunpack.c.l.b16 %v530_v31  ;;  %v597_v41 = vunpack.c.h.b16 %v530_v31  ;;  %v1504_v44 = vor.u32 %v1575_v33, %v1503_v30  ;;  %v1359_v46 = vld [vmem:[%s1864_s11 + $0xc8] sm:$0xf]  ;;  %s491_s17 = scalar_lea.vmem %s2052_s2, %s2063_s14  ;;  %s496_s25 = scalar_lea.vmem %s2053_s3, %s2063_s14 }
  0x71   : > { %940 = vmatpush.bf16.msra.mxu1 %v1416_v5  ;;  %953 = vmatpush.bf16.msra.mxu2 %v1292_v6  ;;  %v1573_v39 = vld [vmem:[%s1864_s11 + $0x1ec] sm:$0xf]  ;;  %v1505_v40 = vld [vmem:[%s1864_s11 + $0x1f8] sm:$0xf0]  ;;  %v1380_v45 = vor.u32 %v1541_v34, %v1377_v35  ;;  %v1539_v47 = vld [vmem:[%s1864_s11 + $0xd4] sm:$0xf0] }
  0x72   : > { %966 = vmatpush.bf16.msra.mxu3 %v1420_v10  ;;  %v1487_v48 = vld [vmem:[%s1864_s11 + $0x1c8] sm:$0xf]  ;;  %v1508_v49 = vor.u32 %v1573_v39, %v1505_v40  ;;  %v1571_v50 = vld [vmem:[%s1864_s11 + $0x1d4] sm:$0xf0]  ;;  %v1537_v51 = vld [vmem:[%s1864_s11 + $0xcc] sm:$0xf]  ;;  %v1947_v53 = vpack.c.b16 %v596_v36, %v596_v36  ;;  %v1951_v56 = vpack.c.b16 %v597_v41, %v597_v41  ;;  %v1360_v57 = vor.u32 %v1539_v47, %v1359_v46 }
  0x73   : > { %v1361_v52 = vld [vmem:[%s1864_s11 + $0xd8] sm:$0xf0]  ;;  %v1569_v54 = vld [vmem:[%s1864_s11 + $0x1cc] sm:$0xf]  ;;  %v1488_v58 = vor.u32 %v1571_v50, %v1487_v48  ;;  %v1343_v60 = vld [vmem:[%s1864_s11 + $0xa8] sm:$0xf] }
  0x74   : > { %928 = vmatpush.bf16.msra.mxu0 %v1272_v16  ;;  %v1489_v55 = vld [vmem:[%s1864_s11 + $0x1d8] sm:$0xf0]  ;;  %v1364_v59 = vor.u32 %v1537_v51, %v1361_v52  ;;  %v1535_v61 = vld [vmem:[%s1864_s11 + $0xb4] sm:$0xf0]  ;;  %v1471_v62 = vld [vmem:[%s1864_s11 + $0x1a8] sm:$0xf] }
  0x75   : > { %941 = vmatpush.bf16.msra.mxu1 %v1400_v20  ;;  %954 = vmatpush.bf16.msra.mxu2 %v1276_v21  ;;  %v1492_v63 = vor.u32 %v1569_v54, %v1489_v55  ;;  %v1567_v0 = vld [vmem:[%s1864_s11 + $0x1b4] sm:$0xf0]  ;;  %v1533_v1 = vld [vmem:[%s1864_s11 + $0xac] sm:$0xf]  ;;  %v1345_v2 = vld [vmem:[%s1864_s11 + $0xb8] sm:$0xf0]  ;;  %v1344_v5 = vor.u32 %v1535_v61, %v1343_v60 }
  0x76   : > { %967 = vmatpush.bf16.msra.mxu3 %v1404_v25  ;;  %v1565_v3 = vld [vmem:[%s1864_s11 + $0x1ac] sm:$0xf]  ;;  %v1473_v4 = vld [vmem:[%s1864_s11 + $0x1b8] sm:$0xf0]  ;;  %v1472_v6 = vor.u32 %v1567_v0, %v1471_v62  ;;  %v1348_v7 = vor.u32 %v1533_v1, %v1345_v2  ;;  %v1327_v8 = vld [vmem:[%s1864_s11 + $0x88] sm:$0xf] }
  0x77   : > { %v1531_v9 = vld [vmem:[%s1864_s11 + $0x94] sm:$0xf0]  ;;  %v1455_v10 = vld [vmem:[%s1864_s11 + $0x188] sm:$0xf]  ;;  %v1476_v11 = vor.u32 %v1565_v3, %v1473_v4  ;;  %v1529_v13 = vld [vmem:[%s1864_s11 + $0x8c] sm:$0xf] }
  0x78   : > { %929 = vmatpush.bf16.msra.mxu0 %v1256_v32  ;;  %v1563_v12 = vld [vmem:[%s1864_s11 + $0x194] sm:$0xf0]  ;;  %v1329_v14 = vld [vmem:[%s1864_s11 + $0x98] sm:$0xf0]  ;;  %v1561_v15 = vld [vmem:[%s1864_s11 + $0x18c] sm:$0xf]  ;;  %v1328_v17 = vor.u32 %v1531_v9, %v1327_v8 }
  0x79   : > { %942 = vmatpush.bf16.msra.mxu1 %v1384_v37  ;;  %955 = vmatpush.bf16.msra.mxu2 %v1260_v38  ;;  %v1457_v16 = vld [vmem:[%s1864_s11 + $0x198] sm:$0xf0]  ;;  %v1456_v18 = vor.u32 %v1563_v12, %v1455_v10  ;;  %v1332_v19 = vor.u32 %v1529_v13, %v1329_v14  ;;  %v1311_v20 = vld [vmem:[%s1864_s11 + $0x68] sm:$0xf]  ;;  %v1527_v21 = vld [vmem:[%s1864_s11 + $0x74] sm:$0xf0] }
  0x7a   : > { %968 = vmatpush.bf16.msra.mxu3 %v1388_v42  ;;  %v1439_v22 = vld [vmem:[%s1864_s11 + $0x168] sm:$0xf]  ;;  %v1460_v23 = vor.u32 %v1561_v15, %v1457_v16  ;;  %v1559_v24 = vld [vmem:[%s1864_s11 + $0x174] sm:$0xf0]  ;;  %v1525_v25 = vld [vmem:[%s1864_s11 + $0x6c] sm:$0xf]  ;;  %v1312_v29 = vor.u32 %v1527_v21, %v1311_v20 }
  0x7b   : > { %930 = vmatmul.bf16.vlgmr.msra.gmra.mxu0 %v1947_v53  ;;  %v1313_v26 = vld [vmem:[%s1864_s11 + $0x78] sm:$0xf0]  ;;  %v1557_v27 = vld [vmem:[%s1864_s11 + $0x16c] sm:$0xf]  ;;  %v1440_v30 = vor.u32 %v1559_v24, %v1439_v22  ;;  %v1295_v32 = vld [vmem:[%s1864_s11 + $0x48] sm:$0xf] }
  0x7c   : > { %974 = vmatpush.bf16.msrb.mxu0 %v1376_v43  ;;  %956 = vmatmul.bf16.vlgmr.msra.gmra.mxu2 %v1947_v53  ;;  %v1441_v28 = vld [vmem:[%s1864_s11 + $0x178] sm:$0xf0]  ;;  %v1316_v31 = vor.u32 %v1525_v25, %v1313_v26  ;;  %v1523_v33 = vld [vmem:[%s1864_s11 + $0x54] sm:$0xf0]  ;;  %v1423_v34 = vld [vmem:[%s1864_s11 + $0x148] sm:$0xf] }
  0x7d   : > { %987 = vmatpush.bf16.msrb.mxu1 %v1504_v44  ;;  %1000 = vmatpush.bf16.msrb.mxu2 %v1380_v45  ;;  %v1444_v35 = vor.u32 %v1557_v27, %v1441_v28  ;;  %v1555_v36 = vld [vmem:[%s1864_s11 + $0x154] sm:$0xf0]  ;;  %v1521_v37 = vld [vmem:[%s1864_s11 + $0x4c] sm:$0xf]  ;;  %v1297_v38 = vld [vmem:[%s1864_s11 + $0x58] sm:$0xf0]  ;;  %v1296_v41 = vor.u32 %v1523_v33, %v1295_v32 }
  0x7e   : > { %1013 = vmatpush.bf16.msrb.mxu3 %v1508_v49  ;;  %943 = vmatmul.bf16.vlgmr.msra.gmra.mxu1 %v1951_v56  ;;  %v1553_v39 = vld [vmem:[%s1864_s11 + $0x14c] sm:$0xf]  ;;  %v1425_v40 = vld [vmem:[%s1864_s11 + $0x158] sm:$0xf0]  ;;  %v1424_v42 = vor.u32 %v1555_v36, %v1423_v34  ;;  %v1300_v43 = vor.u32 %v1521_v37, %v1297_v38  ;;  %v1279_v44 = vld [vmem:[%s1864_s11 + $0x28] sm:$0xf] }
  0x7f   : > { %969 = vmatmul.bf16.vlgmr.msra.gmra.mxu3 %v1951_v56  ;;  %v1519_v45 = vld [vmem:[%s1864_s11 + $0x34] sm:$0xf0]  ;;  %v1407_v46 = vld [vmem:[%s1864_s11 + $0x128] sm:$0xf]  ;;  %v1428_v47 = vor.u32 %v1553_v39, %v1425_v40  ;;  %v1517_v49 = vld [vmem:[%s1864_s11 + $0x2c] sm:$0xf] }
  0x80   : > { %975 = vmatpush.bf16.msrb.mxu0 %v1360_v57  ;;  %v1551_v48 = vld [vmem:[%s1864_s11 + $0x134] sm:$0xf0]  ;;  %v1281_v50 = vld [vmem:[%s1864_s11 + $0x38] sm:$0xf0]  ;;  %v1549_v51 = vld [vmem:[%s1864_s11 + $0x12c] sm:$0xf]  ;;  %v1280_v54 = vor.u32 %v1519_v45, %v1279_v44 }
  0x81   : > { %988 = vmatpush.bf16.msrb.mxu1 %v1488_v58  ;;  %1001 = vmatpush.bf16.msrb.mxu2 %v1364_v59  ;;  %v1409_v52 = vld [vmem:[%s1864_s11 + $0x138] sm:$0xf0]  ;;  %v1408_v55 = vor.u32 %v1551_v48, %v1407_v46  ;;  %v1284_v57 = vor.u32 %v1517_v49, %v1281_v50  ;;  %v1263_v58 = vld [vmem:[%s1864_s11 + $0x8] sm:$0xf]  ;;  %v1515_v59 = vld [vmem:[%s1864_s11 + $0x14] sm:$0xf0] }
  0x82   : > { %1014 = vmatpush.bf16.msrb.mxu3 %v1492_v63  ;;  %v1391_v60 = vld [vmem:[%s1864_s11 + $0x108] sm:$0xf]  ;;  %v1412_v61 = vor.u32 %v1549_v51, %v1409_v52  ;;  %v1547_v62 = vld [vmem:[%s1864_s11 + $0x114] sm:$0xf0]  ;;  %v1513_v63 = vld [vmem:[%s1864_s11 + $0xc] sm:$0xf]  ;;  %v1264_v3 = vor.u32 %v1515_v59, %v1263_v58 }
  0x83   : > { %v1265_v0 = vld [vmem:[%s1864_s11 + $0x18] sm:$0xf0]  ;;  %v1545_v1 = vld [vmem:[%s1864_s11 + $0x10c] sm:$0xf]  ;;  %v1392_v4 = vor.u32 %v1547_v62, %v1391_v60  ;;  %s1250_s27 = sshll.u32 %s2063_s14, 2 }
  0x84   : > { %976 = vmatpush.bf16.msrb.mxu0 %v1344_v5  ;;  %v1393_v2 = vld [vmem:[%s1864_s11 + $0x118] sm:$0xf0]  ;;  %v1268_v5 = vor.u32 %v1513_v63, %v1265_v0  ;;  %s2026_s29 = scalar_lea.vmem %s2054_s4, %s1250_s27  ;;  %s516_s7 = scalar_lea.vmem %s2055_s5, %s1250_s27 }
  0x85   : > { %989 = vmatpush.bf16.msrb.mxu1 %v1472_v6  ;;  %1002 = vmatpush.bf16.msrb.mxu2 %v1348_v7  ;;  %v1396_v6 = vor.u32 %v1545_v1, %v1393_v2  ;;  %v1069_v12 = vld [vmem:[%s2026_s29] sm:$0xff]  ;;  %v1070_v39 = vld [vmem:[%s2026_s29 + $0x8] sm:$0xff] }
  0x86   : > { %1015 = vmatpush.bf16.msrb.mxu3 %v1476_v11  ;;  %v1071_v14 = vunpack.c.l.bf16 %v1069_v12  ;;  %v1072_v24 = vunpack.c.h.bf16 %v1069_v12  ;;  %v1074_v51 = vunpack.c.h.bf16 %v1070_v39 }
  0x88   : > { %977 = vmatpush.bf16.msrb.mxu0 %v1328_v17 }
  0x89   : > { %990 = vmatpush.bf16.msrb.mxu1 %v1456_v18  ;;  %1003 = vmatpush.bf16.msrb.mxu2 %v1332_v19 }
  0x8a   : > { %1016 = vmatpush.bf16.msrb.mxu3 %v1460_v23 }
  0x8c   : > { %978 = vmatpush.bf16.msrb.mxu0 %v1312_v29 }
  0x8d   : > { %991 = vmatpush.bf16.msrb.mxu1 %v1440_v30  ;;  %1004 = vmatpush.bf16.msrb.mxu2 %v1316_v31 }
  0x8e   : > { %1017 = vmatpush.bf16.msrb.mxu3 %v1444_v35 }
  0x90   : > { %979 = vmatpush.bf16.msrb.mxu0 %v1296_v41  ;;  %v1073_v41 = vunpack.c.l.bf16 %v1070_v39 }
  0x91   : > { %992 = vmatpush.bf16.msrb.mxu1 %v1424_v42  ;;  %1005 = vmatpush.bf16.msrb.mxu2 %v1300_v43 }
  0x92   : > { %1018 = vmatpush.bf16.msrb.mxu3 %v1428_v47 }
  0x94   : > { %980 = vmatpush.bf16.msrb.mxu0 %v1280_v54 }
  0x95   : > { %993 = vmatpush.bf16.msrb.mxu1 %v1408_v55  ;;  %1006 = vmatpush.bf16.msrb.mxu2 %v1284_v57 }
  0x96   : > { %1019 = vmatpush.bf16.msrb.mxu3 %v1412_v61 }
  0x98   : > { %981 = vmatpush.bf16.msrb.mxu0 %v1264_v3 }
  0x99   : > { %994 = vmatpush.bf16.msrb.mxu1 %v1392_v4  ;;  %1007 = vmatpush.bf16.msrb.mxu2 %v1268_v5 }
  0x9a   : > { %1020 = vmatpush.bf16.msrb.mxu3 %v1396_v6 }
  0x9b   : > { %982 = vmatmul.bf16.vlgmr.msrb.gmra.mxu0 %v1947_v53 }
  0x9c   : > { %995 = vmatmul.bf16.vlgmr.msrb.gmra.mxu1 %v1951_v56  ;;  %1008 = vmatmul.bf16.vlgmr.msrb.gmra.mxu2 %v1947_v53  ;;  %v1041_v53 = vld [vmem:[%s491_s17] sm:$0xf] }
  0x9d   : > { %1021 = vmatmul.bf16.vlgmr.msrb.gmra.mxu3 %v1951_v56  ;;  %v1055_v56 = vld [vmem:[%s496_s25] sm:$0xf]  ;;  %v1043_v8 = vperm.slane %v1041_v53, 0  ;;  %v1044_v16 = vperm.slane %v1041_v53, 1  ;;  %v1045_v34 = vperm.slane %v1041_v53, 2  ;;  %v1046_v43 = vperm.slane %v1041_v53, 3 }
  0x9e   : > { %v1057_v11 = vperm.slane %v1055_v56, 0  ;;  %v1058_v20 = vperm.slane %v1055_v56, 1  ;;  %v1059_v37 = vperm.slane %v1055_v56, 2  ;;  %v1060_v47 = vperm.slane %v1055_v56, 3 }
  0xf8   : > { %v931_v7 = vpop.f32.mrf.mxu0 }
  0xfb   : > { %v944_v9 = vpop.f32.mrf.mxu1 }
  0xfc   : > { %v945_v10 = vadd.f32 %v944_v9, %v931_v7 }
  0xfe   : > { %v1051_v13 = vmul.f32 %v1043_v8, %v945_v10 }
  0xff   : > { %v957_v15 = vpop.f32.mrf.mxu2 }
 0x100   : > { %v1065_v17 = vadd.f32 %v1057_v11, %v1051_v13  ;;  %v933_v21 = vpop.f32.mrf.mxu0 }
 0x102   : > { %v970_v18 = vpop.f32.mrf.mxu3  ;;  %v1075_v22 = vadd.f32 %v1071_v14, %v1065_v17 }
 0x103   : > { %v971_v19 = vadd.f32 %v970_v18, %v957_v15  ;;  %v946_v25 = vpop.f32.mrf.mxu1 }
 0x104   : > { %v1079_v27 = vmax.f32 %v1075_v22, 0.0 }
 0x105   : > { %v1052_v23 = vmul.f32 %v1044_v16, %v971_v19 }
 0x107   : > { %v1066_v26 = vadd.f32 %v1058_v20, %v1052_v23  ;;  %v959_v29 = vpop.f32.mrf.mxu2 }
 0x109   : > { %v1076_v28 = vadd.f32 %v1072_v24, %v1066_v26 }
 0x10a   : > { %v972_v30 = vpop.f32.mrf.mxu3 }
 0x10b   : > { %v1080_v31 = vmax.f32 %v1076_v28, 0.0 }
 0x10d   : > { %v1083_v32 = vpack.c.bf16 %v1080_v31, %v1079_v27 }
 0x10f   : > { %1085 = vst [vmem:[%s516_s7] sm:$0xff] %v1083_v32 }
 0x118   : > { %v983_v33 = vpop.f32.mrf.mxu0 }
 0x119   : > { %v996_v35 = vpop.f32.mrf.mxu1 }
 0x11a   : > { %v997_v36 = vadd.f32 %v996_v35, %v983_v33 }
 0x11c   : > { %v1053_v38 = vmul.f32 %v1045_v34, %v997_v36 }
 0x11e   : > { %v1067_v40 = vadd.f32 %v1059_v37, %v1053_v38 }
 0x11f   : > { %v1009_v42 = vpop.f32.mrf.mxu2 }
 0x120   : > { %v1022_v44 = vpop.f32.mrf.mxu3  ;;  %v985_v45 = vpop.f32.mrf.mxu0  ;;  %v1077_v49 = vadd.f32 %v1073_v41, %v1067_v40 }
 0x121   : > { %v1023_v46 = vadd.f32 %v1022_v44, %v1009_v42  ;;  %v998_v48 = vpop.f32.mrf.mxu1 }
 0x122   : > { %v1081_v54 = vmax.f32 %v1077_v49, 0.0 }
 0x123   : > { %v1054_v50 = vmul.f32 %v1046_v43, %v1023_v46 }
 0x125   : > { %v1068_v52 = vadd.f32 %v1060_v47, %v1054_v50 }
 0x127   : > { %v1078_v55 = vadd.f32 %v1074_v51, %v1068_v52  ;;  %v1011_v57 = vpop.f32.mrf.mxu2 }
 0x128   : > { %v1024_v58 = vpop.f32.mrf.mxu3 }
 0x129   : > { %v1082_v59 = vmax.f32 %v1078_v55, 0.0 }
 0x12b   : > { %v1084_v60 = vpack.c.bf16 %v1082_v59, %v1081_v54 }
 0x12d   : > { %1086 = vst [vmem:[%s516_s7 + $0x8] sm:$0xff] %v1084_v60 }
 0x12e PF: > { %s15_s22 = sadd.s32 1, %s1654_s22   ;;  %s2056_s18 = smov %s1642_s19 }
 0x12f   : > { %p12_p10 = scmp.ge.s32.totalorder %s15_s22, 4   ;;  %s2057_s19 = smov %s1721_s26 }
 0x130   : > { %s2058_s20 = smov %s1650_s21  ;;  %s2059_s21 = smov %s2061_s23 }
 0x131   :  { %14 = sbr.rel (!%p12_p10) target bundleno = 3 (0x3), region = 118 }

// kernel: _lambda_.43
= control target key start
LH: loop header
LB: loop body
LE: loop exit
PB: predicated region body
PF: predicated region fallthrough
CT: control target
= control target key end

     0   :  { %s2528_s15 = smov 0   ;;  %s2530_s16 = smov 0   ;;  %s3151_s0 = inlined_call_operand.vmem [shape: bf16[8,512], index: 0, kind: input, shape index: {}]   ;;  %s3152_s1 = inlined_call_operand.vmem [shape: bf16[512,1024], index: 1, kind: input, shape index: {}]   ;;  %s3153_s2 = inlined_call_operand.vmem [shape: f32[1,1024], index: 2, kind: input, shape index: {}]   ;;  %s3154_s3 = inlined_call_operand.vmem [shape: f32[1,1024], index: 3, kind: input, shape index: {}]   ;;  %s3155_s4 = inlined_call_operand.vmem [shape: bf16[8,1024], index: 4, kind: output, shape index: {}]  }
   0x1   :  { %s2532_s17 = smov 0   ;;  %s2534_s18 = smov 0  }
   0x2   :  { %s2536_s19 = smov 0  }
   0x3 LB: > { %s29_s20 = sadd.s32 1, %s2497_s18  ;;  %p77_p1 = scmp.ne.s32.totalorder %s2489_s16, %s2485_s15  ;;  %s2501_s19 = sphi %s2536_s19, %s14_s19   ;;  %s2497_s18 = sphi %s2534_s18, %s3159_s18   ;;  %s2493_s17 = sphi %s2532_s17, %s3158_s17   ;;  %s2489_s16 = sphi %s2530_s16, %s3157_s16   ;;  %s2485_s15 = sphi %s2528_s15, %s3156_s15  }
   0x4   : > { %p31_p0 = scmp.ge.s32.totalorder %s29_s20, 2  ;;  %p78_p2 = scmp.eq.s32.totalorder %s2501_s19, 0 }
   0x5   : > { %s70_s22 = sadd.s32 1, %s2489_s16  ;;  %p1770_p5 = scmp.ge.s32.totalorder %s2501_s19, 2 }
   0x6   : > { %s3161_s20 = smov (%p31_p0, %s29_s20), 0  ;;  %p79_p3 = por %p78_p2, %p77_p1 }
   0x7   : > { %s66_s21 = ssub.s32 %s2497_s18, %s3161_s20  ;;  %196 = sbr.rel (%p1770_p5) target bundleno = 144 (0x90), region = 20 }
   0x8   : > { %p68_p4 = scmp.eq.s32.totalorder %s66_s21, 0 }
   0xa   : > { %s2563_s23 = scalar_select %p68_p4, %s2489_s16, %s70_s22  }
   0xc   : > { %199 = sbr.rel (!%p79_p3) target bundleno = 144 (0x90), region = 24  ;;  %s201_s24 = sand.u32 (%p79_p3), 1, %s2489_s16  }
   0xd   : > { %s2294_s25 = sshll.u32 (%p79_p3), %s2497_s18, 4  ;;  %s1771_s26 = sshll.u32 (%p79_p3), %s201_s24, 10 }
   0xe   : > { %s2571_s29 = scalar_lea.vmem (%p79_p3), %s3152_s1, %s2294_s25  ;;  %s2576_s30 = scalar_lea.vmem (%p79_p3), [#allocation3], %s1771_s26 }
   0xf   : > { %v222_v0 = vld [vmem:[%s2571_s29] sm:$0xff] (%p79_p3)  ;;  %v224_v1 = vld [vmem:[%s2571_s29 + $0x8] sm:$0xff] (%p79_p3) }
  0x10   : > { %v226_v2 = vld [vmem:[%s2571_s29 + $0x20] sm:$0xff] (%p79_p3)  ;;  %223 = vst [vmem:[%s2576_s30] sm:$0xff] (%p79_p3), %v222_v0  ;;  %v228_v3 = vld [vmem:[%s2571_s29 + $0x28] sm:$0xff] (%p79_p3) }
  0x11   : > { %225 = vst [vmem:[%s2576_s30 + $0x8] sm:$0xff] %v224_v1  ;;  %v230_v4 = vld [vmem:[%s2571_s29 + $0x40] sm:$0xff]  ;;  %v232_v5 = vld [vmem:[%s2571_s29 + $0x48] sm:$0xff] }
  0x12   : > { %227 = vst [vmem:[%s2576_s30 + $0x10] sm:$0xff] %v226_v2  ;;  %v234_v6 = vld [vmem:[%s2571_s29 + $0x60] sm:$0xff]  ;;  %v236_v7 = vld [vmem:[%s2571_s29 + $0x68] sm:$0xff] }
  0x13   : > { %229 = vst [vmem:[%s2576_s30 + $0x18] sm:$0xff] %v228_v3  ;;  %v238_v8 = vld [vmem:[%s2571_s29 + $0x80] sm:$0xff]  ;;  %v240_v9 = vld [vmem:[%s2571_s29 + $0x88] sm:$0xff] }
  0x14   : > { %231 = vst [vmem:[%s2576_s30 + $0x20] sm:$0xff] %v230_v4  ;;  %v242_v10 = vld [vmem:[%s2571_s29 + $0xa0] sm:$0xff]  ;;  %v244_v11 = vld [vmem:[%s2571_s29 + $0xa8] sm:$0xff] }
  0x15   : > { %233 = vst [vmem:[%s2576_s30 + $0x28] sm:$0xff] %v232_v5  ;;  %v246_v12 = vld [vmem:[%s2571_s29 + $0xc0] sm:$0xff]  ;;  %v248_v13 = vld [vmem:[%s2571_s29 + $0xc8] sm:$0xff] }
  0x16   : > { %235 = vst [vmem:[%s2576_s30 + $0x30] sm:$0xff] %v234_v6  ;;  %v250_v14 = vld [vmem:[%s2571_s29 + $0xe0] sm:$0xff]  ;;  %v252_v15 = vld [vmem:[%s2571_s29 + $0xe8] sm:$0xff] }
  0x17   : > { %237 = vst [vmem:[%s2576_s30 + $0x38] sm:$0xff] %v236_v7  ;;  %v254_v16 = vld [vmem:[%s2571_s29 + $0x100] sm:$0xff]  ;;  %v256_v17 = vld [vmem:[%s2571_s29 + $0x108] sm:$0xff] }
  0x18   : > { %239 = vst [vmem:[%s2576_s30 + $0x40] sm:$0xff] %v238_v8  ;;  %v258_v18 = vld [vmem:[%s2571_s29 + $0x120] sm:$0xff]  ;;  %v260_v19 = vld [vmem:[%s2571_s29 + $0x128] sm:$0xff] }
  0x19   : > { %241 = vst [vmem:[%s2576_s30 + $0x48] sm:$0xff] %v240_v9  ;;  %v262_v20 = vld [vmem:[%s2571_s29 + $0x140] sm:$0xff]  ;;  %v264_v21 = vld [vmem:[%s2571_s29 + $0x148] sm:$0xff] }
  0x1a   : > { %243 = vst [vmem:[%s2576_s30 + $0x50] sm:$0xff] %v242_v10  ;;  %v266_v22 = vld [vmem:[%s2571_s29 + $0x160] sm:$0xff]  ;;  %v268_v23 = vld [vmem:[%s2571_s29 + $0x168] sm:$0xff] }
  0x1b   : > { %245 = vst [vmem:[%s2576_s30 + $0x58] sm:$0xff] %v244_v11  ;;  %v270_v24 = vld [vmem:[%s2571_s29 + $0x180] sm:$0xff]  ;;  %v272_v25 = vld [vmem:[%s2571_s29 + $0x188] sm:$0xff] }
  0x1c   : > { %247 = vst [vmem:[%s2576_s30 + $0x60] sm:$0xff] %v246_v12  ;;  %v274_v26 = vld [vmem:[%s2571_s29 + $0x1a0] sm:$0xff]  ;;  %v276_v27 = vld [vmem:[%s2571_s29 + $0x1a8] sm:$0xff] }
  0x1d   : > { %249 = vst [vmem:[%s2576_s30 + $0x68] sm:$0xff] %v248_v13  ;;  %v278_v28 = vld [vmem:[%s2571_s29 + $0x1c0] sm:$0xff]  ;;  %v280_v29 = vld [vmem:[%s2571_s29 + $0x1c8] sm:$0xff] }
  0x1e   : > { %251 = vst [vmem:[%s2576_s30 + $0x70] sm:$0xff] %v250_v14  ;;  %v282_v30 = vld [vmem:[%s2571_s29 + $0x1e0] sm:$0xff]  ;;  %v284_v31 = vld [vmem:[%s2571_s29 + $0x1e8] sm:$0xff] }
  0x1f   : > { %253 = vst [vmem:[%s2576_s30 + $0x78] sm:$0xff] %v252_v15  ;;  %v286_v32 = vld [vmem:[%s2571_s29 + $0x200] sm:$0xff]  ;;  %v288_v33 = vld [vmem:[%s2571_s29 + $0x208] sm:$0xff] }
  0x20   : > { %255 = vst [vmem:[%s2576_s30 + $0x80] sm:$0xff] %v254_v16  ;;  %v290_v34 = vld [vmem:[%s2571_s29 + $0x220] sm:$0xff]  ;;  %v292_v35 = vld [vmem:[%s2571_s29 + $0x228] sm:$0xff] }
  0x21   : > { %257 = vst [vmem:[%s2576_s30 + $0x88] sm:$0xff] %v256_v17  ;;  %v294_v36 = vld [vmem:[%s2571_s29 + $0x240] sm:$0xff]  ;;  %v296_v37 = vld [vmem:[%s2571_s29 + $0x248] sm:$0xff] }
  0x22   : > { %259 = vst [vmem:[%s2576_s30 + $0x90] sm:$0xff] %v258_v18  ;;  %v298_v38 = vld [vmem:[%s2571_s29 + $0x260] sm:$0xff]  ;;  %v300_v39 = vld [vmem:[%s2571_s29 + $0x268] sm:$0xff] }
  0x23   : > { %261 = vst [vmem:[%s2576_s30 + $0x98] sm:$0xff] %v260_v19  ;;  %v302_v40 = vld [vmem:[%s2571_s29 + $0x280] sm:$0xff]  ;;  %v304_v41 = vld [vmem:[%s2571_s29 + $0x288] sm:$0xff] }
  0x24   : > { %263 = vst [vmem:[%s2576_s30 + $0xa0] sm:$0xff] %v262_v20  ;;  %v306_v42 = vld [vmem:[%s2571_s29 + $0x2a0] sm:$0xff]  ;;  %v308_v43 = vld [vmem:[%s2571_s29 + $0x2a8] sm:$0xff] }
  0x25   : > { %265 = vst [vmem:[%s2576_s30 + $0xa8] sm:$0xff] %v264_v21  ;;  %v310_v44 = vld [vmem:[%s2571_s29 + $0x2c0] sm:$0xff]  ;;  %v312_v45 = vld [vmem:[%s2571_s29 + $0x2c8] sm:$0xff] }
  0x26   : > { %267 = vst [vmem:[%s2576_s30 + $0xb0] sm:$0xff] %v266_v22  ;;  %v314_v46 = vld [vmem:[%s2571_s29 + $0x2e0] sm:$0xff]  ;;  %v316_v47 = vld [vmem:[%s2571_s29 + $0x2e8] sm:$0xff] }
  0x27   : > { %269 = vst [vmem:[%s2576_s30 + $0xb8] sm:$0xff] %v268_v23  ;;  %v318_v48 = vld [vmem:[%s2571_s29 + $0x300] sm:$0xff]  ;;  %v320_v49 = vld [vmem:[%s2571_s29 + $0x308] sm:$0xff] }
  0x28   : > { %271 = vst [vmem:[%s2576_s30 + $0xc0] sm:$0xff] %v270_v24  ;;  %v322_v50 = vld [vmem:[%s2571_s29 + $0x320] sm:$0xff]  ;;  %v324_v51 = vld [vmem:[%s2571_s29 + $0x328] sm:$0xff] }
  0x29   : > { %273 = vst [vmem:[%s2576_s30 + $0xc8] sm:$0xff] %v272_v25  ;;  %v326_v52 = vld [vmem:[%s2571_s29 + $0x340] sm:$0xff]  ;;  %v328_v53 = vld [vmem:[%s2571_s29 + $0x348] sm:$0xff] }
  0x2a   : > { %275 = vst [vmem:[%s2576_s30 + $0xd0] sm:$0xff] %v274_v26  ;;  %v330_v54 = vld [vmem:[%s2571_s29 + $0x360] sm:$0xff]  ;;  %v332_v55 = vld [vmem:[%s2571_s29 + $0x368] sm:$0xff] }
  0x2b   : > { %277 = vst [vmem:[%s2576_s30 + $0xd8] sm:$0xff] %v276_v27  ;;  %v334_v56 = vld [vmem:[%s2571_s29 + $0x380] sm:$0xff]  ;;  %v336_v57 = vld [vmem:[%s2571_s29 + $0x388] sm:$0xff] }
  0x2c   : > { %279 = vst [vmem:[%s2576_s30 + $0xe0] sm:$0xff] %v278_v28  ;;  %v338_v58 = vld [vmem:[%s2571_s29 + $0x3a0] sm:$0xff]  ;;  %v340_v59 = vld [vmem:[%s2571_s29 + $0x3a8] sm:$0xff] }
  0x2d   : > { %281 = vst [vmem:[%s2576_s30 + $0xe8] sm:$0xff] %v280_v29  ;;  %v342_v60 = vld [vmem:[%s2571_s29 + $0x3c0] sm:$0xff]  ;;  %v344_v61 = vld [vmem:[%s2571_s29 + $0x3c8] sm:$0xff] }
  0x2e   : > { %283 = vst [vmem:[%s2576_s30 + $0xf0] sm:$0xff] %v282_v30  ;;  %v346_v62 = vld [vmem:[%s2571_s29 + $0x3e0] sm:$0xff]  ;;  %v348_v63 = vld [vmem:[%s2571_s29 + $0x3e8] sm:$0xff] }
  0x2f   : > { %285 = vst [vmem:[%s2576_s30 + $0xf8] sm:$0xff] %v284_v31  ;;  %v350_v0 = vld [vmem:[%s2571_s29 + $0x400] sm:$0xff]  ;;  %v352_v1 = vld [vmem:[%s2571_s29 + $0x408] sm:$0xff] }
  0x30   : > { %287 = vst [vmem:[%s2576_s30 + $0x100] sm:$0xff] %v286_v32  ;;  %v354_v2 = vld [vmem:[%s2571_s29 + $0x420] sm:$0xff]  ;;  %v356_v3 = vld [vmem:[%s2571_s29 + $0x428] sm:$0xff] }
  0x31   : > { %289 = vst [vmem:[%s2576_s30 + $0x108] sm:$0xff] %v288_v33  ;;  %v358_v4 = vld [vmem:[%s2571_s29 + $0x440] sm:$0xff]  ;;  %v360_v5 = vld [vmem:[%s2571_s29 + $0x448] sm:$0xff] }
  0x32   : > { %291 = vst [vmem:[%s2576_s30 + $0x110] sm:$0xff] %v290_v34  ;;  %v362_v6 = vld [vmem:[%s2571_s29 + $0x460] sm:$0xff]  ;;  %v364_v7 = vld [vmem:[%s2571_s29 + $0x468] sm:$0xff] }
  0x33   : > { %293 = vst [vmem:[%s2576_s30 + $0x118] sm:$0xff] %v292_v35  ;;  %v366_v8 = vld [vmem:[%s2571_s29 + $0x480] sm:$0xff]  ;;  %v368_v9 = vld [vmem:[%s2571_s29 + $0x488] sm:$0xff] }
  0x34   : > { %295 = vst [vmem:[%s2576_s30 + $0x120] sm:$0xff] %v294_v36  ;;  %v370_v10 = vld [vmem:[%s2571_s29 + $0x4a0] sm:$0xff]  ;;  %v372_v11 = vld [vmem:[%s2571_s29 + $0x4a8] sm:$0xff] }
  0x35   : > { %297 = vst [vmem:[%s2576_s30 + $0x128] sm:$0xff] %v296_v37  ;;  %v374_v12 = vld [vmem:[%s2571_s29 + $0x4c0] sm:$0xff]  ;;  %v376_v13 = vld [vmem:[%s2571_s29 + $0x4c8] sm:$0xff] }
  0x36   : > { %299 = vst [vmem:[%s2576_s30 + $0x130] sm:$0xff] %v298_v38  ;;  %v378_v14 = vld [vmem:[%s2571_s29 + $0x4e0] sm:$0xff]  ;;  %v380_v15 = vld [vmem:[%s2571_s29 + $0x4e8] sm:$0xff] }
  0x37   : > { %301 = vst [vmem:[%s2576_s30 + $0x138] sm:$0xff] %v300_v39  ;;  %v382_v16 = vld [vmem:[%s2571_s29 + $0x500] sm:$0xff]  ;;  %v384_v17 = vld [vmem:[%s2571_s29 + $0x508] sm:$0xff] }
  0x38   : > { %303 = vst [vmem:[%s2576_s30 + $0x140] sm:$0xff] %v302_v40  ;;  %v386_v18 = vld [vmem:[%s2571_s29 + $0x520] sm:$0xff]  ;;  %v388_v19 = vld [vmem:[%s2571_s29 + $0x528] sm:$0xff] }
  0x39   : > { %305 = vst [vmem:[%s2576_s30 + $0x148] sm:$0xff] %v304_v41  ;;  %v390_v20 = vld [vmem:[%s2571_s29 + $0x540] sm:$0xff]  ;;  %v392_v21 = vld [vmem:[%s2571_s29 + $0x548] sm:$0xff] }
  0x3a   : > { %307 = vst [vmem:[%s2576_s30 + $0x150] sm:$0xff] %v306_v42  ;;  %v394_v22 = vld [vmem:[%s2571_s29 + $0x560] sm:$0xff]  ;;  %v396_v23 = vld [vmem:[%s2571_s29 + $0x568] sm:$0xff] }
  0x3b   : > { %309 = vst [vmem:[%s2576_s30 + $0x158] sm:$0xff] %v308_v43  ;;  %v398_v24 = vld [vmem:[%s2571_s29 + $0x580] sm:$0xff]  ;;  %v400_v25 = vld [vmem:[%s2571_s29 + $0x588] sm:$0xff] }
  0x3c   : > { %311 = vst [vmem:[%s2576_s30 + $0x160] sm:$0xff] %v310_v44  ;;  %v402_v26 = vld [vmem:[%s2571_s29 + $0x5a0] sm:$0xff]  ;;  %v404_v27 = vld [vmem:[%s2571_s29 + $0x5a8] sm:$0xff] }
  0x3d   : > { %313 = vst [vmem:[%s2576_s30 + $0x168] sm:$0xff] %v312_v45  ;;  %v406_v28 = vld [vmem:[%s2571_s29 + $0x5c0] sm:$0xff]  ;;  %v408_v29 = vld [vmem:[%s2571_s29 + $0x5c8] sm:$0xff] }
  0x3e   : > { %315 = vst [vmem:[%s2576_s30 + $0x170] sm:$0xff] %v314_v46  ;;  %v410_v30 = vld [vmem:[%s2571_s29 + $0x5e0] sm:$0xff]  ;;  %v412_v31 = vld [vmem:[%s2571_s29 + $0x5e8] sm:$0xff] }
  0x3f   : > { %317 = vst [vmem:[%s2576_s30 + $0x178] sm:$0xff] %v316_v47  ;;  %v414_v32 = vld [vmem:[%s2571_s29 + $0x600] sm:$0xff]  ;;  %v416_v33 = vld [vmem:[%s2571_s29 + $0x608] sm:$0xff] }
  0x40   : > { %319 = vst [vmem:[%s2576_s30 + $0x180] sm:$0xff] %v318_v48  ;;  %v418_v34 = vld [vmem:[%s2571_s29 + $0x620] sm:$0xff]  ;;  %v420_v35 = vld [vmem:[%s2571_s29 + $0x628] sm:$0xff] }
  0x41   : > { %321 = vst [vmem:[%s2576_s30 + $0x188] sm:$0xff] %v320_v49  ;;  %v422_v36 = vld [vmem:[%s2571_s29 + $0x640] sm:$0xff]  ;;  %v424_v37 = vld [vmem:[%s2571_s29 + $0x648] sm:$0xff] }
  0x42   : > { %323 = vst [vmem:[%s2576_s30 + $0x190] sm:$0xff] %v322_v50  ;;  %v426_v38 = vld [vmem:[%s2571_s29 + $0x660] sm:$0xff]  ;;  %v428_v39 = vld [vmem:[%s2571_s29 + $0x668] sm:$0xff] }
  0x43   : > { %325 = vst [vmem:[%s2576_s30 + $0x198] sm:$0xff] %v324_v51  ;;  %v430_v40 = vld [vmem:[%s2571_s29 + $0x680] sm:$0xff]  ;;  %v432_v41 = vld [vmem:[%s2571_s29 + $0x688] sm:$0xff] }
  0x44   : > { %327 = vst [vmem:[%s2576_s30 + $0x1a0] sm:$0xff] %v326_v52  ;;  %v434_v42 = vld [vmem:[%s2571_s29 + $0x6a0] sm:$0xff]  ;;  %v436_v43 = vld [vmem:[%s2571_s29 + $0x6a8] sm:$0xff] }
  0x45   : > { %329 = vst [vmem:[%s2576_s30 + $0x1a8] sm:$0xff] %v328_v53  ;;  %v438_v44 = vld [vmem:[%s2571_s29 + $0x6c0] sm:$0xff]  ;;  %v440_v45 = vld [vmem:[%s2571_s29 + $0x6c8] sm:$0xff] }
  0x46   : > { %331 = vst [vmem:[%s2576_s30 + $0x1b0] sm:$0xff] %v330_v54  ;;  %v442_v46 = vld [vmem:[%s2571_s29 + $0x6e0] sm:$0xff]  ;;  %v444_v47 = vld [vmem:[%s2571_s29 + $0x6e8] sm:$0xff] }
  0x47   : > { %333 = vst [vmem:[%s2576_s30 + $0x1b8] sm:$0xff] %v332_v55  ;;  %v446_v48 = vld [vmem:[%s2571_s29 + $0x700] sm:$0xff]  ;;  %v448_v49 = vld [vmem:[%s2571_s29 + $0x708] sm:$0xff] }
  0x48   : > { %335 = vst [vmem:[%s2576_s30 + $0x1c0] sm:$0xff] %v334_v56  ;;  %v450_v50 = vld [vmem:[%s2571_s29 + $0x720] sm:$0xff]  ;;  %v452_v51 = vld [vmem:[%s2571_s29 + $0x728] sm:$0xff] }
  0x49   : > { %337 = vst [vmem:[%s2576_s30 + $0x1c8] sm:$0xff] %v336_v57  ;;  %v454_v52 = vld [vmem:[%s2571_s29 + $0x740] sm:$0xff]  ;;  %v456_v53 = vld [vmem:[%s2571_s29 + $0x748] sm:$0xff] }
  0x4a   : > { %339 = vst [vmem:[%s2576_s30 + $0x1d0] sm:$0xff] %v338_v58  ;;  %v458_v54 = vld [vmem:[%s2571_s29 + $0x760] sm:$0xff]  ;;  %v460_v55 = vld [vmem:[%s2571_s29 + $0x768] sm:$0xff] }
  0x4b   : > { %341 = vst [vmem:[%s2576_s30 + $0x1d8] sm:$0xff] %v340_v59  ;;  %v462_v56 = vld [vmem:[%s2571_s29 + $0x780] sm:$0xff]  ;;  %v464_v57 = vld [vmem:[%s2571_s29 + $0x788] sm:$0xff] }
  0x4c   : > { %343 = vst [vmem:[%s2576_s30 + $0x1e0] sm:$0xff] %v342_v60  ;;  %v466_v58 = vld [vmem:[%s2571_s29 + $0x7a0] sm:$0xff]  ;;  %v468_v59 = vld [vmem:[%s2571_s29 + $0x7a8] sm:$0xff] }
  0x4d   : > { %345 = vst [vmem:[%s2576_s30 + $0x1e8] sm:$0xff] %v344_v61  ;;  %v470_v60 = vld [vmem:[%s2571_s29 + $0x7c0] sm:$0xff]  ;;  %v472_v61 = vld [vmem:[%s2571_s29 + $0x7c8] sm:$0xff] }
  0x4e   : > { %347 = vst [vmem:[%s2576_s30 + $0x1f0] sm:$0xff] %v346_v62  ;;  %v474_v62 = vld [vmem:[%s2571_s29 + $0x7e0] sm:$0xff] }
  0x4f   : > { %349 = vst [vmem:[%s2576_s30 + $0x1f8] sm:$0xff] %v348_v63  ;;  %v476_v63 = vld [vmem:[%s2571_s29 + $0x7e8] sm:$0xff] }
  0x50   : > { %351 = vst [vmem:[%s2576_s30 + $0x200] sm:$0xff] %v350_v0 }
  0x51   : > { %353 = vst [vmem:[%s2576_s30 + $0x208] sm:$0xff] %v352_v1 }
  0x52   : > { %355 = vst [vmem:[%s2576_s30 + $0x210] sm:$0xff] %v354_v2 }
  0x53   : > { %357 = vst [vmem:[%s2576_s30 + $0x218] sm:$0xff] %v356_v3 }
  0x54   : > { %359 = vst [vmem:[%s2576_s30 + $0x220] sm:$0xff] %v358_v4 }
  0x55   : > { %361 = vst [vmem:[%s2576_s30 + $0x228] sm:$0xff] %v360_v5 }
  0x56   : > { %363 = vst [vmem:[%s2576_s30 + $0x230] sm:$0xff] %v362_v6 }
  0x57   : > { %365 = vst [vmem:[%s2576_s30 + $0x238] sm:$0xff] %v364_v7 }
  0x58   : > { %367 = vst [vmem:[%s2576_s30 + $0x240] sm:$0xff] %v366_v8 }
  0x59   : > { %369 = vst [vmem:[%s2576_s30 + $0x248] sm:$0xff] %v368_v9 }
  0x5a   : > { %371 = vst [vmem:[%s2576_s30 + $0x250] sm:$0xff] %v370_v10 }
  0x5b   : > { %373 = vst [vmem:[%s2576_s30 + $0x258] sm:$0xff] %v372_v11 }
  0x5c   : > { %375 = vst [vmem:[%s2576_s30 + $0x260] sm:$0xff] %v374_v12 }
  0x5d   : > { %377 = vst [vmem:[%s2576_s30 + $0x268] sm:$0xff] %v376_v13 }
  0x5e   : > { %379 = vst [vmem:[%s2576_s30 + $0x270] sm:$0xff] %v378_v14 }
  0x5f   : > { %381 = vst [vmem:[%s2576_s30 + $0x278] sm:$0xff] %v380_v15 }
  0x60   : > { %383 = vst [vmem:[%s2576_s30 + $0x280] sm:$0xff] %v382_v16 }
  0x61   : > { %385 = vst [vmem:[%s2576_s30 + $0x288] sm:$0xff] %v384_v17 }
  0x62   : > { %387 = vst [vmem:[%s2576_s30 + $0x290] sm:$0xff] %v386_v18 }
  0x63   : > { %389 = vst [vmem:[%s2576_s30 + $0x298] sm:$0xff] %v388_v19 }
  0x64   : > { %391 = vst [vmem:[%s2576_s30 + $0x2a0] sm:$0xff] %v390_v20 }
  0x65   : > { %393 = vst [vmem:[%s2576_s30 + $0x2a8] sm:$0xff] %v392_v21 }
  0x66   : > { %395 = vst [vmem:[%s2576_s30 + $0x2b0] sm:$0xff] %v394_v22 }
  0x67   : > { %397 = vst [vmem:[%s2576_s30 + $0x2b8] sm:$0xff] %v396_v23 }
  0x68   : > { %399 = vst [vmem:[%s2576_s30 + $0x2c0] sm:$0xff] %v398_v24 }
  0x69   : > { %401 = vst [vmem:[%s2576_s30 + $0x2c8] sm:$0xff] %v400_v25 }
  0x6a   : > { %403 = vst [vmem:[%s2576_s30 + $0x2d0] sm:$0xff] %v402_v26 }
  0x6b   : > { %405 = vst [vmem:[%s2576_s30 + $0x2d8] sm:$0xff] %v404_v27 }
  0x6c   : > { %407 = vst [vmem:[%s2576_s30 + $0x2e0] sm:$0xff] %v406_v28 }
  0x6d   : > { %409 = vst [vmem:[%s2576_s30 + $0x2e8] sm:$0xff] %v408_v29 }
  0x6e   : > { %411 = vst [vmem:[%s2576_s30 + $0x2f0] sm:$0xff] %v410_v30 }
  0x6f   : > { %413 = vst [vmem:[%s2576_s30 + $0x2f8] sm:$0xff] %v412_v31 }
  0x70   : > { %415 = vst [vmem:[%s2576_s30 + $0x300] sm:$0xff] %v414_v32 }
  0x71   : > { %417 = vst [vmem:[%s2576_s30 + $0x308] sm:$0xff] %v416_v33 }
  0x72   : > { %419 = vst [vmem:[%s2576_s30 + $0x310] sm:$0xff] %v418_v34 }
  0x73   : > { %421 = vst [vmem:[%s2576_s30 + $0x318] sm:$0xff] %v420_v35 }
  0x74   : > { %423 = vst [vmem:[%s2576_s30 + $0x320] sm:$0xff] %v422_v36 }
  0x75   : > { %425 = vst [vmem:[%s2576_s30 + $0x328] sm:$0xff] %v424_v37 }
  0x76   : > { %427 = vst [vmem:[%s2576_s30 + $0x330] sm:$0xff] %v426_v38 }
  0x77   : > { %429 = vst [vmem:[%s2576_s30 + $0x338] sm:$0xff] %v428_v39 }
  0x78   : > { %431 = vst [vmem:[%s2576_s30 + $0x340] sm:$0xff] %v430_v40 }
  0x79   : > { %433 = vst [vmem:[%s2576_s30 + $0x348] sm:$0xff] %v432_v41 }
  0x7a   : > { %435 = vst [vmem:[%s2576_s30 + $0x350] sm:$0xff] %v434_v42 }
  0x7b   : > { %437 = vst [vmem:[%s2576_s30 + $0x358] sm:$0xff] %v436_v43 }
  0x7c   : > { %439 = vst [vmem:[%s2576_s30 + $0x360] sm:$0xff] %v438_v44 }
  0x7d   : > { %441 = vst [vmem:[%s2576_s30 + $0x368] sm:$0xff] %v440_v45 }
  0x7e   : > { %443 = vst [vmem:[%s2576_s30 + $0x370] sm:$0xff] %v442_v46 }
  0x7f   : > { %445 = vst [vmem:[%s2576_s30 + $0x378] sm:$0xff] %v444_v47 }
  0x80   : > { %447 = vst [vmem:[%s2576_s30 + $0x380] sm:$0xff] %v446_v48 }
  0x81   : > { %449 = vst [vmem:[%s2576_s30 + $0x388] sm:$0xff] %v448_v49 }
  0x82   : > { %451 = vst [vmem:[%s2576_s30 + $0x390] sm:$0xff] %v450_v50 }
  0x83   : > { %453 = vst [vmem:[%s2576_s30 + $0x398] sm:$0xff] %v452_v51 }
  0x84   : > { %455 = vst [vmem:[%s2576_s30 + $0x3a0] sm:$0xff] %v454_v52 }
  0x85   : > { %457 = vst [vmem:[%s2576_s30 + $0x3a8] sm:$0xff] %v456_v53 }
  0x86   : > { %459 = vst [vmem:[%s2576_s30 + $0x3b0] sm:$0xff] %v458_v54 }
  0x87   : > { %461 = vst [vmem:[%s2576_s30 + $0x3b8] sm:$0xff] %v460_v55 }
  0x88   : > { %463 = vst [vmem:[%s2576_s30 + $0x3c0] sm:$0xff] %v462_v56 }
  0x89   : > { %465 = vst [vmem:[%s2576_s30 + $0x3c8] sm:$0xff] %v464_v57 }
  0x8a   : > { %467 = vst [vmem:[%s2576_s30 + $0x3d0] sm:$0xff] %v466_v58 }
  0x8b   : > { %469 = vst [vmem:[%s2576_s30 + $0x3d8] sm:$0xff] %v468_v59 }
  0x8c   : > { %471 = vst [vmem:[%s2576_s30 + $0x3e0] sm:$0xff] %v470_v60 }
  0x8d   : > { %473 = vst [vmem:[%s2576_s30 + $0x3e8] sm:$0xff] %v472_v61 }
  0x8e   : > { %475 = vst [vmem:[%s2576_s30 + $0x3f0] sm:$0xff] %v474_v62 }
  0x8f   : > { %477 = vst [vmem:[%s2576_s30 + $0x3f8] sm:$0xff] %v476_v63 }
  0x90 PF: > { %p1774_p6 = scmp.ge.s32.totalorder %s2501_s19, 1  ;;  %p498_p7 = scmp.lt.s32.totalorder %s2501_s19, 3 }
  0x92   : > { %p499_p8 = pnand %p1774_p6, %p498_p7 }
  0x93   : > { %s505_s5 = sand.u32 (!%p499_p8), 1, %s2485_s15   ;;  %s1776_s12 = sshll.u32 (!%p499_p8), %s2493_s17, 2 }
  0x94   : > { %502 = sbr.rel (%p499_p8) target bundleno = 428 (0x1ac), region = 55  ;;  %s1775_s6 = sshll.u32 (!%p499_p8), %s505_s5, 10 }
  0x95   : > { %s2834_s7 = scalar_lea.vmem (!%p499_p8), [#allocation3], %s1775_s6  ;;  %p564_p9 = scmp.lt.s32.totalorder (!%p499_p8), %s1776_s12, 7 }
  0x99   : > { %v1894_v0 = vld [vmem:[%s2834_s7 + $0xe0] sm:$0xf]  ;;  %v2325_v1 = vld [vmem:[%s2834_s7 + $0xec] sm:$0xf0]  ;;  %s3163_s12 = smov (!%p564_p9, %s1776_s12), 7 }
  0x9a   : > { %v2022_v2 = vld [vmem:[%s2834_s7 + $0x1e0] sm:$0xf]  ;;  %v1895_v3 = vor.u32 %v2325_v1, %v1894_v0  ;;  %v2357_v4 = vld [vmem:[%s2834_s7 + $0x1ec] sm:$0xf0]  ;;  %s566_s15 = scalar_lea.vmem %s3153_s2, %s3163_s12  ;;  %s571_s24 = scalar_lea.vmem %s3154_s3, %s3163_s12 }
  0x9b   : > { %v2150_v5 = vld [vmem:[%s2834_s7 + $0x2e0] sm:$0xf]  ;;  %v2389_v6 = vld [vmem:[%s2834_s7 + $0x2ec] sm:$0xf0]  ;;  %v2023_v7 = vor.u32 %v2357_v4, %v2022_v2  ;;  %s1779_s17 = sshll.u32 %s3163_s12, 2 }
  0x9c   : > { %v2151_v8 = vor.u32 %v2389_v6, %v2150_v5  ;;  %v2278_v9 = vld [vmem:[%s2834_s7 + $0x3e0] sm:$0xf]  ;;  %v2421_v10 = vld [vmem:[%s2834_s7 + $0x3ec] sm:$0xf0]  ;;  %1379 = vmatpush.bf16.msra.mxu0 %v1895_v3  ;;  %s3132_s27 = scalar_lea.vmem %s3155_s4, %s1779_s17 }
  0x9d   : > { %v1878_v11 = vld [vmem:[%s2834_s7 + $0xc0] sm:$0xf]  ;;  %v2279_v12 = vor.u32 %v2421_v10, %v2278_v9  ;;  %v2321_v13 = vld [vmem:[%s2834_s7 + $0xcc] sm:$0xf0]  ;;  %1392 = vmatpush.bf16.msra.mxu1 %v2023_v7 }
  0x9e   : > { %v2006_v14 = vld [vmem:[%s2834_s7 + $0x1c0] sm:$0xf]  ;;  %v2353_v15 = vld [vmem:[%s2834_s7 + $0x1cc] sm:$0xf0]  ;;  %1405 = vmatpush.bf16.msra.mxu2 %v2151_v8  ;;  %v1879_v16 = vor.u32 %v2321_v13, %v1878_v11 }
  0x9f   : > { %v2007_v17 = vor.u32 %v2353_v15, %v2006_v14  ;;  %v2134_v18 = vld [vmem:[%s2834_s7 + $0x2c0] sm:$0xf]  ;;  %v2385_v19 = vld [vmem:[%s2834_s7 + $0x2cc] sm:$0xf0]  ;;  %1418 = vmatpush.bf16.msra.mxu3 %v2279_v12 }
  0xa0   : > { %v2262_v20 = vld [vmem:[%s2834_s7 + $0x3c0] sm:$0xf]  ;;  %v2135_v21 = vor.u32 %v2385_v19, %v2134_v18  ;;  %v2417_v22 = vld [vmem:[%s2834_s7 + $0x3cc] sm:$0xf0]  ;;  %1380 = vmatpush.bf16.msra.mxu0 %v1879_v16 }
  0xa1   : > { %v1862_v23 = vld [vmem:[%s2834_s7 + $0xa0] sm:$0xf]  ;;  %v2317_v24 = vld [vmem:[%s2834_s7 + $0xac] sm:$0xf0]  ;;  %v2263_v25 = vor.u32 %v2417_v22, %v2262_v20  ;;  %1393 = vmatpush.bf16.msra.mxu1 %v2007_v17 }
  0xa2   : > { %v1990_v26 = vld [vmem:[%s2834_s7 + $0x1a0] sm:$0xf]  ;;  %v2349_v27 = vld [vmem:[%s2834_s7 + $0x1ac] sm:$0xf0]  ;;  %v1863_v29 = vor.u32 %v2317_v24, %v1862_v23  ;;  %1406 = vmatpush.bf16.msra.mxu2 %v2135_v21 }
  0xa3   : > { %v2118_v28 = vld [vmem:[%s2834_s7 + $0x2a0] sm:$0xf]  ;;  %v2381_v30 = vld [vmem:[%s2834_s7 + $0x2ac] sm:$0xf0]  ;;  %v1991_v33 = vor.u32 %v2349_v27, %v1990_v26  ;;  %1419 = vmatpush.bf16.msra.mxu3 %v2263_v25 }
  0xa4   : > { %v2246_v31 = vld [vmem:[%s2834_s7 + $0x3a0] sm:$0xf]  ;;  %v2413_v32 = vld [vmem:[%s2834_s7 + $0x3ac] sm:$0xf0]  ;;  %v2119_v34 = vor.u32 %v2381_v30, %v2118_v28  ;;  %1381 = vmatpush.bf16.msra.mxu0 %v1863_v29  ;;  %v2323_v28 = vld [vmem:[%s2834_s7 + $0xe4] sm:$0xf] }
  0xa5   : > { %v1846_v35 = vld [vmem:[%s2834_s7 + $0x80] sm:$0xf]  ;;  %v2313_v36 = vld [vmem:[%s2834_s7 + $0x8c] sm:$0xf0]  ;;  %v2247_v38 = vor.u32 %v2413_v32, %v2246_v31  ;;  %1394 = vmatpush.bf16.msra.mxu1 %v1991_v33  ;;  %v1896_v29 = vld [vmem:[%s2834_s7 + $0xf0] sm:$0xf0] }
  0xa6   : > { %v1974_v37 = vld [vmem:[%s2834_s7 + $0x180] sm:$0xf]  ;;  %v2345_v39 = vld [vmem:[%s2834_s7 + $0x18c] sm:$0xf0]  ;;  %v1847_v44 = vor.u32 %v2313_v36, %v1846_v35  ;;  %1407 = vmatpush.bf16.msra.mxu2 %v2119_v34  ;;  %v2355_v30 = vld [vmem:[%s2834_s7 + $0x1e4] sm:$0xf] }
  0xa7   : > { %v2102_v40 = vld [vmem:[%s2834_s7 + $0x280] sm:$0xf]  ;;  %v2377_v41 = vld [vmem:[%s2834_s7 + $0x28c] sm:$0xf0]  ;;  %v1975_v45 = vor.u32 %v2345_v39, %v1974_v37  ;;  %1420 = vmatpush.bf16.msra.mxu3 %v2247_v38  ;;  %v2024_v32 = vld [vmem:[%s2834_s7 + $0x1f0] sm:$0xf0] }
  0xa8   : > { %v2230_v42 = vld [vmem:[%s2834_s7 + $0x380] sm:$0xf]  ;;  %v2409_v43 = vld [vmem:[%s2834_s7 + $0x38c] sm:$0xf0]  ;;  %v2103_v46 = vor.u32 %v2377_v41, %v2102_v40  ;;  %1382 = vmatpush.bf16.msra.mxu0 %v1847_v44  ;;  %v2387_v33 = vld [vmem:[%s2834_s7 + $0x2e4] sm:$0xf]  ;;  %v1899_v40 = vor.u32 %v2323_v28, %v1896_v29  ;;  %v2027_v41 = vor.u32 %v2355_v30, %v2024_v32 }
  0xa9   : > { %v1830_v47 = vld [vmem:[%s2834_s7 + $0x60] sm:$0xf]  ;;  %v2309_v48 = vld [vmem:[%s2834_s7 + $0x6c] sm:$0xf0]  ;;  %v2231_v50 = vor.u32 %v2409_v43, %v2230_v42  ;;  %1395 = vmatpush.bf16.msra.mxu1 %v1975_v45  ;;  %v2152_v34 = vld [vmem:[%s2834_s7 + $0x2f0] sm:$0xf0] }
  0xaa   : > { %v1958_v49 = vld [vmem:[%s2834_s7 + $0x160] sm:$0xf]  ;;  %v2341_v51 = vld [vmem:[%s2834_s7 + $0x16c] sm:$0xf0]  ;;  %v1831_v56 = vor.u32 %v2309_v48, %v1830_v47  ;;  %1408 = vmatpush.bf16.msra.mxu2 %v2103_v46  ;;  %v2419_v37 = vld [vmem:[%s2834_s7 + $0x3e4] sm:$0xf]  ;;  %v2155_v42 = vor.u32 %v2387_v33, %v2152_v34 }
  0xab   : > { %v2086_v52 = vld [vmem:[%s2834_s7 + $0x260] sm:$0xf]  ;;  %v2373_v53 = vld [vmem:[%s2834_s7 + $0x26c] sm:$0xf0]  ;;  %v1959_v57 = vor.u32 %v2341_v51, %v1958_v49  ;;  %1421 = vmatpush.bf16.msra.mxu3 %v2231_v50  ;;  %v2280_v38 = vld [vmem:[%s2834_s7 + $0x3f0] sm:$0xf0] }
  0xac   : > { %v2214_v54 = vld [vmem:[%s2834_s7 + $0x360] sm:$0xf]  ;;  %v2405_v55 = vld [vmem:[%s2834_s7 + $0x36c] sm:$0xf0]  ;;  %v2087_v58 = vor.u32 %v2373_v53, %v2086_v52  ;;  %1383 = vmatpush.bf16.msra.mxu0 %v1831_v56  ;;  %v2319_v43 = vld [vmem:[%s2834_s7 + $0xc4] sm:$0xf]  ;;  %v2283_v46 = vor.u32 %v2419_v37, %v2280_v38 }
  0xad   : > { %v1814_v59 = vld [vmem:[%s2834_s7 + $0x40] sm:$0xf]  ;;  %v2305_v60 = vld [vmem:[%s2834_s7 + $0x4c] sm:$0xf0]  ;;  %v2215_v62 = vor.u32 %v2405_v55, %v2214_v54  ;;  %1396 = vmatpush.bf16.msra.mxu1 %v1959_v57  ;;  %v1880_v44 = vld [vmem:[%s2834_s7 + $0xd0] sm:$0xf0] }
  0xae   : > { %v1942_v61 = vld [vmem:[%s2834_s7 + $0x140] sm:$0xf]  ;;  %v2337_v63 = vld [vmem:[%s2834_s7 + $0x14c] sm:$0xf0]  ;;  %v1815_v4 = vor.u32 %v2305_v60, %v1814_v59  ;;  %1409 = vmatpush.bf16.msra.mxu2 %v2087_v58  ;;  %v2351_v45 = vld [vmem:[%s2834_s7 + $0x1c4] sm:$0xf]  ;;  %v1883_v53 = vor.u32 %v2319_v43, %v1880_v44 }
  0xaf   : > { %v2070_v0 = vld [vmem:[%s2834_s7 + $0x240] sm:$0xf]  ;;  %v2369_v1 = vld [vmem:[%s2834_s7 + $0x24c] sm:$0xf0]  ;;  %v1943_v5 = vor.u32 %v2337_v63, %v1942_v61  ;;  %1422 = vmatpush.bf16.msra.mxu3 %v2215_v62  ;;  %v2008_v47 = vld [vmem:[%s2834_s7 + $0x1d0] sm:$0xf0] }
  0xb0   : > { %v2198_v2 = vld [vmem:[%s2834_s7 + $0x340] sm:$0xf]  ;;  %v2401_v3 = vld [vmem:[%s2834_s7 + $0x34c] sm:$0xf0]  ;;  %v2071_v6 = vor.u32 %v2369_v1, %v2070_v0  ;;  %1384 = vmatpush.bf16.msra.mxu0 %v1815_v4  ;;  %v2383_v48 = vld [vmem:[%s2834_s7 + $0x2c4] sm:$0xf]  ;;  %v2011_v57 = vor.u32 %v2351_v45, %v2008_v47 }
  0xb1   : > { %v1798_v7 = vld [vmem:[%s2834_s7 + $0x20] sm:$0xf]  ;;  %v2301_v8 = vld [vmem:[%s2834_s7 + $0x2c] sm:$0xf0]  ;;  %v2199_v10 = vor.u32 %v2401_v3, %v2198_v2  ;;  %1397 = vmatpush.bf16.msra.mxu1 %v1943_v5  ;;  %v2136_v49 = vld [vmem:[%s2834_s7 + $0x2d0] sm:$0xf0] }
  0xb2   : > { %v1926_v9 = vld [vmem:[%s2834_s7 + $0x120] sm:$0xf]  ;;  %v2333_v11 = vld [vmem:[%s2834_s7 + $0x12c] sm:$0xf0]  ;;  %v1799_v16 = vor.u32 %v2301_v8, %v1798_v7  ;;  %1410 = vmatpush.bf16.msra.mxu2 %v2071_v6  ;;  %v2415_v50 = vld [vmem:[%s2834_s7 + $0x3c4] sm:$0xf]  ;;  %v2139_v58 = vor.u32 %v2383_v48, %v2136_v49 }
  0xb3   : > { %v2054_v12 = vld [vmem:[%s2834_s7 + $0x220] sm:$0xf]  ;;  %v2365_v13 = vld [vmem:[%s2834_s7 + $0x22c] sm:$0xf0]  ;;  %v1927_v19 = vor.u32 %v2333_v11, %v1926_v9  ;;  %1423 = vmatpush.bf16.msra.mxu3 %v2199_v10  ;;  %v2264_v51 = vld [vmem:[%s2834_s7 + $0x3d0] sm:$0xf0] }
  0xb4   : > { %v2182_v14 = vld [vmem:[%s2834_s7 + $0x320] sm:$0xf]  ;;  %v2397_v15 = vld [vmem:[%s2834_s7 + $0x32c] sm:$0xf0]  ;;  %v2055_v20 = vor.u32 %v2365_v13, %v2054_v12  ;;  %1385 = vmatpush.bf16.msra.mxu0 %v1799_v16  ;;  %v596_v52 = vld [vmem:[%s3151_s0 + $0x8] sm:$0xff]  ;;  %v2267_v62 = vor.u32 %v2415_v50, %v2264_v51 }
  0xb5   : > { %v1782_v17 = vld [vmem:[%s2834_s7] sm:$0xf]  ;;  %v2297_v18 = vld [vmem:[%s2834_s7 + $0xc] sm:$0xf0]  ;;  %v2183_v24 = vor.u32 %v2397_v15, %v2182_v14  ;;  %1398 = vmatpush.bf16.msra.mxu1 %v1927_v19  ;;  %v2315_v54 = vld [vmem:[%s2834_s7 + $0xa4] sm:$0xf]  ;;  %v729_v55 = vunpack.c.l.b16 %v596_v52  ;;  %v730_v56 = vunpack.c.h.b16 %v596_v52 }
  0xb6   : > { %v1910_v21 = vld [vmem:[%s2834_s7 + $0x100] sm:$0xf]  ;;  %v2329_v22 = vld [vmem:[%s2834_s7 + $0x10c] sm:$0xf0]  ;;  %v1783_v31 = vor.u32 %v2297_v18, %v1782_v17  ;;  %1411 = vmatpush.bf16.msra.mxu2 %v2055_v20  ;;  %v1864_v59 = vld [vmem:[%s2834_s7 + $0xb0] sm:$0xf0] }
  0xb7   : > { %v2038_v23 = vld [vmem:[%s2834_s7 + $0x200] sm:$0xf]  ;;  %v2361_v25 = vld [vmem:[%s2834_s7 + $0x20c] sm:$0xf0]  ;;  %v1911_v35 = vor.u32 %v2329_v22, %v1910_v21  ;;  %1424 = vmatpush.bf16.msra.mxu3 %v2183_v24  ;;  %v2347_v60 = vld [vmem:[%s2834_s7 + $0x1a4] sm:$0xf]  ;;  %v2925_v1 = vpack.c.b16 %v729_v55, %v729_v55  ;;  %v2932_v5 = vpack.c.b16 %v730_v56, %v730_v56  ;;  %v1867_v8 = vor.u32 %v2315_v54, %v1864_v59 }
  0xb8   : > { %v2166_v26 = vld [vmem:[%s2834_s7 + $0x300] sm:$0xf]  ;;  %v2393_v27 = vld [vmem:[%s2834_s7 + $0x30c] sm:$0xf0]  ;;  %v2039_v36 = vor.u32 %v2361_v25, %v2038_v23  ;;  %1386 = vmatpush.bf16.msra.mxu0 %v1783_v31  ;;  %v1992_v61 = vld [vmem:[%s2834_s7 + $0x1b0] sm:$0xf0] }
  0xb9   : > { %v2167_v39 = vor.u32 %v2393_v27, %v2166_v26  ;;  %1399 = vmatpush.bf16.msra.mxu1 %v1911_v35  ;;  %v2379_v63 = vld [vmem:[%s2834_s7 + $0x2a4] sm:$0xf]  ;;  %v2120_v0 = vld [vmem:[%s2834_s7 + $0x2b0] sm:$0xf0]  ;;  %v1995_v9 = vor.u32 %v2347_v60, %v1992_v61 }
  0xba   : > { %1412 = vmatpush.bf16.msra.mxu2 %v2039_v36  ;;  %v595_v2 = vld [vmem:[%s3151_s0] sm:$0xff]  ;;  %v2248_v4 = vld [vmem:[%s2834_s7 + $0x3b0] sm:$0xf0]  ;;  %v2123_v10 = vor.u32 %v2379_v63, %v2120_v0 }
  0xbb   : > { %1425 = vmatpush.bf16.msra.mxu3 %v2167_v39  ;;  %v2411_v3 = vld [vmem:[%s2834_s7 + $0x3a4] sm:$0xf]  ;;  %v727_v6 = vunpack.c.l.b16 %v595_v2  ;;  %v728_v7 = vunpack.c.h.b16 %v595_v2  ;;  %v1848_v12 = vld [vmem:[%s2834_s7 + $0x90] sm:$0xf0] }
  0xbc   : > { %1431 = vmatpush.bf16.msrb.mxu0 %v1899_v40  ;;  %v2311_v11 = vld [vmem:[%s2834_s7 + $0x84] sm:$0xf]  ;;  %v2251_v16 = vor.u32 %v2411_v3, %v2248_v4  ;;  %v1976_v17 = vld [vmem:[%s2834_s7 + $0x190] sm:$0xf0] }
  0xbd   : > { %1444 = vmatpush.bf16.msrb.mxu1 %v2027_v41  ;;  %1413 = vmatmul.bf16.vlgmr.msra.gmra.mxu2 %v2925_v1  ;;  %v2343_v13 = vld [vmem:[%s2834_s7 + $0x184] sm:$0xf]  ;;  %v2938_v14 = vpack.c.b16 %v727_v6, %v727_v6  ;;  %v2940_v15 = vpack.c.b16 %v728_v7, %v728_v7  ;;  %v2104_v19 = vld [vmem:[%s2834_s7 + $0x290] sm:$0xf0]  ;;  %v1851_v22 = vor.u32 %v2311_v11, %v1848_v12  ;;  %v2358_v12 = vld [vmem:[%s2834_s7 + $0x1f4] sm:$0xf0] }
  0xbe   : > { %1457 = vmatpush.bf16.msrb.mxu2 %v2155_v42  ;;  %v2375_v18 = vld [vmem:[%s2834_s7 + $0x284] sm:$0xf]  ;;  %v2232_v21 = vld [vmem:[%s2834_s7 + $0x390] sm:$0xf0]  ;;  %1426 = vmatmul.bf16.vlgmr.msra.gmra.mxu3 %v2932_v5  ;;  %v1979_v23 = vor.u32 %v2343_v13, %v1976_v17  ;;  %v2158_v13 = vld [vmem:[%s2834_s7 + $0x2e8] sm:$0xf] }
  0xbf   : > { %1470 = vmatpush.bf16.msrb.mxu3 %v2283_v46  ;;  %v2407_v20 = vld [vmem:[%s2834_s7 + $0x384] sm:$0xf]  ;;  %1387 = vmatmul.bf16.vlgmr.msra.gmra.mxu0 %v2938_v14  ;;  %v2107_v24 = vor.u32 %v2375_v18, %v2104_v19  ;;  %v1832_v26 = vld [vmem:[%s2834_s7 + $0x70] sm:$0xf0]  ;;  %v2286_v19 = vld [vmem:[%s2834_s7 + $0x3e8] sm:$0xf] }
  0xc0   : > { %1432 = vmatpush.bf16.msrb.mxu0 %v1883_v53  ;;  %1400 = vmatmul.bf16.vlgmr.msra.gmra.mxu1 %v2940_v15  ;;  %v2307_v25 = vld [vmem:[%s2834_s7 + $0x64] sm:$0xf]  ;;  %v2235_v28 = vor.u32 %v2407_v20, %v2232_v21  ;;  %v1960_v29 = vld [vmem:[%s2834_s7 + $0x170] sm:$0xf0]  ;;  %v2422_v20 = vld [vmem:[%s2834_s7 + $0x3f4] sm:$0xf0] }
  0xc1   : > { %1445 = vmatpush.bf16.msrb.mxu1 %v2011_v57  ;;  %v2339_v27 = vld [vmem:[%s2834_s7 + $0x164] sm:$0xf]  ;;  %v2088_v31 = vld [vmem:[%s2834_s7 + $0x270] sm:$0xf0]  ;;  %v1835_v34 = vor.u32 %v2307_v25, %v1832_v26  ;;  %v1886_v25 = vld [vmem:[%s2834_s7 + $0xc8] sm:$0xf] }
  0xc2   : > { %1458 = vmatpush.bf16.msrb.mxu2 %v2139_v58  ;;  %v2371_v30 = vld [vmem:[%s2834_s7 + $0x264] sm:$0xf]  ;;  %v2216_v33 = vld [vmem:[%s2834_s7 + $0x370] sm:$0xf0]  ;;  %v1963_v35 = vor.u32 %v2339_v27, %v1960_v29  ;;  %v2322_v26 = vld [vmem:[%s2834_s7 + $0xd4] sm:$0xf0] }
  0xc3   : > { %1471 = vmatpush.bf16.msrb.mxu3 %v2267_v62  ;;  %v2403_v32 = vld [vmem:[%s2834_s7 + $0x364] sm:$0xf]  ;;  %v2091_v36 = vor.u32 %v2371_v30, %v2088_v31  ;;  %v1816_v38 = vld [vmem:[%s2834_s7 + $0x50] sm:$0xf0]  ;;  %v2014_v27 = vld [vmem:[%s2834_s7 + $0x1c8] sm:$0xf] }
  0xc4   : > { %1433 = vmatpush.bf16.msrb.mxu0 %v1867_v8  ;;  %v2303_v37 = vld [vmem:[%s2834_s7 + $0x44] sm:$0xf]  ;;  %v2219_v40 = vor.u32 %v2403_v32, %v2216_v33  ;;  %v1944_v41 = vld [vmem:[%s2834_s7 + $0x150] sm:$0xf0]  ;;  %v1902_v8 = vld [vmem:[%s2834_s7 + $0xe8] sm:$0xf] }
  0xc5   : > { %1446 = vmatpush.bf16.msrb.mxu1 %v1995_v9  ;;  %v2335_v39 = vld [vmem:[%s2834_s7 + $0x144] sm:$0xf]  ;;  %v2072_v43 = vld [vmem:[%s2834_s7 + $0x250] sm:$0xf0]  ;;  %v1819_v46 = vor.u32 %v2303_v37, %v1816_v38  ;;  %v2326_v9 = vld [vmem:[%s2834_s7 + $0xf4] sm:$0xf0] }
  0xc6   : > { %1459 = vmatpush.bf16.msrb.mxu2 %v2123_v10  ;;  %v2367_v42 = vld [vmem:[%s2834_s7 + $0x244] sm:$0xf]  ;;  %v2200_v45 = vld [vmem:[%s2834_s7 + $0x350] sm:$0xf0]  ;;  %v1947_v47 = vor.u32 %v2335_v39, %v1944_v41  ;;  %v2030_v10 = vld [vmem:[%s2834_s7 + $0x1e8] sm:$0xf] }
  0xc7   : > { %1472 = vmatpush.bf16.msrb.mxu3 %v2251_v16  ;;  %v2399_v44 = vld [vmem:[%s2834_s7 + $0x344] sm:$0xf]  ;;  %v2075_v48 = vor.u32 %v2367_v42, %v2072_v43  ;;  %v1800_v50 = vld [vmem:[%s2834_s7 + $0x30] sm:$0xf0]  ;;  %v2390_v16 = vld [vmem:[%s2834_s7 + $0x2f4] sm:$0xf0] }
  0xc8   : > { %1434 = vmatpush.bf16.msrb.mxu0 %v1851_v22  ;;  %v2299_v49 = vld [vmem:[%s2834_s7 + $0x24] sm:$0xf]  ;;  %v2203_v52 = vor.u32 %v2399_v44, %v2200_v45  ;;  %v1928_v53 = vld [vmem:[%s2834_s7 + $0x130] sm:$0xf0]  ;;  %v1903_v22 = vor.u32 %v2326_v9, %v1902_v8  ;;  %v2354_v29 = vld [vmem:[%s2834_s7 + $0x1d4] sm:$0xf0] }
  0xc9   : > { %1447 = vmatpush.bf16.msrb.mxu1 %v1979_v23  ;;  %v2331_v51 = vld [vmem:[%s2834_s7 + $0x124] sm:$0xf]  ;;  %v2056_v55 = vld [vmem:[%s2834_s7 + $0x230] sm:$0xf0]  ;;  %v1803_v58 = vor.u32 %v2299_v49, %v1800_v50  ;;  %v2031_v23 = vor.u32 %v2358_v12, %v2030_v10  ;;  %v2142_v30 = vld [vmem:[%s2834_s7 + $0x2c8] sm:$0xf] }
  0xca   : > { %1460 = vmatpush.bf16.msrb.mxu2 %v2107_v24  ;;  %v2363_v54 = vld [vmem:[%s2834_s7 + $0x224] sm:$0xf]  ;;  %v2184_v57 = vld [vmem:[%s2834_s7 + $0x330] sm:$0xf0]  ;;  %v1931_v61 = vor.u32 %v2331_v51, %v1928_v53  ;;  %v2159_v24 = vor.u32 %v2390_v16, %v2158_v13  ;;  %v2386_v31 = vld [vmem:[%s2834_s7 + $0x2d4] sm:$0xf0] }
  0xcb   : > { %1473 = vmatpush.bf16.msrb.mxu3 %v2235_v28  ;;  %v2395_v56 = vld [vmem:[%s2834_s7 + $0x324] sm:$0xf]  ;;  %v1784_v60 = vld [vmem:[%s2834_s7 + $0x10] sm:$0xf0]  ;;  %v2059_v62 = vor.u32 %v2363_v54, %v2056_v55  ;;  %v2287_v28 = vor.u32 %v2422_v20, %v2286_v19  ;;  %v2270_v32 = vld [vmem:[%s2834_s7 + $0x3c8] sm:$0xf] }
  0xcc   : > { %1435 = vmatpush.bf16.msrb.mxu0 %v1835_v34  ;;  %v2295_v59 = vld [vmem:[%s2834_s7 + $0x4] sm:$0xf]  ;;  %v1912_v0 = vld [vmem:[%s2834_s7 + $0x110] sm:$0xf0]  ;;  %v2187_v3 = vor.u32 %v2395_v56, %v2184_v57  ;;  %v2418_v33 = vld [vmem:[%s2834_s7 + $0x3d4] sm:$0xf0]  ;;  %v1887_v34 = vor.u32 %v2322_v26, %v1886_v25 }
  0xcd   : > { %1448 = vmatpush.bf16.msrb.mxu1 %v1963_v35  ;;  %v2327_v63 = vld [vmem:[%s2834_s7 + $0x104] sm:$0xf]  ;;  %v2040_v4 = vld [vmem:[%s2834_s7 + $0x210] sm:$0xf0]  ;;  %v1787_v11 = vor.u32 %v2295_v59, %v1784_v60  ;;  %v2015_v35 = vor.u32 %v2354_v29, %v2014_v27  ;;  %v1870_v37 = vld [vmem:[%s2834_s7 + $0xa8] sm:$0xf] }
  0xce   : > { %1461 = vmatpush.bf16.msrb.mxu2 %v2091_v36  ;;  %v2359_v2 = vld [vmem:[%s2834_s7 + $0x204] sm:$0xf]  ;;  %v2168_v7 = vld [vmem:[%s2834_s7 + $0x310] sm:$0xf0]  ;;  %v1915_v17 = vor.u32 %v2327_v63, %v1912_v0  ;;  %v2143_v36 = vor.u32 %v2386_v31, %v2142_v30  ;;  %v2318_v38 = vld [vmem:[%s2834_s7 + $0xb4] sm:$0xf0] }
  0xcf   : > { %1474 = vmatpush.bf16.msrb.mxu3 %v2219_v40  ;;  %v2391_v6 = vld [vmem:[%s2834_s7 + $0x304] sm:$0xf]  ;;  %v2043_v18 = vor.u32 %v2359_v2, %v2040_v4  ;;  %v1998_v39 = vld [vmem:[%s2834_s7 + $0x1a8] sm:$0xf]  ;;  %v2271_v40 = vor.u32 %v2418_v33, %v2270_v32  ;;  %v2350_v41 = vld [vmem:[%s2834_s7 + $0x1b4] sm:$0xf0] }
  0xd0   : > { %1436 = vmatpush.bf16.msrb.mxu0 %v1819_v46  ;;  %v2171_v21 = vor.u32 %v2391_v6, %v2168_v7  ;;  %v2126_v42 = vld [vmem:[%s2834_s7 + $0x2a8] sm:$0xf]  ;;  %v2382_v43 = vld [vmem:[%s2834_s7 + $0x2b4] sm:$0xf0]  ;;  %v1871_v46 = vor.u32 %v2318_v38, %v1870_v37 }
  0xd1   : > { %1449 = vmatpush.bf16.msrb.mxu1 %v1947_v47  ;;  %v2254_v44 = vld [vmem:[%s2834_s7 + $0x3a8] sm:$0xf]  ;;  %v2414_v45 = vld [vmem:[%s2834_s7 + $0x3b4] sm:$0xf0]  ;;  %v1999_v47 = vor.u32 %v2350_v41, %v1998_v39 }
  0xd2   : > { %1462 = vmatpush.bf16.msrb.mxu2 %v2075_v48  ;;  %v2127_v48 = vor.u32 %v2382_v43, %v2126_v42  ;;  %v1854_v49 = vld [vmem:[%s2834_s7 + $0x88] sm:$0xf]  ;;  %v2314_v50 = vld [vmem:[%s2834_s7 + $0x94] sm:$0xf0] }
  0xd3   : > { %1475 = vmatpush.bf16.msrb.mxu3 %v2203_v52  ;;  %v1982_v51 = vld [vmem:[%s2834_s7 + $0x188] sm:$0xf]  ;;  %v2255_v52 = vor.u32 %v2414_v45, %v2254_v44  ;;  %v2346_v53 = vld [vmem:[%s2834_s7 + $0x194] sm:$0xf0] }
  0xd4   : > { %1437 = vmatpush.bf16.msrb.mxu0 %v1803_v58  ;;  %v2110_v54 = vld [vmem:[%s2834_s7 + $0x288] sm:$0xf]  ;;  %v2378_v55 = vld [vmem:[%s2834_s7 + $0x294] sm:$0xf0]  ;;  %v1855_v58 = vor.u32 %v2314_v50, %v1854_v49  ;;  %v1983_v59 = vor.u32 %v2346_v53, %v1982_v51  ;;  %v2032_v50 = vld [vmem:[%s2834_s7 + $0x1f8] sm:$0xf0] }
  0xd5   : > { %1450 = vmatpush.bf16.msrb.mxu1 %v1931_v61  ;;  %v2238_v56 = vld [vmem:[%s2834_s7 + $0x388] sm:$0xf]  ;;  %v2410_v57 = vld [vmem:[%s2834_s7 + $0x394] sm:$0xf0]  ;;  %v2111_v60 = vor.u32 %v2378_v55, %v2110_v54  ;;  %v2388_v51 = vld [vmem:[%s2834_s7 + $0x2ec] sm:$0xf] }
  0xd6   : > { %1463 = vmatpush.bf16.msrb.mxu2 %v2059_v62  ;;  %v1838_v61 = vld [vmem:[%s2834_s7 + $0x68] sm:$0xf]  ;;  %v2310_v62 = vld [vmem:[%s2834_s7 + $0x74] sm:$0xf0]  ;;  %v2239_v0 = vor.u32 %v2410_v57, %v2238_v56  ;;  %v2420_v55 = vld [vmem:[%s2834_s7 + $0x3ec] sm:$0xf] }
  0xd7   : > { %1476 = vmatpush.bf16.msrb.mxu3 %v2187_v3  ;;  %v1966_v63 = vld [vmem:[%s2834_s7 + $0x168] sm:$0xf]  ;;  %v2342_v2 = vld [vmem:[%s2834_s7 + $0x174] sm:$0xf0]  ;;  %v1839_v8 = vor.u32 %v2310_v62, %v1838_v61  ;;  %v2288_v56 = vld [vmem:[%s2834_s7 + $0x3f8] sm:$0xf0] }
  0xd8   : > { %1438 = vmatpush.bf16.msrb.mxu0 %v1787_v11  ;;  %v2094_v3 = vld [vmem:[%s2834_s7 + $0x268] sm:$0xf]  ;;  %v2374_v4 = vld [vmem:[%s2834_s7 + $0x274] sm:$0xf0]  ;;  %v1967_v9 = vor.u32 %v2342_v2, %v1966_v63  ;;  %v2320_v61 = vld [vmem:[%s2834_s7 + $0xcc] sm:$0xf] }
  0xd9   : > { %1451 = vmatpush.bf16.msrb.mxu1 %v1915_v17  ;;  %v2222_v6 = vld [vmem:[%s2834_s7 + $0x368] sm:$0xf]  ;;  %v2406_v7 = vld [vmem:[%s2834_s7 + $0x374] sm:$0xf0]  ;;  %v2095_v10 = vor.u32 %v2374_v4, %v2094_v3  ;;  %v1888_v62 = vld [vmem:[%s2834_s7 + $0xd8] sm:$0xf0] }
  0xda   : > { %1464 = vmatpush.bf16.msrb.mxu2 %v2043_v18  ;;  %v1822_v11 = vld [vmem:[%s2834_s7 + $0x48] sm:$0xf]  ;;  %v2306_v12 = vld [vmem:[%s2834_s7 + $0x54] sm:$0xf0]  ;;  %v2223_v16 = vor.u32 %v2406_v7, %v2222_v6  ;;  %v2352_v63 = vld [vmem:[%s2834_s7 + $0x1cc] sm:$0xf] }
  0xdb   : > { %1477 = vmatpush.bf16.msrb.mxu3 %v2171_v21  ;;  %1439 = vmatmul.bf16.vlgmr.msrb.gmra.mxu0 %v2938_v14  ;;  %v1950_v13 = vld [vmem:[%s2834_s7 + $0x148] sm:$0xf]  ;;  %v2338_v17 = vld [vmem:[%s2834_s7 + $0x154] sm:$0xf0]  ;;  %v2016_v2 = vld [vmem:[%s2834_s7 + $0x1d8] sm:$0xf0] }
  0xdc   : > { %1483 = vmatpush.bf16.msra.mxu0 %v1903_v22  ;;  %1452 = vmatmul.bf16.vlgmr.msrb.gmra.mxu1 %v2940_v15  ;;  %v2078_v18 = vld [vmem:[%s2834_s7 + $0x248] sm:$0xf]  ;;  %v2370_v19 = vld [vmem:[%s2834_s7 + $0x254] sm:$0xf0]  ;;  %v1823_v22 = vor.u32 %v2306_v12, %v1822_v11  ;;  %v2384_v3 = vld [vmem:[%s2834_s7 + $0x2cc] sm:$0xf] }
  0xdd   : > { %1496 = vmatpush.bf16.msra.mxu1 %v2031_v23  ;;  %1465 = vmatmul.bf16.vlgmr.msrb.gmra.mxu2 %v2925_v1  ;;  %v2206_v20 = vld [vmem:[%s2834_s7 + $0x348] sm:$0xf]  ;;  %v2402_v21 = vld [vmem:[%s2834_s7 + $0x354] sm:$0xf0]  ;;  %v1951_v23 = vor.u32 %v2338_v17, %v1950_v13  ;;  %v2144_v4 = vld [vmem:[%s2834_s7 + $0x2d8] sm:$0xf0] }
  0xde   : > { %1509 = vmatpush.bf16.msra.mxu2 %v2159_v24  ;;  %1478 = vmatmul.bf16.vlgmr.msrb.gmra.mxu3 %v2932_v5  ;;  %v2079_v24 = vor.u32 %v2370_v19, %v2078_v18  ;;  %v1806_v25 = vld [vmem:[%s2834_s7 + $0x28] sm:$0xf]  ;;  %v2302_v26 = vld [vmem:[%s2834_s7 + $0x34] sm:$0xf0]  ;;  %v2416_v6 = vld [vmem:[%s2834_s7 + $0x3cc] sm:$0xf] }
  0xdf   : > { %1522 = vmatpush.bf16.msra.mxu3 %v2287_v28  ;;  %v1934_v27 = vld [vmem:[%s2834_s7 + $0x128] sm:$0xf]  ;;  %v2207_v28 = vor.u32 %v2402_v21, %v2206_v20  ;;  %v2334_v29 = vld [vmem:[%s2834_s7 + $0x134] sm:$0xf0]  ;;  %v2272_v7 = vld [vmem:[%s2834_s7 + $0x3d8] sm:$0xf0] }
  0xe0   : > { %1484 = vmatpush.bf16.msra.mxu0 %v1887_v34  ;;  %v2062_v30 = vld [vmem:[%s2834_s7 + $0x228] sm:$0xf]  ;;  %v2366_v31 = vld [vmem:[%s2834_s7 + $0x234] sm:$0xf0]  ;;  %v1807_v34 = vor.u32 %v2302_v26, %v1806_v25  ;;  %v1935_v37 = vor.u32 %v2334_v29, %v1934_v27  ;;  %v2316_v11 = vld [vmem:[%s2834_s7 + $0xac] sm:$0xf] }
  0xe1   : > { %1497 = vmatpush.bf16.msra.mxu1 %v2015_v35  ;;  %v2190_v32 = vld [vmem:[%s2834_s7 + $0x328] sm:$0xf]  ;;  %v2398_v33 = vld [vmem:[%s2834_s7 + $0x334] sm:$0xf0]  ;;  %v2063_v38 = vor.u32 %v2366_v31, %v2062_v30  ;;  %v1872_v12 = vld [vmem:[%s2834_s7 + $0xb8] sm:$0xf0] }
  0xe2   : > { %1510 = vmatpush.bf16.msra.mxu2 %v2143_v36  ;;  %v1790_v35 = vld [vmem:[%s2834_s7 + $0x8] sm:$0xf]  ;;  %v2298_v36 = vld [vmem:[%s2834_s7 + $0x14] sm:$0xf0]  ;;  %v2191_v42 = vor.u32 %v2398_v33, %v2190_v32  ;;  %v2348_v13 = vld [vmem:[%s2834_s7 + $0x1ac] sm:$0xf] }
  0xe3   : > { %1523 = vmatpush.bf16.msra.mxu3 %v2271_v40  ;;  %v1918_v39 = vld [vmem:[%s2834_s7 + $0x108] sm:$0xf]  ;;  %v2330_v40 = vld [vmem:[%s2834_s7 + $0x114] sm:$0xf0]  ;;  %v1791_v49 = vor.u32 %v2298_v36, %v1790_v35  ;;  %v2000_v17 = vld [vmem:[%s2834_s7 + $0x1b8] sm:$0xf0] }
  0xe4   : > { %1485 = vmatpush.bf16.msra.mxu0 %v1871_v46  ;;  %v2046_v41 = vld [vmem:[%s2834_s7 + $0x208] sm:$0xf]  ;;  %v2362_v43 = vld [vmem:[%s2834_s7 + $0x214] sm:$0xf0]  ;;  %v2324_v46 = vld [vmem:[%s2834_s7 + $0xec] sm:$0xf]  ;;  %v1919_v53 = vor.u32 %v2330_v40, %v1918_v39 }
  0xe5   : > { %1498 = vmatpush.bf16.msra.mxu1 %v1999_v47  ;;  %v2174_v44 = vld [vmem:[%s2834_s7 + $0x308] sm:$0xf]  ;;  %v2394_v45 = vld [vmem:[%s2834_s7 + $0x314] sm:$0xf0]  ;;  %v1904_v47 = vld [vmem:[%s2834_s7 + $0xf8] sm:$0xf0]  ;;  %v2047_v54 = vor.u32 %v2362_v43, %v2046_v41 }
  0xe6   : > { %1511 = vmatpush.bf16.msra.mxu2 %v2127_v48  ;;  %v2356_v48 = vld [vmem:[%s2834_s7 + $0x1ec] sm:$0xf]  ;;  %v2175_v57 = vor.u32 %v2394_v45, %v2174_v44  ;;  %v2128_v19 = vld [vmem:[%s2834_s7 + $0x2b8] sm:$0xf0] }
  0xe7   : > { %1524 = vmatpush.bf16.msra.mxu3 %v2255_v52  ;;  %v2160_v52 = vld [vmem:[%s2834_s7 + $0x2f8] sm:$0xf0]  ;;  %v2380_v18 = vld [vmem:[%s2834_s7 + $0x2ac] sm:$0xf] }
  0xe8   : > { %1486 = vmatpush.bf16.msra.mxu0 %v1855_v58  ;;  %v1907_v58 = vor.u32 %v2324_v46, %v1904_v47  ;;  %v2412_v20 = vld [vmem:[%s2834_s7 + $0x3ac] sm:$0xf]  ;;  %v2256_v21 = vld [vmem:[%s2834_s7 + $0x3b8] sm:$0xf0] }
  0xe9   : > { %1499 = vmatpush.bf16.msra.mxu1 %v1983_v59  ;;  %v2035_v59 = vor.u32 %v2356_v48, %v2032_v50  ;;  %v2312_v25 = vld [vmem:[%s2834_s7 + $0x8c] sm:$0xf]  ;;  %v1856_v26 = vld [vmem:[%s2834_s7 + $0x98] sm:$0xf0] }
  0xea   : > { %1512 = vmatpush.bf16.msra.mxu2 %v2111_v60  ;;  %v2163_v60 = vor.u32 %v2388_v51, %v2160_v52  ;;  %v2344_v27 = vld [vmem:[%s2834_s7 + $0x18c] sm:$0xf]  ;;  %v1984_v29 = vld [vmem:[%s2834_s7 + $0x198] sm:$0xf0] }
  0xeb   : > { %1525 = vmatpush.bf16.msra.mxu3 %v2239_v0  ;;  %v2291_v0 = vor.u32 %v2420_v55, %v2288_v56  ;;  %v2376_v30 = vld [vmem:[%s2834_s7 + $0x28c] sm:$0xf]  ;;  %v2112_v31 = vld [vmem:[%s2834_s7 + $0x298] sm:$0xf0]  ;;  %v1987_v35 = vor.u32 %v2344_v27, %v1984_v29 }
  0xec   : > { %1487 = vmatpush.bf16.msra.mxu0 %v1839_v8  ;;  %v1891_v8 = vor.u32 %v2320_v61, %v1888_v62  ;;  %v2408_v32 = vld [vmem:[%s2834_s7 + $0x38c] sm:$0xf]  ;;  %v2240_v33 = vld [vmem:[%s2834_s7 + $0x398] sm:$0xf0]  ;;  %v2115_v36 = vor.u32 %v2376_v30, %v2112_v31 }
  0xed   : > { %1500 = vmatpush.bf16.msra.mxu1 %v1967_v9  ;;  %v2019_v9 = vor.u32 %v2352_v63, %v2016_v2  ;;  %v2340_v39 = vld [vmem:[%s2834_s7 + $0x16c] sm:$0xf]  ;;  %v2243_v40 = vor.u32 %v2408_v32, %v2240_v33  ;;  %v1968_v41 = vld [vmem:[%s2834_s7 + $0x178] sm:$0xf0] }
  0xee   : > { %1513 = vmatpush.bf16.msra.mxu2 %v2095_v10  ;;  %v2147_v10 = vor.u32 %v2384_v3, %v2144_v4  ;;  %v2096_v43 = vld [vmem:[%s2834_s7 + $0x278] sm:$0xf0]  ;;  %v2404_v44 = vld [vmem:[%s2834_s7 + $0x36c] sm:$0xf]  ;;  %v1971_v47 = vor.u32 %v2340_v39, %v1968_v41 }
  0xef   : > { %1526 = vmatpush.bf16.msra.mxu3 %v2223_v16  ;;  %v2275_v16 = vor.u32 %v2416_v6, %v2272_v7  ;;  %v2224_v45 = vld [vmem:[%s2834_s7 + $0x378] sm:$0xf0]  ;;  %v2336_v51 = vld [vmem:[%s2834_s7 + $0x14c] sm:$0xf] }
  0xf0   : > { %1488 = vmatpush.bf16.msra.mxu0 %v1823_v22  ;;  %v1875_v22 = vor.u32 %v2316_v11, %v1872_v12  ;;  %v1824_v50 = vld [vmem:[%s2834_s7 + $0x58] sm:$0xf0]  ;;  %v2227_v52 = vor.u32 %v2404_v44, %v2224_v45  ;;  %v2400_v56 = vld [vmem:[%s2834_s7 + $0x34c] sm:$0xf] }
  0xf1   : > { %1501 = vmatpush.bf16.msra.mxu1 %v1951_v23  ;;  %v2003_v23 = vor.u32 %v2348_v13, %v2000_v17  ;;  %v2080_v55 = vld [vmem:[%s2834_s7 + $0x258] sm:$0xf0]  ;;  %v2300_v61 = vld [vmem:[%s2834_s7 + $0x2c] sm:$0xf] }
  0xf2   : > { %1514 = vmatpush.bf16.msra.mxu2 %v2079_v24  ;;  %v2131_v24 = vor.u32 %v2380_v18, %v2128_v19  ;;  %v1808_v62 = vld [vmem:[%s2834_s7 + $0x38] sm:$0xf0]  ;;  %v2332_v63 = vld [vmem:[%s2834_s7 + $0x12c] sm:$0xf] }
  0xf3   : > { %1527 = vmatpush.bf16.msra.mxu3 %v2207_v28  ;;  %v2259_v28 = vor.u32 %v2412_v20, %v2256_v21  ;;  %v1936_v2 = vld [vmem:[%s2834_s7 + $0x138] sm:$0xf0]  ;;  %v2364_v3 = vld [vmem:[%s2834_s7 + $0x22c] sm:$0xf] }
  0xf4   : > { %1489 = vmatpush.bf16.msra.mxu0 %v1807_v34  ;;  %v1859_v34 = vor.u32 %v2312_v25, %v1856_v26  ;;  %v2064_v4 = vld [vmem:[%s2834_s7 + $0x238] sm:$0xf0]  ;;  %v2396_v6 = vld [vmem:[%s2834_s7 + $0x32c] sm:$0xf] }
  0xf5   : > { %1502 = vmatpush.bf16.msra.mxu1 %v1935_v37  ;;  %v2308_v37 = vld [vmem:[%s2834_s7 + $0x6c] sm:$0xf]  ;;  %v2192_v7 = vld [vmem:[%s2834_s7 + $0x338] sm:$0xf0] }
  0xf6   : > { %1515 = vmatpush.bf16.msra.mxu2 %v2063_v38  ;;  %v1840_v38 = vld [vmem:[%s2834_s7 + $0x78] sm:$0xf0]  ;;  %v2296_v11 = vld [vmem:[%s2834_s7 + $0xc] sm:$0xf] }
  0xf7   : > { %1528 = vmatpush.bf16.msra.mxu3 %v2191_v42  ;;  %v2372_v42 = vld [vmem:[%s2834_s7 + $0x26c] sm:$0xf]  ;;  %v1843_v46 = vor.u32 %v2308_v37, %v1840_v38  ;;  %v1792_v12 = vld [vmem:[%s2834_s7 + $0x18] sm:$0xf0]  ;;  %v1616_v38 = vld [vmem:[%s571_s24] sm:$0xf] }
  0xf8   : > { %1490 = vmatpush.bf16.msra.mxu0 %v1791_v49  ;;  %v2099_v48 = vor.u32 %v2372_v42, %v2096_v43  ;;  %v2304_v49 = vld [vmem:[%s2834_s7 + $0x4c] sm:$0xf]  ;;  %v1920_v17 = vld [vmem:[%s2834_s7 + $0x118] sm:$0xf0]  ;;  %v1618_v44 = vperm.slane %v1616_v38, 0 }
  0xf9   : > { %1503 = vmatpush.bf16.msra.mxu1 %v1919_v53  ;;  %v1952_v53 = vld [vmem:[%s2834_s7 + $0x158] sm:$0xf0]  ;;  %v2328_v13 = vld [vmem:[%s2834_s7 + $0x10c] sm:$0xf] }
  0xfa   : > { %1516 = vmatpush.bf16.msra.mxu2 %v2047_v54  ;;  %v2368_v54 = vld [vmem:[%s2834_s7 + $0x24c] sm:$0xf]  ;;  %v2048_v19 = vld [vmem:[%s2834_s7 + $0x218] sm:$0xf0] }
  0xfb   : > { %1529 = vmatpush.bf16.msra.mxu3 %v2175_v57  ;;  %1491 = vmatmul.bf16.vlgmr.msra.gmra.mxu0 %v2938_v14  ;;  %v2208_v57 = vld [vmem:[%s2834_s7 + $0x358] sm:$0xf0]  ;;  %v2360_v18 = vld [vmem:[%s2834_s7 + $0x20c] sm:$0xf] }
  0xfc   : > { %1535 = vmatpush.bf16.msrb.mxu0 %v1907_v58  ;;  %1504 = vmatmul.bf16.vlgmr.msra.gmra.mxu1 %v2940_v15  ;;  %v1827_v58 = vor.u32 %v2304_v49, %v1824_v50  ;;  %v2392_v20 = vld [vmem:[%s2834_s7 + $0x30c] sm:$0xf]  ;;  %v2176_v21 = vld [vmem:[%s2834_s7 + $0x318] sm:$0xf0] }
  0xfd   : > { %1548 = vmatpush.bf16.msrb.mxu1 %v2035_v59  ;;  %1517 = vmatmul.bf16.vlgmr.msra.gmra.mxu2 %v2925_v1  ;;  %v1955_v59 = vor.u32 %v2336_v51, %v1952_v53  ;;  %v2179_v25 = vor.u32 %v2392_v20, %v2176_v21 }
  0xfe   : > { %1561 = vmatpush.bf16.msrb.mxu2 %v2163_v60  ;;  %1530 = vmatmul.bf16.vlgmr.msra.gmra.mxu3 %v2932_v5  ;;  %v2083_v60 = vor.u32 %v2368_v54, %v2080_v55 }
  0xff   : > { %1574 = vmatpush.bf16.msrb.mxu3 %v2291_v0  ;;  %v2211_v0 = vor.u32 %v2400_v56, %v2208_v57 }
 0x100   : > { %1536 = vmatpush.bf16.msrb.mxu0 %v1891_v8  ;;  %v1811_v8 = vor.u32 %v2300_v61, %v1808_v62 }
 0x101   : > { %1549 = vmatpush.bf16.msrb.mxu1 %v2019_v9  ;;  %v1939_v9 = vor.u32 %v2332_v63, %v1936_v2 }
 0x102   : > { %1562 = vmatpush.bf16.msrb.mxu2 %v2147_v10  ;;  %v2067_v10 = vor.u32 %v2364_v3, %v2064_v4 }
 0x103   : > { %1575 = vmatpush.bf16.msrb.mxu3 %v2275_v16  ;;  %v2195_v16 = vor.u32 %v2396_v6, %v2192_v7 }
 0x104   : > { %1537 = vmatpush.bf16.msrb.mxu0 %v1875_v22  ;;  %v1795_v22 = vor.u32 %v2296_v11, %v1792_v12 }
 0x105   : > { %1550 = vmatpush.bf16.msrb.mxu1 %v2003_v23  ;;  %v1923_v23 = vor.u32 %v2328_v13, %v1920_v17  ;;  %v1620_v17 = vperm.slane %v1616_v38, 2 }
 0x106   : > { %1563 = vmatpush.bf16.msrb.mxu2 %v2131_v24  ;;  %v2051_v24 = vor.u32 %v2360_v18, %v2048_v19  ;;  %v1621_v19 = vperm.slane %v1616_v38, 3 }
 0x107   : > { %1576 = vmatpush.bf16.msrb.mxu3 %v2259_v28 }
 0x108   : > { %1538 = vmatpush.bf16.msrb.mxu0 %v1859_v34 }
 0x109   : > { %1551 = vmatpush.bf16.msrb.mxu1 %v1987_v35 }
 0x10a   : > { %1564 = vmatpush.bf16.msrb.mxu2 %v2115_v36 }
 0x10b   : > { %1577 = vmatpush.bf16.msrb.mxu3 %v2243_v40 }
 0x10c   : > { %1539 = vmatpush.bf16.msrb.mxu0 %v1843_v46  ;;  %v1619_v46 = vperm.slane %v1616_v38, 1 }
 0x10d   : > { %1552 = vmatpush.bf16.msrb.mxu1 %v1971_v47 }
 0x10e   : > { %1565 = vmatpush.bf16.msrb.mxu2 %v2099_v48 }
 0x10f   : > { %1578 = vmatpush.bf16.msrb.mxu3 %v2227_v52 }
 0x110   : > { %1540 = vmatpush.bf16.msrb.mxu0 %v1827_v58 }
 0x111   : > { %1553 = vmatpush.bf16.msrb.mxu1 %v1955_v59 }
 0x112   : > { %1566 = vmatpush.bf16.msrb.mxu2 %v2083_v60 }
 0x113   : > { %1579 = vmatpush.bf16.msrb.mxu3 %v2211_v0 }
 0x114   : > { %1541 = vmatpush.bf16.msrb.mxu0 %v1811_v8 }
 0x115   : > { %1554 = vmatpush.bf16.msrb.mxu1 %v1939_v9 }
 0x116   : > { %1567 = vmatpush.bf16.msrb.mxu2 %v2067_v10 }
 0x117   : > { %1580 = vmatpush.bf16.msrb.mxu3 %v2195_v16 }
 0x118   : > { %1542 = vmatpush.bf16.msrb.mxu0 %v1795_v22 }
 0x119   : > { %1555 = vmatpush.bf16.msrb.mxu1 %v1923_v23 }
 0x11a   : > { %1568 = vmatpush.bf16.msrb.mxu2 %v2051_v24 }
 0x11b   : > { %1581 = vmatpush.bf16.msrb.mxu3 %v2179_v25  ;;  %1543 = vmatmul.bf16.vlgmr.msrb.gmra.mxu0 %v2938_v14 }
 0x11c   : > { %1556 = vmatmul.bf16.vlgmr.msrb.gmra.mxu1 %v2940_v15  ;;  %v1602_v15 = vld [vmem:[%s566_s15] sm:$0xf] }
 0x11d   : > { %1569 = vmatmul.bf16.vlgmr.msrb.gmra.mxu2 %v2925_v1  ;;  %v1604_v37 = vperm.slane %v1602_v15, 0  ;;  %v1605_v42 = vperm.slane %v1602_v15, 1  ;;  %v1606_v7 = vperm.slane %v1602_v15, 2  ;;  %v1607_v11 = vperm.slane %v1602_v15, 3 }
 0x11e   : > { %1582 = vmatmul.bf16.vlgmr.msrb.gmra.mxu3 %v2932_v5 }
 0x13c   : > { %v1388_v26 = vpop.f32.mrf.mxu0 }
 0x13d   : > { %v1401_v27 = vpop.f32.mrf.mxu1 }
 0x13e   : > { %v1402_v34 = vadd.f32 %v1401_v27, %v1388_v26 }
 0x140   : > { %v1414_v28 = vpop.f32.mrf.mxu2 }
 0x141   : > { %v1427_v29 = vpop.f32.mrf.mxu3  ;;  %v1415_v14 = vadd.f32 %v1414_v28, %v1402_v34 }
 0x143   : > { %v1428_v36 = vadd.f32 %v1427_v29, %v1415_v14 }
 0x144   : > { %v1390_v30 = vpop.f32.mrf.mxu0 }
 0x145   : > { %v1403_v31 = vpop.f32.mrf.mxu1  ;;  %v1612_v43 = vmul.f32 %v1604_v37, %v1428_v36 }
 0x147   : > { %v1626_v50 = vadd.f32 %v1618_v44, %v1612_v43 }
 0x148   : > { %v1416_v32 = vpop.f32.mrf.mxu2 }
 0x149   : > { %v1429_v33 = vpop.f32.mrf.mxu3 }
 0x158   : > { %v1440_v1 = vpop.f32.mrf.mxu0 }
 0x159   : > { %v1453_v5 = vpop.f32.mrf.mxu1 }
 0x15a   : > { %v1454_v35 = vadd.f32 %v1453_v5, %v1440_v1 }
 0x160   : > { %v1466_v39 = vpop.f32.mrf.mxu2  ;;  %v1442_v47 = vpop.f32.mrf.mxu0 }
 0x161   : > { %v1467_v40 = vadd.f32 %v1466_v39, %v1454_v35  ;;  %v1479_v41 = vpop.f32.mrf.mxu3  ;;  %v1455_v48 = vpop.f32.mrf.mxu1 }
 0x163   : > { %v1480_v45 = vadd.f32 %v1479_v41, %v1467_v40 }
 0x165   : > { %v1613_v49 = vmul.f32 %v1605_v42, %v1480_v45 }
 0x167   : > { %v1627_v51 = vadd.f32 %v1619_v46, %v1613_v49 }
 0x168   : > { %v1468_v52 = vpop.f32.mrf.mxu2 }
 0x169   : > { %v1630_v53 = vpack.c.bf16 %v1627_v51, %v1626_v50  ;;  %v1481_v54 = vpop.f32.mrf.mxu3 }
 0x16b   : > { %1632 = vst [vmem:[%s3132_s27] sm:$0xff] %v1630_v53 }
 0x178   : > { %v1492_v55 = vpop.f32.mrf.mxu0 }
 0x179   : > { %v1505_v56 = vpop.f32.mrf.mxu1 }
 0x17a   : > { %v1506_v63 = vadd.f32 %v1505_v56, %v1492_v55 }
 0x180   : > { %v1518_v57 = vpop.f32.mrf.mxu2  ;;  %v1494_v59 = vpop.f32.mrf.mxu0 }
 0x181   : > { %v1531_v58 = vpop.f32.mrf.mxu3  ;;  %v1507_v60 = vpop.f32.mrf.mxu1  ;;  %v1519_v3 = vadd.f32 %v1518_v57, %v1506_v63 }
 0x183   : > { %v1532_v6 = vadd.f32 %v1531_v58, %v1519_v3 }
 0x185   : > { %v1614_v16 = vmul.f32 %v1606_v7, %v1532_v6 }
 0x187   : > { %v1628_v21 = vadd.f32 %v1620_v17, %v1614_v16 }
 0x188   : > { %v1520_v61 = vpop.f32.mrf.mxu2 }
 0x189   : > { %v1533_v62 = vpop.f32.mrf.mxu3 }
 0x198   : > { %v1544_v0 = vpop.f32.mrf.mxu0 }
 0x199   : > { %v1557_v2 = vpop.f32.mrf.mxu1 }
 0x19a   : > { %v1558_v4 = vadd.f32 %v1557_v2, %v1544_v0 }
 0x1a0   : > { %v1570_v8 = vpop.f32.mrf.mxu2  ;;  %v1546_v12 = vpop.f32.mrf.mxu0 }
 0x1a1   : > { %v1571_v9 = vadd.f32 %v1570_v8, %v1558_v4  ;;  %v1583_v10 = vpop.f32.mrf.mxu3  ;;  %v1559_v13 = vpop.f32.mrf.mxu1 }
 0x1a3   : > { %v1584_v18 = vadd.f32 %v1583_v10, %v1571_v9 }
 0x1a5   : > { %v1615_v20 = vmul.f32 %v1607_v11, %v1584_v18 }
 0x1a7   : > { %v1629_v22 = vadd.f32 %v1621_v19, %v1615_v20 }
 0x1a8   : > { %v1572_v23 = vpop.f32.mrf.mxu2 }
 0x1a9   : > { %v1631_v24 = vpack.c.bf16 %v1629_v22, %v1628_v21  ;;  %v1585_v25 = vpop.f32.mrf.mxu3 }
 0x1ab   : > { %1633 = vst [vmem:[%s3132_s27 + $0x8] sm:$0xff] %v1631_v24 }
 0x1ac PF: > { %s14_s19 = sadd.s32 1, %s2501_s19   ;;  %s3156_s15 = smov %s2489_s16 }
 0x1ad   : > { %p11_p10 = scmp.ge.s32.totalorder %s14_s19, 4   ;;  %s3157_s16 = smov %s2563_s23 }
 0x1ae   : > { %s3158_s17 = smov %s2497_s18  ;;  %s3159_s18 = smov %s3161_s20 }
 0x1af   :  { %13 = sbr.rel (!%p11_p10) target bundleno = 3 (0x3), region = 111 }

// kernel: _lambda_.45
= control target key start
LH: loop header
LB: loop body
LE: loop exit
PB: predicated region body
PF: predicated region fallthrough
CT: control target
= control target key end

     0   :  { %6 = vsyncpa [#allocation4], 0  ;;  %s490_s0 = inlined_call_operand.vmem [shape: bf16[2,1,1024], index: 0, kind: input, shape index: {}]   ;;  %s491_s1 = inlined_call_operand.hbm [shape: f32[2,1024], index: 1, kind: output, shape index: {}]  }
   0x1   :  { %8 = vsyncpa [#allocation4 + $0x1], 0  ;;  %s400_s6 = smov 0   ;;  %s402_s7 = smov 0  }
   0x2   :  { %s404_s8 = smov 0   ;;  %s406_s9 = smov 0  }
   0x3 LB: > { %s268_s10 = sadd.s32 4294967295, %s388_s9   ;;  %s269_s11 = sadd.s32 4294967294, %s388_s9   ;;  %s388_s9 = sphi %s406_s9, %s497_s9   ;;  %s384_s8 = sphi %s404_s8, %s496_s8   ;;  %s380_s7 = sphi %s402_s7, %s495_s7   ;;  %s376_s6 = sphi %s400_s6, %s494_s6  }
   0x4   : > { %s423_s12 = sadd.s32 1, %s388_s9   ;;  %s21_s13 = sadd.s32 1, %s384_s8 }
   0x5   : > { %s18_s14 = ssub.s32 %s388_s9, %s423_s12  ;;  %p28_p0 = scmp.ne.s32.totalorder %s384_s8, %s380_s7 }
   0x6   : > { %p19_p1 = scmp.eq.s32.totalorder %s18_s14, 0  ;;  %p29_p2 = scmp.eq.s32.totalorder %s388_s9, 0 }
   0x7   : > { %p58_p3 = scmp.eq.s32.totalorder %s268_s10, 1  ;;  %p63_p4 = scmp.ne.s32.totalorder %s380_s7, %s376_s6 }
   0x8   : > { %s436_s15 = scalar_select %p19_p1, %s384_s8, %s21_s13  }
   0x9   : > { %p30_p5 = por %p29_p2, %p28_p0  ;;  %p438_p6 = por %p58_p3, %p28_p0 }
   0xa   : > { %p64_p7 = scmp.eq.s32.totalorder %s269_s11, 1  ;;  %p271_p9 = scmp.ge.s32.totalorder %s388_s9, 2 }
   0xc   : > { %p442_p8 = por %p64_p7, %p63_p4  ;;  %80 = sbr.rel (%p271_p9) target bundleno = 23 (0x17), region = 16 }
  0x11   : > { %83 = sbr.rel (!%p30_p5) target bundleno = 23 (0x17), region = 20  ;;  %s85_s18 = sand.u32 (%p30_p5), 1, %s384_s8  }
  0x12   : > { %s273_s19 = sshll.u32 (%p30_p5), %s388_s9, 2  ;;  %s272_s20 = sshll.u32 (%p30_p5), %s85_s18, 3 }
  0x13   : > { %s89_s23 = scalar_lea.vmem (%p30_p5), %s490_s0, %s273_s19  ;;  %s87_s24 = scalar_lea.vmem (%p30_p5), [#allocation2], %s272_s20 }
  0x14   : > { %v106_v0 = vld [vmem:[%s89_s23] sm:$0xf] (%p30_p5)  ;;  %v108_v1 = vld [vmem:[%s89_s23 + $0x8] sm:$0xf] (%p30_p5) }
  0x15   : > { %107 = vst [vmem:[%s87_s24] sm:$0xf] (%p30_p5), %v106_v0 }
  0x16   : > { %109 = vst [vmem:[%s87_s24 + $0x4] sm:$0xf] %v108_v1 }
  0x17 PF: > { %p274_p10 = scmp.ge.s32.totalorder %s388_s9, 1  ;;  %p136_p11 = scmp.lt.s32.totalorder %s388_s9, 3 }
  0x19   : > { %p137_p12 = pnand %p274_p10, %p136_p11 }
  0x1a   : > { %s143_s25 = sand.u32 (!%p137_p12), 1, %s380_s7   ;;  %s282_s27 = sshll.u32 (!%p137_p12), %s268_s10, 3 }
  0x1b   : > { %140 = sbr.rel (%p137_p12) target bundleno = 44 (0x2c), region = 61  ;;  %s275_s26 = sshll.u32 (!%p137_p12), %s143_s25, 3 }
  0x1c   : > { %s145_s28 = scalar_lea.vmem (!%p137_p12), [#allocation2], %s275_s26  ;;  %s199_s2 = scalar_lea.hbm (!%p137_p12), %s491_s1, %s282_s27 }
  0x1d   : > { %s161_s3 = scalar_lea.vmem (!%p137_p12), [#allocation3], %s275_s26  ;;  %s203_s5 = sshll.u32 (!%p137_p12), %s199_s2, 4  ;;  %s204_s5 = int_to_ptr.hbm [resolvable:$true] %s203_s5 }
  0x1e   : > { %s201_s4 = sshll.u32 (!%p137_p12), %s161_s3, 4  ;;  %s188_s10 = scalar_lea.sflag (!%p137_p12), [#allocation4], %s143_s25  ;;  %s202_s4 = int_to_ptr.vmem [resolvable:$true] %s201_s4 }
  0x1f   : > { %s340_s11 = sshra.s32 (!%p137_p12), %s204_s5, 4  ;;  %s346_s19 = scalar_lea.hbm (!%p137_p12), %s491_s1, 16  ;;  %s341_s11 = int_to_ptr.hbm [resolvable:$true] %s340_s11 }
  0x20   : > { %v284_v2 = vld [vmem:[%s145_s28] sm:$0xff]   ;;  %vm177_vm0 = vcmask 1041409   ;;  %vm179_vm1 = vcmask 1043459   ;;  %vm181_vm2 = vcmask 1045509   ;;  %vm183_vm3 = vcmask 1047559   ;;  %s342_s13 = scalar_lea.hbm %s341_s11, 8  ;;  %p347_p2 = scmp.lt.s32.totalorder %s341_s11, %s491_s1 }
  0x21   : > { %v285_v3 = vunpack.c.l.bf16 %v284_v2  ;;  %v286_v4 = vunpack.c.h.bf16 %v284_v2  ;;  %p343_p13 = scmp.ne.s32.totalorder %s341_s11, %s342_s13  ;;  %p348_p3 = scmp.lt.s32.totalorder %s346_s19, %s342_s13 }
  0x23   : > { %v176_v5 = vrot.slane %v286_v4, 7  ;;  %p344_p0 = pnand %p343_p13, %p438_p6  ;;  %p349_p4 = por %p348_p3, %p347_p2 }
  0x25   : > { %v178_v6 = vsel %vm177_vm0, %v176_v5, %v285_v3  ;;  %p345_p1 = pneg %p344_p0 }
  0x26   : > { %v180_v7 = vsel %vm179_vm1, %v176_v5, %v178_v6 }
  0x27   : > { %v182_v8 = vsel %vm181_vm2, %v176_v5, %v180_v7  ;;  %p350_p5 = pnand %p349_p4, %p345_p1 }
  0x28   : > { %v184_v9 = vsel %vm183_vm3, %v176_v5, %v182_v8 }
  0x29   : > { %186 = vst [vmem:[%s161_s3] sm:$0xff] %v184_v9 }
  0x2a   : > { %353 = shalt.err (!%p350_p5)
}
  0x2b   : > { %287 = dma.vmem_to_hbm [thread:$0]  (%p438_p6), %s202_s4, 128, %s204_s5, %s188_s10  }
  0x2c PF: > { %s215_s22 = sand.u32 1, %s376_s6   ;;  %p290_p7 = pnand %p271_p9, %p442_p8 }
  0x2d   : > { %s216_s23 = scalar_lea.sflag [#allocation4], %s215_s22 }
  0x2e   : > { %p291_p10 = pneg %p290_p7 }
  0x30   : > { %371 = dma.done.wait (%p291_p10), %s216_s23, 128  }
  0x31   : > { %373 = vsyncadd (%p291_p10), %s216_s23, 4294967168  ;;  %p11_p11 = scmp.ge.s32.totalorder %s423_s12, 4   ;;  %s494_s6 = smov %s380_s7 }
  0x32   : > { %s495_s7 = smov %s384_s8  ;;  %s496_s8 = smov %s436_s15 }
  0x33   : > { %s497_s9 = smov %s423_s12  ;;  %13 = sbr.rel (!%p11_p11) target bundleno = 3 (0x3), region = 105 }
  0x38   :  { %222 = vsyncpa [#allocation4], 1 }
  0x39   :  { %224 = vsyncpa [#allocation4 + $0x1], 1 }

</bundles_post_ra>
